<compile_context>
chip_gen: v7x
topology: tpu7x:2x2x1
jax: 0.10.0
libtpu: 0.0.40
codegen_flags: <defaults>
</compile_context>

<pallas_src>
import numpy as np
import jax
import jax.numpy as jnp
from jax.experimental import pallas as pl
from jax.experimental.pallas import tpu as pltpu


# ---------------------------------------------------------------------------
# One-hot pooling/selection matrices (host-side numpy constants)
# ---------------------------------------------------------------------------
def _pool_selector_T(H, W, to_padded):
    """Selection matrix S (n_in, n_out) so that  m2 @ S  extracts the 2x2 max-pool.

    m2 (built in-kernel) has one column per flat anchor r of the conv grid
    (row-major over (H, W+2)); m2[:, r] = max of the 2x2 window anchored at r.
    Column i of S is one-hot on the anchor of pooled output i.  If `to_padded`,
    outputs are laid out on the next layer's zero-padded flat grid
    ((H/2+2) x (W/2+2)); padding positions are all-zero columns.
    """
    P = W + 2
    H2, W2 = H // 2, W // 2
    n_in = (H - 2) * P + W - 1          # length of the in-kernel m2 array
    if to_padded:
        P2 = W2 + 2
        S = np.zeros((n_in, (H2 + 2) * P2), np.float32)
        for h2 in range(H2):
            for w2 in range(W2):
                S[2 * h2 * P + 2 * w2, (h2 + 1) * P2 + (w2 + 1)] = 1.0
    else:
        S = np.zeros((n_in, H2 * W2), np.float32)
        for h2 in range(H2):
            for w2 in range(W2):
                S[2 * h2 * P + 2 * w2, h2 * W2 + w2] = 1.0
    return S


_SEL1 = _pool_selector_T(56, 32, to_padded=True)    # (1867, 540)
_SEL2 = _pool_selector_T(28, 16, to_padded=True)    # (483, 160)
_SEL3 = _pool_selector_T(14, 8, to_padded=False)    # (127, 28)


# ---------------------------------------------------------------------------
# Fused kernel
# ---------------------------------------------------------------------------
def _conv_relu_pool(x_pad_T, w_col_T, b_col, H, W):
    """conv3x3(pad=1) + bias + ReLU + 2x2-max pairing, in (C, flat) layout.

    x_pad_T : (Cin, (H+2)*(W+2)) zero-padded flat input (channels on sublanes).
    Returns m2 : (Cout, (H-2)*(W+2)+W-1); the pooled value for output pixel
    (h2, w2) sits in column 2*h2*(W+2) + 2*w2 (extracted by the selection matmul).
    """
    P = W + 2
    n_conv = (H - 1) * P + W
    # im2col: the 9 shifted windows are static lane-offset slices, stacked along
    # the channel (sublane) axis -> single K = 9*Cin MXU matmul.
    cols = [x_pad_T[:, kh * P + kw: kh * P + kw + n_conv]
            for kh in range(3) for kw in range(3)]
    xcol = jnp.concatenate(cols, axis=0)                        # (9*Cin, n_conv)
    y = jnp.dot(w_col_T, xcol, preferred_element_type=jnp.float32) + b_col
    y = jnp.maximum(y, 0.0)                                     # bias + ReLU
    m1 = jnp.maximum(y[:, :-1], y[:, 1:])                       # horizontal pair max
    return jnp.maximum(m1[:, :-P], m1[:, P:])                   # + vertical pair max


def _odcnn_fused_kernel(x_ref, w1_ref, b1_ref, s1_ref, w2_ref, b2_ref, s2_ref,
                        w3_ref, b3_ref, s3_ref, fw1_ref, fb1_ref, fw2_ref, fb2_ref,
                        o_ref):
    f32 = jnp.float32
    x0 = x_ref[...][0]                                               # (1, 58*34)
    # ---- conv1 + ReLU + pool1 ----
    m = _conv_relu_pool(x0, w1_ref[...], b1_ref[...], 56, 32)        # (16, 1867)
    x2 = jnp.dot(m, s1_ref[...], preferred_element_type=f32)         # (16, 540)
    # ---- conv2 + ReLU + pool2 ----
    m = _conv_relu_pool(x2, w2_ref[...], b2_ref[...], 28, 16)        # (32, 483)
    x3 = jnp.dot(m, s2_ref[...], preferred_element_type=f32)         # (32, 160)
    # ---- conv3 + ReLU + pool3 ----
    m = _conv_relu_pool(x3, w3_ref[...], b3_ref[...], 14, 8)         # (64, 127)
    pooled = jnp.dot(m, s3_ref[...], preferred_element_type=f32)     # (64, 28)
    # `pooled` is (channel, spatial): row-major order == torch's view(-1, 64*7*4).
    # ---- fc1 + ReLU + fc2 + sigmoid ----
    # fc1 as 64 accumulated (1,28)@(28,128) dots -> no in-kernel flatten/reshape
    # across the sublane/lane boundary.
    acc = jnp.zeros((1, 128), f32)
    for c in range(64):
        acc = acc + jnp.dot(pooled[c:c + 1, :], fw1_ref[c],
                            preferred_element_type=f32)
    h = jnp.maximum(acc + fb1_ref[...], 0.0)
    z = jnp.dot(h, fw2_ref[...], preferred_element_type=f32) + fb2_ref[...]
    o_ref[0] = 1.0 / (1.0 + jnp.exp(-z))


# ---------------------------------------------------------------------------
# Wrapper
# ---------------------------------------------------------------------------
@jax.jit
def object_detection_cnn(params, x_nchw):
    B, C, H, W = x_nchw.shape
    assert (C, H, W) == (1, 56, 32)
    x = x_nchw.astype(jnp.float32)
    xp = jnp.pad(x, ((0, 0), (0, 0), (1, 1), (1, 1)))               # (B, 1, 58, 34)
    x_flat = xp.reshape(B, 1, 58 * 34)                              # (B, Cin, flat)

    def conv_w_T(w):  # OIHW -> (Cout, 9*Cin), column = (kh*3+kw)*Cin + ci
        cout, cin = w.shape[0], w.shape[1]
        return jnp.transpose(w, (0, 2, 3, 1)).reshape(cout, 9 * cin)

    w1 = conv_w_T(params["conv1_w"]); b1 = params["conv1_b"].reshape(16, 1)
    w2 = conv_w_T(params["conv2_w"]); b2 = params["conv2_b"].reshape(32, 1)
    w3 = conv_w_T(params["conv3_w"]); b3 = params["conv3_b"].reshape(64, 1)
    fw1 = params["fc1_w"].reshape(64, 28, 128)       # row c*28+s -> fw1[c, s, :]
    fb1 = params["fc1_b"].reshape(1, 128)
    fw2 = params["fc2_w"]                            # (128, 2)
    fb2 = params["fc2_b"].reshape(1, 2)
    s1, s2, s3 = jnp.asarray(_SEL1), jnp.asarray(_SEL2), jnp.asarray(_SEL3)

    def full_spec(a):
        nd = a.ndim
        return pl.BlockSpec(a.shape, lambda i, _nd=nd: (0,) * _nd)

    consts = (w1, b1, s1, w2, b2, s2, w3, b3, s3, fw1, fb1, fw2, fb2)
    out = pl.pallas_call(
        _odcnn_fused_kernel,
        out_shape=jax.ShapeDtypeStruct((B, 1, 2), jnp.float32),
        grid=(B,),
        in_specs=[pl.BlockSpec((1, 1, 58 * 34), lambda i: (i, 0, 0))]
                 + [full_spec(a) for a in consts],
        out_specs=pl.BlockSpec((1, 1, 2), lambda i: (i, 0, 0)),
        compiler_params=pltpu.CompilerParams(
            dimension_semantics=("parallel",),
            vmem_limit_bytes=32 * 1024 * 1024),
    )(x_flat, *consts)
    return out.reshape(B, 2)


# ---------------------------------------------------------------------------
# Params + pure-JAX reference (PyTorch semantics)
# ---------------------------------------------------------------------------
def init_params(key):
    ks = jax.random.split(key, 10)
    n = lambda k, shape, s: jax.random.normal(k, shape, jnp.float32) * s
    return {
        "conv1_w": n(ks[0], (16, 1, 3, 3), 0.20),    # OIHW, like nn.Conv2d
        "conv1_b": n(ks[1], (16,), 0.10),
        "conv2_w": n(ks[2], (32, 16, 3, 3), 0.05),
        "conv2_b": n(ks[3], (32,), 0.10),
        "conv3_w": n(ks[4], (64, 32, 3, 3), 0.05),
        "conv3_b": n(ks[5], (64,), 0.10),
        "fc1_w":   n(ks[6], (64 * 7 * 4, 128), 0.02),   # stored (in, out)
        "fc1_b":   n(ks[7], (128,), 0.10),
        "fc2_w":   n(ks[8], (128, 2), 0.05),
        "fc2_b":   n(ks[9], (2,), 0.10),
    }


def reference_forward(params, x_nchw):
    hi = jax.lax.Precision.HIGHEST

    def conv(x, w, b):
        y = jax.lax.conv_general_dilated(
            x, w, window_strides=(1, 1), padding=((1, 1), (1, 1)),
            dimension_numbers=("NCHW", "OIHW", "NCHW"), precision=hi)
        return jax.nn.relu(y + b[None, :, None, None])

    def pool(x):
        return jax.lax.reduce_window(x, -jnp.inf, jax.lax.max,
                                     (1, 1, 2, 2), (1, 1, 2, 2), "VALID")

    x = pool(conv(x_nchw, params["conv1_w"], params["conv1_b"]))
    x = pool(conv(x, params["conv2_w"], params["conv2_b"]))
    x = pool(conv(x, params["conv3_w"], params["conv3_b"]))
    x = x.reshape(x.shape[0], -1)                    # torch view(-1, 64*7*4)
    x = jax.nn.relu(jnp.dot(x, params["fc1_w"], precision=hi) + params["fc1_b"])
    return jax.nn.sigmoid(jnp.dot(x, params["fc2_w"], precision=hi) + params["fc2_b"])


if __name__ == "__main__":
    key = jax.random.PRNGKey(0)
    pkey, xkey = jax.random.split(key)
    params = init_params(pkey)
    # (B, 1, 56, 32): three 2x2 max-pools -> (7, 4) spatial, matching fc1 = 64*7*4.
    x = jax.random.normal(xkey, (2, 1, 56, 32), jnp.float32)

    out = jax.block_until_ready(object_detection_cnn(params, x))
    ref = jax.block_until_ready(reference_forward(params, x))

    assert out.shape == (2, 2), out.shape
    # tolerance accounts for TPU MXU f32 matmul precision vs HIGHEST reference
    assert jnp.allclose(out, ref, atol=5e-3, rtol=5e-3), (out, ref)
    print("KERNEL_OK")
</pallas_src>

<mosaic_0001>
module attributes {stable_mosaic.version = 11 : i64} {
  func.func @_odcnn_fused_kernel(%arg0: i32, %arg1: memref<1x1x1972xf32, #tpu.memory_space<vmem>>, %arg2: memref<16x9xf32, #tpu.memory_space<vmem>>, %arg3: memref<16x1xf32, #tpu.memory_space<vmem>>, %arg4: memref<1867x540xf32, #tpu.memory_space<vmem>>, %arg5: memref<32x144xf32, #tpu.memory_space<vmem>>, %arg6: memref<32x1xf32, #tpu.memory_space<vmem>>, %arg7: memref<483x160xf32, #tpu.memory_space<vmem>>, %arg8: memref<64x288xf32, #tpu.memory_space<vmem>>, %arg9: memref<64x1xf32, #tpu.memory_space<vmem>>, %arg10: memref<127x28xf32, #tpu.memory_space<vmem>>, %arg11: memref<64x28x128xf32, #tpu.memory_space<vmem>>, %arg12: memref<1x128xf32, #tpu.memory_space<vmem>>, %arg13: memref<128x2xf32, #tpu.memory_space<vmem>>, %arg14: memref<1x2xf32, #tpu.memory_space<vmem>>, %arg15: memref<1x1x2xf32, #tpu.memory_space<vmem>>) attributes {dimension_semantics = [#tpu.dimension_semantics<parallel>], iteration_bounds = array<i64: 2>, scalar_prefetch = 0 : i64, scratch_operands = 0 : i64, tpu.core_type = #tpu.core_type<tc>, window_params = [{transform_indices = @transform_0, window_bounds = array<i64: 1, 1, 1972>}, {pipeline_mode = #tpu.pipeline_mode<synchronous>, transform_indices = @transform_1, window_bounds = array<i64: 16, 9>}, {pipeline_mode = #tpu.pipeline_mode<synchronous>, transform_indices = @transform_2, window_bounds = array<i64: 16, 1>}, {pipeline_mode = #tpu.pipeline_mode<synchronous>, transform_indices = @transform_3, window_bounds = array<i64: 1867, 540>}, {pipeline_mode = #tpu.pipeline_mode<synchronous>, transform_indices = @transform_4, window_bounds = array<i64: 32, 144>}, {pipeline_mode = #tpu.pipeline_mode<synchronous>, transform_indices = @transform_5, window_bounds = array<i64: 32, 1>}, {pipeline_mode = #tpu.pipeline_mode<synchronous>, transform_indices = @transform_6, window_bounds = array<i64: 483, 160>}, {pipeline_mode = #tpu.pipeline_mode<synchronous>, transform_indices = @transform_7, window_bounds = array<i64: 64, 288>}, {pipeline_mode = #tpu.pipeline_mode<synchronous>, transform_indices = @transform_8, window_bounds = array<i64: 64, 1>}, {pipeline_mode = #tpu.pipeline_mode<synchronous>, transform_indices = @transform_9, window_bounds = array<i64: 127, 28>}, {pipeline_mode = #tpu.pipeline_mode<synchronous>, transform_indices = @transform_10, window_bounds = array<i64: 64, 28, 128>}, {pipeline_mode = #tpu.pipeline_mode<synchronous>, transform_indices = @transform_11, window_bounds = array<i64: 1, 128>}, {pipeline_mode = #tpu.pipeline_mode<synchronous>, transform_indices = @transform_12, window_bounds = array<i64: 128, 2>}, {pipeline_mode = #tpu.pipeline_mode<synchronous>, transform_indices = @transform_13, window_bounds = array<i64: 1, 2>}, {transform_indices = @transform_14, window_bounds = array<i64: 1, 1, 2>}]} {
    %c0 = arith.constant 0 : index
    %c0_0 = arith.constant 0 : index
    %c0_1 = arith.constant 0 : index
    %0 = vector.load %arg1[%c0, %c0_0, %c0_1] : memref<1x1x1972xf32, #tpu.memory_space<vmem>>, vector<1x1x1972xf32>
    %1 = vector.shape_cast %0 : vector<1x1x1972xf32> to vector<1x1972xf32>
    %c0_2 = arith.constant 0 : index
    %c0_3 = arith.constant 0 : index
    %2 = vector.load %arg2[%c0_2, %c0_3] : memref<16x9xf32, #tpu.memory_space<vmem>>, vector<16x9xf32>
    %c0_4 = arith.constant 0 : index
    %c0_5 = arith.constant 0 : index
    %3 = vector.load %arg3[%c0_4, %c0_5] : memref<16x1xf32, #tpu.memory_space<vmem>>, vector<16x1xf32>
    %4 = vector.extract_strided_slice %1 {offsets = [0, 0], sizes = [1, 1902], strides = [1, 1]} : vector<1x1972xf32> to vector<1x1902xf32>
    %5 = vector.extract_strided_slice %1 {offsets = [0, 1], sizes = [1, 1902], strides = [1, 1]} : vector<1x1972xf32> to vector<1x1902xf32>
    %6 = vector.extract_strided_slice %1 {offsets = [0, 2], sizes = [1, 1902], strides = [1, 1]} : vector<1x1972xf32> to vector<1x1902xf32>
    %7 = vector.extract_strided_slice %1 {offsets = [0, 34], sizes = [1, 1902], strides = [1, 1]} : vector<1x1972xf32> to vector<1x1902xf32>
    %8 = vector.extract_strided_slice %1 {offsets = [0, 35], sizes = [1, 1902], strides = [1, 1]} : vector<1x1972xf32> to vector<1x1902xf32>
    %9 = vector.extract_strided_slice %1 {offsets = [0, 36], sizes = [1, 1902], strides = [1, 1]} : vector<1x1972xf32> to vector<1x1902xf32>
    %10 = vector.extract_strided_slice %1 {offsets = [0, 68], sizes = [1, 1902], strides = [1, 1]} : vector<1x1972xf32> to vector<1x1902xf32>
    %11 = vector.extract_strided_slice %1 {offsets = [0, 69], sizes = [1, 1902], strides = [1, 1]} : vector<1x1972xf32> to vector<1x1902xf32>
    %12 = vector.extract_strided_slice %1 {offsets = [0, 70], sizes = [1, 1902], strides = [1, 1]} : vector<1x1972xf32> to vector<1x1902xf32>
    %13 = tpu.concatenate %4, %5, %6, %7, %8, %9, %10, %11, %12 in 0 : vector<1x1902xf32>, vector<1x1902xf32>, vector<1x1902xf32>, vector<1x1902xf32>, vector<1x1902xf32>, vector<1x1902xf32>, vector<1x1902xf32>, vector<1x1902xf32>, vector<1x1902xf32> -> vector<9x1902xf32>
    %cst = arith.constant dense<0.000000e+00> : vector<16x1902xf32>
    %14 = tpu.matmul %2, %13, %cst {dimension_numbers = #tpu.dot_dimension_numbers<[1], [0], [0], [1], [0, 0, 1, 1], [], []>} : vector<16x9xf32>, vector<9x1902xf32>, vector<16x1902xf32> -> vector<16x1902xf32>
    %15 = vector.broadcast %3 : vector<16x1xf32> to vector<16x1902xf32>
    %16 = arith.addf %14, %15 : vector<16x1902xf32>
    %cst_6 = arith.constant 0.000000e+00 : f32
    %17 = vector.broadcast %cst_6 : f32 to vector<16x1902xf32>
    %18 = arith.maximumf %16, %17 : vector<16x1902xf32>
    %19 = vector.extract_strided_slice %18 {offsets = [0, 0], sizes = [16, 1901], strides = [1, 1]} : vector<16x1902xf32> to vector<16x1901xf32>
    %20 = vector.extract_strided_slice %18 {offsets = [0, 1], sizes = [16, 1901], strides = [1, 1]} : vector<16x1902xf32> to vector<16x1901xf32>
    %21 = arith.maximumf %19, %20 : vector<16x1901xf32>
    %22 = vector.extract_strided_slice %21 {offsets = [0, 0], sizes = [16, 1867], strides = [1, 1]} : vector<16x1901xf32> to vector<16x1867xf32>
    %23 = vector.extract_strided_slice %21 {offsets = [0, 34], sizes = [16, 1867], strides = [1, 1]} : vector<16x1901xf32> to vector<16x1867xf32>
    %24 = arith.maximumf %22, %23 : vector<16x1867xf32>
    %c0_7 = arith.constant 0 : index
    %c0_8 = arith.constant 0 : index
    %25 = vector.load %arg4[%c0_7, %c0_8] : memref<1867x540xf32, #tpu.memory_space<vmem>>, vector<1867x540xf32>
    %cst_9 = arith.constant dense<0.000000e+00> : vector<16x540xf32>
    %26 = tpu.matmul %24, %25, %cst_9 {dimension_numbers = #tpu.dot_dimension_numbers<[1], [0], [0], [1], [0, 0, 1, 1], [], []>} : vector<16x1867xf32>, vector<1867x540xf32>, vector<16x540xf32> -> vector<16x540xf32>
    %c0_10 = arith.constant 0 : index
    %c0_11 = arith.constant 0 : index
    %27 = vector.load %arg5[%c0_10, %c0_11] : memref<32x144xf32, #tpu.memory_space<vmem>>, vector<32x144xf32>
    %c0_12 = arith.constant 0 : index
    %c0_13 = arith.constant 0 : index
    %28 = vector.load %arg6[%c0_12, %c0_13] : memref<32x1xf32, #tpu.memory_space<vmem>>, vector<32x1xf32>
    %29 = vector.extract_strided_slice %26 {offsets = [0, 0], sizes = [16, 502], strides = [1, 1]} : vector<16x540xf32> to vector<16x502xf32>
    %30 = vector.extract_strided_slice %26 {offsets = [0, 1], sizes = [16, 502], strides = [1, 1]} : vector<16x540xf32> to vector<16x502xf32>
    %31 = vector.extract_strided_slice %26 {offsets = [0, 2], sizes = [16, 502], strides = [1, 1]} : vector<16x540xf32> to vector<16x502xf32>
    %32 = vector.extract_strided_slice %26 {offsets = [0, 18], sizes = [16, 502], strides = [1, 1]} : vector<16x540xf32> to vector<16x502xf32>
    %33 = vector.extract_strided_slice %26 {offsets = [0, 19], sizes = [16, 502], strides = [1, 1]} : vector<16x540xf32> to vector<16x502xf32>
    %34 = vector.extract_strided_slice %26 {offsets = [0, 20], sizes = [16, 502], strides = [1, 1]} : vector<16x540xf32> to vector<16x502xf32>
    %35 = vector.extract_strided_slice %26 {offsets = [0, 36], sizes = [16, 502], strides = [1, 1]} : vector<16x540xf32> to vector<16x502xf32>
    %36 = vector.extract_strided_slice %26 {offsets = [0, 37], sizes = [16, 502], strides = [1, 1]} : vector<16x540xf32> to vector<16x502xf32>
    %37 = vector.extract_strided_slice %26 {offsets = [0, 38], sizes = [16, 502], strides = [1, 1]} : vector<16x540xf32> to vector<16x502xf32>
    %38 = tpu.concatenate %29, %30, %31, %32, %33, %34, %35, %36, %37 in 0 : vector<16x502xf32>, vector<16x502xf32>, vector<16x502xf32>, vector<16x502xf32>, vector<16x502xf32>, vector<16x502xf32>, vector<16x502xf32>, vector<16x502xf32>, vector<16x502xf32> -> vector<144x502xf32>
    %cst_14 = arith.constant dense<0.000000e+00> : vector<32x502xf32>
    %39 = tpu.matmul %27, %38, %cst_14 {dimension_numbers = #tpu.dot_dimension_numbers<[1], [0], [0], [1], [0, 0, 1, 1], [], []>} : vector<32x144xf32>, vector<144x502xf32>, vector<32x502xf32> -> vector<32x502xf32>
    %40 = vector.broadcast %28 : vector<32x1xf32> to vector<32x502xf32>
    %41 = arith.addf %39, %40 : vector<32x502xf32>
    %cst_15 = arith.constant 0.000000e+00 : f32
    %42 = vector.broadcast %cst_15 : f32 to vector<32x502xf32>
    %43 = arith.maximumf %41, %42 : vector<32x502xf32>
    %44 = vector.extract_strided_slice %43 {offsets = [0, 0], sizes = [32, 501], strides = [1, 1]} : vector<32x502xf32> to vector<32x501xf32>
    %45 = vector.extract_strided_slice %43 {offsets = [0, 1], sizes = [32, 501], strides = [1, 1]} : vector<32x502xf32> to vector<32x501xf32>
    %46 = arith.maximumf %44, %45 : vector<32x501xf32>
    %47 = vector.extract_strided_slice %46 {offsets = [0, 0], sizes = [32, 483], strides = [1, 1]} : vector<32x501xf32> to vector<32x483xf32>
    %48 = vector.extract_strided_slice %46 {offsets = [0, 18], sizes = [32, 483], strides = [1, 1]} : vector<32x501xf32> to vector<32x483xf32>
    %49 = arith.maximumf %47, %48 : vector<32x483xf32>
    %c0_16 = arith.constant 0 : index
    %c0_17 = arith.constant 0 : index
    %50 = vector.load %arg7[%c0_16, %c0_17] : memref<483x160xf32, #tpu.memory_space<vmem>>, vector<483x160xf32>
    %cst_18 = arith.constant dense<0.000000e+00> : vector<32x160xf32>
    %51 = tpu.matmul %49, %50, %cst_18 {dimension_numbers = #tpu.dot_dimension_numbers<[1], [0], [0], [1], [0, 0, 1, 1], [], []>} : vector<32x483xf32>, vector<483x160xf32>, vector<32x160xf32> -> vector<32x160xf32>
    %c0_19 = arith.constant 0 : index
    %c0_20 = arith.constant 0 : index
    %52 = vector.load %arg8[%c0_19, %c0_20] : memref<64x288xf32, #tpu.memory_space<vmem>>, vector<64x288xf32>
    %c0_21 = arith.constant 0 : index
    %c0_22 = arith.constant 0 : index
    %53 = vector.load %arg9[%c0_21, %c0_22] : memref<64x1xf32, #tpu.memory_space<vmem>>, vector<64x1xf32>
    %54 = vector.extract_strided_slice %51 {offsets = [0, 0], sizes = [32, 138], strides = [1, 1]} : vector<32x160xf32> to vector<32x138xf32>
    %55 = vector.extract_strided_slice %51 {offsets = [0, 1], sizes = [32, 138], strides = [1, 1]} : vector<32x160xf32> to vector<32x138xf32>
    %56 = vector.extract_strided_slice %51 {offsets = [0, 2], sizes = [32, 138], strides = [1, 1]} : vector<32x160xf32> to vector<32x138xf32>
    %57 = vector.extract_strided_slice %51 {offsets = [0, 10], sizes = [32, 138], strides = [1, 1]} : vector<32x160xf32> to vector<32x138xf32>
    %58 = vector.extract_strided_slice %51 {offsets = [0, 11], sizes = [32, 138], strides = [1, 1]} : vector<32x160xf32> to vector<32x138xf32>
    %59 = vector.extract_strided_slice %51 {offsets = [0, 12], sizes = [32, 138], strides = [1, 1]} : vector<32x160xf32> to vector<32x138xf32>
    %60 = vector.extract_strided_slice %51 {offsets = [0, 20], sizes = [32, 138], strides = [1, 1]} : vector<32x160xf32> to vector<32x138xf32>
    %61 = vector.extract_strided_slice %51 {offsets = [0, 21], sizes = [32, 138], strides = [1, 1]} : vector<32x160xf32> to vector<32x138xf32>
    %62 = vector.extract_strided_slice %51 {offsets = [0, 22], sizes = [32, 138], strides = [1, 1]} : vector<32x160xf32> to vector<32x138xf32>
    %63 = tpu.concatenate %54, %55, %56, %57, %58, %59, %60, %61, %62 in 0 : vector<32x138xf32>, vector<32x138xf32>, vector<32x138xf32>, vector<32x138xf32>, vector<32x138xf32>, vector<32x138xf32>, vector<32x138xf32>, vector<32x138xf32>, vector<32x138xf32> -> vector<288x138xf32>
    %cst_23 = arith.constant dense<0.000000e+00> : vector<64x138xf32>
    %64 = tpu.matmul %52, %63, %cst_23 {dimension_numbers = #tpu.dot_dimension_numbers<[1], [0], [0], [1], [0, 0, 1, 1], [], []>} : vector<64x288xf32>, vector<288x138xf32>, vector<64x138xf32> -> vector<64x138xf32>
    %65 = vector.broadcast %53 : vector<64x1xf32> to vector<64x138xf32>
    %66 = arith.addf %64, %65 : vector<64x138xf32>
    %cst_24 = arith.constant 0.000000e+00 : f32
    %67 = vector.broadcast %cst_24 : f32 to vector<64x138xf32>
    %68 = arith.maximumf %66, %67 : vector<64x138xf32>
    %69 = vector.extract_strided_slice %68 {offsets = [0, 0], sizes = [64, 137], strides = [1, 1]} : vector<64x138xf32> to vector<64x137xf32>
    %70 = vector.extract_strided_slice %68 {offsets = [0, 1], sizes = [64, 137], strides = [1, 1]} : vector<64x138xf32> to vector<64x137xf32>
    %71 = arith.maximumf %69, %70 : vector<64x137xf32>
    %72 = vector.extract_strided_slice %71 {offsets = [0, 0], sizes = [64, 127], strides = [1, 1]} : vector<64x137xf32> to vector<64x127xf32>
    %73 = vector.extract_strided_slice %71 {offsets = [0, 10], sizes = [64, 127], strides = [1, 1]} : vector<64x137xf32> to vector<64x127xf32>
    %74 = arith.maximumf %72, %73 : vector<64x127xf32>
    %c0_25 = arith.constant 0 : index
    %c0_26 = arith.constant 0 : index
    %75 = vector.load %arg10[%c0_25, %c0_26] : memref<127x28xf32, #tpu.memory_space<vmem>>, vector<127x28xf32>
    %cst_27 = arith.constant dense<0.000000e+00> : vector<64x28xf32>
    %76 = tpu.matmul %74, %75, %cst_27 {dimension_numbers = #tpu.dot_dimension_numbers<[1], [0], [0], [1], [0, 0, 1, 1], [], []>} : vector<64x127xf32>, vector<127x28xf32>, vector<64x28xf32> -> vector<64x28xf32>
    %cst_28 = arith.constant 0.000000e+00 : f32
    %77 = vector.broadcast %cst_28 : f32 to vector<1x128xf32>
    %78 = vector.extract_strided_slice %76 {offsets = [0, 0], sizes = [1, 28], strides = [1, 1]} : vector<64x28xf32> to vector<1x28xf32>
    %c0_29 = arith.constant 0 : index
    %c0_30 = arith.constant 0 : index
    %c0_31 = arith.constant 0 : index
    %79 = vector.load %arg11[%c0_29, %c0_30, %c0_31] : memref<64x28x128xf32, #tpu.memory_space<vmem>>, vector<1x28x128xf32>
    %80 = vector.shape_cast %79 : vector<1x28x128xf32> to vector<28x128xf32>
    %cst_32 = arith.constant dense<0.000000e+00> : vector<1x128xf32>
    %81 = tpu.matmul %78, %80, %cst_32 {dimension_numbers = #tpu.dot_dimension_numbers<[1], [0], [0], [1], [0, 0, 1, 1], [], []>} : vector<1x28xf32>, vector<28x128xf32>, vector<1x128xf32> -> vector<1x128xf32>
    %82 = arith.addf %77, %81 : vector<1x128xf32>
    %83 = vector.extract_strided_slice %76 {offsets = [1, 0], sizes = [1, 28], strides = [1, 1]} : vector<64x28xf32> to vector<1x28xf32>
    %c1 = arith.constant 1 : index
    %c0_33 = arith.constant 0 : index
    %c0_34 = arith.constant 0 : index
    %84 = vector.load %arg11[%c1, %c0_33, %c0_34] : memref<64x28x128xf32, #tpu.memory_space<vmem>>, vector<1x28x128xf32>
    %85 = vector.shape_cast %84 : vector<1x28x128xf32> to vector<28x128xf32>
    %cst_35 = arith.constant dense<0.000000e+00> : vector<1x128xf32>
    %86 = tpu.matmul %83, %85, %cst_35 {dimension_numbers = #tpu.dot_dimension_numbers<[1], [0], [0], [1], [0, 0, 1, 1], [], []>} : vector<1x28xf32>, vector<28x128xf32>, vector<1x128xf32> -> vector<1x128xf32>
    %87 = arith.addf %82, %86 : vector<1x128xf32>
    %88 = vector.extract_strided_slice %76 {offsets = [2, 0], sizes = [1, 28], strides = [1, 1]} : vector<64x28xf32> to vector<1x28xf32>
    %c2 = arith.constant 2 : index
    %c0_36 = arith.constant 0 : index
    %c0_37 = arith.constant 0 : index
    %89 = vector.load %arg11[%c2, %c0_36, %c0_37] : memref<64x28x128xf32, #tpu.memory_space<vmem>>, vector<1x28x128xf32>
    %90 = vector.shape_cast %89 : vector<1x28x128xf32> to vector<28x128xf32>
    %cst_38 = arith.constant dense<0.000000e+00> : vector<1x128xf32>
    %91 = tpu.matmul %88, %90, %cst_38 {dimension_numbers = #tpu.dot_dimension_numbers<[1], [0], [0], [1], [0, 0, 1, 1], [], []>} : vector<1x28xf32>, vector<28x128xf32>, vector<1x128xf32> -> vector<1x128xf32>
    %92 = arith.addf %87, %91 : vector<1x128xf32>
    %93 = vector.extract_strided_slice %76 {offsets = [3, 0], sizes = [1, 28], strides = [1, 1]} : vector<64x28xf32> to vector<1x28xf32>
    %c3 = arith.constant 3 : index
    %c0_39 = arith.constant 0 : index
    %c0_40 = arith.constant 0 : index
    %94 = vector.load %arg11[%c3, %c0_39, %c0_40] : memref<64x28x128xf32, #tpu.memory_space<vmem>>, vector<1x28x128xf32>
    %95 = vector.shape_cast %94 : vector<1x28x128xf32> to vector<28x128xf32>
    %cst_41 = arith.constant dense<0.000000e+00> : vector<1x128xf32>
    %96 = tpu.matmul %93, %95, %cst_41 {dimension_numbers = #tpu.dot_dimension_numbers<[1], [0], [0], [1], [0, 0, 1, 1], [], []>} : vector<1x28xf32>, vector<28x128xf32>, vector<1x128xf32> -> vector<1x128xf32>
    %97 = arith.addf %92, %96 : vector<1x128xf32>
    %98 = vector.extract_strided_slice %76 {offsets = [4, 0], sizes = [1, 28], strides = [1, 1]} : vector<64x28xf32> to vector<1x28xf32>
    %c4 = arith.constant 4 : index
    %c0_42 = arith.constant 0 : index
    %c0_43 = arith.constant 0 : index
    %99 = vector.load %arg11[%c4, %c0_42, %c0_43] : memref<64x28x128xf32, #tpu.memory_space<vmem>>, vector<1x28x128xf32>
    %100 = vector.shape_cast %99 : vector<1x28x128xf32> to vector<28x128xf32>
    %cst_44 = arith.constant dense<0.000000e+00> : vector<1x128xf32>
    %101 = tpu.matmul %98, %100, %cst_44 {dimension_numbers = #tpu.dot_dimension_numbers<[1], [0], [0], [1], [0, 0, 1, 1], [], []>} : vector<1x28xf32>, vector<28x128xf32>, vector<1x128xf32> -> vector<1x128xf32>
    %102 = arith.addf %97, %101 : vector<1x128xf32>
    %103 = vector.extract_strided_slice %76 {offsets = [5, 0], sizes = [1, 28], strides = [1, 1]} : vector<64x28xf32> to vector<1x28xf32>
    %c5 = arith.constant 5 : index
    %c0_45 = arith.constant 0 : index
    %c0_46 = arith.constant 0 : index
    %104 = vector.load %arg11[%c5, %c0_45, %c0_46] : memref<64x28x128xf32, #tpu.memory_space<vmem>>, vector<1x28x128xf32>
    %105 = vector.shape_cast %104 : vector<1x28x128xf32> to vector<28x128xf32>
    %cst_47 = arith.constant dense<0.000000e+00> : vector<1x128xf32>
    %106 = tpu.matmul %103, %105, %cst_47 {dimension_numbers = #tpu.dot_dimension_numbers<[1], [0], [0], [1], [0, 0, 1, 1], [], []>} : vector<1x28xf32>, vector<28x128xf32>, vector<1x128xf32> -> vector<1x128xf32>
    %107 = arith.addf %102, %106 : vector<1x128xf32>
    %108 = vector.extract_strided_slice %76 {offsets = [6, 0], sizes = [1, 28], strides = [1, 1]} : vector<64x28xf32> to vector<1x28xf32>
    %c6 = arith.constant 6 : index
    %c0_48 = arith.constant 0 : index
    %c0_49 = arith.constant 0 : index
    %109 = vector.load %arg11[%c6, %c0_48, %c0_49] : memref<64x28x128xf32, #tpu.memory_space<vmem>>, vector<1x28x128xf32>
    %110 = vector.shape_cast %109 : vector<1x28x128xf32> to vector<28x128xf32>
    %cst_50 = arith.constant dense<0.000000e+00> : vector<1x128xf32>
    %111 = tpu.matmul %108, %110, %cst_50 {dimension_numbers = #tpu.dot_dimension_numbers<[1], [0], [0], [1], [0, 0, 1, 1], [], []>} : vector<1x28xf32>, vector<28x128xf32>, vector<1x128xf32> -> vector<1x128xf32>
    %112 = arith.addf %107, %111 : vector<1x128xf32>
    %113 = vector.extract_strided_slice %76 {offsets = [7, 0], sizes = [1, 28], strides = [1, 1]} : vector<64x28xf32> to vector<1x28xf32>
    %c7 = arith.constant 7 : index
    %c0_51 = arith.constant 0 : index
    %c0_52 = arith.constant 0 : index
    %114 = vector.load %arg11[%c7, %c0_51, %c0_52] : memref<64x28x128xf32, #tpu.memory_space<vmem>>, vector<1x28x128xf32>
    %115 = vector.shape_cast %114 : vector<1x28x128xf32> to vector<28x128xf32>
    %cst_53 = arith.constant dense<0.000000e+00> : vector<1x128xf32>
    %116 = tpu.matmul %113, %115, %cst_53 {dimension_numbers = #tpu.dot_dimension_numbers<[1], [0], [0], [1], [0, 0, 1, 1], [], []>} : vector<1x28xf32>, vector<28x128xf32>, vector<1x128xf32> -> vector<1x128xf32>
    %117 = arith.addf %112, %116 : vector<1x128xf32>
    %118 = vector.extract_strided_slice %76 {offsets = [8, 0], sizes = [1, 28], strides = [1, 1]} : vector<64x28xf32> to vector<1x28xf32>
    %c8 = arith.constant 8 : index
    %c0_54 = arith.constant 0 : index
    %c0_55 = arith.constant 0 : index
    %119 = vector.load %arg11[%c8, %c0_54, %c0_55] : memref<64x28x128xf32, #tpu.memory_space<vmem>>, vector<1x28x128xf32>
    %120 = vector.shape_cast %119 : vector<1x28x128xf32> to vector<28x128xf32>
    %cst_56 = arith.constant dense<0.000000e+00> : vector<1x128xf32>
    %121 = tpu.matmul %118, %120, %cst_56 {dimension_numbers = #tpu.dot_dimension_numbers<[1], [0], [0], [1], [0, 0, 1, 1], [], []>} : vector<1x28xf32>, vector<28x128xf32>, vector<1x128xf32> -> vector<1x128xf32>
    %122 = arith.addf %117, %121 : vector<1x128xf32>
    %123 = vector.extract_strided_slice %76 {offsets = [9, 0], sizes = [1, 28], strides = [1, 1]} : vector<64x28xf32> to vector<1x28xf32>
    %c9 = arith.constant 9 : index
    %c0_57 = arith.constant 0 : index
    %c0_58 = arith.constant 0 : index
    %124 = vector.load %arg11[%c9, %c0_57, %c0_58] : memref<64x28x128xf32, #tpu.memory_space<vmem>>, vector<1x28x128xf32>
    %125 = vector.shape_cast %124 : vector<1x28x128xf32> to vector<28x128xf32>
    %cst_59 = arith.constant dense<0.000000e+00> : vector<1x128xf32>
    %126 = tpu.matmul %123, %125, %cst_59 {dimension_numbers = #tpu.dot_dimension_numbers<[1], [0], [0], [1], [0, 0, 1, 1], [], []>} : vector<1x28xf32>, vector<28x128xf32>, vector<1x128xf32> -> vector<1x128xf32>
    %127 = arith.addf %122, %126 : vector<1x128xf32>
    %128 = vector.extract_strided_slice %76 {offsets = [10, 0], sizes = [1, 28], strides = [1, 1]} : vector<64x28xf32> to vector<1x28xf32>
    %c10 = arith.constant 10 : index
    %c0_60 = arith.constant 0 : index
    %c0_61 = arith.constant 0 : index
    %129 = vector.load %arg11[%c10, %c0_60, %c0_61] : memref<64x28x128xf32, #tpu.memory_space<vmem>>, vector<1x28x128xf32>
    %130 = vector.shape_cast %129 : vector<1x28x128xf32> to vector<28x128xf32>
    %cst_62 = arith.constant dense<0.000000e+00> : vector<1x128xf32>
    %131 = tpu.matmul %128, %130, %cst_62 {dimension_numbers = #tpu.dot_dimension_numbers<[1], [0], [0], [1], [0, 0, 1, 1], [], []>} : vector<1x28xf32>, vector<28x128xf32>, vector<1x128xf32> -> vector<1x128xf32>
    %132 = arith.addf %127, %131 : vector<1x128xf32>
    %133 = vector.extract_strided_slice %76 {offsets = [11, 0], sizes = [1, 28], strides = [1, 1]} : vector<64x28xf32> to vector<1x28xf32>
    %c11 = arith.constant 11 : index
    %c0_63 = arith.constant 0 : index
    %c0_64 = arith.constant 0 : index
    %134 = vector.load %arg11[%c11, %c0_63, %c0_64] : memref<64x28x128xf32, #tpu.memory_space<vmem>>, vector<1x28x128xf32>
    %135 = vector.shape_cast %134 : vector<1x28x128xf32> to vector<28x128xf32>
    %cst_65 = arith.constant dense<0.000000e+00> : vector<1x128xf32>
    %136 = tpu.matmul %133, %135, %cst_65 {dimension_numbers = #tpu.dot_dimension_numbers<[1], [0], [0], [1], [0, 0, 1, 1], [], []>} : vector<1x28xf32>, vector<28x128xf32>, vector<1x128xf32> -> vector<1x128xf32>
    %137 = arith.addf %132, %136 : vector<1x128xf32>
    %138 = vector.extract_strided_slice %76 {offsets = [12, 0], sizes = [1, 28], strides = [1, 1]} : vector<64x28xf32> to vector<1x28xf32>
    %c12 = arith.constant 12 : index
    %c0_66 = arith.constant 0 : index
    %c0_67 = arith.constant 0 : index
    %139 = vector.load %arg11[%c12, %c0_66, %c0_67] : memref<64x28x128xf32, #tpu.memory_space<vmem>>, vector<1x28x128xf32>
    %140 = vector.shape_cast %139 : vector<1x28x128xf32> to vector<28x128xf32>
    %cst_68 = arith.constant dense<0.000000e+00> : vector<1x128xf32>
    %141 = tpu.matmul %138, %140, %cst_68 {dimension_numbers = #tpu.dot_dimension_numbers<[1], [0], [0], [1], [0, 0, 1, 1], [], []>} : vector<1x28xf32>, vector<28x128xf32>, vector<1x128xf32> -> vector<1x128xf32>
    %142 = arith.addf %137, %141 : vector<1x128xf32>
    %143 = vector.extract_strided_slice %76 {offsets = [13, 0], sizes = [1, 28], strides = [1, 1]} : vector<64x28xf32> to vector<1x28xf32>
    %c13 = arith.constant 13 : index
    %c0_69 = arith.constant 0 : index
    %c0_70 = arith.constant 0 : index
    %144 = vector.load %arg11[%c13, %c0_69, %c0_70] : memref<64x28x128xf32, #tpu.memory_space<vmem>>, vector<1x28x128xf32>
    %145 = vector.shape_cast %144 : vector<1x28x128xf32> to vector<28x128xf32>
    %cst_71 = arith.constant dense<0.000000e+00> : vector<1x128xf32>
    %146 = tpu.matmul %143, %145, %cst_71 {dimension_numbers = #tpu.dot_dimension_numbers<[1], [0], [0], [1], [0, 0, 1, 1], [], []>} : vector<1x28xf32>, vector<28x128xf32>, vector<1x128xf32> -> vector<1x128xf32>
    %147 = arith.addf %142, %146 : vector<1x128xf32>
    %148 = vector.extract_strided_slice %76 {offsets = [14, 0], sizes = [1, 28], strides = [1, 1]} : vector<64x28xf32> to vector<1x28xf32>
    %c14 = arith.constant 14 : index
    %c0_72 = arith.constant 0 : index
    %c0_73 = arith.constant 0 : index
    %149 = vector.load %arg11[%c14, %c0_72, %c0_73] : memref<64x28x128xf32, #tpu.memory_space<vmem>>, vector<1x28x128xf32>
    %150 = vector.shape_cast %149 : vector<1x28x128xf32> to vector<28x128xf32>
    %cst_74 = arith.constant dense<0.000000e+00> : vector<1x128xf32>
    %151 = tpu.matmul %148, %150, %cst_74 {dimension_numbers = #tpu.dot_dimension_numbers<[1], [0], [0], [1], [0, 0, 1, 1], [], []>} : vector<1x28xf32>, vector<28x128xf32>, vector<1x128xf32> -> vector<1x128xf32>
    %152 = arith.addf %147, %151 : vector<1x128xf32>
    %153 = vector.extract_strided_slice %76 {offsets = [15, 0], sizes = [1, 28], strides = [1, 1]} : vector<64x28xf32> to vector<1x28xf32>
    %c15 = arith.constant 15 : index
    %c0_75 = arith.constant 0 : index
    %c0_76 = arith.constant 0 : index
    %154 = vector.load %arg11[%c15, %c0_75, %c0_76] : memref<64x28x128xf32, #tpu.memory_space<vmem>>, vector<1x28x128xf32>
    %155 = vector.shape_cast %154 : vector<1x28x128xf32> to vector<28x128xf32>
    %cst_77 = arith.constant dense<0.000000e+00> : vector<1x128xf32>
    %156 = tpu.matmul %153, %155, %cst_77 {dimension_numbers = #tpu.dot_dimension_numbers<[1], [0], [0], [1], [0, 0, 1, 1], [], []>} : vector<1x28xf32>, vector<28x128xf32>, vector<1x128xf32> -> vector<1x128xf32>
    %157 = arith.addf %152, %156 : vector<1x128xf32>
    %158 = vector.extract_strided_slice %76 {offsets = [16, 0], sizes = [1, 28], strides = [1, 1]} : vector<64x28xf32> to vector<1x28xf32>
    %c16 = arith.constant 16 : index
    %c0_78 = arith.constant 0 : index
    %c0_79 = arith.constant 0 : index
    %159 = vector.load %arg11[%c16, %c0_78, %c0_79] : memref<64x28x128xf32, #tpu.memory_space<vmem>>, vector<1x28x128xf32>
    %160 = vector.shape_cast %159 : vector<1x28x128xf32> to vector<28x128xf32>
    %cst_80 = arith.constant dense<0.000000e+00> : vector<1x128xf32>
    %161 = tpu.matmul %158, %160, %cst_80 {dimension_numbers = #tpu.dot_dimension_numbers<[1], [0], [0], [1], [0, 0, 1, 1], [], []>} : vector<1x28xf32>, vector<28x128xf32>, vector<1x128xf32> -> vector<1x128xf32>
    %162 = arith.addf %157, %161 : vector<1x128xf32>
    %163 = vector.extract_strided_slice %76 {offsets = [17, 0], sizes = [1, 28], strides = [1, 1]} : vector<64x28xf32> to vector<1x28xf32>
    %c17 = arith.constant 17 : index
    %c0_81 = arith.constant 0 : index
    %c0_82 = arith.constant 0 : index
    %164 = vector.load %arg11[%c17, %c0_81, %c0_82] : memref<64x28x128xf32, #tpu.memory_space<vmem>>, vector<1x28x128xf32>
    %165 = vector.shape_cast %164 : vector<1x28x128xf32> to vector<28x128xf32>
    %cst_83 = arith.constant dense<0.000000e+00> : vector<1x128xf32>
    %166 = tpu.matmul %163, %165, %cst_83 {dimension_numbers = #tpu.dot_dimension_numbers<[1], [0], [0], [1], [0, 0, 1, 1], [], []>} : vector<1x28xf32>, vector<28x128xf32>, vector<1x128xf32> -> vector<1x128xf32>
    %167 = arith.addf %162, %166 : vector<1x128xf32>
    %168 = vector.extract_strided_slice %76 {offsets = [18, 0], sizes = [1, 28], strides = [1, 1]} : vector<64x28xf32> to vector<1x28xf32>
    %c18 = arith.constant 18 : index
    %c0_84 = arith.constant 0 : index
    %c0_85 = arith.constant 0 : index
    %169 = vector.load %arg11[%c18, %c0_84, %c0_85] : memref<64x28x128xf32, #tpu.memory_space<vmem>>, vector<1x28x128xf32>
    %170 = vector.shape_cast %169 : vector<1x28x128xf32> to vector<28x128xf32>
    %cst_86 = arith.constant dense<0.000000e+00> : vector<1x128xf32>
    %171 = tpu.matmul %168, %170, %cst_86 {dimension_numbers = #tpu.dot_dimension_numbers<[1], [0], [0], [1], [0, 0, 1, 1], [], []>} : vector<1x28xf32>, vector<28x128xf32>, vector<1x128xf32> -> vector<1x128xf32>
    %172 = arith.addf %167, %171 : vector<1x128xf32>
    %173 = vector.extract_strided_slice %76 {offsets = [19, 0], sizes = [1, 28], strides = [1, 1]} : vector<64x28xf32> to vector<1x28xf32>
    %c19 = arith.constant 19 : index
    %c0_87 = arith.constant 0 : index
    %c0_88 = arith.constant 0 : index
    %174 = vector.load %arg11[%c19, %c0_87, %c0_88] : memref<64x28x128xf32, #tpu.memory_space<vmem>>, vector<1x28x128xf32>
    %175 = vector.shape_cast %174 : vector<1x28x128xf32> to vector<28x128xf32>
    %cst_89 = arith.constant dense<0.000000e+00> : vector<1x128xf32>
    %176 = tpu.matmul %173, %175, %cst_89 {dimension_numbers = #tpu.dot_dimension_numbers<[1], [0], [0], [1], [0, 0, 1, 1], [], []>} : vector<1x28xf32>, vector<28x128xf32>, vector<1x128xf32> -> vector<1x128xf32>
    %177 = arith.addf %172, %176 : vector<1x128xf32>
    %178 = vector.extract_strided_slice %76 {offsets = [20, 0], sizes = [1, 28], strides = [1, 1]} : vector<64x28xf32> to vector<1x28xf32>
    %c20 = arith.constant 20 : index
    %c0_90 = arith.constant 0 : index
    %c0_91 = arith.constant 0 : index
    %179 = vector.load %arg11[%c20, %c0_90, %c0_91] : memref<64x28x128xf32, #tpu.memory_space<vmem>>, vector<1x28x128xf32>
    %180 = vector.shape_cast %179 : vector<1x28x128xf32> to vector<28x128xf32>
    %cst_92 = arith.constant dense<0.000000e+00> : vector<1x128xf32>
    %181 = tpu.matmul %178, %180, %cst_92 {dimension_numbers = #tpu.dot_dimension_numbers<[1], [0], [0], [1], [0, 0, 1, 1], [], []>} : vector<1x28xf32>, vector<28x128xf32>, vector<1x128xf32> -> vector<1x128xf32>
    %182 = arith.addf %177, %181 : vector<1x128xf32>
    %183 = vector.extract_strided_slice %76 {offsets = [21, 0], sizes = [1, 28], strides = [1, 1]} : vector<64x28xf32> to vector<1x28xf32>
    %c21 = arith.constant 21 : index
    %c0_93 = arith.constant 0 : index
    %c0_94 = arith.constant 0 : index
    %184 = vector.load %arg11[%c21, %c0_93, %c0_94] : memref<64x28x128xf32, #tpu.memory_space<vmem>>, vector<1x28x128xf32>
    %185 = vector.shape_cast %184 : vector<1x28x128xf32> to vector<28x128xf32>
    %cst_95 = arith.constant dense<0.000000e+00> : vector<1x128xf32>
    %186 = tpu.matmul %183, %185, %cst_95 {dimension_numbers = #tpu.dot_dimension_numbers<[1], [0], [0], [1], [0, 0, 1, 1], [], []>} : vector<1x28xf32>, vector<28x128xf32>, vector<1x128xf32> -> vector<1x128xf32>
    %187 = arith.addf %182, %186 : vector<1x128xf32>
    %188 = vector.extract_strided_slice %76 {offsets = [22, 0], sizes = [1, 28], strides = [1, 1]} : vector<64x28xf32> to vector<1x28xf32>
    %c22 = arith.constant 22 : index
    %c0_96 = arith.constant 0 : index
    %c0_97 = arith.constant 0 : index
    %189 = vector.load %arg11[%c22, %c0_96, %c0_97] : memref<64x28x128xf32, #tpu.memory_space<vmem>>, vector<1x28x128xf32>
    %190 = vector.shape_cast %189 : vector<1x28x128xf32> to vector<28x128xf32>
    %cst_98 = arith.constant dense<0.000000e+00> : vector<1x128xf32>
    %191 = tpu.matmul %188, %190, %cst_98 {dimension_numbers = #tpu.dot_dimension_numbers<[1], [0], [0], [1], [0, 0, 1, 1], [], []>} : vector<1x28xf32>, vector<28x128xf32>, vector<1x128xf32> -> vector<1x128xf32>
    %192 = arith.addf %187, %191 : vector<1x128xf32>
    %193 = vector.extract_strided_slice %76 {offsets = [23, 0], sizes = [1, 28], strides = [1, 1]} : vector<64x28xf32> to vector<1x28xf32>
    %c23 = arith.constant 23 : index
    %c0_99 = arith.constant 0 : index
    %c0_100 = arith.constant 0 : index
    %194 = vector.load %arg11[%c23, %c0_99, %c0_100] : memref<64x28x128xf32, #tpu.memory_space<vmem>>, vector<1x28x128xf32>
    %195 = vector.shape_cast %194 : vector<1x28x128xf32> to vector<28x128xf32>
    %cst_101 = arith.constant dense<0.000000e+00> : vector<1x128xf32>
    %196 = tpu.matmul %193, %195, %cst_101 {dimension_numbers = #tpu.dot_dimension_numbers<[1], [0], [0], [1], [0, 0, 1, 1], [], []>} : vector<1x28xf32>, vector<28x128xf32>, vector<1x128xf32> -> vector<1x128xf32>
    %197 = arith.addf %192, %196 : vector<1x128xf32>
    %198 = vector.extract_strided_slice %76 {offsets = [24, 0], sizes = [1, 28], strides = [1, 1]} : vector<64x28xf32> to vector<1x28xf32>
    %c24 = arith.constant 24 : index
    %c0_102 = arith.constant 0 : index
    %c0_103 = arith.constant 0 : index
    %199 = vector.load %arg11[%c24, %c0_102, %c0_103] : memref<64x28x128xf32, #tpu.memory_space<vmem>>, vector<1x28x128xf32>
    %200 = vector.shape_cast %199 : vector<1x28x128xf32> to vector<28x128xf32>
    %cst_104 = arith.constant dense<0.000000e+00> : vector<1x128xf32>
    %201 = tpu.matmul %198, %200, %cst_104 {dimension_numbers = #tpu.dot_dimension_numbers<[1], [0], [0], [1], [0, 0, 1, 1], [], []>} : vector<1x28xf32>, vector<28x128xf32>, vector<1x128xf32> -> vector<1x128xf32>
    %202 = arith.addf %197, %201 : vector<1x128xf32>
    %203 = vector.extract_strided_slice %76 {offsets = [25, 0], sizes = [1, 28], strides = [1, 1]} : vector<64x28xf32> to vector<1x28xf32>
    %c25 = arith.constant 25 : index
    %c0_105 = arith.constant 0 : index
    %c0_106 = arith.constant 0 : index
    %204 = vector.load %arg11[%c25, %c0_105, %c0_106] : memref<64x28x128xf32, #tpu.memory_space<vmem>>, vector<1x28x128xf32>
    %205 = vector.shape_cast %204 : vector<1x28x128xf32> to vector<28x128xf32>
    %cst_107 = arith.constant dense<0.000000e+00> : vector<1x128xf32>
    %206 = tpu.matmul %203, %205, %cst_107 {dimension_numbers = #tpu.dot_dimension_numbers<[1], [0], [0], [1], [0, 0, 1, 1], [], []>} : vector<1x28xf32>, vector<28x128xf32>, vector<1x128xf32> -> vector<1x128xf32>
    %207 = arith.addf %202, %206 : vector<1x128xf32>
    %208 = vector.extract_strided_slice %76 {offsets = [26, 0], sizes = [1, 28], strides = [1, 1]} : vector<64x28xf32> to vector<1x28xf32>
    %c26 = arith.constant 26 : index
    %c0_108 = arith.constant 0 : index
    %c0_109 = arith.constant 0 : index
    %209 = vector.load %arg11[%c26, %c0_108, %c0_109] : memref<64x28x128xf32, #tpu.memory_space<vmem>>, vector<1x28x128xf32>
    %210 = vector.shape_cast %209 : vector<1x28x128xf32> to vector<28x128xf32>
    %cst_110 = arith.constant dense<0.000000e+00> : vector<1x128xf32>
    %211 = tpu.matmul %208, %210, %cst_110 {dimension_numbers = #tpu.dot_dimension_numbers<[1], [0], [0], [1], [0, 0, 1, 1], [], []>} : vector<1x28xf32>, vector<28x128xf32>, vector<1x128xf32> -> vector<1x128xf32>
    %212 = arith.addf %207, %211 : vector<1x128xf32>
    %213 = vector.extract_strided_slice %76 {offsets = [27, 0], sizes = [1, 28], strides = [1, 1]} : vector<64x28xf32> to vector<1x28xf32>
    %c27 = arith.constant 27 : index
    %c0_111 = arith.constant 0 : index
    %c0_112 = arith.constant 0 : index
    %214 = vector.load %arg11[%c27, %c0_111, %c0_112] : memref<64x28x128xf32, #tpu.memory_space<vmem>>, vector<1x28x128xf32>
    %215 = vector.shape_cast %214 : vector<1x28x128xf32> to vector<28x128xf32>
    %cst_113 = arith.constant dense<0.000000e+00> : vector<1x128xf32>
    %216 = tpu.matmul %213, %215, %cst_113 {dimension_numbers = #tpu.dot_dimension_numbers<[1], [0], [0], [1], [0, 0, 1, 1], [], []>} : vector<1x28xf32>, vector<28x128xf32>, vector<1x128xf32> -> vector<1x128xf32>
    %217 = arith.addf %212, %216 : vector<1x128xf32>
    %218 = vector.extract_strided_slice %76 {offsets = [28, 0], sizes = [1, 28], strides = [1, 1]} : vector<64x28xf32> to vector<1x28xf32>
    %c28 = arith.constant 28 : index
    %c0_114 = arith.constant 0 : index
    %c0_115 = arith.constant 0 : index
    %219 = vector.load %arg11[%c28, %c0_114, %c0_115] : memref<64x28x128xf32, #tpu.memory_space<vmem>>, vector<1x28x128xf32>
    %220 = vector.shape_cast %219 : vector<1x28x128xf32> to vector<28x128xf32>
    %cst_116 = arith.constant dense<0.000000e+00> : vector<1x128xf32>
    %221 = tpu.matmul %218, %220, %cst_116 {dimension_numbers = #tpu.dot_dimension_numbers<[1], [0], [0], [1], [0, 0, 1, 1], [], []>} : vector<1x28xf32>, vector<28x128xf32>, vector<1x128xf32> -> vector<1x128xf32>
    %222 = arith.addf %217, %221 : vector<1x128xf32>
    %223 = vector.extract_strided_slice %76 {offsets = [29, 0], sizes = [1, 28], strides = [1, 1]} : vector<64x28xf32> to vector<1x28xf32>
    %c29 = arith.constant 29 : index
    %c0_117 = arith.constant 0 : index
    %c0_118 = arith.constant 0 : index
    %224 = vector.load %arg11[%c29, %c0_117, %c0_118] : memref<64x28x128xf32, #tpu.memory_space<vmem>>, vector<1x28x128xf32>
    %225 = vector.shape_cast %224 : vector<1x28x128xf32> to vector<28x128xf32>
    %cst_119 = arith.constant dense<0.000000e+00> : vector<1x128xf32>
    %226 = tpu.matmul %223, %225, %cst_119 {dimension_numbers = #tpu.dot_dimension_numbers<[1], [0], [0], [1], [0, 0, 1, 1], [], []>} : vector<1x28xf32>, vector<28x128xf32>, vector<1x128xf32> -> vector<1x128xf32>
    %227 = arith.addf %222, %226 : vector<1x128xf32>
    %228 = vector.extract_strided_slice %76 {offsets = [30, 0], sizes = [1, 28], strides = [1, 1]} : vector<64x28xf32> to vector<1x28xf32>
    %c30 = arith.constant 30 : index
    %c0_120 = arith.constant 0 : index
    %c0_121 = arith.constant 0 : index
    %229 = vector.load %arg11[%c30, %c0_120, %c0_121] : memref<64x28x128xf32, #tpu.memory_space<vmem>>, vector<1x28x128xf32>
    %230 = vector.shape_cast %229 : vector<1x28x128xf32> to vector<28x128xf32>
    %cst_122 = arith.constant dense<0.000000e+00> : vector<1x128xf32>
    %231 = tpu.matmul %228, %230, %cst_122 {dimension_numbers = #tpu.dot_dimension_numbers<[1], [0], [0], [1], [0, 0, 1, 1], [], []>} : vector<1x28xf32>, vector<28x128xf32>, vector<1x128xf32> -> vector<1x128xf32>
    %232 = arith.addf %227, %231 : vector<1x128xf32>
    %233 = vector.extract_strided_slice %76 {offsets = [31, 0], sizes = [1, 28], strides = [1, 1]} : vector<64x28xf32> to vector<1x28xf32>
    %c31 = arith.constant 31 : index
    %c0_123 = arith.constant 0 : index
    %c0_124 = arith.constant 0 : index
    %234 = vector.load %arg11[%c31, %c0_123, %c0_124] : memref<64x28x128xf32, #tpu.memory_space<vmem>>, vector<1x28x128xf32>
    %235 = vector.shape_cast %234 : vector<1x28x128xf32> to vector<28x128xf32>
    %cst_125 = arith.constant dense<0.000000e+00> : vector<1x128xf32>
    %236 = tpu.matmul %233, %235, %cst_125 {dimension_numbers = #tpu.dot_dimension_numbers<[1], [0], [0], [1], [0, 0, 1, 1], [], []>} : vector<1x28xf32>, vector<28x128xf32>, vector<1x128xf32> -> vector<1x128xf32>
    %237 = arith.addf %232, %236 : vector<1x128xf32>
    %238 = vector.extract_strided_slice %76 {offsets = [32, 0], sizes = [1, 28], strides = [1, 1]} : vector<64x28xf32> to vector<1x28xf32>
    %c32 = arith.constant 32 : index
    %c0_126 = arith.constant 0 : index
    %c0_127 = arith.constant 0 : index
    %239 = vector.load %arg11[%c32, %c0_126, %c0_127] : memref<64x28x128xf32, #tpu.memory_space<vmem>>, vector<1x28x128xf32>
    %240 = vector.shape_cast %239 : vector<1x28x128xf32> to vector<28x128xf32>
    %cst_128 = arith.constant dense<0.000000e+00> : vector<1x128xf32>
    %241 = tpu.matmul %238, %240, %cst_128 {dimension_numbers = #tpu.dot_dimension_numbers<[1], [0], [0], [1], [0, 0, 1, 1], [], []>} : vector<1x28xf32>, vector<28x128xf32>, vector<1x128xf32> -> vector<1x128xf32>
    %242 = arith.addf %237, %241 : vector<1x128xf32>
    %243 = vector.extract_strided_slice %76 {offsets = [33, 0], sizes = [1, 28], strides = [1, 1]} : vector<64x28xf32> to vector<1x28xf32>
    %c33 = arith.constant 33 : index
    %c0_129 = arith.constant 0 : index
    %c0_130 = arith.constant 0 : index
    %244 = vector.load %arg11[%c33, %c0_129, %c0_130] : memref<64x28x128xf32, #tpu.memory_space<vmem>>, vector<1x28x128xf32>
    %245 = vector.shape_cast %244 : vector<1x28x128xf32> to vector<28x128xf32>
    %cst_131 = arith.constant dense<0.000000e+00> : vector<1x128xf32>
    %246 = tpu.matmul %243, %245, %cst_131 {dimension_numbers = #tpu.dot_dimension_numbers<[1], [0], [0], [1], [0, 0, 1, 1], [], []>} : vector<1x28xf32>, vector<28x128xf32>, vector<1x128xf32> -> vector<1x128xf32>
    %247 = arith.addf %242, %246 : vector<1x128xf32>
    %248 = vector.extract_strided_slice %76 {offsets = [34, 0], sizes = [1, 28], strides = [1, 1]} : vector<64x28xf32> to vector<1x28xf32>
    %c34 = arith.constant 34 : index
    %c0_132 = arith.constant 0 : index
    %c0_133 = arith.constant 0 : index
    %249 = vector.load %arg11[%c34, %c0_132, %c0_133] : memref<64x28x128xf32, #tpu.memory_space<vmem>>, vector<1x28x128xf32>
    %250 = vector.shape_cast %249 : vector<1x28x128xf32> to vector<28x128xf32>
    %cst_134 = arith.constant dense<0.000000e+00> : vector<1x128xf32>
    %251 = tpu.matmul %248, %250, %cst_134 {dimension_numbers = #tpu.dot_dimension_numbers<[1], [0], [0], [1], [0, 0, 1, 1], [], []>} : vector<1x28xf32>, vector<28x128xf32>, vector<1x128xf32> -> vector<1x128xf32>
    %252 = arith.addf %247, %251 : vector<1x128xf32>
    %253 = vector.extract_strided_slice %76 {offsets = [35, 0], sizes = [1, 28], strides = [1, 1]} : vector<64x28xf32> to vector<1x28xf32>
    %c35 = arith.constant 35 : index
    %c0_135 = arith.constant 0 : index
    %c0_136 = arith.constant 0 : index
    %254 = vector.load %arg11[%c35, %c0_135, %c0_136] : memref<64x28x128xf32, #tpu.memory_space<vmem>>, vector<1x28x128xf32>
    %255 = vector.shape_cast %254 : vector<1x28x128xf32> to vector<28x128xf32>
    %cst_137 = arith.constant dense<0.000000e+00> : vector<1x128xf32>
    %256 = tpu.matmul %253, %255, %cst_137 {dimension_numbers = #tpu.dot_dimension_numbers<[1], [0], [0], [1], [0, 0, 1, 1], [], []>} : vector<1x28xf32>, vector<28x128xf32>, vector<1x128xf32> -> vector<1x128xf32>
    %257 = arith.addf %252, %256 : vector<1x128xf32>
    %258 = vector.extract_strided_slice %76 {offsets = [36, 0], sizes = [1, 28], strides = [1, 1]} : vector<64x28xf32> to vector<1x28xf32>
    %c36 = arith.constant 36 : index
    %c0_138 = arith.constant 0 : index
    %c0_139 = arith.constant 0 : index
    %259 = vector.load %arg11[%c36, %c0_138, %c0_139] : memref<64x28x128xf32, #tpu.memory_space<vmem>>, vector<1x28x128xf32>
    %260 = vector.shape_cast %259 : vector<1x28x128xf32> to vector<28x128xf32>
    %cst_140 = arith.constant dense<0.000000e+00> : vector<1x128xf32>
    %261 = tpu.matmul %258, %260, %cst_140 {dimension_numbers = #tpu.dot_dimension_numbers<[1], [0], [0], [1], [0, 0, 1, 1], [], []>} : vector<1x28xf32>, vector<28x128xf32>, vector<1x128xf32> -> vector<1x128xf32>
    %262 = arith.addf %257, %261 : vector<1x128xf32>
    %263 = vector.extract_strided_slice %76 {offsets = [37, 0], sizes = [1, 28], strides = [1, 1]} : vector<64x28xf32> to vector<1x28xf32>
    %c37 = arith.constant 37 : index
    %c0_141 = arith.constant 0 : index
    %c0_142 = arith.constant 0 : index
    %264 = vector.load %arg11[%c37, %c0_141, %c0_142] : memref<64x28x128xf32, #tpu.memory_space<vmem>>, vector<1x28x128xf32>
    %265 = vector.shape_cast %264 : vector<1x28x128xf32> to vector<28x128xf32>
    %cst_143 = arith.constant dense<0.000000e+00> : vector<1x128xf32>
    %266 = tpu.matmul %263, %265, %cst_143 {dimension_numbers = #tpu.dot_dimension_numbers<[1], [0], [0], [1], [0, 0, 1, 1], [], []>} : vector<1x28xf32>, vector<28x128xf32>, vector<1x128xf32> -> vector<1x128xf32>
    %267 = arith.addf %262, %266 : vector<1x128xf32>
    %268 = vector.extract_strided_slice %76 {offsets = [38, 0], sizes = [1, 28], strides = [1, 1]} : vector<64x28xf32> to vector<1x28xf32>
    %c38 = arith.constant 38 : index
    %c0_144 = arith.constant 0 : index
    %c0_145 = arith.constant 0 : index
    %269 = vector.load %arg11[%c38, %c0_144, %c0_145] : memref<64x28x128xf32, #tpu.memory_space<vmem>>, vector<1x28x128xf32>
    %270 = vector.shape_cast %269 : vector<1x28x128xf32> to vector<28x128xf32>
    %cst_146 = arith.constant dense<0.000000e+00> : vector<1x128xf32>
    %271 = tpu.matmul %268, %270, %cst_146 {dimension_numbers = #tpu.dot_dimension_numbers<[1], [0], [0], [1], [0, 0, 1, 1], [], []>} : vector<1x28xf32>, vector<28x128xf32>, vector<1x128xf32> -> vector<1x128xf32>
    %272 = arith.addf %267, %271 : vector<1x128xf32>
    %273 = vector.extract_strided_slice %76 {offsets = [39, 0], sizes = [1, 28], strides = [1, 1]} : vector<64x28xf32> to vector<1x28xf32>
    %c39 = arith.constant 39 : index
    %c0_147 = arith.constant 0 : index
    %c0_148 = arith.constant 0 : index
    %274 = vector.load %arg11[%c39, %c0_147, %c0_148] : memref<64x28x128xf32, #tpu.memory_space<vmem>>, vector<1x28x128xf32>
    %275 = vector.shape_cast %274 : vector<1x28x128xf32> to vector<28x128xf32>
    %cst_149 = arith.constant dense<0.000000e+00> : vector<1x128xf32>
    %276 = tpu.matmul %273, %275, %cst_149 {dimension_numbers = #tpu.dot_dimension_numbers<[1], [0], [0], [1], [0, 0, 1, 1], [], []>} : vector<1x28xf32>, vector<28x128xf32>, vector<1x128xf32> -> vector<1x128xf32>
    %277 = arith.addf %272, %276 : vector<1x128xf32>
    %278 = vector.extract_strided_slice %76 {offsets = [40, 0], sizes = [1, 28], strides = [1, 1]} : vector<64x28xf32> to vector<1x28xf32>
    %c40 = arith.constant 40 : index
    %c0_150 = arith.constant 0 : index
    %c0_151 = arith.constant 0 : index
    %279 = vector.load %arg11[%c40, %c0_150, %c0_151] : memref<64x28x128xf32, #tpu.memory_space<vmem>>, vector<1x28x128xf32>
    %280 = vector.shape_cast %279 : vector<1x28x128xf32> to vector<28x128xf32>
    %cst_152 = arith.constant dense<0.000000e+00> : vector<1x128xf32>
    %281 = tpu.matmul %278, %280, %cst_152 {dimension_numbers = #tpu.dot_dimension_numbers<[1], [0], [0], [1], [0, 0, 1, 1], [], []>} : vector<1x28xf32>, vector<28x128xf32>, vector<1x128xf32> -> vector<1x128xf32>
    %282 = arith.addf %277, %281 : vector<1x128xf32>
    %283 = vector.extract_strided_slice %76 {offsets = [41, 0], sizes = [1, 28], strides = [1, 1]} : vector<64x28xf32> to vector<1x28xf32>
    %c41 = arith.constant 41 : index
    %c0_153 = arith.constant 0 : index
    %c0_154 = arith.constant 0 : index
    %284 = vector.load %arg11[%c41, %c0_153, %c0_154] : memref<64x28x128xf32, #tpu.memory_space<vmem>>, vector<1x28x128xf32>
    %285 = vector.shape_cast %284 : vector<1x28x128xf32> to vector<28x128xf32>
    %cst_155 = arith.constant dense<0.000000e+00> : vector<1x128xf32>
    %286 = tpu.matmul %283, %285, %cst_155 {dimension_numbers = #tpu.dot_dimension_numbers<[1], [0], [0], [1], [0, 0, 1, 1], [], []>} : vector<1x28xf32>, vector<28x128xf32>, vector<1x128xf32> -> vector<1x128xf32>
    %287 = arith.addf %282, %286 : vector<1x128xf32>
    %288 = vector.extract_strided_slice %76 {offsets = [42, 0], sizes = [1, 28], strides = [1, 1]} : vector<64x28xf32> to vector<1x28xf32>
    %c42 = arith.constant 42 : index
    %c0_156 = arith.constant 0 : index
    %c0_157 = arith.constant 0 : index
    %289 = vector.load %arg11[%c42, %c0_156, %c0_157] : memref<64x28x128xf32, #tpu.memory_space<vmem>>, vector<1x28x128xf32>
    %290 = vector.shape_cast %289 : vector<1x28x128xf32> to vector<28x128xf32>
    %cst_158 = arith.constant dense<0.000000e+00> : vector<1x128xf32>
    %291 = tpu.matmul %288, %290, %cst_158 {dimension_numbers = #tpu.dot_dimension_numbers<[1], [0], [0], [1], [0, 0, 1, 1], [], []>} : vector<1x28xf32>, vector<28x128xf32>, vector<1x128xf32> -> vector<1x128xf32>
    %292 = arith.addf %287, %291 : vector<1x128xf32>
    %293 = vector.extract_strided_slice %76 {offsets = [43, 0], sizes = [1, 28], strides = [1, 1]} : vector<64x28xf32> to vector<1x28xf32>
    %c43 = arith.constant 43 : index
    %c0_159 = arith.constant 0 : index
    %c0_160 = arith.constant 0 : index
    %294 = vector.load %arg11[%c43, %c0_159, %c0_160] : memref<64x28x128xf32, #tpu.memory_space<vmem>>, vector<1x28x128xf32>
    %295 = vector.shape_cast %294 : vector<1x28x128xf32> to vector<28x128xf32>
    %cst_161 = arith.constant dense<0.000000e+00> : vector<1x128xf32>
    %296 = tpu.matmul %293, %295, %cst_161 {dimension_numbers = #tpu.dot_dimension_numbers<[1], [0], [0], [1], [0, 0, 1, 1], [], []>} : vector<1x28xf32>, vector<28x128xf32>, vector<1x128xf32> -> vector<1x128xf32>
    %297 = arith.addf %292, %296 : vector<1x128xf32>
    %298 = vector.extract_strided_slice %76 {offsets = [44, 0], sizes = [1, 28], strides = [1, 1]} : vector<64x28xf32> to vector<1x28xf32>
    %c44 = arith.constant 44 : index
    %c0_162 = arith.constant 0 : index
    %c0_163 = arith.constant 0 : index
    %299 = vector.load %arg11[%c44, %c0_162, %c0_163] : memref<64x28x128xf32, #tpu.memory_space<vmem>>, vector<1x28x128xf32>
    %300 = vector.shape_cast %299 : vector<1x28x128xf32> to vector<28x128xf32>
    %cst_164 = arith.constant dense<0.000000e+00> : vector<1x128xf32>
    %301 = tpu.matmul %298, %300, %cst_164 {dimension_numbers = #tpu.dot_dimension_numbers<[1], [0], [0], [1], [0, 0, 1, 1], [], []>} : vector<1x28xf32>, vector<28x128xf32>, vector<1x128xf32> -> vector<1x128xf32>
    %302 = arith.addf %297, %301 : vector<1x128xf32>
    %303 = vector.extract_strided_slice %76 {offsets = [45, 0], sizes = [1, 28], strides = [1, 1]} : vector<64x28xf32> to vector<1x28xf32>
    %c45 = arith.constant 45 : index
    %c0_165 = arith.constant 0 : index
    %c0_166 = arith.constant 0 : index
    %304 = vector.load %arg11[%c45, %c0_165, %c0_166] : memref<64x28x128xf32, #tpu.memory_space<vmem>>, vector<1x28x128xf32>
    %305 = vector.shape_cast %304 : vector<1x28x128xf32> to vector<28x128xf32>
    %cst_167 = arith.constant dense<0.000000e+00> : vector<1x128xf32>
    %306 = tpu.matmul %303, %305, %cst_167 {dimension_numbers = #tpu.dot_dimension_numbers<[1], [0], [0], [1], [0, 0, 1, 1], [], []>} : vector<1x28xf32>, vector<28x128xf32>, vector<1x128xf32> -> vector<1x128xf32>
    %307 = arith.addf %302, %306 : vector<1x128xf32>
    %308 = vector.extract_strided_slice %76 {offsets = [46, 0], sizes = [1, 28], strides = [1, 1]} : vector<64x28xf32> to vector<1x28xf32>
    %c46 = arith.constant 46 : index
    %c0_168 = arith.constant 0 : index
    %c0_169 = arith.constant 0 : index
    %309 = vector.load %arg11[%c46, %c0_168, %c0_169] : memref<64x28x128xf32, #tpu.memory_space<vmem>>, vector<1x28x128xf32>
    %310 = vector.shape_cast %309 : vector<1x28x128xf32> to vector<28x128xf32>
    %cst_170 = arith.constant dense<0.000000e+00> : vector<1x128xf32>
    %311 = tpu.matmul %308, %310, %cst_170 {dimension_numbers = #tpu.dot_dimension_numbers<[1], [0], [0], [1], [0, 0, 1, 1], [], []>} : vector<1x28xf32>, vector<28x128xf32>, vector<1x128xf32> -> vector<1x128xf32>
    %312 = arith.addf %307, %311 : vector<1x128xf32>
    %313 = vector.extract_strided_slice %76 {offsets = [47, 0], sizes = [1, 28], strides = [1, 1]} : vector<64x28xf32> to vector<1x28xf32>
    %c47 = arith.constant 47 : index
    %c0_171 = arith.constant 0 : index
    %c0_172 = arith.constant 0 : index
    %314 = vector.load %arg11[%c47, %c0_171, %c0_172] : memref<64x28x128xf32, #tpu.memory_space<vmem>>, vector<1x28x128xf32>
    %315 = vector.shape_cast %314 : vector<1x28x128xf32> to vector<28x128xf32>
    %cst_173 = arith.constant dense<0.000000e+00> : vector<1x128xf32>
    %316 = tpu.matmul %313, %315, %cst_173 {dimension_numbers = #tpu.dot_dimension_numbers<[1], [0], [0], [1], [0, 0, 1, 1], [], []>} : vector<1x28xf32>, vector<28x128xf32>, vector<1x128xf32> -> vector<1x128xf32>
    %317 = arith.addf %312, %316 : vector<1x128xf32>
    %318 = vector.extract_strided_slice %76 {offsets = [48, 0], sizes = [1, 28], strides = [1, 1]} : vector<64x28xf32> to vector<1x28xf32>
    %c48 = arith.constant 48 : index
    %c0_174 = arith.constant 0 : index
    %c0_175 = arith.constant 0 : index
    %319 = vector.load %arg11[%c48, %c0_174, %c0_175] : memref<64x28x128xf32, #tpu.memory_space<vmem>>, vector<1x28x128xf32>
    %320 = vector.shape_cast %319 : vector<1x28x128xf32> to vector<28x128xf32>
    %cst_176 = arith.constant dense<0.000000e+00> : vector<1x128xf32>
    %321 = tpu.matmul %318, %320, %cst_176 {dimension_numbers = #tpu.dot_dimension_numbers<[1], [0], [0], [1], [0, 0, 1, 1], [], []>} : vector<1x28xf32>, vector<28x128xf32>, vector<1x128xf32> -> vector<1x128xf32>
    %322 = arith.addf %317, %321 : vector<1x128xf32>
    %323 = vector.extract_strided_slice %76 {offsets = [49, 0], sizes = [1, 28], strides = [1, 1]} : vector<64x28xf32> to vector<1x28xf32>
    %c49 = arith.constant 49 : index
    %c0_177 = arith.constant 0 : index
    %c0_178 = arith.constant 0 : index
    %324 = vector.load %arg11[%c49, %c0_177, %c0_178] : memref<64x28x128xf32, #tpu.memory_space<vmem>>, vector<1x28x128xf32>
    %325 = vector.shape_cast %324 : vector<1x28x128xf32> to vector<28x128xf32>
    %cst_179 = arith.constant dense<0.000000e+00> : vector<1x128xf32>
    %326 = tpu.matmul %323, %325, %cst_179 {dimension_numbers = #tpu.dot_dimension_numbers<[1], [0], [0], [1], [0, 0, 1, 1], [], []>} : vector<1x28xf32>, vector<28x128xf32>, vector<1x128xf32> -> vector<1x128xf32>
    %327 = arith.addf %322, %326 : vector<1x128xf32>
    %328 = vector.extract_strided_slice %76 {offsets = [50, 0], sizes = [1, 28], strides = [1, 1]} : vector<64x28xf32> to vector<1x28xf32>
    %c50 = arith.constant 50 : index
    %c0_180 = arith.constant 0 : index
    %c0_181 = arith.constant 0 : index
    %329 = vector.load %arg11[%c50, %c0_180, %c0_181] : memref<64x28x128xf32, #tpu.memory_space<vmem>>, vector<1x28x128xf32>
    %330 = vector.shape_cast %329 : vector<1x28x128xf32> to vector<28x128xf32>
    %cst_182 = arith.constant dense<0.000000e+00> : vector<1x128xf32>
    %331 = tpu.matmul %328, %330, %cst_182 {dimension_numbers = #tpu.dot_dimension_numbers<[1], [0], [0], [1], [0, 0, 1, 1], [], []>} : vector<1x28xf32>, vector<28x128xf32>, vector<1x128xf32> -> vector<1x128xf32>
    %332 = arith.addf %327, %331 : vector<1x128xf32>
    %333 = vector.extract_strided_slice %76 {offsets = [51, 0], sizes = [1, 28], strides = [1, 1]} : vector<64x28xf32> to vector<1x28xf32>
    %c51 = arith.constant 51 : index
    %c0_183 = arith.constant 0 : index
    %c0_184 = arith.constant 0 : index
    %334 = vector.load %arg11[%c51, %c0_183, %c0_184] : memref<64x28x128xf32, #tpu.memory_space<vmem>>, vector<1x28x128xf32>
    %335 = vector.shape_cast %334 : vector<1x28x128xf32> to vector<28x128xf32>
    %cst_185 = arith.constant dense<0.000000e+00> : vector<1x128xf32>
    %336 = tpu.matmul %333, %335, %cst_185 {dimension_numbers = #tpu.dot_dimension_numbers<[1], [0], [0], [1], [0, 0, 1, 1], [], []>} : vector<1x28xf32>, vector<28x128xf32>, vector<1x128xf32> -> vector<1x128xf32>
    %337 = arith.addf %332, %336 : vector<1x128xf32>
    %338 = vector.extract_strided_slice %76 {offsets = [52, 0], sizes = [1, 28], strides = [1, 1]} : vector<64x28xf32> to vector<1x28xf32>
    %c52 = arith.constant 52 : index
    %c0_186 = arith.constant 0 : index
    %c0_187 = arith.constant 0 : index
    %339 = vector.load %arg11[%c52, %c0_186, %c0_187] : memref<64x28x128xf32, #tpu.memory_space<vmem>>, vector<1x28x128xf32>
    %340 = vector.shape_cast %339 : vector<1x28x128xf32> to vector<28x128xf32>
    %cst_188 = arith.constant dense<0.000000e+00> : vector<1x128xf32>
    %341 = tpu.matmul %338, %340, %cst_188 {dimension_numbers = #tpu.dot_dimension_numbers<[1], [0], [0], [1], [0, 0, 1, 1], [], []>} : vector<1x28xf32>, vector<28x128xf32>, vector<1x128xf32> -> vector<1x128xf32>
    %342 = arith.addf %337, %341 : vector<1x128xf32>
    %343 = vector.extract_strided_slice %76 {offsets = [53, 0], sizes = [1, 28], strides = [1, 1]} : vector<64x28xf32> to vector<1x28xf32>
    %c53 = arith.constant 53 : index
    %c0_189 = arith.constant 0 : index
    %c0_190 = arith.constant 0 : index
    %344 = vector.load %arg11[%c53, %c0_189, %c0_190] : memref<64x28x128xf32, #tpu.memory_space<vmem>>, vector<1x28x128xf32>
    %345 = vector.shape_cast %344 : vector<1x28x128xf32> to vector<28x128xf32>
    %cst_191 = arith.constant dense<0.000000e+00> : vector<1x128xf32>
    %346 = tpu.matmul %343, %345, %cst_191 {dimension_numbers = #tpu.dot_dimension_numbers<[1], [0], [0], [1], [0, 0, 1, 1], [], []>} : vector<1x28xf32>, vector<28x128xf32>, vector<1x128xf32> -> vector<1x128xf32>
    %347 = arith.addf %342, %346 : vector<1x128xf32>
    %348 = vector.extract_strided_slice %76 {offsets = [54, 0], sizes = [1, 28], strides = [1, 1]} : vector<64x28xf32> to vector<1x28xf32>
    %c54 = arith.constant 54 : index
    %c0_192 = arith.constant 0 : index
    %c0_193 = arith.constant 0 : index
    %349 = vector.load %arg11[%c54, %c0_192, %c0_193] : memref<64x28x128xf32, #tpu.memory_space<vmem>>, vector<1x28x128xf32>
    %350 = vector.shape_cast %349 : vector<1x28x128xf32> to vector<28x128xf32>
    %cst_194 = arith.constant dense<0.000000e+00> : vector<1x128xf32>
    %351 = tpu.matmul %348, %350, %cst_194 {dimension_numbers = #tpu.dot_dimension_numbers<[1], [0], [0], [1], [0, 0, 1, 1], [], []>} : vector<1x28xf32>, vector<28x128xf32>, vector<1x128xf32> -> vector<1x128xf32>
    %352 = arith.addf %347, %351 : vector<1x128xf32>
    %353 = vector.extract_strided_slice %76 {offsets = [55, 0], sizes = [1, 28], strides = [1, 1]} : vector<64x28xf32> to vector<1x28xf32>
    %c55 = arith.constant 55 : index
    %c0_195 = arith.constant 0 : index
    %c0_196 = arith.constant 0 : index
    %354 = vector.load %arg11[%c55, %c0_195, %c0_196] : memref<64x28x128xf32, #tpu.memory_space<vmem>>, vector<1x28x128xf32>
    %355 = vector.shape_cast %354 : vector<1x28x128xf32> to vector<28x128xf32>
    %cst_197 = arith.constant dense<0.000000e+00> : vector<1x128xf32>
    %356 = tpu.matmul %353, %355, %cst_197 {dimension_numbers = #tpu.dot_dimension_numbers<[1], [0], [0], [1], [0, 0, 1, 1], [], []>} : vector<1x28xf32>, vector<28x128xf32>, vector<1x128xf32> -> vector<1x128xf32>
    %357 = arith.addf %352, %356 : vector<1x128xf32>
    %358 = vector.extract_strided_slice %76 {offsets = [56, 0], sizes = [1, 28], strides = [1, 1]} : vector<64x28xf32> to vector<1x28xf32>
    %c56 = arith.constant 56 : index
    %c0_198 = arith.constant 0 : index
    %c0_199 = arith.constant 0 : index
    %359 = vector.load %arg11[%c56, %c0_198, %c0_199] : memref<64x28x128xf32, #tpu.memory_space<vmem>>, vector<1x28x128xf32>
    %360 = vector.shape_cast %359 : vector<1x28x128xf32> to vector<28x128xf32>
    %cst_200 = arith.constant dense<0.000000e+00> : vector<1x128xf32>
    %361 = tpu.matmul %358, %360, %cst_200 {dimension_numbers = #tpu.dot_dimension_numbers<[1], [0], [0], [1], [0, 0, 1, 1], [], []>} : vector<1x28xf32>, vector<28x128xf32>, vector<1x128xf32> -> vector<1x128xf32>
    %362 = arith.addf %357, %361 : vector<1x128xf32>
    %363 = vector.extract_strided_slice %76 {offsets = [57, 0], sizes = [1, 28], strides = [1, 1]} : vector<64x28xf32> to vector<1x28xf32>
    %c57 = arith.constant 57 : index
    %c0_201 = arith.constant 0 : index
    %c0_202 = arith.constant 0 : index
    %364 = vector.load %arg11[%c57, %c0_201, %c0_202] : memref<64x28x128xf32, #tpu.memory_space<vmem>>, vector<1x28x128xf32>
    %365 = vector.shape_cast %364 : vector<1x28x128xf32> to vector<28x128xf32>
    %cst_203 = arith.constant dense<0.000000e+00> : vector<1x128xf32>
    %366 = tpu.matmul %363, %365, %cst_203 {dimension_numbers = #tpu.dot_dimension_numbers<[1], [0], [0], [1], [0, 0, 1, 1], [], []>} : vector<1x28xf32>, vector<28x128xf32>, vector<1x128xf32> -> vector<1x128xf32>
    %367 = arith.addf %362, %366 : vector<1x128xf32>
    %368 = vector.extract_strided_slice %76 {offsets = [58, 0], sizes = [1, 28], strides = [1, 1]} : vector<64x28xf32> to vector<1x28xf32>
    %c58 = arith.constant 58 : index
    %c0_204 = arith.constant 0 : index
    %c0_205 = arith.constant 0 : index
    %369 = vector.load %arg11[%c58, %c0_204, %c0_205] : memref<64x28x128xf32, #tpu.memory_space<vmem>>, vector<1x28x128xf32>
    %370 = vector.shape_cast %369 : vector<1x28x128xf32> to vector<28x128xf32>
    %cst_206 = arith.constant dense<0.000000e+00> : vector<1x128xf32>
    %371 = tpu.matmul %368, %370, %cst_206 {dimension_numbers = #tpu.dot_dimension_numbers<[1], [0], [0], [1], [0, 0, 1, 1], [], []>} : vector<1x28xf32>, vector<28x128xf32>, vector<1x128xf32> -> vector<1x128xf32>
    %372 = arith.addf %367, %371 : vector<1x128xf32>
    %373 = vector.extract_strided_slice %76 {offsets = [59, 0], sizes = [1, 28], strides = [1, 1]} : vector<64x28xf32> to vector<1x28xf32>
    %c59 = arith.constant 59 : index
    %c0_207 = arith.constant 0 : index
    %c0_208 = arith.constant 0 : index
    %374 = vector.load %arg11[%c59, %c0_207, %c0_208] : memref<64x28x128xf32, #tpu.memory_space<vmem>>, vector<1x28x128xf32>
    %375 = vector.shape_cast %374 : vector<1x28x128xf32> to vector<28x128xf32>
    %cst_209 = arith.constant dense<0.000000e+00> : vector<1x128xf32>
    %376 = tpu.matmul %373, %375, %cst_209 {dimension_numbers = #tpu.dot_dimension_numbers<[1], [0], [0], [1], [0, 0, 1, 1], [], []>} : vector<1x28xf32>, vector<28x128xf32>, vector<1x128xf32> -> vector<1x128xf32>
    %377 = arith.addf %372, %376 : vector<1x128xf32>
    %378 = vector.extract_strided_slice %76 {offsets = [60, 0], sizes = [1, 28], strides = [1, 1]} : vector<64x28xf32> to vector<1x28xf32>
    %c60 = arith.constant 60 : index
    %c0_210 = arith.constant 0 : index
    %c0_211 = arith.constant 0 : index
    %379 = vector.load %arg11[%c60, %c0_210, %c0_211] : memref<64x28x128xf32, #tpu.memory_space<vmem>>, vector<1x28x128xf32>
    %380 = vector.shape_cast %379 : vector<1x28x128xf32> to vector<28x128xf32>
    %cst_212 = arith.constant dense<0.000000e+00> : vector<1x128xf32>
    %381 = tpu.matmul %378, %380, %cst_212 {dimension_numbers = #tpu.dot_dimension_numbers<[1], [0], [0], [1], [0, 0, 1, 1], [], []>} : vector<1x28xf32>, vector<28x128xf32>, vector<1x128xf32> -> vector<1x128xf32>
    %382 = arith.addf %377, %381 : vector<1x128xf32>
    %383 = vector.extract_strided_slice %76 {offsets = [61, 0], sizes = [1, 28], strides = [1, 1]} : vector<64x28xf32> to vector<1x28xf32>
    %c61 = arith.constant 61 : index
    %c0_213 = arith.constant 0 : index
    %c0_214 = arith.constant 0 : index
    %384 = vector.load %arg11[%c61, %c0_213, %c0_214] : memref<64x28x128xf32, #tpu.memory_space<vmem>>, vector<1x28x128xf32>
    %385 = vector.shape_cast %384 : vector<1x28x128xf32> to vector<28x128xf32>
    %cst_215 = arith.constant dense<0.000000e+00> : vector<1x128xf32>
    %386 = tpu.matmul %383, %385, %cst_215 {dimension_numbers = #tpu.dot_dimension_numbers<[1], [0], [0], [1], [0, 0, 1, 1], [], []>} : vector<1x28xf32>, vector<28x128xf32>, vector<1x128xf32> -> vector<1x128xf32>
    %387 = arith.addf %382, %386 : vector<1x128xf32>
    %388 = vector.extract_strided_slice %76 {offsets = [62, 0], sizes = [1, 28], strides = [1, 1]} : vector<64x28xf32> to vector<1x28xf32>
    %c62 = arith.constant 62 : index
    %c0_216 = arith.constant 0 : index
    %c0_217 = arith.constant 0 : index
    %389 = vector.load %arg11[%c62, %c0_216, %c0_217] : memref<64x28x128xf32, #tpu.memory_space<vmem>>, vector<1x28x128xf32>
    %390 = vector.shape_cast %389 : vector<1x28x128xf32> to vector<28x128xf32>
    %cst_218 = arith.constant dense<0.000000e+00> : vector<1x128xf32>
    %391 = tpu.matmul %388, %390, %cst_218 {dimension_numbers = #tpu.dot_dimension_numbers<[1], [0], [0], [1], [0, 0, 1, 1], [], []>} : vector<1x28xf32>, vector<28x128xf32>, vector<1x128xf32> -> vector<1x128xf32>
    %392 = arith.addf %387, %391 : vector<1x128xf32>
    %393 = vector.extract_strided_slice %76 {offsets = [63, 0], sizes = [1, 28], strides = [1, 1]} : vector<64x28xf32> to vector<1x28xf32>
    %c63 = arith.constant 63 : index
    %c0_219 = arith.constant 0 : index
    %c0_220 = arith.constant 0 : index
    %394 = vector.load %arg11[%c63, %c0_219, %c0_220] : memref<64x28x128xf32, #tpu.memory_space<vmem>>, vector<1x28x128xf32>
    %395 = vector.shape_cast %394 : vector<1x28x128xf32> to vector<28x128xf32>
    %cst_221 = arith.constant dense<0.000000e+00> : vector<1x128xf32>
    %396 = tpu.matmul %393, %395, %cst_221 {dimension_numbers = #tpu.dot_dimension_numbers<[1], [0], [0], [1], [0, 0, 1, 1], [], []>} : vector<1x28xf32>, vector<28x128xf32>, vector<1x128xf32> -> vector<1x128xf32>
    %397 = arith.addf %392, %396 : vector<1x128xf32>
    %c0_222 = arith.constant 0 : index
    %c0_223 = arith.constant 0 : index
    %398 = vector.load %arg12[%c0_222, %c0_223] : memref<1x128xf32, #tpu.memory_space<vmem>>, vector<1x128xf32>
    %399 = arith.addf %397, %398 : vector<1x128xf32>
    %cst_224 = arith.constant 0.000000e+00 : f32
    %400 = vector.broadcast %cst_224 : f32 to vector<1x128xf32>
    %401 = arith.maximumf %399, %400 : vector<1x128xf32>
    %c0_225 = arith.constant 0 : index
    %c0_226 = arith.constant 0 : index
    %402 = vector.load %arg13[%c0_225, %c0_226] : memref<128x2xf32, #tpu.memory_space<vmem>>, vector<128x2xf32>
    %cst_227 = arith.constant dense<0.000000e+00> : vector<1x2xf32>
    %403 = tpu.matmul %401, %402, %cst_227 {dimension_numbers = #tpu.dot_dimension_numbers<[1], [0], [0], [1], [0, 0, 1, 1], [], []>} : vector<1x128xf32>, vector<128x2xf32>, vector<1x2xf32> -> vector<1x2xf32>
    %c0_228 = arith.constant 0 : index
    %c0_229 = arith.constant 0 : index
    %404 = vector.load %arg14[%c0_228, %c0_229] : memref<1x2xf32, #tpu.memory_space<vmem>>, vector<1x2xf32>
    %405 = arith.addf %403, %404 : vector<1x2xf32>
    %cst_230 = arith.constant 0.000000e+00 : f32
    %406 = vector.broadcast %cst_230 : f32 to vector<1x2xf32>
    %407 = arith.subf %406, %405 : vector<1x2xf32>
    %408 = math.exp %407 : vector<1x2xf32>
    %cst_231 = arith.constant 1.000000e+00 : f32
    %409 = vector.broadcast %cst_231 : f32 to vector<1x2xf32>
    %410 = arith.addf %409, %408 : vector<1x2xf32>
    %cst_232 = arith.constant 1.000000e+00 : f32
    %411 = vector.broadcast %cst_232 : f32 to vector<1x2xf32>
    %412 = arith.divf %411, %410 : vector<1x2xf32>
    %c0_233 = arith.constant 0 : index
    %c0_234 = arith.constant 0 : index
    %c0_235 = arith.constant 0 : index
    %413 = vector.load %arg15[%c0_233, %c0_234, %c0_235] : memref<1x1x2xf32, #tpu.memory_space<vmem>>, vector<1x1x2xf32>
    %414 = vector.shape_cast %413 : vector<1x1x2xf32> to vector<1x2xf32>
    %415 = vector.shape_cast %412 : vector<1x2xf32> to vector<1x1x2xf32>
    tpu.vector_store %arg15[%c0_233, %c0_234, %c0_235], %415 {strides = array<i32>} : memref<1x1x2xf32, #tpu.memory_space<vmem>>, vector<1x1x2xf32>,
    return
  }
  func.func @transform_0(%arg0: i32) -> (i32, i32, i32) {
    %c0_i32 = arith.constant 0 : i32
    %c0_i32_0 = arith.constant 0 : i32
    %c0_i32_1 = arith.constant 0 : i32
    return %arg0, %c0_i32, %c0_i32_0 : i32, i32, i32
  }
  func.func @transform_1(%arg0: i32) -> (i32, i32) {
    %c0_i32 = arith.constant 0 : i32
    %c0_i32_0 = arith.constant 0 : i32
    %c0_i32_1 = arith.constant 0 : i32
    return %c0_i32, %c0_i32_0 : i32, i32
  }
  func.func @transform_2(%arg0: i32) -> (i32, i32) {
    %c0_i32 = arith.constant 0 : i32
    %c0_i32_0 = arith.constant 0 : i32
    %c0_i32_1 = arith.constant 0 : i32
    return %c0_i32, %c0_i32_0 : i32, i32
  }
  func.func @transform_3(%arg0: i32) -> (i32, i32) {
    %c0_i32 = arith.constant 0 : i32
    %c0_i32_0 = arith.constant 0 : i32
    %c0_i32_1 = arith.constant 0 : i32
    return %c0_i32, %c0_i32_0 : i32, i32
  }
  func.func @transform_4(%arg0: i32) -> (i32, i32) {
    %c0_i32 = arith.constant 0 : i32
    %c0_i32_0 = arith.constant 0 : i32
    %c0_i32_1 = arith.constant 0 : i32
    return %c0_i32, %c0_i32_0 : i32, i32
  }
  func.func @transform_5(%arg0: i32) -> (i32, i32) {
    %c0_i32 = arith.constant 0 : i32
    %c0_i32_0 = arith.constant 0 : i32
    %c0_i32_1 = arith.constant 0 : i32
    return %c0_i32, %c0_i32_0 : i32, i32
  }
  func.func @transform_6(%arg0: i32) -> (i32, i32) {
    %c0_i32 = arith.constant 0 : i32
    %c0_i32_0 = arith.constant 0 : i32
    %c0_i32_1 = arith.constant 0 : i32
    return %c0_i32, %c0_i32_0 : i32, i32
  }
  func.func @transform_7(%arg0: i32) -> (i32, i32) {
    %c0_i32 = arith.constant 0 : i32
    %c0_i32_0 = arith.constant 0 : i32
    %c0_i32_1 = arith.constant 0 : i32
    return %c0_i32, %c0_i32_0 : i32, i32
  }
  func.func @transform_8(%arg0: i32) -> (i32, i32) {
    %c0_i32 = arith.constant 0 : i32
    %c0_i32_0 = arith.constant 0 : i32
    %c0_i32_1 = arith.constant 0 : i32
    return %c0_i32, %c0_i32_0 : i32, i32
  }
  func.func @transform_9(%arg0: i32) -> (i32, i32) {
    %c0_i32 = arith.constant 0 : i32
    %c0_i32_0 = arith.constant 0 : i32
    %c0_i32_1 = arith.constant 0 : i32
    return %c0_i32, %c0_i32_0 : i32, i32
  }
  func.func @transform_10(%arg0: i32) -> (i32, i32, i32) {
    %c0_i32 = arith.constant 0 : i32
    %c0_i32_0 = arith.constant 0 : i32
    %c0_i32_1 = arith.constant 0 : i32
    %c0_i32_2 = arith.constant 0 : i32
    return %c0_i32, %c0_i32_0, %c0_i32_1 : i32, i32, i32
  }
  func.func @transform_11(%arg0: i32) -> (i32, i32) {
    %c0_i32 = arith.constant 0 : i32
    %c0_i32_0 = arith.constant 0 : i32
    %c0_i32_1 = arith.constant 0 : i32
    return %c0_i32, %c0_i32_0 : i32, i32
  }
  func.func @transform_12(%arg0: i32) -> (i32, i32) {
    %c0_i32 = arith.constant 0 : i32
    %c0_i32_0 = arith.constant 0 : i32
    %c0_i32_1 = arith.constant 0 : i32
    return %c0_i32, %c0_i32_0 : i32, i32
  }
  func.func @transform_13(%arg0: i32) -> (i32, i32) {
    %c0_i32 = arith.constant 0 : i32
    %c0_i32_0 = arith.constant 0 : i32
    %c0_i32_1 = arith.constant 0 : i32
    return %c0_i32, %c0_i32_0 : i32, i32
  }
  func.func @transform_14(%arg0: i32) -> (i32, i32, i32) {
    %c0_i32 = arith.constant 0 : i32
    %c0_i32_0 = arith.constant 0 : i32
    %c0_i32_1 = arith.constant 0 : i32
    return %arg0, %c0_i32, %c0_i32_0 : i32, i32, i32
  }
}

</mosaic_0001>

<bundles_post_ra>
// kernel: object_detection_cnn.1
= control target key start
LH: loop header
LB: loop body
LE: loop exit
PB: predicated region body
PF: predicated region fallthrough
CT: control target
= control target key end

     0   :  { %s22293_s0 = inlined_call_operand.vmem [shape: f32[2,1,1972], index: 0, kind: input, shape index: {}]   ;;  %s22294_s1 = inlined_call_operand.vmem [shape: f32[16,9], index: 1, kind: input, shape index: {}]   ;;  %s22295_s2 = inlined_call_operand.vmem [shape: f32[16,1], index: 2, kind: input, shape index: {}]   ;;  %s22296_s3 = inlined_call_operand.hbm [shape: f32[1867,540], index: 3, kind: input, shape index: {}]   ;;  %s22297_s4 = inlined_call_operand.vmem [shape: f32[32,144], index: 4, kind: input, shape index: {}]   ;;  %s22298_s5 = inlined_call_operand.vmem [shape: f32[32,1], index: 5, kind: input, shape index: {}]   ;;  %s22299_s6 = inlined_call_operand.hbm [shape: f32[483,160], index: 6, kind: input, shape index: {}]   ;;  %s22300_s7 = inlined_call_operand.vmem [shape: f32[64,288], index: 7, kind: input, shape index: {}]   ;;  %s22301_s8 = inlined_call_operand.vmem [shape: f32[64,1], index: 8, kind: input, shape index: {}]   ;;  %s22302_s9 = inlined_call_operand.hbm [shape: f32[127,28], index: 9, kind: input, shape index: {}]   ;;  %s22303_s10 = inlined_call_operand.vmem [shape: f32[64,28,128], index: 10, kind: input, shape index: {}]   ;;  %s22304_s11 = inlined_call_operand.hbm [shape: f32[1,128], index: 11, kind: input, shape index: {}]   ;;  %s22305_s12 = inlined_call_operand.vmem [shape: f32[128,2], index: 12, kind: input, shape index: {}]   ;;  %s22306_s13 = inlined_call_operand.hbm [shape: f32[1,2], index: 13, kind: input, shape index: {}]   ;;  %s22307_s14 = inlined_call_operand.hbm [shape: f32[2,1,2], index: 14, kind: output, shape index: {}]  }
   0x1   :  { %22369 = sst [smem:[#allocation26_spill]] %s22305_s12 }
   0x2   :  { %22370 = sst [smem:[#allocation27_spill]] %s22307_s14 }
   0x3   :  { %19 = vsyncpa [#allocation3], 0 }
   0x4   :  { %20 = vsyncpa [#allocation6], 0 }
   0x5   :  { %21 = vsyncpa [#allocation9], 0 }
   0x6   :  { %22 = vsyncpa [#allocation4], 0 }
   0x7   :  { %24 = vsyncpa [#allocation4 + $0x1], 0  ;;  %s17955_s29 = smov 0   ;;  %s17957_s30 = smov 0  }
   0x8   :  { %s17959_s15 = smov 0   ;;  %s17961_s16 = smov 0  }
   0x9 LB: > { %22371 = sst [smem:[#allocation16_spill]] %s17831_s29  ;;  %s17976_s17 = sadd.s32 4294967295, %s17843_s16   ;;  %s17843_s16 = sphi %s17961_s16, %s22581_s16   ;;  %s17839_s15 = sphi %s17959_s15, %s22584_s15   ;;  %s17835_s30 = sphi %s17957_s30, %s22583_s30   ;;  %s17831_s29 = sphi %s17955_s29, %s22582_s29  }
   0xa   : > { %22372 = sst [smem:[#allocation17_spill]] %s17835_s30  ;;  %s12663_s18 = sadd.s32 4294967294, %s17843_s16  }
   0xb   : > { %22373 = sst [smem:[#allocation18_spill]] %s17839_s15  ;;  %s17980_s19 = sadd.s32 1, %s17843_s16  }
   0xc   : > { %22374 = sst [smem:[#allocation19_spill]] %s17843_s16  ;;  %s336_s20 = sadd.s32 1, %s17839_s15 }
   0xd   : > { %22375 = sst [smem:[#allocation20_spill]] %s17980_s19  ;;  %s333_s21 = ssub.s32 %s17843_s16, %s17980_s19 }
   0xe   : > { %p346_p0 = scmp.ne.s32.totalorder %s17839_s15, %s17835_s30  ;;  %p334_p1 = scmp.eq.s32.totalorder %s333_s21, 0 }
   0xf   : > { %p347_p2 = scmp.eq.s32.totalorder %s17976_s17, 1  ;;  %p352_p3 = scmp.ne.s32.totalorder %s17835_s30, %s17831_s29 }
  0x10   : > { %p353_p4 = scmp.eq.s32.totalorder %s12663_s18, 1  ;;  %p12664_p7 = scmp.ge.s32.totalorder %s17843_s16, 1 }
  0x11   : > { %s17991_s22 = scalar_select %p334_p1, %s17839_s15, %s336_s20  }
  0x12   : > { %p17993_p5 = por %p347_p2, %p346_p0  ;;  %p17997_p6 = por %p353_p4, %p352_p3 }
  0x13   : > { %22376 = sst [smem:[#allocation21_spill]] %s17991_s22  ;;  %p360_p8 = scmp.lt.s32.totalorder %s17843_s16, 3 }
  0x14   : > { %s22377_s23 = scalar_select %p17993_p5, 1, 0 }
  0x15   : > { %s22379_s24 = scalar_select %p17997_p6, 1, 0 }
  0x16   : > { %22378 = sst [smem:[#allocation22_spill]] %s22377_s23  ;;  %p22314_p9 = scmp.eq.s32.totalorder %s17976_s17, 0 }
  0x17   : > { %22380 = sst [smem:[#allocation23_spill]] %s22379_s24  ;;  %p18004_p10 = pnand %p12664_p7, %p360_p8 }
  0x18   : > { %s17845_s26 = smov [#allocation5]   ;;  %s17846_s18 = smov [#allocation8]  }
  0x19   : > { %s22381_s25 = scalar_select %p18004_p10, 1, 0 }
  0x1a   : > { %s397_s27 = sshll.u32 %s17845_s26, 4  ;;  %p16714_p11 = pneg %p18004_p10  ;;  %s18010_s27 = int_to_ptr.vmem [resolvable:$true] %s397_s27 }
  0x1b   : > { %s433_s20 = sshll.u32 %s17846_s18, 4  ;;  %s17847_s21 = smov [#allocation2]   ;;  %s18018_s20 = int_to_ptr.vmem [resolvable:$true] %s433_s20 }
  0x1c   : > { %p18014_p12 = pnand %p22314_p9, %p16714_p11  ;;  %s18020_s22 = sshll.u32 %s17847_s21, 4  ;;  %s379_s22 = int_to_ptr.vmem [resolvable:$true] %s18020_s22 }
  0x1d   : > { %s17629_s26 = scalar_lea.hbm %s22299_s6, 15616 }
  0x1e   : > { %p17630_p13 = scmp.ne.s32.totalorder %s22299_s6, %s17629_s26  ;;  %p18030_p0 = pneg %p18014_p12 }
  0x1f   : > { %p17636_p3 = scmp.lt.u32.totalorder %s17629_s26, %s22299_s6 }
  0x20   : > { %p17632_p1 = pnand %p18030_p0, %p17630_p13 }
  0x22   : > { %p17633_p2 = pneg %p17632_p1 }
  0x24   : > { %p17638_p4 = pnand %p17636_p3, %p17633_p2 }
  0x26   : > { %17641 = shalt.err (!%p17638_p4)
}
  0x27   : > { %s17642_s29 = scalar_lea.vmem %s18010_s27, 15616  ;;  %p17650_p9 = scmp.lt.s32.totalorder %s18010_s27, %s18010_s27 }
  0x28   : > { %p17643_p7 = scmp.ne.s32.totalorder %s18010_s27, %s17642_s29  ;;  %p17651_p6 = scmp.lt.s32.totalorder %s17642_s29, %s17642_s29 }
  0x2a   : > { %p17645_p8 = pnand %p17643_p7, %p18030_p0  ;;  %p17652_p13 = por %p17651_p6, %p17650_p9 }
  0x2c   : > { %p17646_p11 = pneg %p17645_p8 }
  0x2e   : > { %p17653_p1 = pnand %p17652_p13, %p17646_p11 }
  0x30   : > { %17656 = shalt.err (!%p17653_p1)
}
  0x31   : > { %s17848_s15 = smov 256   ;;  %s17849_s19 = smov 16  }
  0x32   : > { %16720 = dma.hbm_to_vmem [thread:$0]  (!%p18014_p12), %s22299_s6, 15616, %s18010_s27, [#allocation6], %s17848_s15, %s17848_s15, %s17849_s19  }
  0x33   : > { %s17657_s14 = scalar_lea.hbm %s22304_s11, 16 }
  0x34   : > { %p17658_p6 = scmp.ne.s32.totalorder %s22304_s11, %s17657_s14  ;;  %p17664_p3 = scmp.lt.u32.totalorder %s17657_s14, %s22304_s11 }
  0x36   : > { %p17660_p9 = pnand %p17658_p6, %p18030_p0 }
  0x38   : > { %p17661_p2 = pneg %p17660_p9 }
  0x3a   : > { %p17666_p4 = pnand %p17664_p3, %p17661_p2 }
  0x3c   : > { %17669 = shalt.err (!%p17666_p4)
}
  0x3d   : > { %s17670_s27 = scalar_lea.vmem %s18018_s20, 16  ;;  %s17677_s30 = scalar_lea.vmem %s18018_s20, 32 }
  0x3e   : > { %p17671_p7 = scmp.ne.s32.totalorder %s18018_s20, %s17670_s27  ;;  %p17678_p13 = scmp.lt.s32.totalorder %s18018_s20, %s18018_s20 }
  0x3f   : > { %p17679_p1 = scmp.lt.s32.totalorder %s17677_s30, %s17670_s27 }
  0x40   : > { %p17673_p8 = pnand %p17671_p7, %p18030_p0 }
  0x41   : > { %p17680_p6 = por %p17679_p1, %p17678_p13 }
  0x42   : > { %p17674_p11 = pneg %p17673_p8 }
  0x44   : > { %p17681_p9 = pnand %p17680_p6, %p17674_p11 }
  0x46   : > { %17684 = shalt.err (!%p17681_p9)
}
  0x47   : > { %16726 = dma.hbm_to_vmem [thread:$0]  (!%p18014_p12), %s22304_s11, 16, %s18018_s20, [#allocation9]  }
  0x48   : > { %s17685_s19 = scalar_lea.hbm %s22296_s3, 149760 }
  0x49   : > { %p17686_p2 = scmp.ne.s32.totalorder %s22296_s3, %s17685_s19  ;;  %p17692_p7 = scmp.lt.u32.totalorder %s17685_s19, %s22296_s3 }
  0x4b   : > { %p17688_p3 = pnand %p17686_p2, %p18030_p0 }
  0x4d   : > { %p17689_p4 = pneg %p17688_p3 }
  0x4f   : > { %p17694_p8 = pnand %p17692_p7, %p17689_p4 }
  0x51   : > { %17697 = shalt.err (!%p17694_p8)
}
  0x52   : > { %s17698_s29 = scalar_lea.vmem %s379_s22, 149760  ;;  %p17706_p6 = scmp.lt.s32.totalorder %s379_s22, %s379_s22 }
  0x53   : > { %p17699_p11 = scmp.ne.s32.totalorder %s379_s22, %s17698_s29  ;;  %p17707_p9 = scmp.lt.s32.totalorder %s17698_s29, %s17698_s29 }
  0x55   : > { %p17701_p13 = pnand %p17699_p11, %p18030_p0  ;;  %p17708_p5 = por %p17707_p9, %p17706_p6 }
  0x57   : > { %p17702_p1 = pneg %p17701_p13 }
  0x59   : > { %p17709_p10 = pnand %p17708_p5, %p17702_p1 }
  0x5b   : > { %17712 = shalt.err (!%p17709_p10)
}
  0x5c   : > { %s17850_s20 = smov 640   ;;  %s17851_s27 = smov 40  }
  0x5d   : > { %16717 = dma.hbm_to_vmem [thread:$0]  (!%p18014_p12), %s22296_s3, 149760, %s379_s22, [#allocation3], %s17850_s20, %s17850_s20, %s17851_s27  }
  0x5e   : > { %s17852_s14 = smov [#allocation7]   ;;  %s17713_s24 = scalar_lea.hbm %s22302_s9, 2048 }
  0x5f   : > { %s416_s23 = sshll.u32 %s17852_s14, 4  ;;  %p17714_p5 = scmp.ne.s32.totalorder %s22302_s9, %s17713_s24  ;;  %s417_s23 = int_to_ptr.vmem [resolvable:$true] %s416_s23 }
  0x60   : > { %p17720_p3 = scmp.lt.u32.totalorder %s17713_s24, %s22302_s9 }
  0x61   : > { %p17716_p10 = pnand %p17714_p5, %p18030_p0 }
  0x63   : > { %p17717_p2 = pneg %p17716_p10 }
  0x65   : > { %p17722_p4 = pnand %p17720_p3, %p17717_p2 }
  0x67   : > { %17725 = shalt.err (!%p17722_p4)
}
  0x68   : > { %s17726_s22 = scalar_lea.vmem %s417_s23, 2048  ;;  %p17734_p13 = scmp.lt.s32.totalorder %s417_s23, %s417_s23 }
  0x69   : > { %p17727_p7 = scmp.ne.s32.totalorder %s417_s23, %s17726_s22  ;;  %p17735_p1 = scmp.lt.s32.totalorder %s17726_s22, %s17726_s22 }
  0x6b   : > { %p17729_p8 = pnand %p17727_p7, %p18030_p0  ;;  %p17736_p6 = por %p17735_p1, %p17734_p13 }
  0x6d   : > { %p17730_p11 = pneg %p17729_p8 }
  0x6f   : > { %p17737_p9 = pnand %p17736_p6, %p17730_p11 }
  0x71   : > { %17740 = shalt.err (!%p17737_p9)
}
  0x72   : > { %s17853_s20 = smov 128   ;;  %s17854_s27 = smov 8  }
  0x73   : > { %16723 = dma.hbm_to_vmem [thread:$0]  (!%p18014_p12), %s22302_s9, 2048, %s417_s23, [#allocation6], %s17853_s20, %s17853_s20, %s17854_s27  }
  0x74   : > { %s17855_s14 = smov [#allocation10]   ;;  %s17741_s26 = scalar_lea.hbm %s22306_s13, 16 }
  0x75   : > { %s447_s15 = sshll.u32 %s17855_s14, 4  ;;  %p17742_p5 = scmp.ne.s32.totalorder %s22306_s13, %s17741_s26  ;;  %s448_s15 = int_to_ptr.vmem [resolvable:$true] %s447_s15 }
  0x76   : > { %p17748_p3 = scmp.lt.u32.totalorder %s17741_s26, %s22306_s13 }
  0x77   : > { %p17744_p10 = pnand %p17742_p5, %p18030_p0 }
  0x79   : > { %p17745_p2 = pneg %p17744_p10 }
  0x7b   : > { %p17750_p4 = pnand %p17748_p3, %p17745_p2 }
  0x7d   : > { %17753 = shalt.err (!%p17750_p4)
}
  0x7e   : > { %s17754_s23 = scalar_lea.vmem %s448_s15, 16  ;;  %s17761_s20 = scalar_lea.vmem %s448_s15, 32 }
  0x7f   : > { %p17755_p7 = scmp.ne.s32.totalorder %s448_s15, %s17754_s23  ;;  %p17762_p13 = scmp.lt.s32.totalorder %s448_s15, %s448_s15 }
  0x80   : > { %p17763_p1 = scmp.lt.s32.totalorder %s17761_s20, %s17754_s23 }
  0x81   : > { %p17757_p8 = pnand %p17755_p7, %p18030_p0 }
  0x82   : > { %p17764_p6 = por %p17763_p1, %p17762_p13 }
  0x83   : > { %p17758_p11 = pneg %p17757_p8 }
  0x85   : > { %p17765_p9 = pnand %p17764_p6, %p17758_p11 }
  0x87   : > { %17768 = shalt.err (!%p17765_p9)
}
  0x88   : > { %16729 = dma.hbm_to_vmem [thread:$0]  (!%p18014_p12), %s22306_s13, 16, %s448_s15, [#allocation9]  }
  0x89   : > { %p22384_p5 = scmp.ne.s32.totalorder %s22381_s25, 0 }
  0x8b   : > { %467 = sbr.rel (%p22384_p5) target bundleno = 4333 (0x10ed), region = 76 }
  0x92   : > { %p22385_p10 = scmp.eq.s32.totalorder %s17976_s17, 0 }
  0x94   : > { %17814 = dma.done.wait (%p22385_p10), [#allocation3], 149760   ;;  %p22386_p0 = pmov %p22385_p10 }
  0x96   : > { %17816 = vsyncadd (%p22386_p0), [#allocation3], 4294817536  ;;  %p22387_p2 = pmov %p22386_p0 }
  0x97   : > { %p22388_p3 = pmov %p22386_p0 }
  0x98   : > { %17818 = dma.done.wait (%p22387_p2), [#allocation6], 17664  }
  0x99   : > { %17820 = vsyncadd (%p22388_p3), [#allocation6], 4294949632  ;;  %p22389_p4 = pmov %p22386_p0 }
  0x9a   : > { %p22390_p12 = pmov %p22386_p0 }
  0x9b   : > { %17822 = dma.done.wait (%p22389_p4), [#allocation9], 32  }
  0x9c   : > { %17824 = vsyncadd (%p22390_p12), [#allocation9], 4294967264  ;;  %p527_p7 = scmp.lt.s32.totalorder %s17976_s17, 1  ;;  %v539_v0 = vlaneseq  ;;  %v17856_v1 = vmov 0   ;;  %s17857_s15 = smov 126   ;;  %v22331_v16 = vmov 0.0  }
  0x9d   : > { %17011 = vset.pattern.permute.xlu0 %v17856_v1  ;;  %17412 = vset.pattern.permute.xlu1 %v17856_v1  ;;  %s17858_s19 = smov 127   ;;  %s17859_s24 = smov 94   ;;  %v535_v33 = vld [vmem:[%s22295_s2] sm:$0xff]  ;;  %v536_v41 = vld [vmem:[%s22295_s2 + $0x8] sm:$0xff]  ;;  %vm22329_vm0 = vcmask 1039360   ;;  %vm22325_vm1 = vcmask 1031168  }
  0x9e   : > { %s528_s16 = scalar_select %p527_p7, %s17976_s17, 1  ;;  %v18146_v2 = vshrl.u32 %v539_v0, 7  ;;  %1330 = vmatprep.mubr.f32.mxu1 %v22331_v16  ;;  %1324 = vmatprep.mubr.f32.mxu0 %v22331_v16  ;;  %vm22326_vm2 = vcmask 1040384   ;;  %vm22322_vm3 = vcmask 1041408   ;;  %vm770_vm4 = vcmask 769024  }
  0x9f   : > { %s17860_s26 = smov 93   ;;  %s17861_s18 = smov 92   ;;  %vm1133_vm5 = vcmask 1042432   ;;  %vm833_vm6 = vcmask 760832   ;;  %vm896_vm7 = vcmask 752640   ;;  %vm1149_vm8 = vcmask 1043456  }
  0xa0   : > { %s12677_s25 = sshll.u32 %s528_s16, 4  ;;  %v545_v3 = vsub.s32 1, %v18146_v2  ;;  %v549_v4 = vsub.s32 2, %v18146_v2  ;;  %v541_v5 = vsub.s32 0, %v18146_v2  ;;  %v553_v6 = vsub.s32 3, %v18146_v2  ;;  %s17862_s21 = smov 60  }
  0xa1   : > { %s18155_s14 = scalar_lea.vmem %s22293_s0, %s12677_s25  ;;  %v557_v14 = vsub.s32 4, %v18146_v2  ;;  %s17863_s29 = smov 59   ;;  %v561_v17 = vsub.s32 5, %v18146_v2  ;;  %v565_v18 = vsub.s32 6, %v18146_v2  ;;  %v569_v22 = vsub.s32 7, %v18146_v2 }
  0xa2   : > { %v531_v7 = vld [vmem:[%s18155_s14] sm:$0xff]  ;;  %s17865_s22 = smov 58   ;;  %v532_v23 = vld [vmem:[%s18155_s14 + $0x8] sm:$0xff]  ;;  %vm1165_vm9 = vcmask 1044480   ;;  %vm959_vm10 = vcmask 490496   ;;  %vm1181_vm11 = vcmask 1045504  }
  0xa3   : > { %v18160_v8 = vrot.slane %v531_v7, %v545_v3  ;;  %v18164_v9 = vrot.slane %v531_v7, %v549_v4  ;;  %v18166_v10 = vrot.slane %v531_v7, %v541_v5  ;;  %v18170_v11 = vrot.slane %v531_v7, %v553_v6  ;;  %s17871_s23 = smov 90   ;;  %s13131_s20 = sshll.u32 %s17976_s17, 4 }
  0xa4   : > { %v18185_v15 = vrot.slane %v531_v7, %v557_v14  ;;  %v18213_v19 = vrot.slane %v531_v7, %v561_v17  ;;  %v18215_v20 = vrot.slane %v531_v7, %v565_v18  ;;  %v18233_v24 = vrot.slane %v531_v7, %v569_v22  ;;  %s22574_s16 = sld [smem:[#allocation27_spill]]  ;;  %s17879_s17 = smov [#allocation11]  }
  0xa5   : > { %v16821_v12 = vpack.i.bf16 %v18164_v9, %v18160_v8  ;;  %v16826_v13 = vpack.i.bf16 %v18170_v11, %v18166_v10  ;;  %v18235_v25 = vrot.slane %v532_v23, %v541_v5  ;;  %v18247_v27 = vrot.slane %v532_v23, %v545_v3  ;;  %s17773_s12 = sshll.u32 %s17879_s17, 4  ;;  %s17774_s12 = int_to_ptr.vmem [resolvable:$false] %s17773_s12 }
  0xa6   : > { %v16896_v21 = vpack.i.bf16 %v18215_v20, %v18213_v19  ;;  %v18253_v28 = vrot.slane %v532_v23, %v549_v4  ;;  %v18267_v30 = vrot.slane %v532_v23, %v557_v14  ;;  %v18271_v31 = vrot.slane %v532_v23, %v553_v6 }
  0xa7   : > { %16822 = vrot.lane.b32.xlu1 %v16821_v12, %s17857_s15  ;;  %16812 = vrot.lane.b32.xlu0 %v16821_v12, %s17858_s19  ;;  %v16931_v26 = vpack.i.bf16 %v18235_v25, %v18233_v24  ;;  %v18283_v34 = vrot.slane %v532_v23, %v561_v17  ;;  %v18286_v35 = vrot.slane %v532_v23, %v565_v18  ;;  %vm22330_vm12 = vcmask 482304  }
  0xa8   : > { %v16971_v29 = vpack.i.bf16 %v18253_v28, %v18247_v27  ;;  %v17012_v32 = vpack.i.bf16 %v18267_v30, %v18271_v31  ;;  %vm22328_vm13 = vcmask 474112   ;;  %vm22327_vm14 = vcmask 1046528  }
  0xa9   : > { %v17052_v36 = vpack.i.bf16 %v18286_v35, %v18283_v34  ;;  %vm22323_vm15 = vmmov 1  }
  0xaa   : > { %s22575_s25 = smov %s22574_s16 }
  0xab   : > { %16827 = vrot.lane.b32.xlu1 %v16826_v13, %s17857_s15  ;;  %16817 = vrot.lane.b32.xlu0 %v16826_v13, %s17858_s19 }
  0xaf   : > { %16837 = vrot.lane.b32.xlu1 %v16826_v13, %s17859_s24  ;;  %16832 = vrot.lane.b32.xlu0 %v16821_v12, %s17859_s24 }
  0xb3   : > { %622 = vrot.lane.b32.xlu1 %v18185_v15, %s17858_s19  ;;  %16842 = vrot.lane.b32.xlu0 %v16821_v12, %s17860_s26 }
  0xb7   : > { %16852 = vrot.lane.b32.xlu1 %v16821_v12, %s17861_s18  ;;  %16847 = vrot.lane.b32.xlu0 %v16826_v13, %s17860_s26 }
  0xbb   : > { %16857 = vrot.lane.b32.xlu1 %v16826_v13, %s17861_s18  ;;  %682 = vrot.lane.b32.xlu0 %v18185_v15, %s17857_s15 }
  0xbf   : > { %746 = vrot.lane.b32.xlu1 %v18185_v15, %s17859_s24  ;;  %16862 = vrot.lane.b32.xlu0 %v16821_v12, %s17862_s21 }
  0xc3   : > { %16872 = vrot.lane.b32.xlu1 %v16821_v12, %s17863_s29  ;;  %16867 = vrot.lane.b32.xlu0 %v16826_v13, %s17862_s21 }
  0xc7   : > { %16877 = vrot.lane.b32.xlu1 %v16826_v13, %s17863_s29  ;;  %809 = vrot.lane.b32.xlu0 %v18185_v15, %s17860_s26 }
  0xcb   : > { %872 = vrot.lane.b32.xlu1 %v18185_v15, %s17861_s18  ;;  %16882 = vrot.lane.b32.xlu0 %v16821_v12, %s17865_s22 }
  0xcf   : > { %935 = vrot.lane.b32.xlu1 %v18185_v15, %s17862_s21  ;;  %16887 = vrot.lane.b32.xlu0 %v16826_v13, %s17865_s22 }
  0xd3   : > { %1061 = vrot.lane.b32.xlu1 %v18185_v15, %s17865_s22  ;;  %998 = vrot.lane.b32.xlu0 %v18185_v15, %s17863_s29 }
  0xd7   : > { %16897 = vrot.lane.b32.xlu1 %v16896_v21, %s17857_s15  ;;  %16892 = vrot.lane.b32.xlu0 %v16896_v21, %s17858_s19 }
  0xdb   : > { %16907 = vrot.lane.b32.xlu1 %v16896_v21, %s17860_s26  ;;  %16902 = vrot.lane.b32.xlu0 %v16896_v21, %s17859_s24 }
  0xdf   : > { %16917 = vrot.lane.b32.xlu1 %v16896_v21, %s17862_s21  ;;  %16912 = vrot.lane.b32.xlu0 %v16896_v21, %s17861_s18 }
  0xe3   : > { %16927 = vrot.lane.b32.xlu1 %v16896_v21, %s17865_s22  ;;  %16922 = vrot.lane.b32.xlu0 %v16896_v21, %s17863_s29 }
  0xe7   : > { %16932 = vrot.lane.b32.xlu0 %v16931_v26, %s17858_s19  ;;  %16937 = vrot.lane.b32.xlu1 %v16931_v26, %s17857_s15 }
  0xeb   : > { %16942 = vrot.lane.b32.xlu0 %v16931_v26, %s17859_s24  ;;  %16947 = vrot.lane.b32.xlu1 %v16931_v26, %s17860_s26 }
  0xef   : > { %16952 = vrot.lane.b32.xlu0 %v16931_v26, %s17861_s18  ;;  %16957 = vrot.lane.b32.xlu1 %v16931_v26, %s17862_s21 }
  0xf3   : > { %16962 = vrot.lane.b32.xlu0 %v16931_v26, %s17863_s29  ;;  %16967 = vrot.lane.b32.xlu1 %v16931_v26, %s17865_s22 }
  0xf7   : > { %16972 = vrot.lane.b32.xlu0 %v16971_v29, %s17858_s19  ;;  %16977 = vrot.lane.b32.xlu1 %v16971_v29, %s17857_s15 }
  0xfb   : > { %16982 = vrot.lane.b32.xlu0 %v16971_v29, %s17859_s24  ;;  %16987 = vrot.lane.b32.xlu1 %v16971_v29, %s17860_s26 }
  0xff   : > { %16992 = vrot.lane.b32.xlu0 %v16971_v29, %s17861_s18  ;;  %16997 = vrot.lane.b32.xlu1 %v16971_v29, %s17862_s21 }
 0x103   : > { %17002 = vrot.lane.b32.xlu0 %v16971_v29, %s17863_s29  ;;  %17007 = vrot.lane.b32.xlu1 %v16971_v29, %s17865_s22 }
 0x107   : > { %1215 = vperm.xlu0 %17011, %v535_v33   ;;  %17013 = vrot.lane.b32.xlu1 %v17012_v32, %s17858_s19 }
 0x10b   : > { %17023 = vrot.lane.b32.xlu0 %v17012_v32, %s17859_s24  ;;  %17018 = vrot.lane.b32.xlu1 %v17012_v32, %s17857_s15 }
 0x10f   : > { %17033 = vrot.lane.b32.xlu0 %v17012_v32, %s17861_s18  ;;  %17028 = vrot.lane.b32.xlu1 %v17012_v32, %s17860_s26 }
 0x113   : > { %17043 = vrot.lane.b32.xlu0 %v17012_v32, %s17863_s29  ;;  %17038 = vrot.lane.b32.xlu1 %v17012_v32, %s17862_s21 }
 0x117   : > { %17053 = vrot.lane.b32.xlu0 %v17052_v36, %s17858_s19  ;;  %17048 = vrot.lane.b32.xlu1 %v17012_v32, %s17865_s22 }
 0x119   : > { %v16823_v37 = vpop.permute.xlu1 %16822  ;;  %v16813_v38 = vpop.permute.xlu0 %16812 }
 0x11a   : > { %v16815_v48 = vunpack.i.h.bf16 %v16813_v38  ;;  %v16814_v49 = vunpack.i.l.bf16 %v16813_v38  ;;  %v16825_v53 = vunpack.i.h.bf16 %v16823_v37  ;;  %v16824_v54 = vunpack.i.l.bf16 %v16823_v37 }
 0x11b   : > { %17063 = vrot.lane.b32.xlu0 %v17052_v36, %s17859_s24  ;;  %17058 = vrot.lane.b32.xlu1 %v17052_v36, %s17857_s15 }
 0x11c   : > { %v646_v56 = vsel %vm22329_vm0, %v16814_v49, %v16815_v48  ;;  %v706_v0 = vsel %vm22325_vm1, %v16824_v54, %v16825_v53 }
 0x11d   : > { %v18297_v39 = vpop.permute.xlu1 %16827  ;;  %v18299_v40 = vpop.permute.xlu0 %16817  ;;  %v1103_v1 = vsel %vm22326_vm2, %v18160_v8, %v646_v56 }
 0x11e   : > { %v16819_v50 = vunpack.i.l.bf16 %v18299_v40  ;;  %v16820_v55 = vunpack.i.h.bf16 %v18299_v40  ;;  %v16829_v57 = vunpack.i.l.bf16 %v18297_v39  ;;  %v16830_v58 = vunpack.i.h.bf16 %v18297_v39 }
 0x11f   : > { %17073 = vrot.lane.b32.xlu0 %v17052_v36, %s17861_s18  ;;  %17068 = vrot.lane.b32.xlu1 %v17052_v36, %s17860_s26  ;;  %v1119_v21 = vsel %vm22322_vm3, %v1103_v1, %v706_v0 }
 0x120   : > { %v645_v59 = vsel %vm22329_vm0, %v16819_v50, %v16814_v49  ;;  %v647_v3 = vsel %vm22329_vm0, %v16815_v48, %v16820_v55  ;;  %v705_v4 = vsel %vm22325_vm1, %v16829_v57, %v16824_v54  ;;  %v707_v12 = vsel %vm22325_vm1, %v16825_v53, %v16830_v58 }
 0x121   : > { %v18306_v42 = vpop.permute.xlu1 %16837  ;;  %v16833_v43 = vpop.permute.xlu0 %16832  ;;  %v1102_v5 = vsel %vm22326_vm2, %v18166_v10, %v645_v59  ;;  %v1104_v8 = vsel %vm22326_vm2, %v18164_v9, %v647_v3 }
 0x122   : > { %v16839_v60 = vunpack.i.l.bf16 %v18306_v42  ;;  %v16834_v61 = vunpack.i.l.bf16 %v16833_v43  ;;  %v16840_v6 = vunpack.i.h.bf16 %v18306_v42  ;;  %v16835_v7 = vunpack.i.h.bf16 %v16833_v43 }
 0x123   : > { %1220 = vperm.xlu0 %17011, %v536_v41   ;;  %17078 = vrot.lane.b32.xlu1 %v17052_v36, %s17862_s21  ;;  %v1118_v23 = vsel %vm22322_vm3, %v1102_v5, %v705_v4  ;;  %v1120_v37 = vsel %vm22322_vm3, %v1104_v8, %v707_v12 }
 0x124   : > { %v771_v13 = vsel %vm770_vm4, %v16839_v60, %v16834_v61  ;;  %v773_v29 = vsel %vm770_vm4, %v16835_v7, %v16840_v6  ;;  %v772_v32 = vsel %vm770_vm4, %v16834_v61, %v16835_v7 }
 0x125   : > { %v18309_v44 = vpop.permute.xlu1 %622  ;;  %v18311_v45 = vpop.permute.xlu0 %16842  ;;  %v1134_v38 = vsel %vm1133_vm5, %v1118_v23, %v771_v13  ;;  %v1135_v48 = vsel %vm1133_vm5, %v1119_v21, %v772_v32  ;;  %v1136_v49 = vsel %vm1133_vm5, %v1120_v37, %v773_v29  ;;  %v2288_v29 = vld [vmem:[#allocation2 + $0xe0] sm:$0xff] }
 0x126   : > { %v16845_v14 = vunpack.i.h.bf16 %v18311_v45  ;;  %v16844_v17 = vunpack.i.l.bf16 %v18311_v45  ;;  %v648_v41 = vsel %vm22329_vm0, %v16820_v55, %v18309_v44 }
 0x127   : > { %17083 = vrot.lane.b32.xlu1 %v17052_v36, %s17863_s29  ;;  %17088 = vrot.lane.b32.xlu0 %v17052_v36, %s17865_s22  ;;  %v1105_v59 = vsel %vm22326_vm2, %v18170_v11, %v648_v41 }
 0x128   : > { %v835_v42 = vsel %vm833_vm6, %v16844_v17, %v16845_v14 }
 0x129   : > { %v18315_v46 = vpop.permute.xlu1 %16852  ;;  %v18317_v47 = vpop.permute.xlu0 %16847 }
 0x12a   : > { %v16850_v26 = vunpack.i.h.bf16 %v18317_v47  ;;  %v16849_v9 = vunpack.i.l.bf16 %v18317_v47  ;;  %v16855_v33 = vunpack.i.h.bf16 %v18315_v46  ;;  %v16854_v36 = vunpack.i.l.bf16 %v18315_v46 }
 0x12c   : > { %v834_v50 = vsel %vm833_vm6, %v16849_v9, %v16844_v17  ;;  %v836_v53 = vsel %vm833_vm6, %v16845_v14, %v16850_v26  ;;  %v898_v54 = vsel %vm896_vm7, %v16854_v36, %v16855_v33 }
 0x12d   : > { %v18320_v51 = vpop.permute.xlu1 %16857  ;;  %v18322_v52 = vpop.permute.xlu0 %682  ;;  %v1150_v0 = vsel %vm1149_vm8, %v1134_v38, %v834_v50  ;;  %v1152_v1 = vsel %vm1149_vm8, %v1136_v49, %v836_v53 }
 0x12e   : > { %v16860_v55 = vunpack.i.h.bf16 %v18320_v51  ;;  %v16859_v56 = vunpack.i.l.bf16 %v18320_v51  ;;  %v708_v57 = vsel %vm22325_vm1, %v16830_v58, %v18322_v52 }
 0x12f   : > { %v1121_v5 = vsel %vm22322_vm3, %v1105_v59, %v708_v57  ;;  %vm18406_vm3 = vmpackc.low %vm22326_vm2, %vm22323_vm15  ;;  %vm1223_vm15 = vcmask 72704  }
 0x130   : > { %v897_v8 = vsel %vm896_vm7, %v16859_v56, %v16854_v36  ;;  %v899_v13 = vsel %vm896_vm7, %v16855_v33, %v16860_v55 }
 0x131   : > { %v18330_v62 = vpop.permute.xlu1 %746  ;;  %v18332_v63 = vpop.permute.xlu0 %16862 }
 0x132   : > { %v16865_v39 = vunpack.i.h.bf16 %v18332_v63  ;;  %v16864_v40 = vunpack.i.l.bf16 %v18332_v63  ;;  %v1151_v63 = vsel %vm1149_vm8, %v1135_v48, %v835_v42  ;;  %v774_v14 = vsel %vm770_vm4, %v16840_v6, %v18330_v62 }
 0x133   : > { %v1167_v12 = vsel %vm1165_vm9, %v1151_v63, %v898_v54  ;;  %v1166_v42 = vsel %vm1165_vm9, %v1150_v0, %v897_v8  ;;  %v1137_v48 = vsel %vm1133_vm5, %v1121_v5, %v774_v14  ;;  %v1168_v54 = vsel %vm1165_vm9, %v1152_v1, %v899_v13  ;;  %v18459_v5 = vld [vmem:[%s22294_s1] sm:$0xff] }
 0x134   : > { %v961_v61 = vsel %vm959_vm10, %v16864_v40, %v16865_v39 }
 0x135   : > { %v18348_v18 = vpop.permute.xlu1 %16872  ;;  %v18350_v10 = vpop.permute.xlu0 %16867  ;;  %v1183_v17 = vsel %vm1181_vm11, %v1167_v12, %v961_v61 }
 0x136   : > { %v16875_v43 = vunpack.i.h.bf16 %v18348_v18  ;;  %v16874_v45 = vunpack.i.l.bf16 %v18348_v18  ;;  %v16869_v60 = vunpack.i.l.bf16 %v18350_v10  ;;  %v16870_v18 = vunpack.i.h.bf16 %v18350_v10 }
 0x138   : > { %v1024_v58 = vsel %vm22330_vm12, %v16874_v45, %v16875_v43  ;;  %v960_v21 = vsel %vm959_vm10, %v16869_v60, %v16864_v40 }
 0x139   : > { %v18369_v47 = vpop.permute.xlu1 %16877  ;;  %v18371_v46 = vpop.permute.xlu0 %809  ;;  %v1199_v9 = vsel %vm22327_vm14, %v1183_v17, %v1024_v58 }
 0x13a   : > { %v16879_v3 = vunpack.i.l.bf16 %v18369_v47  ;;  %v16880_v32 = vunpack.i.h.bf16 %v18369_v47  ;;  %v837_v6 = vsel %vm833_vm6, %v16850_v26, %v18371_v46  ;;  %v1182_v26 = vsel %vm1181_vm11, %v1166_v42, %v960_v21 }
 0x13b   : > { %v1153_v49 = vsel %vm1149_vm8, %v1137_v48, %v837_v6 }
 0x13c   : > { %v1023_v37 = vsel %vm22330_vm12, %v16879_v3, %v16874_v45  ;;  %v962_v45 = vsel %vm959_vm10, %v16865_v39, %v16870_v18  ;;  %v18453_v3 = vld [vmem:[%s22294_s1 + $0x8] sm:$0xff] }
 0x13d   : > { %v18390_v4 = vpop.permute.xlu1 %872  ;;  %v16883_v51 = vpop.permute.xlu0 %16882  ;;  %v1198_v53 = vsel %vm22327_vm14, %v1182_v26, %v1023_v37  ;;  %v1184_v1 = vsel %vm1181_vm11, %v1168_v54, %v962_v45 }
 0x13e   : > { %v16885_v11 = vunpack.i.h.bf16 %v16883_v51  ;;  %v16884_v7 = vunpack.i.l.bf16 %v16883_v51  ;;  %v900_v38 = vsel %vm896_vm7, %v16860_v55, %v18390_v4  ;;  %v1025_v55 = vsel %vm22330_vm12, %v16875_v43, %v16880_v32 }
 0x13f   : > { %v1169_v56 = vsel %vm1165_vm9, %v1153_v49, %v900_v38  ;;  %v1200_v51 = vsel %vm22327_vm14, %v1184_v1, %v1025_v55 }
 0x140   : > { %v1087_v23 = vsel %vm22328_vm13, %v16884_v7, %v16885_v11 }
 0x141   : > { %v18413_v33 = vpop.permute.xlu1 %935  ;;  %v16888_v10 = vpop.permute.xlu0 %16887  ;;  %v14590_v36 = vpack.c.bf16 %v1087_v23, %v1199_v9 }
 0x142   : > { %v16890_v40 = vunpack.i.h.bf16 %v16888_v10  ;;  %v16889_v41 = vunpack.i.l.bf16 %v16888_v10  ;;  %v963_v47 = vsel %vm959_vm10, %v16870_v18, %v18413_v33 }
 0x143   : > { %14592 = vmatprep.subr.msk.bf16.mxu0 %vm18406_vm3, %v14590_v36  ;;  %16594 = vmatprep.subr.msk.bf16.mxu1 %vm18406_vm3, %v14590_v36  ;;  %v1185_v61 = vsel %vm1181_vm11, %v1169_v56, %v963_v47 }
 0x144   : > { %v1086_v50 = vsel %vm22328_vm13, %v16889_v41, %v16884_v7  ;;  %v1088_v39 = vsel %vm22328_vm13, %v16885_v11, %v16890_v40 }
 0x145   : > { %v18434_v57 = vpop.permute.xlu1 %1061  ;;  %v18436_v59 = vpop.permute.xlu0 %998  ;;  %v14593_v60 = vpack.c.bf16 %v1086_v50, %v1198_v53  ;;  %v14599_v11 = vpack.c.bf16 %v1088_v39, %v1200_v51 }
 0x146   : > { %v1089_v63 = vsel %vm22328_vm13, %v16890_v40, %v18434_v57  ;;  %v1026_v0 = vsel %vm22330_vm12, %v16880_v32, %v18436_v59 }
 0x147   : > { %v1201_v43 = vsel %vm22327_vm14, %v1185_v61, %v1026_v0  ;;  %14595 = vmatpush1.bf16.msk.msra.mxu0 %vm18406_vm3, %v14593_v60  ;;  %16595 = vmatpush1.bf16.msk.msra.mxu1 %vm18406_vm3, %v14593_v60 }
 0x148   : > { %v14596_v58 = vpack.c.bf16 %v1089_v63, %v1201_v43 }
 0x149   : > { %v18461_v7 = vpop.permute.xlu1 %16897  ;;  %v18463_v12 = vpop.permute.xlu0 %16892 }
 0x14a   : > { %v16900_v8 = vunpack.i.h.bf16 %v18461_v7  ;;  %v16899_v13 = vunpack.i.l.bf16 %v18461_v7  ;;  %v16895_v14 = vunpack.i.h.bf16 %v18463_v12  ;;  %v16894_v17 = vunpack.i.l.bf16 %v18463_v12  ;;  %12681 = vmatmul.mubr.msk.f32.vlgmr.msra.gmra.mrb[0].mxu1 %vm1223_vm15, %v18453_v3  ;;  %14598 = vmatprep.subr.msk.bf16.mxu1 %vm18406_vm3, %v14596_v58 }
 0x14b   : > { %14601 = vmatpush1.bf16.msk.msra.mxu1 %vm18406_vm3, %v14599_v11  ;;  %12680 = vmatmul.mubr.msk.f32.vlgmr.msra.gmra.mrb[0].mxu0 %vm1223_vm15, %v18459_v5 }
 0x14c   : > { %v709_v18 = vsel %vm22325_vm1, %v18322_v52, %v16899_v13  ;;  %v710_v21 = vsel %vm22325_vm1, %v16899_v13, %v16900_v8  ;;  %v649_v23 = vsel %vm22329_vm0, %v18309_v44, %v16894_v17  ;;  %v650_v9 = vsel %vm22329_vm0, %v16894_v17, %v16895_v14  ;;  %1401 = vmatprep.mubr.f32.mxu1 %v22331_v16 }
 0x14d   : > { %v1106_v32 = vsel %vm22326_vm2, %v18185_v15, %v649_v23  ;;  %v1107_v6 = vsel %vm22326_vm2, %v18213_v19, %v650_v9  ;;  %v18492_v52 = vpop.permute.xlu1 %16907  ;;  %v18494_v10 = vpop.permute.xlu0 %16902  ;;  %1478 = vmatprep.mubr.f32.mxu0 %v22331_v16  ;;  %vm22393_vm1 = vcmask 1041408  }
 0x14e   : > { %v16910_v44 = vunpack.i.h.bf16 %v18492_v52  ;;  %v16909_v36 = vunpack.i.l.bf16 %v18492_v52  ;;  %v16905_v37 = vunpack.i.h.bf16 %v18494_v10  ;;  %v16904_v38 = vunpack.i.l.bf16 %v18494_v10  ;;  %12684 = vmatmul.mubr.msk.f32.vlgmr.msra.gmra.mrb[2].mxu1 %vm1223_vm15, %v18459_v5  ;;  %vm22394_vm2 = vmmov %vm22393_vm1 }
 0x14f   : > { %v1122_v15 = vsel %vm22393_vm1, %v1106_v32, %v709_v18  ;;  %v1123_v19 = vsel %vm22394_vm2, %v1107_v6, %v710_v21  ;;  %1407 = vmatprep.mubr.f32.mxu1 %v22331_v16  ;;  %vm22395_vm1 = vcmask 1040384  }
 0x150   : > { %v838_v40 = vsel %vm833_vm6, %v18371_v46, %v16909_v36  ;;  %v839_v41 = vsel %vm833_vm6, %v16909_v36, %v16910_v44  ;;  %v775_v42 = vsel %vm770_vm4, %v18330_v62, %v16904_v38  ;;  %v776_v48 = vsel %vm770_vm4, %v16904_v38, %v16905_v37  ;;  %vm22396_vm2 = vmmov %vm22395_vm1 }
 0x151   : > { %v1138_v47 = vsel %vm1133_vm5, %v1122_v15, %v775_v42  ;;  %v1139_v26 = vsel %vm1133_vm5, %v1123_v19, %v776_v48  ;;  %v18518_v45 = vpop.permute.xlu1 %16917  ;;  %v18520_v49 = vpop.permute.xlu0 %16912 }
 0x152   : > { %v16920_v46 = vunpack.i.h.bf16 %v18518_v45  ;;  %v16919_v50 = vunpack.i.l.bf16 %v18518_v45  ;;  %v16915_v53 = vunpack.i.h.bf16 %v18520_v49  ;;  %v16914_v62 = vunpack.i.l.bf16 %v18520_v49  ;;  %12685 = vmatmul.mubr.msk.f32.gmra.mrb[4].mxu1 %vm1223_vm15, %v18453_v3 }
 0x153   : > { %v1154_v54 = vsel %vm1149_vm8, %v1138_v47, %v838_v40  ;;  %v1155_v55 = vsel %vm1149_vm8, %v1139_v26, %v839_v41  ;;  %1555 = vmatprep.mubr.f32.mxu1 %v22331_v16 }
 0x154   : > { %v964_v56 = vsel %vm959_vm10, %v18413_v33, %v16919_v50  ;;  %v965_v60 = vsel %vm959_vm10, %v16919_v50, %v16920_v46  ;;  %v901_v61 = vsel %vm896_vm7, %v18390_v4, %v16914_v62  ;;  %v902_v39 = vsel %vm896_vm7, %v16914_v62, %v16915_v53 }
 0x155   : > { %v1170_v63 = vsel %vm1165_vm9, %v1154_v54, %v901_v61  ;;  %v1171_v0 = vsel %vm1165_vm9, %v1155_v55, %v902_v39  ;;  %v18543_v1 = vpop.permute.xlu1 %16927  ;;  %v18545_v43 = vpop.permute.xlu0 %16922 }
 0x156   : > { %v16930_v33 = vunpack.i.h.bf16 %v18543_v1  ;;  %v16929_v51 = vunpack.i.l.bf16 %v18543_v1  ;;  %v16925_v58 = vunpack.i.h.bf16 %v18545_v43  ;;  %v16924_v4 = vunpack.i.l.bf16 %v18545_v43 }
 0x157   : > { %v1186_v11 = vsel %vm1181_vm11, %v1170_v63, %v964_v56  ;;  %v1187_v13 = vsel %vm1181_vm11, %v1171_v0, %v965_v60 }
 0x158   : > { %v1090_v17 = vsel %vm22328_vm13, %v18434_v57, %v16929_v51  ;;  %v1091_v18 = vsel %vm22328_vm13, %v16929_v51, %v16930_v33  ;;  %v1027_v21 = vsel %vm22330_vm12, %v18436_v59, %v16924_v4  ;;  %v1028_v23 = vsel %vm22330_vm12, %v16924_v4, %v16925_v58 }
 0x159   : > { %v1202_v9 = vsel %vm22327_vm14, %v1186_v11, %v1027_v21  ;;  %v18564_v32 = vpop.permute.xlu0 %16932  ;;  %v18566_v6 = vpop.permute.xlu1 %16937  ;;  %v1203_v36 = vsel %vm22327_vm14, %v1187_v13, %v1028_v23  ;;  %vm22397_vm14 = vcmask 1031168  }
 0x15a   : > { %v14605_v57 = vpack.c.bf16 %v1090_v17, %v1202_v9  ;;  %v16935_v38 = vunpack.i.h.bf16 %v18564_v32  ;;  %v16934_v15 = vunpack.i.l.bf16 %v18564_v32  ;;  %v16940_v19 = vunpack.i.h.bf16 %v18566_v6  ;;  %vm22398_vm13 = vmmov %vm22397_vm14 }
 0x15b   : > { %v16939_v59 = vunpack.i.l.bf16 %v18566_v6  ;;  %v14602_v40 = vpack.c.bf16 %v1091_v18, %v1203_v36 }
 0x15c   : > { %v651_v41 = vsel %vm22329_vm0, %v16895_v14, %v16934_v15  ;;  %v652_v42 = vsel %vm22329_vm0, %v16934_v15, %v16935_v38  ;;  %vm22399_vm0 = vcmask 1041408  }
 0x15d   : > { %v1108_v48 = vsel %vm22395_vm1, %v18215_v20, %v651_v41  ;;  %v1109_v47 = vsel %vm22396_vm2, %v18233_v24, %v652_v42  ;;  %v711_v26 = vsel %vm22397_vm14, %v16900_v8, %v16939_v59  ;;  %v712_v12 = vsel %vm22398_vm13, %v16939_v59, %v16940_v19  ;;  %14604 = vmatprep.subr.msk.bf16.mxu0 %vm18406_vm3, %v14602_v40  ;;  %v18591_v14 = vpop.permute.xlu0 %16942  ;;  %v18593_v50 = vpop.permute.xlu1 %16947  ;;  %vm22400_vm1 = vmmov %vm22399_vm0 }
 0x15e   : > { %v1124_v20 = vsel %vm22399_vm0, %v1108_v48, %v711_v26  ;;  %v1125_v62 = vsel %vm22400_vm1, %v1109_v47, %v712_v12  ;;  %v16945_v24 = vunpack.i.h.bf16 %v18591_v14  ;;  %v16944_v7 = vunpack.i.l.bf16 %v18591_v14  ;;  %14607 = vmatpush1.bf16.msk.msra.mxu0 %vm18406_vm3, %v14605_v57 }
 0x15f   : > { %v16950_v8 = vunpack.i.h.bf16 %v18593_v50  ;;  %v16949_v54 = vunpack.i.l.bf16 %v18593_v50  ;;  %vm22401_vm0 = vcmask 474112   ;;  %vm22403_vm14 = vcmask 1046528  }
 0x160   : > { %v777_v55 = vsel %vm770_vm4, %v16905_v37, %v16944_v7  ;;  %v778_v56 = vsel %vm770_vm4, %v16944_v7, %v16945_v24  ;;  %vm22402_vm13 = vmmov %vm22401_vm0  ;;  %vm22405_vm1 = vcmask 1039360  }
 0x161   : > { %v1140_v60 = vsel %vm1133_vm5, %v1124_v20, %v777_v55  ;;  %v1141_v61 = vsel %vm1133_vm5, %v1125_v62, %v778_v56  ;;  %v840_v39 = vsel %vm833_vm6, %v16910_v44, %v16949_v54  ;;  %v841_v63 = vsel %vm833_vm6, %v16949_v54, %v16950_v8  ;;  %12688 = vmatmul.mubr.msk.f32.vlgmr.msra.gmra.mrb[2].mxu0 %vm1223_vm15, %v18459_v5  ;;  %v18619_v10 = vpop.permute.xlu0 %16952  ;;  %v18621_v37 = vpop.permute.xlu1 %16957  ;;  %vm22404_vm2 = vmmov %vm22403_vm14 }
 0x162   : > { %v1156_v0 = vsel %vm1149_vm8, %v1140_v60, %v840_v39  ;;  %v1157_v51 = vsel %vm1149_vm8, %v1141_v61, %v841_v63  ;;  %v16955_v4 = vunpack.i.h.bf16 %v18619_v10  ;;  %v16954_v52 = vunpack.i.l.bf16 %v18619_v10  ;;  %1484 = vmatprep.mubr.f32.mxu0 %v22331_v16 }
 0x163   : > { %v16960_v44 = vunpack.i.h.bf16 %v18621_v37  ;;  %v16959_v11 = vunpack.i.l.bf16 %v18621_v37 }
 0x164   : > { %v903_v13 = vsel %vm896_vm7, %v16915_v53, %v16954_v52  ;;  %v904_v17 = vsel %vm896_vm7, %v16954_v52, %v16955_v4 }
 0x165   : > { %v1172_v18 = vsel %vm1165_vm9, %v1156_v0, %v903_v13  ;;  %v1173_v21 = vsel %vm1165_vm9, %v1157_v51, %v904_v17  ;;  %v966_v23 = vsel %vm959_vm10, %v16920_v46, %v16959_v11  ;;  %v967_v9 = vsel %vm959_vm10, %v16959_v11, %v16960_v44  ;;  %12689 = vmatmul.mubr.msk.f32.gmra.mrb[4].mxu0 %vm1223_vm15, %v18453_v3  ;;  %v18646_v49 = vpop.permute.xlu0 %16962  ;;  %v18648_v53 = vpop.permute.xlu1 %16967 }
 0x166   : > { %v1188_v36 = vsel %vm1181_vm11, %v1172_v18, %v966_v23  ;;  %v1189_v57 = vsel %vm1181_vm11, %v1173_v21, %v967_v9  ;;  %v16965_v15 = vunpack.i.h.bf16 %v18646_v49  ;;  %v16964_v45 = vunpack.i.l.bf16 %v18646_v49  ;;  %1632 = vmatprep.mubr.f32.mxu0 %v22331_v16 }
 0x167   : > { %v16970_v46 = vunpack.i.h.bf16 %v18648_v53  ;;  %v16969_v59 = vunpack.i.l.bf16 %v18648_v53 }
 0x168   : > { %v1029_v40 = vsel %vm22330_vm12, %v16925_v58, %v16964_v45  ;;  %v1030_v41 = vsel %vm22330_vm12, %v16964_v45, %v16965_v15 }
 0x169   : > { %v1092_v42 = vsel %vm22401_vm0, %v16930_v33, %v16969_v59  ;;  %v1093_v48 = vsel %vm22402_vm13, %v16969_v59, %v16970_v46  ;;  %v1204_v47 = vsel %vm22403_vm14, %v1188_v36, %v1029_v40  ;;  %v18670_v26 = vpop.permute.xlu0 %16972  ;;  %v18672_v12 = vpop.permute.xlu1 %16977  ;;  %v1205_v43 = vsel %vm22404_vm2, %v1189_v57, %v1030_v41  ;;  %vm22406_vm0 = vmmov %vm22405_vm1 }
 0x16a   : > { %v14611_v58 = vpack.c.bf16 %v1092_v42, %v1204_v47  ;;  %v16975_v20 = vunpack.i.h.bf16 %v18670_v26  ;;  %v16974_v62 = vunpack.i.l.bf16 %v18670_v26  ;;  %v16980_v1 = vunpack.i.h.bf16 %v18672_v12 }
 0x16b   : > { %v16979_v33 = vunpack.i.l.bf16 %v18672_v12  ;;  %v14608_v7 = vpack.c.bf16 %v1093_v48, %v1205_v43  ;;  %vm22407_vm13 = vcmask 1040384   ;;  %vm22409_vm2 = vcmask 1031168  }
 0x16c   : > { %v653_v54 = vsel %vm22405_vm1, %v16935_v38, %v16974_v62  ;;  %v654_v55 = vsel %vm22406_vm0, %v16974_v62, %v16975_v20  ;;  %vm22408_vm14 = vmmov %vm22407_vm13  ;;  %vm22411_vm1 = vcmask 1041408  }
 0x16d   : > { %v1110_v56 = vsel %vm22407_vm13, %v18235_v25, %v653_v54  ;;  %v1111_v60 = vsel %vm22408_vm14, %v18247_v27, %v654_v55  ;;  %v713_v61 = vsel %vm22409_vm2, %v16940_v19, %v16979_v33  ;;  %vm22410_vm12 = vmmov %vm22409_vm2  ;;  %14610 = vmatprep.subr.msk.bf16.mxu1 %vm18406_vm3, %v14608_v7  ;;  %v18697_v38 = vpop.permute.xlu0 %16982  ;;  %v18699_v39 = vpop.permute.xlu1 %16987  ;;  %vm22415_vm14 = vcmask 474112  }
 0x16e   : > { %v714_v32 = vsel %vm22410_vm12, %v16979_v33, %v16980_v1  ;;  %v1126_v25 = vsel %vm22411_vm1, %v1110_v56, %v713_v61  ;;  %vm22412_vm0 = vmmov %vm22411_vm1  ;;  %v16985_v27 = vunpack.i.h.bf16 %v18697_v38  ;;  %v16984_v6 = vunpack.i.l.bf16 %v18697_v38  ;;  %14613 = vmatpush1.bf16.msk.msra.mxu1 %vm18406_vm3, %v14611_v58 }
 0x16f   : > { %v1127_v63 = vsel %vm22412_vm0, %v1111_v60, %v714_v32  ;;  %v16990_v19 = vunpack.i.h.bf16 %v18699_v39  ;;  %v16989_v0 = vunpack.i.l.bf16 %v18699_v39  ;;  %vm22413_vm12 = vcmask 482304   ;;  %vm22416_vm2 = vmmov %vm22415_vm14 }
 0x170   : > { %v779_v51 = vsel %vm770_vm4, %v16945_v24, %v16984_v6  ;;  %v780_v52 = vsel %vm770_vm4, %v16984_v6, %v16985_v27  ;;  %vm22414_vm13 = vmmov %vm22413_vm12  ;;  %vm22417_vm1 = vcmask 1046528  }
 0x171   : > { %v1142_v11 = vsel %vm1133_vm5, %v1126_v25, %v779_v51  ;;  %v1143_v13 = vsel %vm1133_vm5, %v1127_v63, %v780_v52  ;;  %v842_v17 = vsel %vm833_vm6, %v16950_v8, %v16989_v0  ;;  %v843_v18 = vsel %vm833_vm6, %v16989_v0, %v16990_v19  ;;  %12692 = vmatmul.mubr.msk.f32.vlgmr.msra.gmra.mrb[6].mxu1 %vm1223_vm15, %v18459_v5  ;;  %v18725_v14 = vpop.permute.xlu0 %16992  ;;  %v18727_v24 = vpop.permute.xlu1 %16997  ;;  %vm22418_vm0 = vmmov %vm22417_vm1 }
 0x172   : > { %v1158_v21 = vsel %vm1149_vm8, %v1142_v11, %v842_v17  ;;  %v1159_v23 = vsel %vm1149_vm8, %v1143_v13, %v843_v18  ;;  %v16995_v9 = vunpack.i.h.bf16 %v18725_v14  ;;  %v16994_v50 = vunpack.i.l.bf16 %v18725_v14  ;;  %1561 = vmatprep.mubr.f32.mxu1 %v22331_v16 }
 0x173   : > { %v17000_v8 = vunpack.i.h.bf16 %v18727_v24  ;;  %v16999_v36 = vunpack.i.l.bf16 %v18727_v24 }
 0x174   : > { %v905_v57 = vsel %vm896_vm7, %v16955_v4, %v16994_v50  ;;  %v906_v45 = vsel %vm896_vm7, %v16994_v50, %v16995_v9 }
 0x175   : > { %v1174_v59 = vsel %vm1165_vm9, %v1158_v21, %v905_v57  ;;  %v1175_v40 = vsel %vm1165_vm9, %v1159_v23, %v906_v45  ;;  %v968_v41 = vsel %vm959_vm10, %v16960_v44, %v16999_v36  ;;  %v969_v42 = vsel %vm959_vm10, %v16999_v36, %v17000_v8  ;;  %12693 = vmatmul.mubr.msk.f32.gmra.mrb[8].mxu1 %vm1223_vm15, %v18453_v3  ;;  %v18752_v10 = vpop.permute.xlu0 %17002  ;;  %v18754_v4 = vpop.permute.xlu1 %17007 }
 0x176   : > { %v1190_v48 = vsel %vm1181_vm11, %v1174_v59, %v968_v41  ;;  %v1191_v47 = vsel %vm1181_vm11, %v1175_v40, %v969_v42  ;;  %v17005_v43 = vunpack.i.h.bf16 %v18752_v10  ;;  %v17004_v37 = vunpack.i.l.bf16 %v18752_v10  ;;  %1709 = vmatprep.mubr.f32.mxu1 %v22331_v16 }
 0x177   : > { %v17010_v44 = vunpack.i.h.bf16 %v18754_v4  ;;  %v17009_v58 = vunpack.i.l.bf16 %v18754_v4 }
 0x178   : > { %v1031_v62 = vsel %vm22413_vm12, %v16965_v15, %v17004_v37  ;;  %v1032_v33 = vsel %vm22414_vm13, %v17004_v37, %v17005_v43  ;;  %vm22419_vm12 = vcmask 1039360  }
 0x179   : > { %v1094_v7 = vsel %vm22415_vm14, %v16970_v46, %v17009_v58  ;;  %v1095_v54 = vsel %vm22416_vm2, %v17009_v58, %v17010_v44  ;;  %v1206_v55 = vsel %vm22417_vm1, %v1190_v48, %v1031_v62  ;;  %v1207_v56 = vsel %vm22418_vm0, %v1191_v47, %v1032_v33  ;;  %v18777_v60 = vpop.permute.xlu1 %17013  ;;  %vm22420_vm13 = vmmov %vm22419_vm12 }
 0x17a   : > { %v14617_v49 = vpack.c.bf16 %v1094_v7, %v1206_v55  ;;  %v14614_v15 = vpack.c.bf16 %v1095_v54, %v1207_v56  ;;  %v17016_v46 = vunpack.i.h.bf16 %v18777_v60  ;;  %v17015_v61 = vunpack.i.l.bf16 %v18777_v60 }
 0x17b   : > { %vm22421_vm14 = vcmask 1040384   ;;  %vm22423_vm1 = vcmask 1031168  }
 0x17c   : > { %14616 = vmatprep.subr.msk.bf16.mxu0 %vm18406_vm3, %v14614_v15  ;;  %v655_v25 = vsel %vm22419_vm12, %v16975_v20, %v17015_v61  ;;  %v656_v63 = vsel %vm22420_vm13, %v17015_v61, %v17016_v46  ;;  %vm22422_vm2 = vmmov %vm22421_vm14  ;;  %vm22425_vm12 = vcmask 1041408  }
 0x17d   : > { %14619 = vmatpush1.bf16.msk.msra.mxu0 %vm18406_vm3, %v14617_v49  ;;  %v18783_v53 = vpop.permute.xlu1 %17018  ;;  %v1112_v26 = vsel %vm22421_vm14, %v18253_v28, %v655_v25  ;;  %v1113_v20 = vsel %vm22422_vm2, %v18271_v31, %v656_v63  ;;  %vm22424_vm0 = vmmov %vm22423_vm1  ;;  %vm22427_vm14 = vcmask 474112  }
 0x17e   : > { %v17021_v6 = vunpack.i.h.bf16 %v18783_v53  ;;  %v17020_v0 = vunpack.i.l.bf16 %v18783_v53  ;;  %vm22426_vm13 = vmmov %vm22425_vm12 }
 0x17f   : > { %vm22428_vm2 = vmmov %vm22427_vm14 }
 0x180   : > { %12696 = vmatmul.mubr.msk.f32.vlgmr.msra.gmra.mrb[6].mxu0 %vm1223_vm15, %v18459_v5  ;;  %v715_v11 = vsel %vm22423_vm1, %v16980_v1, %v17020_v0  ;;  %v716_v13 = vsel %vm22424_vm0, %v17020_v0, %v17021_v6  ;;  %vm22429_vm1 = vcmask 482304  }
 0x181   : > { %1638 = vmatprep.mubr.f32.mxu0 %v22331_v16  ;;  %v18790_v32 = vpop.permute.xlu1 %17028  ;;  %v1128_v50 = vsel %vm22425_vm12, %v1112_v26, %v715_v11  ;;  %v1129_v28 = vsel %vm22426_vm13, %v1113_v20, %v716_v13  ;;  %vm22430_vm0 = vmmov %vm22429_vm1  ;;  %vm22431_vm12 = vcmask 1046528  }
 0x182   : > { %v17031_v17 = vunpack.i.h.bf16 %v18790_v32  ;;  %v17030_v18 = vunpack.i.l.bf16 %v18790_v32  ;;  %vm22432_vm13 = vmmov %vm22431_vm12 }
 0x184   : > { %12697 = vmatmul.mubr.msk.f32.gmra.mrb[8].mxu0 %vm1223_vm15, %v18453_v3  ;;  %v844_v1 = vsel %vm833_vm6, %v16990_v19, %v17030_v18  ;;  %v845_v36 = vsel %vm833_vm6, %v17030_v18, %v17031_v17 }
 0x185   : > { %v18802_v51 = vpop.permute.xlu1 %17038  ;;  %1786 = vmatprep.mubr.f32.mxu0 %v22331_v16 }
 0x186   : > { %v18805_v52 = vpop.permute.xlu0 %1215  ;;  %v17041_v57 = vunpack.i.h.bf16 %v18802_v51  ;;  %v17040_v45 = vunpack.i.l.bf16 %v18802_v51 }
 0x188   : > { %v971_v58 = vsel %vm959_vm10, %v17040_v45, %v17041_v57 }
 0x189   : > { %v18817_v21 = vpop.permute.xlu1 %17048 }
 0x18a   : > { %v18819_v23 = vpop.permute.xlu0 %17023  ;;  %v17051_v62 = vunpack.i.h.bf16 %v18817_v21  ;;  %v17050_v33 = vunpack.i.l.bf16 %v18817_v21 }
 0x18b   : > { %v17026_v31 = vunpack.i.h.bf16 %v18819_v23  ;;  %v17025_v12 = vunpack.i.l.bf16 %v18819_v23 }
 0x18c   : > { %v1096_v53 = vsel %vm22427_vm14, %v17010_v44, %v17050_v33  ;;  %v1097_v61 = vsel %vm22428_vm2, %v17050_v33, %v17051_v62  ;;  %vm22433_vm14 = vcmask 1031168  }
 0x18d   : > { %v781_v59 = vsel %vm770_vm4, %v16985_v27, %v17025_v12  ;;  %v782_v40 = vsel %vm770_vm4, %v17025_v12, %v17026_v31  ;;  %v18837_v41 = vpop.permute.xlu1 %17058  ;;  %v970_v27 = vsel %vm959_vm10, %v17000_v8, %v17040_v45  ;;  %vm22434_vm2 = vmmov %vm22433_vm14 }
 0x18e   : > { %v1144_v39 = vsel %vm1133_vm5, %v1128_v50, %v781_v59  ;;  %v1145_v19 = vsel %vm1133_vm5, %v1129_v28, %v782_v40  ;;  %v18841_v42 = vpop.permute.xlu0 %17033  ;;  %v17061_v25 = vunpack.i.h.bf16 %v18837_v41  ;;  %v17060_v63 = vunpack.i.l.bf16 %v18837_v41 }
 0x18f   : > { %v1160_v48 = vsel %vm1149_vm8, %v1144_v39, %v844_v1  ;;  %v1161_v47 = vsel %vm1149_vm8, %v1145_v19, %v845_v36  ;;  %v17036_v37 = vunpack.i.h.bf16 %v18841_v42  ;;  %v17035_v38 = vunpack.i.l.bf16 %v18841_v42 }
 0x190   : > { %v717_v10 = vsel %vm22433_vm14, %v17021_v6, %v17060_v63  ;;  %vm22439_vm14 = vcmask 1041408  }
 0x191   : > { %v907_v7 = vsel %vm896_vm7, %v16995_v9, %v17035_v38  ;;  %v908_v54 = vsel %vm896_vm7, %v17035_v38, %v17036_v37  ;;  %v18861_v55 = vpop.permute.xlu1 %17068 }
 0x192   : > { %v1176_v24 = vsel %vm1165_vm9, %v1160_v48, %v907_v7  ;;  %v1177_v8 = vsel %vm1165_vm9, %v1161_v47, %v908_v54  ;;  %v18865_v56 = vpop.permute.xlu0 %17043  ;;  %v17071_v28 = vunpack.i.h.bf16 %v18861_v55  ;;  %v17070_v12 = vunpack.i.l.bf16 %v18861_v55 }
 0x193   : > { %v1192_v49 = vsel %vm1181_vm11, %v1176_v24, %v970_v27  ;;  %v1193_v15 = vsel %vm1181_vm11, %v1177_v8, %v971_v58  ;;  %v17046_v14 = vunpack.i.h.bf16 %v18865_v56  ;;  %v17045_v9 = vunpack.i.l.bf16 %v18865_v56 }
 0x195   : > { %v1033_v0 = vsel %vm22429_vm1, %v17005_v43, %v17045_v9  ;;  %v1034_v26 = vsel %vm22430_vm0, %v17045_v9, %v17046_v14  ;;  %v18889_v50 = vpop.permute.xlu1 %17078  ;;  %v718_v43 = vsel %vm22434_vm2, %v17060_v63, %v17061_v25  ;;  %vm22435_vm1 = vcmask 1039360   ;;  %vm22440_vm2 = vmmov %vm22439_vm14 }
 0x196   : > { %v1208_v20 = vsel %vm22431_vm12, %v1192_v49, %v1033_v0  ;;  %v18884_v11 = vpop.permute.xlu0 %17053  ;;  %v1209_v4 = vsel %vm22432_vm13, %v1193_v15, %v1034_v26  ;;  %vm22436_vm0 = vmmov %vm22435_vm1  ;;  %vm22437_vm12 = vcmask 1040384   ;;  %v17081_v47 = vunpack.i.h.bf16 %v18889_v50 }
 0x197   : > { %v14623_v44 = vpack.c.bf16 %v1096_v53, %v1208_v20  ;;  %v17056_v13 = vunpack.i.h.bf16 %v18884_v11  ;;  %v17055_v18 = vunpack.i.l.bf16 %v18884_v11  ;;  %v14620_v23 = vpack.c.bf16 %v1097_v61, %v1209_v4  ;;  %vm22438_vm13 = vmmov %vm22437_vm12 }
 0x198   : > { %v17080_v38 = vunpack.i.l.bf16 %v18889_v50 }
 0x199   : > { %v657_v1 = vsel %vm22435_vm1, %v17016_v46, %v17055_v18  ;;  %v658_v36 = vsel %vm22436_vm0, %v17055_v18, %v17056_v13  ;;  %14622 = vmatprep.subr.msk.bf16.mxu1 %vm18406_vm3, %v14620_v23  ;;  %v18931_v32 = vpop.permute.xlu1 %17083  ;;  %vm22441_vm1 = vcmask 482304  }
 0x19a   : > { %v1114_v6 = vsel %vm22437_vm12, %v18267_v30, %v657_v1  ;;  %v1115_v45 = vsel %vm22438_vm13, %v18283_v34, %v658_v36  ;;  %v18909_v59 = vpop.permute.xlu0 %17063  ;;  %14625 = vmatpush1.bf16.msk.msra.mxu1 %vm18406_vm3, %v14623_v44  ;;  %v846_v30 = vsel %vm833_vm6, %v17031_v17, %v17070_v12  ;;  %v847_v34 = vsel %vm833_vm6, %v17070_v12, %v17071_v28  ;;  %vm22442_vm0 = vmmov %vm22441_vm1 }
 0x19b   : > { %v1130_v60 = vsel %vm22439_vm14, %v1114_v6, %v717_v10  ;;  %v1131_v46 = vsel %vm22440_vm2, %v1115_v45, %v718_v43  ;;  %v17066_v40 = vunpack.i.h.bf16 %v18909_v59  ;;  %v17065_v39 = vunpack.i.l.bf16 %v18909_v59 }
 0x19c   : > { %v17086_v24 = vunpack.i.h.bf16 %v18931_v32  ;;  %v17085_v8 = vunpack.i.l.bf16 %v18931_v32  ;;  %v972_v15 = vsel %vm959_vm10, %v17041_v57, %v17080_v38  ;;  %v973_v9 = vsel %vm959_vm10, %v17080_v38, %v17081_v47 }
 0x19d   : > { %v783_v19 = vsel %vm770_vm4, %v17026_v31, %v17065_v39  ;;  %v784_v48 = vsel %vm770_vm4, %v17065_v39, %v17066_v40  ;;  %12700 = vmatmul.mubr.msk.f32.vlgmr.msra.gmra.mrb[10].mxu1 %vm1223_vm15, %v18459_v5  ;;  %vm22443_vm12 = vcmask 1046528   ;;  %vm22445_vm14 = vcmask 474112  }
 0x19e   : > { %v1146_v17 = vsel %vm1133_vm5, %v1130_v60, %v783_v19  ;;  %v1147_v27 = vsel %vm1133_vm5, %v1131_v46, %v784_v48  ;;  %v18935_v58 = vpop.permute.xlu0 %17073  ;;  %1715 = vmatprep.mubr.f32.mxu1 %v22331_v16  ;;  %v1035_v61 = vsel %vm22441_vm1, %v17046_v14, %v17085_v8  ;;  %v1036_v63 = vsel %vm22442_vm0, %v17085_v8, %v17086_v24  ;;  %vm22444_vm13 = vmmov %vm22443_vm12  ;;  %v17627_v19 = vld [vmem:[%s18155_s14 + $0x8] sm:$0xff]  ;;  %s17775_s14 = scalar_lea.vmem %s17774_s12, 32 }
 0x19f   : > { %v1162_v31 = vsel %vm1149_vm8, %v1146_v17, %v846_v30  ;;  %v1163_v33 = vsel %vm1149_vm8, %v1147_v27, %v847_v34  ;;  %v17076_v7 = vunpack.i.h.bf16 %v18935_v58  ;;  %v17075_v54 = vunpack.i.l.bf16 %v18935_v58  ;;  %vm22446_vm2 = vmmov %vm22445_vm14 }
 0x1a0   : > { %vm22447_vm1 = vcmask 1040384   ;;  %vm22448_vm0 = vcmask 1041408   ;;  %v737_v48 = vrot.slane %v17627_v19, %v569_v22  ;;  %v2280_v19 = vld [vmem:[#allocation2 + $0xa0] sm:$0xff] }
 0x1a1   : > { %v909_v56 = vsel %vm896_vm7, %v17036_v37, %v17075_v54  ;;  %v910_v49 = vsel %vm896_vm7, %v17075_v54, %v17076_v7  ;;  %12701 = vmatmul.mubr.msk.f32.gmra.mrb[12].mxu1 %vm1223_vm15, %v18453_v3  ;;  %v1116_v21 = vsel %vm22447_vm1, %v18286_v35, %v17056_v13 }
 0x1a2   : > { %v1178_v53 = vsel %vm1165_vm9, %v1162_v31, %v909_v56  ;;  %v1179_v42 = vsel %vm1165_vm9, %v1163_v33, %v910_v49  ;;  %v18960_v37 = vpop.permute.xlu0 %1220  ;;  %13781 = vmatprep.mubr.msk.f32.mxu1 %vm1223_vm15, %v18459_v5 }
 0x1a3   : > { %v1194_v51 = vsel %vm1181_vm11, %v1178_v53, %v972_v15  ;;  %v1195_v57 = vsel %vm1181_vm11, %v1179_v42, %v973_v9 }
 0x1a4   : > { %v1210_v4 = vsel %vm22443_vm12, %v1194_v51, %v1035_v61  ;;  %v1211_v44 = vsel %vm22444_vm13, %v1195_v57, %v1036_v63  ;;  %vm22449_vm12 = vcmask 1039360  }
 0x1a5   : > { %vm22450_vm13 = vmmov %vm22449_vm12 }
 0x1a6   : > { %v18970_v0 = vpop.permute.xlu0 %17088 }
 0x1a7   : > { %v22338_v26 = vunpack.i.h.bf16 %v18970_v0  ;;  %v17090_v20 = vunpack.i.l.bf16 %v18970_v0 }
 0x1a9   : > { %v1098_v18 = vsel %vm22445_vm14, %v17051_v62, %v17090_v20  ;;  %v1099_v14 = vsel %vm22446_vm2, %v17090_v20, %v22338_v26  ;;  %v18998_v62 = vsel %vm22448_vm0, %v1116_v21, %v17061_v25  ;;  %v2265_v21 = vld [vmem:[#allocation2 + $0x28] sm:$0xff]  ;;  %v2410_v26 = vld [vmem:[#allocation2 + $0x4b0] sm:$0xff]  ;;  %vm22451_vm14 = vmmov %vm22449_vm12 }
 0x1aa   : > { %v14629_v23 = vpack.c.bf16 %v1098_v18, %v1210_v4  ;;  %v14626_v10 = vpack.c.bf16 %v1099_v14, %v1211_v44  ;;  %v2261_v44 = vld [vmem:[#allocation2 + $0x8] sm:$0xff]  ;;  %v2266_v18 = vld [vmem:[#allocation2 + $0x30] sm:$0xff] }
 0x1ac   : > { %14628 = vmatprep.subr.msk.bf16.mxu0 %vm18406_vm3, %v14626_v10  ;;  %v2260_v10 = vld [vmem:[#allocation2] sm:$0xff] }
 0x1ad   : > { %14631 = vmatpush1.bf16.msk.msra.mxu0 %vm18406_vm3, %v14629_v23  ;;  %v14638_v23 = vpack.c.bf16 %v2266_v18, %v2261_v44  ;;  %v2296_v44 = vld [vmem:[#allocation2 + $0x120] sm:$0xff] }
 0x1af   : > { %14639 = vmatprep.subr.bf16.mxu0 %v14638_v23  ;;  %v2295_v23 = vld [vmem:[#allocation2 + $0x118] sm:$0xff] }
 0x1b0   : > { %12704 = vmatmul.mubr.msk.f32.vlgmr.msra.gmra.mrb[10].mxu0 %vm1223_vm15, %v18459_v5 }
 0x1b1   : > { %1792 = vmatprep.mubr.f32.mxu0 %v22331_v16 }
 0x1b4   : > { %12705 = vmatmul.mubr.msk.f32.gmra.mrb[12].mxu0 %vm1223_vm15, %v18453_v3 }
 0x21d   : > { %v1332_v43 = vpop.f32.mrb[0].mxu1 }
 0x21e   : > { %v1334_v12 = vpop.f32.mrb[1].mxu1  ;;  %v1326_v1 = vpop.f32.mrb[0].mxu0  ;;  %v19042_v2 = vadd.f32 %v1332_v43, %v18960_v37  ;;  %v14640_v43 = vpack.c.bf16 %v2265_v21, %v2260_v10  ;;  %v2290_v10 = vld [vmem:[#allocation2 + $0xf0] sm:$0xff]  ;;  %v2301_v21 = vld [vmem:[#allocation2 + $0x148] sm:$0xff] }
 0x21f   : > { %v19001_v5 = vadd.f32 %v1326_v1, %v18805_v52  ;;  %v1328_v36 = vpop.f32.mrb[1].mxu0  ;;  %v19038_v27 = vadd.f32 %v1334_v12, %v18960_v37  ;;  %v2271_v12 = vld [vmem:[#allocation2 + $0x58] sm:$0xff]  ;;  %v2276_v1 = vld [vmem:[#allocation2 + $0x80] sm:$0xff] }
 0x220   : > { %v19004_v3 = vadd.f32 %v1328_v36, %v18805_v52  ;;  %v22334_v8 = vmax.f32 %v19042_v2, 0.0  ;;  %14641 = vmatpush1.bf16.msra.mxu0 %v14640_v43  ;;  %v14642_v36 = vpack.c.bf16 %v2276_v1, %v2271_v12  ;;  %v2306_v43 = vld [vmem:[#allocation2 + $0x170] sm:$0xff]  ;;  %v14652_v12 = vpack.c.bf16 %v2295_v23, %v2290_v10  ;;  %v2325_v10 = vld [vmem:[#allocation2 + $0x208] sm:$0xff]  ;;  %v2336_v23 = vld [vmem:[#allocation2 + $0x260] sm:$0xff] }
 0x221   : > { %v1403_v11 = vpop.f32.mrb[2].mxu1  ;;  %v1874_v25 = vmax.f32 %v19001_v5, 0.0  ;;  %v22337_v33 = vmax.f32 %v19038_v27, 0.0  ;;  %v14654_v1 = vpack.c.bf16 %v2306_v43, %v2301_v21 }
 0x222   : > { %v1875_v6 = vmax.f32 %v19004_v3, 0.0  ;;  %v19008_v35 = vadd.f32 %v1403_v11, %v18805_v52  ;;  %v1405_v41 = vpop.f32.mrb[3].mxu1  ;;  %v2270_v11 = vld [vmem:[#allocation2 + $0x50] sm:$0xff]  ;;  %14643 = vmatprep.subr.bf16.mxu0 %v14642_v36  ;;  %v2311_v36 = vld [vmem:[#allocation2 + $0x198] sm:$0xff] }
 0x223   : > { %v19012_v13 = vadd.f32 %v1405_v41, %v18805_v52  ;;  %v2275_v41 = vld [vmem:[#allocation2 + $0x78] sm:$0xff] }
 0x224   : > { %v1876_v45 = vmax.f32 %v19008_v35, 0.0 }
 0x225   : > { %v22335_v60 = vmax.f32 %v19012_v13, 0.0  ;;  %v1409_v46 = vpop.f32.mrb[4].mxu1 }
 0x226   : > { %v17092_v39 = vpack.i.bf16 %v1876_v45, %v1875_v6  ;;  %v1411_v30 = vpop.f32.mrb[5].mxu1  ;;  %v19032_v38 = vadd.f32 %v1409_v46, %v18960_v37  ;;  %v14644_v46 = vpack.c.bf16 %v2275_v41, %v2270_v11  ;;  %v2300_v11 = vld [vmem:[#allocation2 + $0x140] sm:$0xff]  ;;  %v2305_v41 = vld [vmem:[#allocation2 + $0x168] sm:$0xff] }
 0x227   : > { %v17097_v34 = vpack.i.bf16 %v1874_v25, %v22335_v60  ;;  %v19035_v17 = vadd.f32 %v1411_v30, %v18960_v37  ;;  %v2286_v30 = vld [vmem:[#allocation2 + $0xd0] sm:$0xff] }
 0x228   : > { %17093 = vrot.lane.b32.xlu1 %v17092_v39, %s17858_s19  ;;  %v22336_v22 = vmax.f32 %v19032_v38, 0.0  ;;  %v2281_v39 = vld [vmem:[#allocation2 + $0xa8] sm:$0xff]  ;;  %14645 = vmatpush1.bf16.msra.mxu0 %v14644_v46 }
 0x229   : > { %17098 = vrot.lane.b32.xlu0 %v17097_v34, %s17858_s19  ;;  %v22333_v31 = vmax.f32 %v19035_v17, 0.0  ;;  %v14646_v34 = vpack.c.bf16 %v2286_v30, %v2281_v39  ;;  %v2316_v39 = vld [vmem:[#allocation2 + $0x1c0] sm:$0xff]  ;;  %v14656_v30 = vpack.c.bf16 %v2305_v41, %v2300_v11  ;;  %v2335_v11 = vld [vmem:[#allocation2 + $0x258] sm:$0xff] }
 0x22a   : > { %v17102_v49 = vpack.i.bf16 %v22336_v22, %v22337_v33  ;;  %v14658_v46 = vpack.c.bf16 %v2316_v39, %v2311_v36  ;;  %v2341_v36 = vld [vmem:[#allocation2 + $0x288] sm:$0xff]  ;;  %v2346_v39 = vld [vmem:[#allocation2 + $0x2b0] sm:$0xff] }
 0x22b   : > { %v17107_v15 = vpack.i.bf16 %v22334_v8, %v22333_v31  ;;  %14647 = vmatprep.subr.bf16.mxu0 %v14646_v34  ;;  %v2321_v34 = vld [vmem:[#allocation2 + $0x1e8] sm:$0xff]  ;;  %v2366_v8 = vld [vmem:[#allocation2 + $0x350] sm:$0xff] }
 0x22c   : > { %768 = vrot.lane.b32.xlu1 %v737_v48, %s17859_s24  ;;  %v2361_v31 = vld [vmem:[#allocation2 + $0x328] sm:$0xff] }
 0x22d   : > { %831 = vrot.lane.b32.xlu0 %v737_v48, %s17860_s26 }
 0x230   : > { %894 = vrot.lane.b32.xlu1 %v737_v48, %s17861_s18 }
 0x231   : > { %957 = vrot.lane.b32.xlu0 %v737_v48, %s17862_s21  ;;  %s17868_s21 = smov 110  }
 0x234   : > { %v19048_v54 = vpop.f32.mrb[2].mxu0  ;;  %1020 = vrot.lane.b32.xlu1 %v737_v48, %s17863_s29  ;;  %s17869_s29 = smov 108  }
 0x235   : > { %v19052_v56 = vpop.f32.mrb[3].mxu0  ;;  %1083 = vrot.lane.b32.xlu0 %v737_v48, %s17865_s22  ;;  %v2285_v48 = vld [vmem:[#allocation2 + $0xc8] sm:$0xff]  ;;  %s17870_s22 = smov 91  }
 0x238   : > { %v19063_v9 = vpop.f32.mrb[4].mxu0  ;;  %17103 = vrot.lane.b32.xlu1 %v17102_v49, %s17858_s19  ;;  %v14648_v49 = vpack.c.bf16 %v2285_v48, %v2280_v19  ;;  %v2310_v19 = vld [vmem:[#allocation2 + $0x190] sm:$0xff]  ;;  %v2315_v48 = vld [vmem:[#allocation2 + $0x1b8] sm:$0xff] }
 0x239   : > { %v19066_v53 = vpop.f32.mrb[5].mxu0  ;;  %17108 = vrot.lane.b32.xlu0 %v17107_v15, %s17858_s19  ;;  %v2291_v15 = vld [vmem:[#allocation2 + $0xf8] sm:$0xff] }
 0x23a   : > { %v14650_v18 = vpack.c.bf16 %v2296_v44, %v2291_v15  ;;  %14649 = vmatpush1.bf16.msra.mxu0 %v14648_v49  ;;  %v2326_v15 = vld [vmem:[#allocation2 + $0x210] sm:$0xff]  ;;  %v14660_v44 = vpack.c.bf16 %v2315_v48, %v2310_v19  ;;  %v2320_v49 = vld [vmem:[#allocation2 + $0x1e0] sm:$0xff]  ;;  %v14670_v19 = vpack.c.bf16 %v2346_v39, %v2341_v36  ;;  %v2371_v36 = vld [vmem:[#allocation2 + $0x378] sm:$0xff] }
 0x23b   : > { %v14662_v16 = vpack.c.bf16 %v2326_v15, %v2321_v34  ;;  %v14664_v21 = vpack.c.bf16 %v2325_v10, %v2320_v49  ;;  %v2340_v48 = vld [vmem:[#allocation2 + $0x280] sm:$0xff]  ;;  %v2345_v34 = vld [vmem:[#allocation2 + $0x2a8] sm:$0xff] }
 0x23c   : > { %14651 = vmatprep.subr.bf16.mxu0 %v14650_v18  ;;  %v2331_v18 = vld [vmem:[#allocation2 + $0x238] sm:$0xff]  ;;  %v2356_v49 = vld [vmem:[#allocation2 + $0x300] sm:$0xff] }
 0x23d   : > { %v2376_v39 = vld [vmem:[#allocation2 + $0x3a0] sm:$0xff] }
 0x23e   : > { %14653 = vmatpush1.bf16.msra.mxu0 %v14652_v12  ;;  %v14666_v12 = vpack.c.bf16 %v2336_v23, %v2331_v18  ;;  %v2350_v18 = vld [vmem:[#allocation2 + $0x2d0] sm:$0xff]  ;;  %v2355_v23 = vld [vmem:[#allocation2 + $0x2f8] sm:$0xff]  ;;  %v14682_v22 = vpack.c.bf16 %v2376_v39, %v2371_v36 }
 0x23f   : > { %14655 = vmatprep.subr.bf16.mxu0 %v14654_v1  ;;  %v2330_v1 = vld [vmem:[#allocation2 + $0x230] sm:$0xff]  ;;  %v2395_v39 = vld [vmem:[#allocation2 + $0x438] sm:$0xff] }
 0x240   : > { %v2390_v36 = vld [vmem:[#allocation2 + $0x410] sm:$0xff] }
 0x242   : > { %14657 = vmatpush1.bf16.msra.mxu0 %v14656_v30  ;;  %v14668_v30 = vpack.c.bf16 %v2335_v11, %v2330_v1  ;;  %v14678_v1 = vpack.c.bf16 %v2366_v8, %v2361_v31  ;;  %v2365_v11 = vld [vmem:[#allocation2 + $0x348] sm:$0xff]  ;;  %v2380_v8 = vld [vmem:[#allocation2 + $0x3c0] sm:$0xff] }
 0x243   : > { %14659 = vmatprep.subr.bf16.mxu0 %v14658_v46 }
 0x244   : > { %v19069_v42 = vpop.f32.mrb[6].mxu1 }
 0x245   : > { %v19071_v51 = vpop.f32.mrb[7].mxu1 }
 0x246   : > { %14661 = vmatpush1.bf16.msra.mxu0 %v14660_v44  ;;  %v2351_v44 = vld [vmem:[#allocation2 + $0x2d8] sm:$0xff] }
 0x247   : > { %14663 = vmatprep.subr.bf16.mxu0 %v14662_v16  ;;  %v14672_v16 = vpack.c.bf16 %v2345_v34, %v2340_v48  ;;  %v14674_v10 = vpack.c.bf16 %v2356_v49, %v2351_v44  ;;  %v2375_v48 = vld [vmem:[#allocation2 + $0x398] sm:$0xff]  ;;  %v2386_v34 = vld [vmem:[#allocation2 + $0x3f0] sm:$0xff] }
 0x248   : > { %v19073_v57 = vpop.f32.mrb[8].mxu1 }
 0x249   : > { %v19075_v61 = vpop.f32.mrb[9].mxu1 }
 0x24a   : > { %14665 = vmatpush1.bf16.msra.mxu0 %v14664_v21  ;;  %v14676_v21 = vpack.c.bf16 %v2355_v23, %v2350_v18  ;;  %v2391_v18 = vld [vmem:[#allocation2 + $0x418] sm:$0xff]  ;;  %v2396_v23 = vld [vmem:[#allocation2 + $0x440] sm:$0xff] }
 0x24b   : > { %14667 = vmatprep.subr.bf16.mxu0 %v14666_v12  ;;  %v2360_v12 = vld [vmem:[#allocation2 + $0x320] sm:$0xff] }
 0x24c   : > { %v14680_v60 = vpack.c.bf16 %v2365_v11, %v2360_v12  ;;  %v14690_v11 = vpack.c.bf16 %v2396_v23, %v2391_v18 }
 0x24e   : > { %14669 = vmatpush1.bf16.msra.mxu0 %v14668_v30  ;;  %v2370_v30 = vld [vmem:[#allocation2 + $0x370] sm:$0xff] }
 0x24f   : > { %14671 = vmatprep.subr.bf16.mxu0 %v14670_v19  ;;  %v2381_v19 = vld [vmem:[#allocation2 + $0x3c8] sm:$0xff]  ;;  %v14684_v49 = vpack.c.bf16 %v2375_v48, %v2370_v30  ;;  %v2406_v30 = vld [vmem:[#allocation2 + $0x490] sm:$0xff] }
 0x250   : > { %v14686_v31 = vpack.c.bf16 %v2386_v34, %v2381_v19  ;;  %v2400_v19 = vld [vmem:[#allocation2 + $0x460] sm:$0xff]  ;;  %v2405_v34 = vld [vmem:[#allocation2 + $0x488] sm:$0xff] }
 0x251   : > { %v14696_v33 = vpack.c.bf16 %v2405_v34, %v2400_v19 }
 0x252   : > { %14673 = vmatpush1.bf16.msra.mxu0 %v14672_v16 }
 0x253   : > { %v19077_v63 = vpop.f32.mrb[6].mxu0  ;;  %14675 = vmatprep.subr.bf16.mxu0 %v14674_v10  ;;  %v2385_v10 = vld [vmem:[#allocation2 + $0x3e8] sm:$0xff] }
 0x254   : > { %v19079_v20 = vpop.f32.mrb[7].mxu0 }
 0x256   : > { %14677 = vmatpush1.bf16.msra.mxu0 %v14676_v21 }
 0x257   : > { %v19081_v4 = vpop.f32.mrb[8].mxu0  ;;  %14679 = vmatprep.subr.bf16.mxu0 %v14678_v1  ;;  %v14688_v1 = vpack.c.bf16 %v2385_v10, %v2380_v8  ;;  %v2416_v8 = vld [vmem:[#allocation2 + $0x4e0] sm:$0xff] }
 0x258   : > { %v19083_v14 = vpop.f32.mrb[9].mxu0 }
 0x25a   : > { %14681 = vmatpush1.bf16.msra.mxu0 %v14680_v60  ;;  %v14692_v60 = vpack.c.bf16 %v2395_v39, %v2390_v36 }
 0x25b   : > { %14683 = vmatprep.subr.bf16.mxu0 %v14682_v22  ;;  %v2401_v22 = vld [vmem:[#allocation2 + $0x468] sm:$0xff] }
 0x25c   : > { %v14694_v48 = vpack.c.bf16 %v2406_v30, %v2401_v22  ;;  %v19111_v22 = vadd.f32 %v19052_v56, %v18805_v52 }
 0x25e   : > { %14685 = vmatpush1.bf16.msra.mxu0 %v14684_v49  ;;  %v2411_v49 = vld [vmem:[#allocation2 + $0x4b8] sm:$0xff] }
 0x25f   : > { %14687 = vmatprep.subr.bf16.mxu0 %v14686_v31  ;;  %v14698_v10 = vpack.c.bf16 %v2416_v8, %v2411_v49  ;;  %v2415_v31 = vld [vmem:[#allocation2 + $0x4d8] sm:$0xff] }
 0x260   : > { %v14700_v18 = vpack.c.bf16 %v2415_v31, %v2410_v26 }
 0x262   : > { %14689 = vmatpush1.bf16.msra.mxu0 %v14688_v1 }
 0x263   : > { %14691 = vmatprep.subr.bf16.mxu0 %v14690_v11 }
 0x266   : > { %14693 = vmatpush1.bf16.msra.mxu0 %v14692_v60 }
 0x267   : > { %14695 = vmatprep.subr.bf16.mxu0 %v14694_v48 }
 0x26a   : > { %14697 = vmatpush1.bf16.msra.mxu0 %v14696_v33  ;;  %v19107_v33 = vadd.f32 %v19048_v54, %v18805_v52 }
 0x26b   : > { %14699 = vmatprep.subr.bf16.mxu0 %v14698_v10 }
 0x26c   : > { %v1878_v59 = vmax.f32 %v19107_v33, 0.0 }
 0x26e   : > { %14701 = vmatpush1.bf16.msra.mxu0 %v14700_v18  ;;  %v2263_v18 = vld [vmem:[#allocation2 + $0x18] sm:$0xff] }
 0x270   : > { %v19085_v43 = vpop.f32.mrb[10].mxu1 }
 0x271   : > { %v19087_v41 = vpop.f32.mrb[11].mxu1 }
 0x274   : > { %v19089_v46 = vpop.f32.mrb[12].mxu1 }
 0x275   : > { %v19091_v15 = vpop.f32.mrb[13].mxu1 }
 0x283   : > { %v19093_v44 = vpop.f32.mrb[10].mxu0 }
 0x284   : > { %v19095_v16 = vpop.f32.mrb[11].mxu0 }
 0x287   : > { %v19097_v21 = vpop.f32.mrb[12].mxu0 }
 0x288   : > { %v19099_v12 = vpop.f32.mrb[13].mxu0 }
 0x29a   : > { %v17094_v23 = vpop.permute.xlu1 %17093 }
 0x29b   : > { %v17096_v1 = vunpack.i.h.bf16 %v17094_v23  ;;  %v17095_v11 = vunpack.i.l.bf16 %v17094_v23  ;;  %v19101_v36 = vpop.permute.xlu0 %17098  ;;  %v2268_v23 = vld [vmem:[#allocation2 + $0x40] sm:$0xff] }
 0x29c   : > { %v17101_v39 = vunpack.i.h.bf16 %v19101_v36  ;;  %v17100_v60 = vunpack.i.l.bf16 %v19101_v36  ;;  %v2440_v36 = vld [vmem:[#allocation2 + $0x5a0] sm:$0xff] }
 0x29d   : > { %v1995_v26 = vsel %vm22449_vm12, %v17095_v11, %v17096_v1 }
 0x29e   : > { %v769_v30 = vpop.permute.xlu1 %768  ;;  %v1994_v48 = vsel %vm22450_vm13, %v17101_v39, %v17095_v11  ;;  %v1996_v19 = vsel %vm22451_vm14, %v17096_v1, %v17100_v60  ;;  %v19120_v34 = vmax.f32 %v1875_v6, %v1995_v26  ;;  %v15108_v26 = vpack.c.bf16 %v2268_v23, %v2263_v18 }
 0x29f   : > { %v785_v54 = vsel %vm770_vm4, %v17066_v40, %v769_v30  ;;  %v832_v49 = vpop.permute.xlu0 %831  ;;  %v19127_v56 = vmax.f32 %v1874_v25, %v1994_v48  ;;  %v19131_v8 = vmax.f32 %v1876_v45, %v1996_v19  ;;  %v22357_v40 = vmax.f32 %v19111_v22, 0.0  ;;  %v2262_v30 = vld [vmem:[#allocation2 + $0x10] sm:$0xff]  ;;  %v2267_v48 = vld [vmem:[#allocation2 + $0x38] sm:$0xff] }
 0x2a0   : > { %v1148_v10 = vsel %vm1133_vm5, %v18998_v62, %v785_v54  ;;  %v848_v3 = vsel %vm833_vm6, %v17071_v28, %v832_v49  ;;  %vm22452_vm6 = vcmask 482304   ;;  %v2273_v54 = vld [vmem:[#allocation2 + $0x68] sm:$0xff]  ;;  %v2278_v49 = vld [vmem:[#allocation2 + $0x90] sm:$0xff]  ;;  %v22459_v18 = vmax.f32 %v19032_v38, 0.0 }
 0x2a1   : > { %2112 = vrot.lane.b32.xlu0 %v19127_v56, %s17859_s24  ;;  %v17112_v5 = vpack.i.bf16 %v19131_v8, %v19120_v34  ;;  %v1164_v35 = vsel %vm1149_vm8, %v1148_v10, %v848_v3  ;;  %v17117_v45 = vpack.i.bf16 %v22357_v40, %v1878_v59  ;;  %v19180_v3 = vadd.f32 %v19066_v53, %v18960_v37  ;;  %v2456_v40 = vld [vmem:[#allocation2 + $0x620] sm:$0xff] }
 0x2a2   : > { %v895_v6 = vpop.permute.xlu1 %894  ;;  %v22458_v53 = vmax.f32 %v19038_v27, 0.0  ;;  %v19207_v27 = vadd.f32 %v19069_v42, %v18805_v52 }
 0x2a3   : > { %v911_v62 = vsel %vm896_vm7, %v17076_v7, %v895_v6  ;;  %v958_v55 = vpop.permute.xlu0 %957  ;;  %17113 = vrot.lane.b32.xlu1 %v17112_v5, %s17859_s24  ;;  %v15110_v6 = vpack.c.bf16 %v2267_v48, %v2262_v30  ;;  %v2298_v30 = vld [vmem:[#allocation2 + $0x130] sm:$0xff] }
 0x2a4   : > { %v1180_v28 = vsel %vm1165_vm9, %v1164_v35, %v911_v62  ;;  %v974_v25 = vsel %vm959_vm10, %v17081_v47, %v958_v55  ;;  %vm22453_vm9 = vcmask 1046528   ;;  %v22454_v47 = vunpack.i.h.bf16 %v18970_v0  ;;  %vm22455_vm10 = vmmov %vm22446_vm2  ;;  %v2272_v55 = vld [vmem:[#allocation2 + $0x60] sm:$0xff] }
 0x2a5   : > { %v1196_v58 = vsel %vm1181_vm11, %v1180_v28, %v974_v25  ;;  %v19176_v0 = vadd.f32 %v19063_v9, %v18960_v37  ;;  %vm22456_vm11 = vmmov %vm22449_vm12  ;;  %v15112_v62 = vpack.c.bf16 %v2278_v49, %v2273_v54  ;;  %v2277_v28 = vld [vmem:[#allocation2 + $0x88] sm:$0xff]  ;;  %v22356_v48 = vmax.f32 %v19207_v27, 0.0 }
 0x2a6   : > { %v1021_v31 = vpop.permute.xlu1 %1020  ;;  %vm22457_vm2 = vmmov %vm22456_vm11  ;;  %v19224_v49 = vadd.f32 %v19073_v57, %v18960_v37  ;;  %v19237_v57 = vadd.f32 %v19079_v20, %v18805_v52 }
 0x2a7   : > { %v1037_v7 = vsel %vm22452_vm6, %v17086_v24, %v1021_v31  ;;  %v1084_v1 = vpop.permute.xlu0 %1083  ;;  %17118 = vrot.lane.b32.xlu1 %v17117_v45, %s17858_s19  ;;  %v2283_v45 = vld [vmem:[#allocation2 + $0xb8] sm:$0xff]  ;;  %v17628_v31 = vld [vmem:[%s22294_s1 + $0x8] sm:$0xff]  ;;  %vm22464_vm1 = vmmov %vm22457_vm2 }
 0x2a8   : > { %v1212_v50 = vsel %vm22453_vm9, %v1196_v58, %v1037_v7  ;;  %v1100_v11 = vsel %vm22455_vm10, %v22454_v47, %v1084_v1  ;;  %v1893_v58 = vmax.f32 %v19176_v0, 0.0  ;;  %v22354_v7 = vmax.f32 %v19180_v3, 0.0  ;;  %vm22465_vm0 = vmmov %vm22464_vm1 }
 0x2a9   : > { %v14632_v39 = vpack.c.bf16 %v1100_v11, %v1212_v50  ;;  %v15114_v1 = vpack.c.bf16 %v2277_v28, %v2272_v55  ;;  %v19211_v50 = vadd.f32 %v19071_v51, %v18805_v52  ;;  %v15116_v38 = vpack.c.bf16 %v2288_v29, %v2283_v45  ;;  %v2282_v11 = vld [vmem:[#allocation2 + $0xb0] sm:$0xff]  ;;  %v2303_v55 = vld [vmem:[#allocation2 + $0x158] sm:$0xff]  ;;  %v2308_v28 = vld [vmem:[#allocation2 + $0x180] sm:$0xff] }
 0x2aa   : > { %v19166_v19 = vpop.permute.xlu1 %17103  ;;  %v17132_v42 = vpack.i.bf16 %v22354_v7, %v1893_v58  ;;  %v22353_v45 = vmax.f32 %v19224_v49, 0.0  ;;  %v2430_v7 = vld [vmem:[#allocation2 + $0x550] sm:$0xff]  ;;  %vm22466_vm12 = vmmov %vm22465_vm0 }
 0x2ab   : > { %v17106_v32 = vunpack.i.h.bf16 %v19166_v19  ;;  %v17105_v24 = vunpack.i.l.bf16 %v19166_v19  ;;  %14634 = vmatprep.subr.msk.bf16.mxu1 %vm18406_vm3, %v14632_v39  ;;  %v19172_v10 = vpop.permute.xlu0 %17108  ;;  %v22352_v54 = vmax.f32 %v19211_v50, 0.0  ;;  %vm22468_vm13 = vmmov %vm22465_vm0 }
 0x2ac   : > { %v17110_v5 = vunpack.i.l.bf16 %v19172_v10  ;;  %14637 = vmatpush3.bf16.msk.msra.mxu1 %vm18406_vm3, %v14632_v39  ;;  %v2287_v39 = vld [vmem:[#allocation2 + $0xd8] sm:$0xff]  ;;  %vm22460_vm3 = vmmov %vm22457_vm2 }
 0x2ad   : > { %v2009_v35 = vsel %vm22456_vm11, %v17105_v24, %v17106_v32  ;;  %15109 = vmatprep.subr.bf16.mxu1 %v15108_v26  ;;  %v2293_v26 = vld [vmem:[#allocation2 + $0x108] sm:$0xff]  ;;  %v15118_v51 = vpack.c.bf16 %v2287_v39, %v2282_v11  ;;  %v19250_v11 = vadd.f32 %v19081_v4, %v18960_v37  ;;  %vm22469_vm14 = vmmov %vm22465_vm0 }
 0x2ae   : > { %v2010_v9 = vsel %vm22457_vm2, %v17106_v32, %v17110_v5  ;;  %v19193_v25 = vmax.f32 %v22458_v53, %v2009_v35  ;;  %v19228_v32 = vadd.f32 %v19075_v61, %v18960_v37  ;;  %v2292_v35 = vld [vmem:[#allocation2 + $0x100] sm:$0xff]  ;;  %v17137_v61 = vpack.i.bf16 %v22352_v54, %v22356_v48  ;;  %vm22472_vm6 = vmmov %vm22465_vm0 }
 0x2af   : > { %13782 = vmatmul.mubr.msk.f32.vlgmr.msra.gmra.mrb[14].mxu1 %vm1223_vm15, %v17628_v31  ;;  %v19201_v23 = vmax.f32 %v22459_v18, %v2010_v9  ;;  %v19233_v9 = vadd.f32 %v19077_v63, %v18805_v52  ;;  %v15124_v31 = vpack.c.bf16 %v2308_v28, %v2303_v55  ;;  %v2302_v18 = vld [vmem:[#allocation2 + $0x150] sm:$0xff]  ;;  %v2307_v63 = vld [vmem:[#allocation2 + $0x178] sm:$0xff]  ;;  %v22345_v55 = vmax.f32 %v19250_v11, 0.0  ;;  %vm22461_vm15 = vmmov %vm22457_vm2 }
 0x2b0   : > { %15111 = vmatpush1.bf16.msra.mxu1 %v15110_v6  ;;  %v15120_v6 = vpack.c.bf16 %v2298_v30, %v2293_v26  ;;  %v22346_v29 = vmax.f32 %v19228_v32, 0.0  ;;  %v15126_v39 = vpack.c.bf16 %v2307_v63, %v2302_v18  ;;  %v19258_v30 = vadd.f32 %v19083_v14, %v18960_v37  ;;  %v2322_v18 = vld [vmem:[#allocation2 + $0x1f0] sm:$0xff]  ;;  %v2327_v63 = vld [vmem:[#allocation2 + $0x218] sm:$0xff]  ;;  %vm22473_vm9 = vmmov %vm22465_vm0 }
 0x2b1   : > { %v17127_v47 = vpack.i.bf16 %v19201_v23, %v19193_v25  ;;  %15113 = vmatprep.subr.bf16.mxu1 %v15112_v62  ;;  %v2297_v62 = vld [vmem:[#allocation2 + $0x128] sm:$0xff]  ;;  %v22351_v20 = vmax.f32 %v19233_v9, 0.0  ;;  %vm22476_vm10 = vmmov %vm22465_vm0 }
 0x2b2   : > { %v15122_v53 = vpack.c.bf16 %v2297_v62, %v2292_v35  ;;  %v17142_v26 = vpack.i.bf16 %v22346_v29, %v22353_v45  ;;  %v2323_v35 = vld [vmem:[#allocation2 + $0x1f8] sm:$0xff]  ;;  %v2328_v62 = vld [vmem:[#allocation2 + $0x220] sm:$0xff]  ;;  %v22339_v14 = vmax.f32 %v19258_v30, 0.0  ;;  %v2373_v29 = vld [vmem:[#allocation2 + $0x388] sm:$0xff] }
 0x2b3   : > { %17128 = vrot.lane.b32.xlu0 %v17127_v47, %s17859_s24  ;;  %v2318_v47 = vld [vmem:[#allocation2 + $0x1d0] sm:$0xff]  ;;  %vm22477_vm11 = vmmov %vm22465_vm0 }
 0x2b4   : > { %15115 = vmatpush1.bf16.msra.mxu1 %v15114_v1  ;;  %v2313_v1 = vld [vmem:[#allocation2 + $0x1a8] sm:$0xff]  ;;  %vm22480_vm2 = vmmov %vm22465_vm0 }
 0x2b5   : > { %15117 = vmatprep.subr.bf16.mxu1 %v15116_v38  ;;  %v22340_v38 = vmax.f32 %v19237_v57, 0.0 }
 0x2b7   : > { %17133 = vrot.lane.b32.xlu0 %v17132_v42, %s17858_s19  ;;  %v15128_v42 = vpack.c.bf16 %v2318_v47, %v2313_v1  ;;  %v17157_v4 = vpack.i.bf16 %v22340_v38, %v22351_v20  ;;  %v2333_v1 = vld [vmem:[#allocation2 + $0x248] sm:$0xff]  ;;  %v2338_v47 = vld [vmem:[#allocation2 + $0x270] sm:$0xff] }
 0x2b8   : > { %15119 = vmatpush1.bf16.msra.mxu1 %v15118_v51  ;;  %v2312_v51 = vld [vmem:[#allocation2 + $0x1a0] sm:$0xff]  ;;  %v2353_v38 = vld [vmem:[#allocation2 + $0x2e8] sm:$0xff] }
 0x2b9   : > { %15121 = vmatprep.subr.bf16.mxu1 %v15120_v6  ;;  %v2317_v6 = vld [vmem:[#allocation2 + $0x1c8] sm:$0xff] }
 0x2ba   : > { %v15130_v28 = vpack.c.bf16 %v2317_v6, %v2312_v51  ;;  %v15136_v6 = vpack.c.bf16 %v2338_v47, %v2333_v1  ;;  %v19303_v1 = vadd.f32 %v19095_v16, %v18805_v52 }
 0x2bb   : > { %17138 = vrot.lane.b32.xlu0 %v17137_v61, %s17858_s19  ;;  %v19273_v61 = vadd.f32 %v19087_v41, %v18805_v52  ;;  %v17162_v41 = vpack.i.bf16 %v22339_v14, %v22345_v55  ;;  %v2367_v55 = vld [vmem:[#allocation2 + $0x358] sm:$0xff] }
 0x2bc   : > { %15123 = vmatpush1.bf16.msra.mxu1 %v15122_v53  ;;  %v19269_v53 = vadd.f32 %v19085_v43, %v18805_v52  ;;  %v19282_v43 = vadd.f32 %v19091_v15, %v18960_v37  ;;  %v22347_v16 = vmax.f32 %v19303_v1, 0.0 }
 0x2bd   : > { %15125 = vmatprep.subr.bf16.mxu1 %v15124_v31  ;;  %v15132_v31 = vpack.c.bf16 %v2328_v62, %v2323_v35  ;;  %v22341_v51 = vmax.f32 %v19273_v61, 0.0  ;;  %v2332_v35 = vld [vmem:[#allocation2 + $0x240] sm:$0xff]  ;;  %v2343_v62 = vld [vmem:[#allocation2 + $0x298] sm:$0xff] }
 0x2bf   : > { %17143 = vrot.lane.b32.xlu0 %v17142_v26, %s17858_s19  ;;  %v15134_v26 = vpack.c.bf16 %v2327_v63, %v2322_v18  ;;  %v2342_v63 = vld [vmem:[#allocation2 + $0x290] sm:$0xff] }
 0x2c0   : > { %15127 = vmatpush1.bf16.msra.mxu1 %v15126_v39  ;;  %v19278_v39 = vadd.f32 %v19089_v46, %v18960_v37  ;;  %v2337_v46 = vld [vmem:[#allocation2 + $0x268] sm:$0xff] }
 0x2c1   : > { %15129 = vmatprep.subr.bf16.mxu1 %v15128_v42  ;;  %v22342_v42 = vmax.f32 %v19269_v53, 0.0  ;;  %v15138_v18 = vpack.c.bf16 %v2337_v46, %v2332_v35 }
 0x2c2   : > { %v22344_v15 = vmax.f32 %v19278_v39, 0.0 }
 0x2c3   : > { %17158 = vrot.lane.b32.xlu0 %v17157_v4, %s17858_s19  ;;  %v2348_v4 = vld [vmem:[#allocation2 + $0x2c0] sm:$0xff]  ;;  %v17177_v14 = vpack.i.bf16 %v22341_v51, %v22342_v42 }
 0x2c4   : > { %15131 = vmatpush1.bf16.msra.mxu1 %v15130_v28  ;;  %v22343_v28 = vmax.f32 %v19282_v43, 0.0  ;;  %v15140_v47 = vpack.c.bf16 %v2348_v4, %v2343_v62  ;;  %v2352_v51 = vld [vmem:[#allocation2 + $0x2e0] sm:$0xff]  ;;  %v2357_v62 = vld [vmem:[#allocation2 + $0x308] sm:$0xff] }
 0x2c5   : > { %15133 = vmatprep.subr.bf16.mxu1 %v15132_v31  ;;  %v19299_v31 = vadd.f32 %v19093_v44, %v18805_v52  ;;  %v2421_v4 = vld [vmem:[#allocation2 + $0x508] sm:$0xff] }
 0x2c6   : > { %v17182_v35 = vpack.i.bf16 %v22343_v28, %v22344_v15  ;;  %v2426_v28 = vld [vmem:[#allocation2 + $0x530] sm:$0xff] }
 0x2c7   : > { %17163 = vrot.lane.b32.xlu0 %v17162_v41, %s17858_s19  ;;  %v2347_v41 = vld [vmem:[#allocation2 + $0x2b8] sm:$0xff]  ;;  %v22350_v42 = vmax.f32 %v19299_v31, 0.0  ;;  %v2362_v15 = vld [vmem:[#allocation2 + $0x330] sm:$0xff] }
 0x2c8   : > { %15135 = vmatpush1.bf16.msra.mxu1 %v15134_v26  ;;  %v2358_v26 = vld [vmem:[#allocation2 + $0x310] sm:$0xff]  ;;  %v15142_v46 = vpack.c.bf16 %v2347_v41, %v2342_v63  ;;  %v2368_v63 = vld [vmem:[#allocation2 + $0x360] sm:$0xff]  ;;  %v15146_v41 = vpack.c.bf16 %v2357_v62, %v2352_v51  ;;  %v15150_v51 = vpack.c.bf16 %v2367_v55, %v2362_v15  ;;  %v2393_v55 = vld [vmem:[#allocation2 + $0x428] sm:$0xff] }
 0x2c9   : > { %15137 = vmatprep.subr.bf16.mxu1 %v15136_v6  ;;  %v15144_v44 = vpack.c.bf16 %v2358_v26, %v2353_v38  ;;  %v19314_v6 = vadd.f32 %v19097_v21, %v18960_v37  ;;  %v14702_v38 = vpack.c.bf16 %v2426_v28, %v2421_v4  ;;  %v17197_v21 = vpack.i.bf16 %v22347_v16, %v22350_v42  ;;  %v2378_v28 = vld [vmem:[#allocation2 + $0x3b0] sm:$0xff]  ;;  %v2372_v62 = vld [vmem:[#allocation2 + $0x380] sm:$0xff]  ;;  %v2377_v4 = vld [vmem:[#allocation2 + $0x3a8] sm:$0xff] }
 0x2ca   : > { %v2398_v15 = vld [vmem:[#allocation2 + $0x450] sm:$0xff] }
 0x2cb   : > { %17178 = vrot.lane.b32.xlu0 %v17177_v14, %s17858_s19  ;;  %v19318_v14 = vadd.f32 %v19099_v12, %v18960_v37  ;;  %14703 = vmatprep.subr.bf16.mxu0 %v14702_v38  ;;  %v22349_v12 = vmax.f32 %v19314_v6, 0.0  ;;  %v2383_v38 = vld [vmem:[#allocation2 + $0x3d8] sm:$0xff] }
 0x2cc   : > { %15139 = vmatpush1.bf16.msra.mxu1 %v15138_v18  ;;  %v2363_v18 = vld [vmem:[#allocation2 + $0x338] sm:$0xff] }
 0x2cd   : > { %15141 = vmatprep.subr.bf16.mxu1 %v15140_v47  ;;  %v22348_v47 = vmax.f32 %v19318_v14, 0.0  ;;  %v15148_v26 = vpack.c.bf16 %v2368_v63, %v2363_v18  ;;  %v15154_v18 = vpack.c.bf16 %v2377_v4, %v2372_v62  ;;  %v2407_v62 = vld [vmem:[#allocation2 + $0x498] sm:$0xff]  ;;  %v2418_v4 = vld [vmem:[#allocation2 + $0x4f0] sm:$0xff] }
 0x2cf   : > { %17183 = vrot.lane.b32.xlu0 %v17182_v35, %s17858_s19  ;;  %v17202_v35 = vpack.i.bf16 %v22348_v47, %v22349_v12  ;;  %v15160_v47 = vpack.c.bf16 %v2398_v15, %v2393_v55  ;;  %v2408_v12 = vld [vmem:[#allocation2 + $0x4a0] sm:$0xff] }
 0x2d0   : > { %15143 = vmatpush1.bf16.msra.mxu1 %v15142_v46  ;;  %v15152_v46 = vpack.c.bf16 %v2378_v28, %v2373_v29  ;;  %v2397_v29 = vld [vmem:[#allocation2 + $0x448] sm:$0xff]  ;;  %v2403_v28 = vld [vmem:[#allocation2 + $0x478] sm:$0xff] }
 0x2d1   : > { %15145 = vmatprep.subr.bf16.mxu1 %v15144_v44  ;;  %v2388_v44 = vld [vmem:[#allocation2 + $0x400] sm:$0xff] }
 0x2d2   : > { %v15156_v63 = vpack.c.bf16 %v2388_v44, %v2383_v38 }
 0x2d3   : > { %17198 = vrot.lane.b32.xlu0 %v17197_v21, %s17858_s19  ;;  %v2382_v21 = vld [vmem:[#allocation2 + $0x3d0] sm:$0xff] }
 0x2d4   : > { %15147 = vmatpush1.bf16.msra.mxu1 %v15146_v41  ;;  %v2387_v41 = vld [vmem:[#allocation2 + $0x3f8] sm:$0xff] }
 0x2d5   : > { %15149 = vmatprep.subr.bf16.mxu1 %v15148_v26  ;;  %v15158_v16 = vpack.c.bf16 %v2387_v41, %v2382_v21  ;;  %v2392_v26 = vld [vmem:[#allocation2 + $0x420] sm:$0xff]  ;;  %v2417_v21 = vld [vmem:[#allocation2 + $0x4e8] sm:$0xff] }
 0x2d6   : > { %v15162_v42 = vpack.c.bf16 %v2397_v29, %v2392_v26  ;;  %v2428_v41 = vld [vmem:[#allocation2 + $0x540] sm:$0xff]  ;;  %v17111_v26 = vunpack.i.h.bf16 %v19172_v10 }
 0x2d7   : > { %17203 = vrot.lane.b32.xlu0 %v17202_v35, %s17858_s19  ;;  %v15164_v35 = vpack.c.bf16 %v2408_v12, %v2403_v28  ;;  %v2420_v12 = vld [vmem:[#allocation2 + $0x500] sm:$0xff]  ;;  %v2422_v28 = vld [vmem:[#allocation2 + $0x510] sm:$0xff] }
 0x2d8   : > { %15151 = vmatpush1.bf16.msra.mxu1 %v15150_v51  ;;  %v2402_v51 = vld [vmem:[#allocation2 + $0x470] sm:$0xff] }
 0x2d9   : > { %15153 = vmatprep.subr.bf16.mxu1 %v15152_v46  ;;  %v2413_v46 = vld [vmem:[#allocation2 + $0x4c8] sm:$0xff]  ;;  %v15166_v38 = vpack.c.bf16 %v2407_v62, %v2402_v51  ;;  %v2431_v51 = vld [vmem:[#allocation2 + $0x558] sm:$0xff] }
 0x2da   : > { %v15168_v44 = vpack.c.bf16 %v2418_v4, %v2413_v46  ;;  %v2436_v46 = vld [vmem:[#allocation2 + $0x580] sm:$0xff]  ;;  %v2433_v4 = vld [vmem:[#allocation2 + $0x568] sm:$0xff] }
 0x2db   : > { %v14706_v54 = vpack.c.bf16 %v2436_v46, %v2431_v51 }
 0x2dc   : > { %15155 = vmatpush1.bf16.msra.mxu1 %v15154_v18  ;;  %v2412_v18 = vld [vmem:[#allocation2 + $0x4c0] sm:$0xff] }
 0x2dd   : > { %15157 = vmatprep.subr.bf16.mxu1 %v15156_v63  ;;  %v2423_v63 = vld [vmem:[#allocation2 + $0x518] sm:$0xff]  ;;  %v15170_v55 = vpack.c.bf16 %v2417_v21, %v2412_v18 }
 0x2de   : > { %v15172_v15 = vpack.c.bf16 %v2428_v41, %v2423_v63 }
 0x2e0   : > { %15159 = vmatpush1.bf16.msra.mxu1 %v15158_v16 }
 0x2e1   : > { %15161 = vmatprep.subr.bf16.mxu1 %v15160_v47  ;;  %v2425_v47 = vld [vmem:[#allocation2 + $0x528] sm:$0xff] }
 0x2e4   : > { %15163 = vmatpush1.bf16.msra.mxu1 %v15162_v42 }
 0x2e5   : > { %15165 = vmatprep.subr.bf16.mxu1 %v15164_v35  ;;  %v2427_v35 = vld [vmem:[#allocation2 + $0x538] sm:$0xff] }
 0x2e8   : > { %15167 = vmatpush1.bf16.msra.mxu1 %v15166_v38  ;;  %v2438_v38 = vld [vmem:[#allocation2 + $0x590] sm:$0xff] }
 0x2e9   : > { %15169 = vmatprep.subr.bf16.mxu1 %v15168_v44  ;;  %v15176_v45 = vpack.c.bf16 %v2438_v38, %v2433_v4 }
 0x2ec   : > { %15171 = vmatpush1.bf16.msra.mxu1 %v15170_v55  ;;  %v14704_v55 = vpack.c.bf16 %v2425_v47, %v2420_v12  ;;  %v2448_v47 = vld [vmem:[#allocation2 + $0x5e0] sm:$0xff] }
 0x2ed   : > { %15173 = vmatprep.subr.bf16.mxu1 %v15172_v15  ;;  %v15174_v15 = vpack.c.bf16 %v2427_v35, %v2422_v28  ;;  %v22463_v35 = vmax.f32 %v19042_v2, 0.0 }
 0x313   : > { %v2113_v62 = vpop.permute.xlu0 %2112 }
 0x315   : > { %v19333_v16 = vpop.permute.xlu1 %17113 }
 0x316   : > { %v22355_v42 = vunpack.i.h.bf16 %v19333_v16  ;;  %v17115_v29 = vunpack.i.l.bf16 %v19333_v16 }
 0x318   : > { %v2172_v44 = vsel %vm770_vm4, %v2113_v62, %v17115_v29  ;;  %v2173_v18 = vsel %vm770_vm4, %v17115_v29, %v22355_v42  ;;  %v2008_v62 = vsel %vm22460_vm3, %v17111_v26, %v17105_v24  ;;  %v2435_v29 = vld [vmem:[#allocation2 + $0x578] sm:$0xff]  ;;  %v2432_v42 = vld [vmem:[#allocation2 + $0x560] sm:$0xff]  ;;  %v22462_v26 = vmax.f32 %v19012_v13, 0.0  ;;  %vm22481_vm3 = vmmov %vm22465_vm0 }
 0x319   : > { %v19343_v21 = vmax.f32 %v19127_v56, %v2172_v44  ;;  %v19345_v63 = vpop.permute.xlu1 %17118  ;;  %v19348_v41 = vmax.f32 %v19120_v34, %v2173_v18  ;;  %v2437_v56 = vld [vmem:[#allocation2 + $0x588] sm:$0xff]  ;;  %v2446_v44 = vld [vmem:[#allocation2 + $0x5d0] sm:$0xff]  ;;  %v2443_v24 = vld [vmem:[#allocation2 + $0x5b8] sm:$0xff]  ;;  %v19368_v51 = vmax.f32 %v22463_v35, %v2008_v62  ;;  %v14708_v46 = vpack.c.bf16 %v2435_v29, %v2430_v7 }
 0x31a   : > { %v17120_v20 = vunpack.i.l.bf16 %v19345_v63  ;;  %v2441_v34 = vld [vmem:[#allocation2 + $0x5a8] sm:$0xff]  ;;  %v17121_v12 = vunpack.i.h.bf16 %v19345_v63  ;;  %v15178_v4 = vpack.c.bf16 %v2437_v56, %v2432_v42  ;;  %v15180_v13 = vpack.c.bf16 %v2448_v47, %v2443_v24  ;;  %v2458_v7 = vld [vmem:[#allocation2 + $0x630] sm:$0xff]  ;;  %v2455_v62 = vld [vmem:[#allocation2 + $0x618] sm:$0xff] }
 0x31b   : > { %3516 = vmatprep.mubr.f32.mxu0 %v19348_v41  ;;  %4132 = vmatprep.mubr.f32.mxu1 %v19348_v41  ;;  %v14710_v38 = vpack.c.bf16 %v2446_v44, %v2441_v34  ;;  %v2445_v18 = vld [vmem:[#allocation2 + $0x5c8] sm:$0xff]  ;;  %v2452_v29 = vld [vmem:[#allocation2 + $0x600] sm:$0xff]  ;;  %v2466_v24 = vld [vmem:[#allocation2 + $0x670] sm:$0xff] }
 0x31c   : > { %3517 = vmatmul.mubr.f32.vlgmr.msra.gmra.mrb[14].mxu0 %v19343_v21  ;;  %4133 = vmatmul.mubr.f32.vlgmr.msra.gmra.mrb[16].mxu1 %v19343_v21  ;;  %v1997_v19 = vsel %vm22461_vm15, %v17100_v60, %v17120_v20  ;;  %v2442_v60 = vld [vmem:[#allocation2 + $0x5b0] sm:$0xff]  ;;  %v1998_v2 = vsel %vm22464_vm1, %v17120_v20, %v17121_v12  ;;  %v2457_v20 = vld [vmem:[#allocation2 + $0x628] sm:$0xff]  ;;  %v2468_v35 = vld [vmem:[#allocation2 + $0x680] sm:$0xff] }
 0x31d   : > { %v19364_v28 = vmax.f32 %v22462_v26, %v1997_v19  ;;  %14705 = vmatpush1.bf16.msra.mxu0 %v14704_v55  ;;  %15175 = vmatpush1.bf16.msra.mxu1 %v15174_v15  ;;  %v2447_v19 = vld [vmem:[#allocation2 + $0x5d8] sm:$0xff]  ;;  %v2453_v55 = vld [vmem:[#allocation2 + $0x608] sm:$0xff]  ;;  %v2450_v15 = vld [vmem:[#allocation2 + $0x5f0] sm:$0xff]  ;;  %v19378_v56 = vmax.f32 %v1878_v59, %v1998_v2  ;;  %v15186_v59 = vpack.c.bf16 %v2457_v20, %v2452_v29 }
 0x31e   : > { %14707 = vmatprep.subr.bf16.mxu0 %v14706_v54  ;;  %15177 = vmatprep.subr.bf16.mxu1 %v15176_v45  ;;  %v2451_v26 = vld [vmem:[#allocation2 + $0x5f8] sm:$0xff]  ;;  %v14712_v54 = vpack.c.bf16 %v2445_v18, %v2440_v36  ;;  %v15182_v45 = vpack.c.bf16 %v2447_v19, %v2442_v60  ;;  %v15184_v34 = vpack.c.bf16 %v2458_v7, %v2453_v55  ;;  %v2461_v44 = vld [vmem:[#allocation2 + $0x648] sm:$0xff]  ;;  %v2462_v18 = vld [vmem:[#allocation2 + $0x650] sm:$0xff] }
 0x31f   : > { %v17122_v48 = vpack.i.bf16 %v19364_v28, %v19368_v51  ;;  %v14714_v42 = vpack.c.bf16 %v2456_v40, %v2451_v26  ;;  %v2463_v40 = vld [vmem:[#allocation2 + $0x658] sm:$0xff]  ;;  %v2465_v36 = vld [vmem:[#allocation2 + $0x668] sm:$0xff]  ;;  %v2476_v19 = vld [vmem:[#allocation2 + $0x6c0] sm:$0xff] }
 0x320   : > { %v2467_v60 = vld [vmem:[#allocation2 + $0x678] sm:$0xff]  ;;  %v15188_v2 = vpack.c.bf16 %v2468_v35, %v2463_v40  ;;  %v2473_v55 = vld [vmem:[#allocation2 + $0x6a8] sm:$0xff]  ;;  %v2478_v7 = vld [vmem:[#allocation2 + $0x6d0] sm:$0xff] }
 0x321   : > { %17123 = vrot.lane.b32.xlu1 %v17122_v48, %s17859_s24  ;;  %14709 = vmatpush1.bf16.msra.mxu0 %v14708_v46  ;;  %v14716_v48 = vpack.c.bf16 %v2455_v62, %v2450_v15  ;;  %v15190_v29 = vpack.c.bf16 %v2467_v60, %v2462_v18  ;;  %v2470_v20 = vld [vmem:[#allocation2 + $0x690] sm:$0xff]  ;;  %v15192_v40 = vpack.c.bf16 %v2478_v7, %v2473_v55  ;;  %v2481_v35 = vld [vmem:[#allocation2 + $0x6e8] sm:$0xff]  ;;  %v22467_v60 = vmax.f32 %v19035_v17, 0.0  ;;  %v2480_v7 = vld [vmem:[#allocation2 + $0x6e0] sm:$0xff] }
 0x322   : > { %15179 = vmatpush1.bf16.msra.mxu1 %v15178_v4  ;;  %14711 = vmatprep.subr.bf16.mxu0 %v14710_v38  ;;  %v14718_v4 = vpack.c.bf16 %v2466_v24, %v2461_v44  ;;  %v2460_v38 = vld [vmem:[#allocation2 + $0x640] sm:$0xff]  ;;  %v2475_v44 = vld [vmem:[#allocation2 + $0x6b8] sm:$0xff]  ;;  %vm22484_vm15 = vmmov %vm22465_vm0 }
 0x323   : > { %15181 = vmatprep.subr.bf16.mxu1 %v15180_v13  ;;  %v2471_v13 = vld [vmem:[#allocation2 + $0x698] sm:$0xff]  ;;  %v2472_v24 = vld [vmem:[#allocation2 + $0x6a0] sm:$0xff]  ;;  %v14724_v10 = vpack.c.bf16 %v2475_v44, %v2470_v20  ;;  %v2498_v44 = vld [vmem:[#allocation2 + $0x770] sm:$0xff] }
 0x324   : > { %vm22485_vm1 = vmmov %vm22465_vm0 }
 0x325   : > { %v19380_v47 = vpop.permute.xlu0 %17128  ;;  %2120 = vrot.lane.b32.xlu1 %v19378_v56, %s17859_s24  ;;  %14713 = vmatpush1.bf16.msra.mxu0 %v14712_v54 }
 0x326   : > { %v22358_v46 = vunpack.i.h.bf16 %v19380_v47  ;;  %v17130_v33 = vunpack.i.l.bf16 %v19380_v47  ;;  %15183 = vmatpush1.bf16.msra.mxu1 %v15182_v45  ;;  %14715 = vmatprep.subr.bf16.mxu0 %v14714_v42  ;;  %v14720_v42 = vpack.c.bf16 %v2465_v36, %v2460_v38  ;;  %v2488_v36 = vld [vmem:[#allocation2 + $0x720] sm:$0xff] }
 0x327   : > { %15185 = vmatprep.subr.bf16.mxu1 %v15184_v34  ;;  %v14722_v34 = vpack.c.bf16 %v2476_v19, %v2471_v13 }
 0x328   : > { %v2187_v26 = vsel %vm770_vm4, %v17130_v33, %v22358_v46  ;;  %v2482_v46 = vld [vmem:[#allocation2 + $0x6f0] sm:$0xff] }
 0x329   : > { %v19391_v54 = vpop.permute.xlu0 %17133  ;;  %v19394_v45 = vmax.f32 %v19193_v25, %v2187_v26  ;;  %14717 = vmatpush1.bf16.msra.mxu0 %v14716_v48  ;;  %v2477_v25 = vld [vmem:[#allocation2 + $0x6c8] sm:$0xff]  ;;  %v2486_v48 = vld [vmem:[#allocation2 + $0x710] sm:$0xff] }
 0x32a   : > { %v17136_v15 = vunpack.i.h.bf16 %v19391_v54  ;;  %v17135_v62 = vunpack.i.l.bf16 %v19391_v54  ;;  %15187 = vmatpush1.bf16.msra.mxu1 %v15186_v59  ;;  %14719 = vmatprep.subr.bf16.mxu0 %v14718_v4  ;;  %v2483_v4 = vld [vmem:[#allocation2 + $0x6f8] sm:$0xff]  ;;  %v14726_v55 = vpack.c.bf16 %v2486_v48, %v2481_v35  ;;  %v22471_v35 = vmax.f32 %v19207_v27, 0.0 }
 0x32b   : > { %3522 = vmatprep.mubr.f32.mxu0 %v19394_v45  ;;  %4138 = vmatprep.mubr.f32.mxu1 %v19394_v45  ;;  %v15196_v0 = vpack.c.bf16 %v2488_v36, %v2483_v4 }
 0x32c   : > { %v2011_v38 = vsel %vm22465_vm0, %v17110_v5, %v17135_v62  ;;  %v2012_v59 = vsel %vm22466_vm12, %v17135_v62, %v17136_v15  ;;  %15189 = vmatprep.subr.bf16.mxu1 %v15188_v2  ;;  %v15194_v2 = vpack.c.bf16 %v2477_v25, %v2472_v24  ;;  %v2485_v62 = vld [vmem:[#allocation2 + $0x708] sm:$0xff]  ;;  %vm22488_vm12 = vmmov %vm22465_vm0 }
 0x32d   : > { %v19406_v18 = vpop.permute.xlu0 %17138  ;;  %v19410_v13 = vmax.f32 %v22467_v60, %v2011_v38  ;;  %v19414_v19 = vmax.f32 %v1893_v58, %v2012_v59  ;;  %14721 = vmatpush1.bf16.msra.mxu0 %v14720_v42  ;;  %v2487_v58 = vld [vmem:[#allocation2 + $0x718] sm:$0xff]  ;;  %v2496_v42 = vld [vmem:[#allocation2 + $0x760] sm:$0xff]  ;;  %v14728_v63 = vpack.c.bf16 %v2485_v62, %v2480_v7  ;;  %v2490_v60 = vld [vmem:[#allocation2 + $0x730] sm:$0xff] }
 0x32e   : > { %v17141_v5 = vunpack.i.h.bf16 %v19406_v18  ;;  %v17140_v26 = vunpack.i.l.bf16 %v19406_v18  ;;  %15191 = vmatpush1.bf16.msra.mxu1 %v15190_v29  ;;  %14723 = vmatprep.subr.bf16.mxu0 %v14722_v34  ;;  %v2491_v38 = vld [vmem:[#allocation2 + $0x738] sm:$0xff]  ;;  %v2493_v34 = vld [vmem:[#allocation2 + $0x748] sm:$0xff]  ;;  %v15198_v4 = vpack.c.bf16 %v2487_v58, %v2482_v46 }
 0x32f   : > { %v17147_v17 = vpack.i.bf16 %v19414_v19, %v19410_v13  ;;  %15193 = vmatprep.subr.bf16.mxu1 %v15192_v40  ;;  %v22470_v40 = vmax.f32 %v19111_v22, 0.0  ;;  %v14730_v36 = vpack.c.bf16 %v2496_v42, %v2491_v38  ;;  %v15200_v27 = vpack.c.bf16 %v2498_v44, %v2493_v34 }
 0x330   : > { %v1999_v20 = vsel %vm22468_vm13, %v17121_v12, %v17140_v26  ;;  %v2000_v29 = vsel %vm22469_vm14, %v17140_v26, %v17141_v5  ;;  %v2495_v26 = vld [vmem:[#allocation2 + $0x758] sm:$0xff]  ;;  %v22475_v38 = vmax.f32 %v19224_v49, 0.0  ;;  %vm22491_vm13 = vmmov %vm22465_vm0 }
 0x331   : > { %v19426_v24 = vpop.permute.xlu0 %17143  ;;  %17148 = vrot.lane.b32.xlu1 %v17147_v17, %s17859_s24  ;;  %v19431_v25 = vmax.f32 %v22470_v40, %v1999_v20  ;;  %v19435_v48 = vmax.f32 %v22471_v35, %v2000_v29  ;;  %14725 = vmatpush1.bf16.msra.mxu0 %v14724_v10  ;;  %v2492_v17 = vld [vmem:[#allocation2 + $0x740] sm:$0xff]  ;;  %v2497_v20 = vld [vmem:[#allocation2 + $0x768] sm:$0xff]  ;;  %v2506_v10 = vld [vmem:[#allocation2 + $0x7b0] sm:$0xff]  ;;  %v14732_v54 = vpack.c.bf16 %v2495_v26, %v2490_v60 }
 0x332   : > { %v17146_v12 = vunpack.i.h.bf16 %v19426_v24  ;;  %v17145_v59 = vunpack.i.l.bf16 %v19426_v24  ;;  %15195 = vmatpush1.bf16.msra.mxu1 %v15194_v2  ;;  %14727 = vmatprep.subr.bf16.mxu0 %v14726_v55  ;;  %v2501_v29 = vld [vmem:[#allocation2 + $0x788] sm:$0xff]  ;;  %v2503_v2 = vld [vmem:[#allocation2 + $0x798] sm:$0xff]  ;;  %v2508_v55 = vld [vmem:[#allocation2 + $0x7c0] sm:$0xff]  ;;  %v15202_v44 = vpack.c.bf16 %v2497_v20, %v2492_v17 }
 0x333   : > { %v17152_v22 = vpack.i.bf16 %v19435_v48, %v19431_v25  ;;  %15197 = vmatprep.subr.bf16.mxu1 %v15196_v0  ;;  %v22474_v0 = vmax.f32 %v19180_v3, 0.0  ;;  %v14734_v40 = vpack.c.bf16 %v2506_v10, %v2501_v29  ;;  %v2500_v35 = vld [vmem:[#allocation2 + $0x780] sm:$0xff]  ;;  %v15204_v49 = vpack.c.bf16 %v2508_v55, %v2503_v2  ;;  %v2518_v26 = vld [vmem:[#allocation2 + $0x810] sm:$0xff]  ;;  %vm22492_vm14 = vmmov %vm22465_vm0 }
 0x334   : > { %v2013_v7 = vsel %vm22472_vm6, %v17136_v15, %v17145_v59  ;;  %v2014_v46 = vsel %vm22473_vm9, %v17145_v59, %v17146_v12  ;;  %v2505_v59 = vld [vmem:[#allocation2 + $0x7a8] sm:$0xff]  ;;  %v22479_v29 = vmax.f32 %v19233_v9, 0.0  ;;  %vm22495_vm6 = vmmov %vm22465_vm0 }
 0x335   : > { %v19447_v62 = vpop.permute.xlu0 %17158  ;;  %17153 = vrot.lane.b32.xlu1 %v17152_v22, %s17859_s24  ;;  %v19452_v58 = vmax.f32 %v22474_v0, %v2013_v7  ;;  %v19456_v42 = vmax.f32 %v22475_v38, %v2014_v46  ;;  %14729 = vmatpush1.bf16.msra.mxu0 %v14728_v63  ;;  %v2502_v22 = vld [vmem:[#allocation2 + $0x790] sm:$0xff]  ;;  %v2507_v7 = vld [vmem:[#allocation2 + $0x7b8] sm:$0xff]  ;;  %v2516_v63 = vld [vmem:[#allocation2 + $0x800] sm:$0xff]  ;;  %v14736_v18 = vpack.c.bf16 %v2505_v59, %v2500_v35 }
 0x336   : > { %v17161_v15 = vunpack.i.h.bf16 %v19447_v62  ;;  %v17160_v34 = vunpack.i.l.bf16 %v19447_v62  ;;  %15199 = vmatpush1.bf16.msra.mxu1 %v15198_v4  ;;  %14731 = vmatprep.subr.bf16.mxu0 %v14730_v36  ;;  %v2511_v46 = vld [vmem:[#allocation2 + $0x7d8] sm:$0xff]  ;;  %v2513_v36 = vld [vmem:[#allocation2 + $0x7e8] sm:$0xff]  ;;  %v15206_v55 = vpack.c.bf16 %v2507_v7, %v2502_v22  ;;  %v2510_v38 = vld [vmem:[#allocation2 + $0x7d0] sm:$0xff] }
 0x337   : > { %v17167_v3 = vpack.i.bf16 %v19456_v42, %v19452_v58  ;;  %15201 = vmatprep.subr.bf16.mxu1 %v15200_v27  ;;  %v22478_v27 = vmax.f32 %v19211_v50, 0.0  ;;  %v14738_v0 = vpack.c.bf16 %v2516_v63, %v2511_v46  ;;  %v15208_v9 = vpack.c.bf16 %v2518_v26, %v2513_v36  ;;  %v2528_v59 = vld [vmem:[#allocation2 + $0x860] sm:$0xff]  ;;  %vm22496_vm9 = vmmov %vm22465_vm0 }
 0x338   : > { %v2001_v60 = vsel %vm22476_vm10, %v17141_v5, %v17160_v34  ;;  %v2002_v4 = vsel %vm22477_vm11, %v17160_v34, %v17161_v15  ;;  %v2515_v34 = vld [vmem:[#allocation2 + $0x7f8] sm:$0xff]  ;;  %v22483_v46 = vmax.f32 %v19250_v11, 0.0  ;;  %vm22504_vm10 = vmmov %vm22465_vm0 }
 0x339   : > { %v19468_v17 = vpop.permute.xlu0 %17163  ;;  %17168 = vrot.lane.b32.xlu1 %v17167_v3, %s17859_s24  ;;  %v19473_v20 = vmax.f32 %v22478_v27, %v2001_v60  ;;  %v19477_v10 = vmax.f32 %v22479_v29, %v2002_v4  ;;  %14733 = vmatpush1.bf16.msra.mxu0 %v14732_v54  ;;  %v2512_v3 = vld [vmem:[#allocation2 + $0x7e0] sm:$0xff]  ;;  %v2517_v60 = vld [vmem:[#allocation2 + $0x808] sm:$0xff]  ;;  %v2526_v54 = vld [vmem:[#allocation2 + $0x850] sm:$0xff]  ;;  %v14740_v24 = vpack.c.bf16 %v2515_v34, %v2510_v38 }
 0x33a   : > { %v17166_v5 = vunpack.i.h.bf16 %v19468_v17  ;;  %v17165_v2 = vunpack.i.l.bf16 %v19468_v17  ;;  %15203 = vmatpush1.bf16.msra.mxu1 %v15202_v44  ;;  %14735 = vmatprep.subr.bf16.mxu0 %v14734_v40  ;;  %v2521_v4 = vld [vmem:[#allocation2 + $0x828] sm:$0xff]  ;;  %v2523_v40 = vld [vmem:[#allocation2 + $0x838] sm:$0xff]  ;;  %v15210_v26 = vpack.c.bf16 %v2517_v60, %v2512_v3  ;;  %v2520_v29 = vld [vmem:[#allocation2 + $0x820] sm:$0xff] }
 0x33b   : > { %v17172_v50 = vpack.i.bf16 %v19477_v10, %v19473_v20  ;;  %15205 = vmatprep.subr.bf16.mxu1 %v15204_v49  ;;  %v22482_v49 = vmax.f32 %v19228_v32, 0.0  ;;  %v14742_v27 = vpack.c.bf16 %v2526_v54, %v2521_v4  ;;  %v15212_v11 = vpack.c.bf16 %v2528_v59, %v2523_v40  ;;  %v2538_v34 = vld [vmem:[#allocation2 + $0x8b0] sm:$0xff]  ;;  %vm22508_vm11 = vmmov %vm22465_vm0 }
 0x33c   : > { %v2015_v35 = vsel %vm22480_vm2, %v17146_v12, %v17165_v2  ;;  %v2016_v44 = vsel %vm22481_vm3, %v17165_v2, %v17166_v5  ;;  %v2525_v2 = vld [vmem:[#allocation2 + $0x848] sm:$0xff]  ;;  %v22487_v4 = vmax.f32 %v19269_v53, 0.0  ;;  %vm3430_vm3 = vcmask 613376  }
 0x33d   : > { %v19489_v22 = vpop.permute.xlu0 %17178  ;;  %17173 = vrot.lane.b32.xlu1 %v17172_v50, %s17859_s24  ;;  %v19494_v7 = vmax.f32 %v22482_v49, %v2015_v35  ;;  %v19498_v63 = vmax.f32 %v22483_v46, %v2016_v44  ;;  %14737 = vmatpush1.bf16.msra.mxu0 %v14736_v18  ;;  %v2522_v50 = vld [vmem:[#allocation2 + $0x830] sm:$0xff]  ;;  %v2527_v35 = vld [vmem:[#allocation2 + $0x858] sm:$0xff]  ;;  %v2536_v18 = vld [vmem:[#allocation2 + $0x8a0] sm:$0xff]  ;;  %v14744_v62 = vpack.c.bf16 %v2525_v2, %v2520_v29 }
 0x33e   : > { %v17181_v12 = vunpack.i.h.bf16 %v19489_v22  ;;  %v17180_v36 = vunpack.i.l.bf16 %v19489_v22  ;;  %15207 = vmatpush1.bf16.msra.mxu1 %v15206_v55  ;;  %14739 = vmatprep.subr.bf16.mxu0 %v14738_v0  ;;  %v2531_v44 = vld [vmem:[#allocation2 + $0x878] sm:$0xff]  ;;  %v2533_v0 = vld [vmem:[#allocation2 + $0x888] sm:$0xff]  ;;  %v15214_v59 = vpack.c.bf16 %v2527_v35, %v2522_v50  ;;  %v2530_v46 = vld [vmem:[#allocation2 + $0x870] sm:$0xff] }
 0x33f   : > { %v17187_v32 = vpack.i.bf16 %v19498_v63, %v19494_v7  ;;  %15209 = vmatprep.subr.bf16.mxu1 %v15208_v9  ;;  %v22486_v9 = vmax.f32 %v19237_v57, 0.0  ;;  %v14746_v49 = vpack.c.bf16 %v2536_v18, %v2531_v44  ;;  %v15216_v53 = vpack.c.bf16 %v2538_v34, %v2533_v0  ;;  %v2548_v2 = vld [vmem:[#allocation2 + $0x900] sm:$0xff] }
 0x340   : > { %v2003_v38 = vsel %vm22484_vm15, %v17161_v15, %v17180_v36  ;;  %v2004_v55 = vsel %vm22485_vm1, %v17180_v36, %v17181_v12  ;;  %v2535_v36 = vld [vmem:[#allocation2 + $0x898] sm:$0xff]  ;;  %v22490_v44 = vmax.f32 %v19278_v39, 0.0  ;;  %vm22521_vm15 = vmmov %vm22465_vm0 }
 0x341   : > { %v19510_v3 = vpop.permute.xlu0 %17183  ;;  %17188 = vrot.lane.b32.xlu1 %v17187_v32, %s17859_s24  ;;  %v19515_v60 = vmax.f32 %v22486_v9, %v2003_v38  ;;  %v19519_v54 = vmax.f32 %v22487_v4, %v2004_v55  ;;  %14741 = vmatpush1.bf16.msra.mxu0 %v14740_v24  ;;  %v2532_v32 = vld [vmem:[#allocation2 + $0x880] sm:$0xff]  ;;  %v2537_v38 = vld [vmem:[#allocation2 + $0x8a8] sm:$0xff]  ;;  %v2546_v24 = vld [vmem:[#allocation2 + $0x8f0] sm:$0xff]  ;;  %v14748_v17 = vpack.c.bf16 %v2535_v36, %v2530_v46 }
 0x342   : > { %v17186_v15 = vunpack.i.h.bf16 %v19510_v3  ;;  %v17185_v40 = vunpack.i.l.bf16 %v19510_v3  ;;  %15211 = vmatpush1.bf16.msra.mxu1 %v15210_v26  ;;  %14743 = vmatprep.subr.bf16.mxu0 %v14742_v27  ;;  %v2541_v55 = vld [vmem:[#allocation2 + $0x8c8] sm:$0xff]  ;;  %v2543_v27 = vld [vmem:[#allocation2 + $0x8d8] sm:$0xff]  ;;  %v15218_v34 = vpack.c.bf16 %v2537_v38, %v2532_v32  ;;  %v2540_v4 = vld [vmem:[#allocation2 + $0x8c0] sm:$0xff]  ;;  %v22493_v32 = vmax.f32 %v19273_v61, 0.0 }
 0x343   : > { %v17192_v57 = vpack.i.bf16 %v19519_v54, %v19515_v60  ;;  %15213 = vmatprep.subr.bf16.mxu1 %v15212_v11  ;;  %v22489_v11 = vmax.f32 %v19258_v30, 0.0  ;;  %v14750_v9 = vpack.c.bf16 %v2546_v24, %v2541_v55  ;;  %v15220_v39 = vpack.c.bf16 %v2548_v2, %v2543_v27  ;;  %v2558_v36 = vld [vmem:[#allocation2 + $0x950] sm:$0xff]  ;;  %v2555_v2 = vld [vmem:[#allocation2 + $0x938] sm:$0xff]  ;;  %vm22522_vm1 = vmmov %vm22465_vm0 }
 0x344   : > { %v2017_v29 = vsel %vm22465_vm0, %v17166_v5, %v17185_v40  ;;  %v2018_v26 = vsel %vm22488_vm12, %v17185_v40, %v17186_v15  ;;  %v2545_v40 = vld [vmem:[#allocation2 + $0x8e8] sm:$0xff]  ;;  %v2550_v27 = vld [vmem:[#allocation2 + $0x910] sm:$0xff]  ;;  %v22498_v3 = vmax.f32 %v19314_v6, 0.0  ;;  %vm22523_vm0 = vcmask 1031168  }
 0x345   : > { %v19531_v50 = vpop.permute.xlu0 %17198  ;;  %17193 = vrot.lane.b32.xlu1 %v17192_v57, %s17859_s24  ;;  %v19536_v35 = vmax.f32 %v22489_v11, %v2017_v29  ;;  %v19540_v18 = vmax.f32 %v22490_v44, %v2018_v26  ;;  %14745 = vmatpush1.bf16.msra.mxu0 %v14744_v62  ;;  %v2542_v57 = vld [vmem:[#allocation2 + $0x8d0] sm:$0xff]  ;;  %v2547_v29 = vld [vmem:[#allocation2 + $0x8f8] sm:$0xff]  ;;  %v2556_v62 = vld [vmem:[#allocation2 + $0x940] sm:$0xff]  ;;  %v14752_v22 = vpack.c.bf16 %v2545_v40, %v2540_v4  ;;  %vm5423_vm12 = vcmask 891904  }
 0x346   : > { %v22363_v5 = vunpack.i.h.bf16 %v19531_v50  ;;  %v17200_v0 = vunpack.i.l.bf16 %v19531_v50  ;;  %15215 = vmatpush1.bf16.msra.mxu1 %v15214_v59  ;;  %14747 = vmatprep.subr.bf16.mxu0 %v14746_v49  ;;  %v2551_v26 = vld [vmem:[#allocation2 + $0x918] sm:$0xff]  ;;  %v2553_v49 = vld [vmem:[#allocation2 + $0x928] sm:$0xff]  ;;  %v2552_v11 = vld [vmem:[#allocation2 + $0x920] sm:$0xff] }
 0x347   : > { %v17207_v30 = vpack.i.bf16 %v19540_v18, %v19536_v35  ;;  %15217 = vmatprep.subr.bf16.mxu1 %v15216_v53  ;;  %v22494_v53 = vmax.f32 %v19299_v31, 0.0  ;;  %v14754_v24 = vpack.c.bf16 %v2556_v62, %v2551_v26  ;;  %v15224_v44 = vpack.c.bf16 %v2558_v36, %v2553_v49  ;;  %v2561_v31 = vld [vmem:[#allocation2 + $0x968] sm:$0xff]  ;;  %v2560_v4 = vld [vmem:[#allocation2 + $0x960] sm:$0xff]  ;;  %v2578_v49 = vld [vmem:[#allocation2 + $0x9f0] sm:$0xff] }
 0x348   : > { %v2005_v46 = vsel %vm22491_vm13, %v17181_v12, %v17200_v0  ;;  %v2006_v59 = vsel %vm22492_vm14, %v17200_v0, %v22363_v5  ;;  %v15222_v12 = vpack.c.bf16 %v2547_v29, %v2542_v57  ;;  %v2557_v0 = vld [vmem:[#allocation2 + $0x948] sm:$0xff]  ;;  %v2562_v57 = vld [vmem:[#allocation2 + $0x970] sm:$0xff]  ;;  %v2571_v29 = vld [vmem:[#allocation2 + $0x9b8] sm:$0xff]  ;;  %vm5386_vm13 = vcmask 900096  }
 0x349   : > { %v19554_v38 = vmax.f32 %v22493_v32, %v2005_v46  ;;  %v19558_v55 = vmax.f32 %v22494_v53, %v2006_v59  ;;  %17208 = vrot.lane.b32.xlu1 %v17207_v30, %s17859_s24  ;;  %14749 = vmatpush1.bf16.msra.mxu0 %v14748_v17  ;;  %v2566_v46 = vld [vmem:[#allocation2 + $0x990] sm:$0xff]  ;;  %v2563_v59 = vld [vmem:[#allocation2 + $0x978] sm:$0xff]  ;;  %v2568_v32 = vld [vmem:[#allocation2 + $0x9a0] sm:$0xff]  ;;  %v14756_v17 = vpack.c.bf16 %v2555_v2, %v2550_v27 }
 0x34a   : > { %15219 = vmatpush1.bf16.msra.mxu1 %v15218_v34  ;;  %14751 = vmatprep.subr.bf16.mxu0 %v14750_v9  ;;  %v15226_v34 = vpack.c.bf16 %v2557_v0, %v2552_v11  ;;  %v14758_v9 = vpack.c.bf16 %v2566_v46, %v2561_v31  ;;  %v2565_v40 = vld [vmem:[#allocation2 + $0x988] sm:$0xff]  ;;  %v15228_v30 = vpack.c.bf16 %v2568_v32, %v2563_v59  ;;  %v2576_v26 = vld [vmem:[#allocation2 + $0x9e0] sm:$0xff]  ;;  %v2583_v0 = vld [vmem:[#allocation2 + $0xa18] sm:$0xff] }
 0x34b   : > { %v17212_v61 = vpack.i.bf16 %v19558_v55, %v19554_v38  ;;  %15221 = vmatprep.subr.bf16.mxu1 %v15220_v39  ;;  %v2567_v39 = vld [vmem:[#allocation2 + $0x998] sm:$0xff]  ;;  %v2573_v62 = vld [vmem:[#allocation2 + $0x9c8] sm:$0xff]  ;;  %v14760_v36 = vpack.c.bf16 %v2565_v40, %v2560_v4  ;;  %v2572_v27 = vld [vmem:[#allocation2 + $0x9c0] sm:$0xff] }
 0x34c   : > { %v15230_v53 = vpack.c.bf16 %v2567_v39, %v2562_v57  ;;  %v15232_v2 = vpack.c.bf16 %v2578_v49, %v2573_v62  ;;  %v2577_v11 = vld [vmem:[#allocation2 + $0x9e8] sm:$0xff]  ;;  %v2588_v31 = vld [vmem:[#allocation2 + $0xa40] sm:$0xff]  ;;  %v22497_v49 = vmax.f32 %v19282_v43, 0.0  ;;  %vm22524_vm14 = vmmov %vm22523_vm0 }
 0x34d   : > { %17213 = vrot.lane.b32.xlu1 %v17212_v61, %s17859_s24  ;;  %14753 = vmatpush1.bf16.msra.mxu0 %v14752_v22  ;;  %v14762_v22 = vpack.c.bf16 %v2576_v26, %v2571_v29  ;;  %v2581_v61 = vld [vmem:[#allocation2 + $0xa08] sm:$0xff]  ;;  %v15234_v59 = vpack.c.bf16 %v2577_v11, %v2572_v27  ;;  %v2582_v11 = vld [vmem:[#allocation2 + $0xa10] sm:$0xff] }
 0x34e   : > { %15223 = vmatpush1.bf16.msra.mxu1 %v15222_v12  ;;  %14755 = vmatprep.subr.bf16.mxu0 %v14754_v24  ;;  %v2570_v12 = vld [vmem:[#allocation2 + $0x9b0] sm:$0xff]  ;;  %v2575_v24 = vld [vmem:[#allocation2 + $0x9d8] sm:$0xff] }
 0x34f   : > { %15225 = vmatprep.subr.bf16.mxu1 %v15224_v44  ;;  %v2586_v44 = vld [vmem:[#allocation2 + $0xa30] sm:$0xff]  ;;  %v14764_v46 = vpack.c.bf16 %v2575_v24, %v2570_v12  ;;  %v2580_v12 = vld [vmem:[#allocation2 + $0xa00] sm:$0xff]  ;;  %v2585_v24 = vld [vmem:[#allocation2 + $0xa28] sm:$0xff] }
 0x350   : > { %v14766_v32 = vpack.c.bf16 %v2586_v44, %v2581_v61  ;;  %v2587_v61 = vld [vmem:[#allocation2 + $0xa38] sm:$0xff] }
 0x351   : > { %14757 = vmatpush1.bf16.msra.mxu0 %v14756_v17  ;;  %v15236_v17 = vpack.c.bf16 %v2588_v31, %v2583_v0  ;;  %v2591_v44 = vld [vmem:[#allocation2 + $0xa58] sm:$0xff]  ;;  %v22499_v0 = vunpack.i.h.bf16 %v19333_v16 }
 0x352   : > { %15227 = vmatpush1.bf16.msra.mxu1 %v15226_v34  ;;  %14759 = vmatprep.subr.bf16.mxu0 %v14758_v9  ;;  %v19564_v34 = vpop.permute.xlu0 %17203 }
 0x353   : > { %15229 = vmatprep.subr.bf16.mxu1 %v15228_v30  ;;  %v22361_v9 = vunpack.i.h.bf16 %v19564_v34  ;;  %v17205_v4 = vunpack.i.l.bf16 %v19564_v34 }
 0x355   : > { %14761 = vmatpush1.bf16.msra.mxu0 %v14760_v36  ;;  %v2019_v57 = vsel %vm22495_vm6, %v17186_v15, %v17205_v4  ;;  %v2020_v30 = vsel %vm22496_vm9, %v17205_v4, %v22361_v9  ;;  %v15238_v4 = vpack.c.bf16 %v2587_v61, %v2582_v11  ;;  %v2602_v61 = vld [vmem:[#allocation2 + $0xab0] sm:$0xff]  ;;  %vm22525_vm6 = vmmov %vm22522_vm1 }
 0x356   : > { %15231 = vmatpush1.bf16.msra.mxu1 %v15230_v53  ;;  %14763 = vmatprep.subr.bf16.mxu0 %v14762_v22  ;;  %v19583_v36 = vmax.f32 %v22497_v49, %v2019_v57  ;;  %v19587_v15 = vmax.f32 %v22498_v3, %v2020_v30  ;;  %v2595_v57 = vld [vmem:[#allocation2 + $0xa78] sm:$0xff]  ;;  %v2592_v49 = vld [vmem:[#allocation2 + $0xa60] sm:$0xff]  ;;  %v2597_v3 = vld [vmem:[#allocation2 + $0xa88] sm:$0xff] }
 0x357   : > { %15233 = vmatprep.subr.bf16.mxu1 %v15232_v2  ;;  %vm22526_vm9 = vmmov %vm22522_vm1 }
 0x359   : > { %14765 = vmatpush1.bf16.msra.mxu0 %v14764_v46 }
 0x35a   : > { %15235 = vmatpush1.bf16.msra.mxu1 %v15234_v59  ;;  %14767 = vmatprep.subr.bf16.mxu0 %v14766_v32  ;;  %v2596_v59 = vld [vmem:[#allocation2 + $0xa80] sm:$0xff]  ;;  %v2593_v32 = vld [vmem:[#allocation2 + $0xa68] sm:$0xff] }
 0x35b   : > { %15237 = vmatprep.subr.bf16.mxu1 %v15236_v17  ;;  %v14768_v17 = vpack.c.bf16 %v2585_v24, %v2580_v12  ;;  %v14770_v30 = vpack.c.bf16 %v2596_v59, %v2591_v44  ;;  %v2605_v12 = vld [vmem:[#allocation2 + $0xac8] sm:$0xff]  ;;  %v2607_v44 = vld [vmem:[#allocation2 + $0xad8] sm:$0xff]  ;;  %v2618_v59 = vld [vmem:[#allocation2 + $0xb30] sm:$0xff] }
 0x382   : > { %v13783_v40 = vpop.f32.mrb[14].mxu1 }
 0x383   : > { %v19575_v39 = vadd.f32 %v13783_v40, %v18960_v37  ;;  %v1865_v29 = vpop.f32.mrb[15].mxu1  ;;  %v2590_v40 = vld [vmem:[#allocation2 + $0xa50] sm:$0xff] }
 0x384   : > { %v19578_v26 = vadd.f32 %v1865_v29, %v18805_v52  ;;  %v17217_v52 = vpack.i.bf16 %v19587_v15, %v19583_v36 }
 0x385   : > { %v22360_v62 = vmax.f32 %v19575_v39, 0.0 }
 0x386   : > { %v22362_v53 = vmax.f32 %v19578_v26, 0.0 }
 0x387   : > { %1992 = vrot.lane.b32.xlu1 %v22360_v62, %s17858_s19  ;;  %v2658_v62 = vld [vmem:[#allocation2 + $0xc70] sm:$0xff] }
 0x388   : > { %1962 = vrot.lane.b32.xlu0 %v22362_v53, %s17858_s19 }
 0x38c   : > { %17218 = vrot.lane.b32.xlu0 %v17217_v52, %s17859_s24  ;;  %v2601_v52 = vld [vmem:[#allocation2 + $0xaa8] sm:$0xff] }
 0x393   : > { %v17124_v37 = vpop.permute.xlu1 %17123 }
 0x394   : > { %v17126_v43 = vunpack.i.h.bf16 %v17124_v37  ;;  %v17125_v6 = vunpack.i.l.bf16 %v17124_v37  ;;  %v2606_v37 = vld [vmem:[#allocation2 + $0xad0] sm:$0xff] }
 0x395   : > { %v14774_v24 = vpack.c.bf16 %v2606_v37, %v2601_v52  ;;  %v2621_v37 = vld [vmem:[#allocation2 + $0xb48] sm:$0xff] }
 0x396   : > { %v2186_v22 = vsel %vm770_vm4, %v17125_v6, %v17130_v33  ;;  %v2174_v31 = vsel %vm770_vm4, %v22499_v0, %v17126_v43  ;;  %v2598_v33 = vld [vmem:[#allocation2 + $0xa90] sm:$0xff]  ;;  %v15242_v6 = vpack.c.bf16 %v2597_v3, %v2592_v49  ;;  %v2611_v0 = vld [vmem:[#allocation2 + $0xaf8] sm:$0xff]  ;;  %v2617_v49 = vld [vmem:[#allocation2 + $0xb28] sm:$0xff] }
 0x397   : > { %v19602_v27 = vpop.permute.xlu1 %2120  ;;  %v19605_v2 = vmax.f32 %v19368_v51, %v2186_v22  ;;  %v19618_v16 = vmax.f32 %v19131_v8, %v2174_v31  ;;  %v15240_v29 = vpack.c.bf16 %v2598_v33, %v2593_v32  ;;  %v14772_v8 = vpack.c.bf16 %v2595_v57, %v2590_v40  ;;  %v2600_v22 = vld [vmem:[#allocation2 + $0xaa0] sm:$0xff] }
 0x398   : > { %v2175_v46 = vsel %vm770_vm4, %v17126_v43, %v19602_v27  ;;  %v2603_v43 = vld [vmem:[#allocation2 + $0xab8] sm:$0xff]  ;;  %v2616_v31 = vld [vmem:[#allocation2 + $0xb20] sm:$0xff]  ;;  %v14776_v32 = vpack.c.bf16 %v2605_v12, %v2600_v22  ;;  %v15246_v33 = vpack.c.bf16 %v2607_v44, %v2602_v61  ;;  %v2625_v44 = vld [vmem:[#allocation2 + $0xb68] sm:$0xff] }
 0x399   : > { %3523 = vmatmul.mubr.f32.gmra.mrb[16].mxu0 %v19605_v2  ;;  %4139 = vmatmul.mubr.f32.gmra.mrb[18].mxu1 %v19605_v2  ;;  %v19615_v51 = vmax.f32 %v19364_v28, %v2175_v46  ;;  %v2608_v28 = vld [vmem:[#allocation2 + $0xae0] sm:$0xff]  ;;  %v2613_v46 = vld [vmem:[#allocation2 + $0xb08] sm:$0xff]  ;;  %v14778_v57 = vpack.c.bf16 %v2616_v31, %v2611_v0 }
 0x39a   : > { %v15244_v11 = vpack.c.bf16 %v2608_v28, %v2603_v43  ;;  %v2626_v28 = vld [vmem:[#allocation2 + $0xb70] sm:$0xff]  ;;  %v2620_v61 = vld [vmem:[#allocation2 + $0xb40] sm:$0xff] }
 0x39b   : > { %3593 = vmatprep.mubr.f32.mxu0 %v19615_v51  ;;  %4209 = vmatprep.mubr.f32.mxu1 %v19615_v51 }
 0x39d   : > { %3594 = vmatmul.mubr.f32.vlgmr.msra.gmra.mrb[14].mxu0 %v19618_v16  ;;  %4210 = vmatmul.mubr.f32.vlgmr.msra.gmra.mrb[16].mxu1 %v19618_v16 }
 0x39e   : > { %14769 = vmatpush1.bf16.msra.mxu0 %v14768_v17  ;;  %15239 = vmatpush1.bf16.msra.mxu1 %v15238_v4  ;;  %v2610_v17 = vld [vmem:[#allocation2 + $0xaf0] sm:$0xff]  ;;  %v2615_v4 = vld [vmem:[#allocation2 + $0xb18] sm:$0xff] }
 0x39f   : > { %14771 = vmatprep.subr.bf16.mxu0 %v14770_v30  ;;  %15241 = vmatprep.subr.bf16.mxu1 %v15240_v29  ;;  %v15248_v30 = vpack.c.bf16 %v2618_v59, %v2613_v46  ;;  %v2612_v29 = vld [vmem:[#allocation2 + $0xb00] sm:$0xff]  ;;  %v14780_v43 = vpack.c.bf16 %v2615_v4, %v2610_v17  ;;  %v2622_v59 = vld [vmem:[#allocation2 + $0xb50] sm:$0xff]  ;;  %v14782_v4 = vpack.c.bf16 %v2626_v28, %v2621_v37  ;;  %v2635_v37 = vld [vmem:[#allocation2 + $0xbb8] sm:$0xff] }
 0x3a0   : > { %v15250_v12 = vpack.c.bf16 %v2617_v49, %v2612_v29  ;;  %v2636_v49 = vld [vmem:[#allocation2 + $0xbc0] sm:$0xff] }
 0x3a2   : > { %14773 = vmatpush1.bf16.msra.mxu0 %v14772_v8  ;;  %15243 = vmatpush1.bf16.msra.mxu1 %v15242_v6  ;;  %v2623_v8 = vld [vmem:[#allocation2 + $0xb58] sm:$0xff]  ;;  %v2628_v6 = vld [vmem:[#allocation2 + $0xb80] sm:$0xff] }
 0x3a3   : > { %v19624_v40 = vpop.permute.xlu1 %17148  ;;  %14775 = vmatprep.subr.bf16.mxu0 %v14774_v24  ;;  %15245 = vmatprep.subr.bf16.mxu1 %v15244_v11  ;;  %v22500_v24 = vunpack.i.h.bf16 %v19380_v47  ;;  %v15252_v29 = vpack.c.bf16 %v2628_v6, %v2623_v8  ;;  %v2632_v6 = vld [vmem:[#allocation2 + $0xba0] sm:$0xff] }
 0x3a4   : > { %v17151_v3 = vunpack.i.h.bf16 %v19624_v40  ;;  %v17150_v52 = vunpack.i.l.bf16 %v19624_v40  ;;  %v2768_v40 = vld [vmem:[#allocation2 + $0xfe0] sm:$0xff] }
 0x3a6   : > { %14777 = vmatpush1.bf16.msra.mxu0 %v14776_v32  ;;  %15247 = vmatpush1.bf16.msra.mxu1 %v15246_v33  ;;  %v2189_v22 = vsel %vm770_vm4, %v17150_v52, %v17151_v3  ;;  %v2188_v11 = vsel %vm770_vm4, %v22500_v24, %v17150_v52  ;;  %v2627_v32 = vld [vmem:[#allocation2 + $0xb78] sm:$0xff]  ;;  %v2633_v52 = vld [vmem:[#allocation2 + $0xba8] sm:$0xff]  ;;  %v2638_v24 = vld [vmem:[#allocation2 + $0xbd0] sm:$0xff] }
 0x3a7   : > { %v19634_v0 = vpop.permute.xlu1 %17153  ;;  %14779 = vmatprep.subr.bf16.mxu0 %v14778_v57  ;;  %15249 = vmatprep.subr.bf16.mxu1 %v15248_v30  ;;  %v19637_v31 = vmax.f32 %v19410_v13, %v2189_v22  ;;  %v19640_v46 = vmax.f32 %v19201_v23, %v2188_v11  ;;  %v2631_v33 = vld [vmem:[#allocation2 + $0xb98] sm:$0xff]  ;;  %v14784_v23 = vpack.c.bf16 %v2625_v44, %v2620_v61  ;;  %v2630_v30 = vld [vmem:[#allocation2 + $0xb90] sm:$0xff]  ;;  %v2637_v22 = vld [vmem:[#allocation2 + $0xbc8] sm:$0xff] }
 0x3a8   : > { %v22359_v17 = vunpack.i.h.bf16 %v19634_v0  ;;  %v17155_v47 = vunpack.i.l.bf16 %v19634_v0  ;;  %v15254_v57 = vpack.c.bf16 %v2627_v32, %v2622_v59  ;;  %v14786_v8 = vpack.c.bf16 %v2636_v49, %v2631_v33  ;;  %v2646_v11 = vld [vmem:[#allocation2 + $0xc10] sm:$0xff]  ;;  %v2643_v61 = vld [vmem:[#allocation2 + $0xbf8] sm:$0xff]  ;;  %v2648_v44 = vld [vmem:[#allocation2 + $0xc20] sm:$0xff] }
 0x3a9   : > { %3599 = vmatprep.mubr.f32.mxu0 %v19637_v31  ;;  %4215 = vmatprep.mubr.f32.mxu1 %v19637_v31  ;;  %v14788_v59 = vpack.c.bf16 %v2635_v37, %v2630_v30  ;;  %v15258_v32 = vpack.c.bf16 %v2637_v22, %v2632_v6  ;;  %v15260_v49 = vpack.c.bf16 %v2648_v44, %v2643_v61  ;;  %v2661_v6 = vld [vmem:[#allocation2 + $0xc88] sm:$0xff]  ;;  %v2666_v22 = vld [vmem:[#allocation2 + $0xcb0] sm:$0xff] }
 0x3aa   : > { %14781 = vmatpush1.bf16.msra.mxu0 %v14780_v43  ;;  %15251 = vmatpush1.bf16.msra.mxu1 %v15250_v12  ;;  %v2177_v13 = vsel %vm770_vm4, %v17155_v47, %v22359_v17  ;;  %v15256_v43 = vpack.c.bf16 %v2638_v24, %v2633_v52  ;;  %v2641_v12 = vld [vmem:[#allocation2 + $0xbe8] sm:$0xff]  ;;  %v2642_v52 = vld [vmem:[#allocation2 + $0xbf0] sm:$0xff]  ;;  %v2656_v24 = vld [vmem:[#allocation2 + $0xc60] sm:$0xff] }
 0x3ab   : > { %3600 = vmatmul.mubr.f32.gmra.mrb[16].mxu0 %v19640_v46  ;;  %4216 = vmatmul.mubr.f32.gmra.mrb[18].mxu1 %v19640_v46  ;;  %v19654_v28 = vmax.f32 %v19431_v25, %v2177_v13  ;;  %v2640_v25 = vld [vmem:[#allocation2 + $0xbe0] sm:$0xff]  ;;  %v2645_v13 = vld [vmem:[#allocation2 + $0xc08] sm:$0xff]  ;;  %v14790_v33 = vpack.c.bf16 %v2646_v11, %v2641_v12  ;;  %v2663_v12 = vld [vmem:[#allocation2 + $0xc98] sm:$0xff] }
 0x3ac   : > { %14783 = vmatprep.subr.bf16.mxu0 %v14782_v4  ;;  %15253 = vmatprep.subr.bf16.mxu1 %v15252_v29  ;;  %v2647_v4 = vld [vmem:[#allocation2 + $0xc18] sm:$0xff]  ;;  %v2653_v17 = vld [vmem:[#allocation2 + $0xc48] sm:$0xff]  ;;  %v14792_v9 = vpack.c.bf16 %v2645_v13, %v2640_v25  ;;  %v2668_v11 = vld [vmem:[#allocation2 + $0xcc0] sm:$0xff]  ;;  %v14798_v25 = vpack.c.bf16 %v2666_v22, %v2661_v6 }
 0x3ad   : > { %3670 = vmatprep.mubr.f32.mxu0 %v19654_v28  ;;  %4286 = vmatprep.mubr.f32.mxu1 %v19654_v28  ;;  %v2651_v29 = vld [vmem:[#allocation2 + $0xc38] sm:$0xff]  ;;  %v15262_v53 = vpack.c.bf16 %v2647_v4, %v2642_v52  ;;  %v15264_v37 = vpack.c.bf16 %v2658_v62, %v2653_v17  ;;  %v15268_v13 = vpack.c.bf16 %v2668_v11, %v2663_v12  ;;  %v2676_v62 = vld [vmem:[#allocation2 + $0xd00] sm:$0xff]  ;;  %v2673_v17 = vld [vmem:[#allocation2 + $0xce8] sm:$0xff] }
 0x3ae   : > { %14785 = vmatpush1.bf16.msra.mxu0 %v14784_v23  ;;  %15255 = vmatpush1.bf16.msra.mxu1 %v15254_v57  ;;  %v2650_v23 = vld [vmem:[#allocation2 + $0xc30] sm:$0xff]  ;;  %v2655_v57 = vld [vmem:[#allocation2 + $0xc58] sm:$0xff]  ;;  %v14794_v30 = vpack.c.bf16 %v2656_v24, %v2651_v29  ;;  %v2688_v22 = vld [vmem:[#allocation2 + $0xd60] sm:$0xff] }
 0x3af   : > { %14787 = vmatprep.subr.bf16.mxu0 %v14786_v8  ;;  %15257 = vmatprep.subr.bf16.mxu1 %v15256_v43  ;;  %v2652_v8 = vld [vmem:[#allocation2 + $0xc40] sm:$0xff]  ;;  %v2657_v43 = vld [vmem:[#allocation2 + $0xc68] sm:$0xff]  ;;  %v14796_v61 = vpack.c.bf16 %v2655_v57, %v2650_v23  ;;  %v2671_v52 = vld [vmem:[#allocation2 + $0xcd8] sm:$0xff] }
 0x3b0   : > { %v15266_v44 = vpack.c.bf16 %v2657_v43, %v2652_v8  ;;  %v2678_v4 = vld [vmem:[#allocation2 + $0xd10] sm:$0xff]  ;;  %v14802_v23 = vpack.c.bf16 %v2676_v62, %v2671_v52  ;;  %v2681_v8 = vld [vmem:[#allocation2 + $0xd28] sm:$0xff]  ;;  %v2683_v6 = vld [vmem:[#allocation2 + $0xd38] sm:$0xff] }
 0x3b1   : > { %v15272_v57 = vpack.c.bf16 %v2678_v4, %v2673_v17  ;;  %v2686_v43 = vld [vmem:[#allocation2 + $0xd50] sm:$0xff]  ;;  %v2693_v52 = vld [vmem:[#allocation2 + $0xd88] sm:$0xff] }
 0x3b2   : > { %14789 = vmatpush1.bf16.msra.mxu0 %v14788_v59  ;;  %15259 = vmatpush1.bf16.msra.mxu1 %v15258_v32  ;;  %v2660_v59 = vld [vmem:[#allocation2 + $0xc80] sm:$0xff]  ;;  %v2665_v32 = vld [vmem:[#allocation2 + $0xca8] sm:$0xff]  ;;  %v2698_v62 = vld [vmem:[#allocation2 + $0xdb0] sm:$0xff] }
 0x3b3   : > { %14791 = vmatprep.subr.bf16.mxu0 %v14790_v33  ;;  %15261 = vmatprep.subr.bf16.mxu1 %v15260_v49  ;;  %v2662_v33 = vld [vmem:[#allocation2 + $0xc90] sm:$0xff]  ;;  %v2667_v49 = vld [vmem:[#allocation2 + $0xcb8] sm:$0xff]  ;;  %v14800_v29 = vpack.c.bf16 %v2665_v32, %v2660_v59  ;;  %v14806_v59 = vpack.c.bf16 %v2686_v43, %v2681_v8  ;;  %v15276_v32 = vpack.c.bf16 %v2688_v22, %v2683_v6  ;;  %v2708_v43 = vld [vmem:[#allocation2 + $0xe00] sm:$0xff] }
 0x3b4   : > { %v15270_v24 = vpack.c.bf16 %v2667_v49, %v2662_v33  ;;  %v2691_v33 = vld [vmem:[#allocation2 + $0xd78] sm:$0xff]  ;;  %v2696_v49 = vld [vmem:[#allocation2 + $0xda0] sm:$0xff] }
 0x3b5   : > { %v2703_v8 = vld [vmem:[#allocation2 + $0xdd8] sm:$0xff] }
 0x3b6   : > { %14793 = vmatpush1.bf16.msra.mxu0 %v14792_v9  ;;  %15263 = vmatpush1.bf16.msra.mxu1 %v15262_v53  ;;  %v2670_v9 = vld [vmem:[#allocation2 + $0xcd0] sm:$0xff]  ;;  %v2675_v53 = vld [vmem:[#allocation2 + $0xcf8] sm:$0xff] }
 0x3b7   : > { %14795 = vmatprep.subr.bf16.mxu0 %v14794_v30  ;;  %15265 = vmatprep.subr.bf16.mxu1 %v15264_v37  ;;  %v2672_v30 = vld [vmem:[#allocation2 + $0xce0] sm:$0xff]  ;;  %v2677_v37 = vld [vmem:[#allocation2 + $0xd08] sm:$0xff]  ;;  %v14804_v12 = vpack.c.bf16 %v2675_v53, %v2670_v9  ;;  %v14810_v9 = vpack.c.bf16 %v2696_v49, %v2691_v33  ;;  %v15280_v53 = vpack.c.bf16 %v2698_v62, %v2693_v52  ;;  %v2718_v49 = vld [vmem:[#allocation2 + $0xe50] sm:$0xff] }
 0x3b8   : > { %v15274_v11 = vpack.c.bf16 %v2677_v37, %v2672_v30  ;;  %v2701_v30 = vld [vmem:[#allocation2 + $0xdc8] sm:$0xff]  ;;  %v2706_v37 = vld [vmem:[#allocation2 + $0xdf0] sm:$0xff] }
 0x3b9   : > { %v2713_v33 = vld [vmem:[#allocation2 + $0xe28] sm:$0xff] }
 0x3ba   : > { %14797 = vmatpush1.bf16.msra.mxu0 %v14796_v61  ;;  %15267 = vmatpush1.bf16.msra.mxu1 %v15266_v44  ;;  %v2680_v61 = vld [vmem:[#allocation2 + $0xd20] sm:$0xff]  ;;  %v2685_v44 = vld [vmem:[#allocation2 + $0xd48] sm:$0xff] }
 0x3bb   : > { %14799 = vmatprep.subr.bf16.mxu0 %v14798_v25  ;;  %15269 = vmatprep.subr.bf16.mxu1 %v15268_v13  ;;  %v2682_v25 = vld [vmem:[#allocation2 + $0xd30] sm:$0xff]  ;;  %v2687_v13 = vld [vmem:[#allocation2 + $0xd58] sm:$0xff]  ;;  %v14808_v17 = vpack.c.bf16 %v2685_v44, %v2680_v61  ;;  %v14814_v61 = vpack.c.bf16 %v2706_v37, %v2701_v30  ;;  %v15284_v44 = vpack.c.bf16 %v2708_v43, %v2703_v8  ;;  %v2728_v37 = vld [vmem:[#allocation2 + $0xea0] sm:$0xff] }
 0x3bc   : > { %v15278_v4 = vpack.c.bf16 %v2687_v13, %v2682_v25  ;;  %v2711_v25 = vld [vmem:[#allocation2 + $0xe18] sm:$0xff]  ;;  %v2716_v13 = vld [vmem:[#allocation2 + $0xe40] sm:$0xff] }
 0x3bd   : > { %v2723_v30 = vld [vmem:[#allocation2 + $0xe78] sm:$0xff] }
 0x3be   : > { %14801 = vmatpush1.bf16.msra.mxu0 %v14800_v29  ;;  %15271 = vmatpush1.bf16.msra.mxu1 %v15270_v24  ;;  %v2690_v29 = vld [vmem:[#allocation2 + $0xd70] sm:$0xff]  ;;  %v2695_v24 = vld [vmem:[#allocation2 + $0xd98] sm:$0xff] }
 0x3bf   : > { %14803 = vmatprep.subr.bf16.mxu0 %v14802_v23  ;;  %15273 = vmatprep.subr.bf16.mxu1 %v15272_v57  ;;  %v2692_v23 = vld [vmem:[#allocation2 + $0xd80] sm:$0xff]  ;;  %v2697_v57 = vld [vmem:[#allocation2 + $0xda8] sm:$0xff]  ;;  %v14812_v6 = vpack.c.bf16 %v2695_v24, %v2690_v29  ;;  %v14818_v29 = vpack.c.bf16 %v2716_v13, %v2711_v25  ;;  %v15288_v24 = vpack.c.bf16 %v2718_v49, %v2713_v33  ;;  %v2738_v33 = vld [vmem:[#allocation2 + $0xef0] sm:$0xff] }
 0x3c0   : > { %v15282_v22 = vpack.c.bf16 %v2697_v57, %v2692_v23  ;;  %v2721_v23 = vld [vmem:[#allocation2 + $0xe68] sm:$0xff]  ;;  %v2726_v57 = vld [vmem:[#allocation2 + $0xe90] sm:$0xff]  ;;  %v2736_v25 = vld [vmem:[#allocation2 + $0xee0] sm:$0xff] }
 0x3c1   : > { %v2733_v13 = vld [vmem:[#allocation2 + $0xec8] sm:$0xff] }
 0x3c2   : > { %14805 = vmatpush1.bf16.msra.mxu0 %v14804_v12  ;;  %15275 = vmatpush1.bf16.msra.mxu1 %v15274_v11  ;;  %v2700_v12 = vld [vmem:[#allocation2 + $0xdc0] sm:$0xff]  ;;  %v2705_v11 = vld [vmem:[#allocation2 + $0xde8] sm:$0xff] }
 0x3c3   : > { %14807 = vmatprep.subr.bf16.mxu0 %v14806_v59  ;;  %15277 = vmatprep.subr.bf16.mxu1 %v15276_v32  ;;  %v2702_v59 = vld [vmem:[#allocation2 + $0xdd0] sm:$0xff]  ;;  %v2707_v32 = vld [vmem:[#allocation2 + $0xdf8] sm:$0xff]  ;;  %v14816_v52 = vpack.c.bf16 %v2705_v11, %v2700_v12  ;;  %v14822_v12 = vpack.c.bf16 %v2726_v57, %v2721_v23  ;;  %v15292_v11 = vpack.c.bf16 %v2728_v37, %v2723_v30  ;;  %v2748_v30 = vld [vmem:[#allocation2 + $0xf40] sm:$0xff] }
 0x3c4   : > { %v15286_v62 = vpack.c.bf16 %v2707_v32, %v2702_v59  ;;  %v2731_v59 = vld [vmem:[#allocation2 + $0xeb8] sm:$0xff]  ;;  %v19658_v32 = vpop.permute.xlu1 %17168  ;;  %v2746_v23 = vld [vmem:[#allocation2 + $0xf30] sm:$0xff] }
 0x3c5   : > { %v2743_v57 = vld [vmem:[#allocation2 + $0xf18] sm:$0xff]  ;;  %v22365_v37 = vunpack.i.h.bf16 %v19658_v32  ;;  %v17170_v5 = vunpack.i.l.bf16 %v19658_v32 }
 0x3c6   : > { %14809 = vmatpush1.bf16.msra.mxu0 %v14808_v17  ;;  %15279 = vmatpush1.bf16.msra.mxu1 %v15278_v4  ;;  %v2710_v17 = vld [vmem:[#allocation2 + $0xe10] sm:$0xff]  ;;  %v2715_v4 = vld [vmem:[#allocation2 + $0xe38] sm:$0xff] }
 0x3c7   : > { %14811 = vmatprep.subr.bf16.mxu0 %v14810_v9  ;;  %15281 = vmatprep.subr.bf16.mxu1 %v15280_v53  ;;  %v2712_v9 = vld [vmem:[#allocation2 + $0xe20] sm:$0xff]  ;;  %v2717_v53 = vld [vmem:[#allocation2 + $0xe48] sm:$0xff]  ;;  %v14820_v8 = vpack.c.bf16 %v2715_v4, %v2710_v17  ;;  %v2735_v17 = vld [vmem:[#allocation2 + $0xed8] sm:$0xff]  ;;  %v14826_v4 = vpack.c.bf16 %v2736_v25, %v2731_v59 }
 0x3c8   : > { %v15290_v43 = vpack.c.bf16 %v2717_v53, %v2712_v9  ;;  %v2737_v9 = vld [vmem:[#allocation2 + $0xee8] sm:$0xff]  ;;  %v2742_v59 = vld [vmem:[#allocation2 + $0xf10] sm:$0xff]  ;;  %v2747_v25 = vld [vmem:[#allocation2 + $0xf38] sm:$0xff] }
 0x3c9   : > { %v2741_v53 = vld [vmem:[#allocation2 + $0xf08] sm:$0xff] }
 0x3ca   : > { %14813 = vmatpush1.bf16.msra.mxu0 %v14812_v6  ;;  %15283 = vmatpush1.bf16.msra.mxu1 %v15282_v22  ;;  %v2720_v6 = vld [vmem:[#allocation2 + $0xe60] sm:$0xff]  ;;  %v2725_v22 = vld [vmem:[#allocation2 + $0xe88] sm:$0xff] }
 0x3cb   : > { %14815 = vmatprep.subr.bf16.mxu0 %v14814_v61  ;;  %15285 = vmatprep.subr.bf16.mxu1 %v15284_v44  ;;  %v2722_v61 = vld [vmem:[#allocation2 + $0xe70] sm:$0xff]  ;;  %v2727_v44 = vld [vmem:[#allocation2 + $0xe98] sm:$0xff]  ;;  %v14824_v49 = vpack.c.bf16 %v2725_v22, %v2720_v6  ;;  %v14830_v22 = vpack.c.bf16 %v2746_v23, %v2741_v53  ;;  %v2190_v23 = vsel %vm770_vm4, %v17151_v3, %v17170_v5 }
 0x3cc   : > { %v19692_v3 = vmax.f32 %v19414_v19, %v2190_v23  ;;  %v2773_v19 = vld [vmem:[#allocation2 + $0x1008] sm:$0xff]  ;;  %v2775_v23 = vld [vmem:[#allocation2 + $0x1018] sm:$0xff] }
 0x3ce   : > { %14817 = vmatpush1.bf16.msra.mxu0 %v14816_v52  ;;  %15287 = vmatpush1.bf16.msra.mxu1 %v15286_v62  ;;  %v15294_v52 = vpack.c.bf16 %v2727_v44, %v2722_v61  ;;  %v2730_v62 = vld [vmem:[#allocation2 + $0xeb0] sm:$0xff]  ;;  %v2745_v61 = vld [vmem:[#allocation2 + $0xf28] sm:$0xff]  ;;  %v2176_v44 = vsel %vm770_vm4, %v19602_v27, %v17155_v47  ;;  %v15302_v27 = vpack.c.bf16 %v2747_v25, %v2742_v59 }
 0x3cf   : > { %14819 = vmatprep.subr.bf16.mxu0 %v14818_v29  ;;  %15289 = vmatprep.subr.bf16.mxu1 %v15288_v24  ;;  %v15296_v29 = vpack.c.bf16 %v2738_v33, %v2733_v13  ;;  %v2732_v24 = vld [vmem:[#allocation2 + $0xec0] sm:$0xff]  ;;  %v2751_v13 = vld [vmem:[#allocation2 + $0xf58] sm:$0xff]  ;;  %v2750_v47 = vld [vmem:[#allocation2 + $0xf50] sm:$0xff]  ;;  %22502 = vst [vmem:[#allocation25_spill] sm:$0xff] %v19692_v3 }
 0x3d0   : > { %v15298_v6 = vpack.c.bf16 %v2737_v9, %v2732_v24  ;;  %v19674_v24 = vmax.f32 %v19378_v56, %v2176_v44  ;;  %v2755_v9 = vld [vmem:[#allocation2 + $0xf78] sm:$0xff]  ;;  %v2765_v44 = vld [vmem:[#allocation2 + $0xfc8] sm:$0xff]  ;;  %v2762_v59 = vld [vmem:[#allocation2 + $0xfb0] sm:$0xff] }
 0x3d2   : > { %14821 = vmatpush1.bf16.msra.mxu0 %v14820_v8  ;;  %15291 = vmatpush1.bf16.msra.mxu1 %v15290_v43  ;;  %v19662_v8 = vpop.permute.xlu1 %17173  ;;  %v14828_v43 = vpack.c.bf16 %v2735_v17, %v2730_v62  ;;  %v2756_v62 = vld [vmem:[#allocation2 + $0xf80] sm:$0xff]  ;;  %v2753_v17 = vld [vmem:[#allocation2 + $0xf68] sm:$0xff] }
 0x3d3   : > { %14823 = vmatprep.subr.bf16.mxu0 %v14822_v12  ;;  %15293 = vmatprep.subr.bf16.mxu1 %v15292_v11  ;;  %v15300_v12 = vpack.c.bf16 %v2748_v30, %v2743_v57  ;;  %v2740_v11 = vld [vmem:[#allocation2 + $0xf00] sm:$0xff]  ;;  %v22364_v33 = vunpack.i.h.bf16 %v19662_v8  ;;  %v14834_v57 = vpack.c.bf16 %v2756_v62, %v2751_v13  ;;  %v2767_v62 = vld [vmem:[#allocation2 + $0xfd8] sm:$0xff] }
 0x3d6   : > { %14825 = vmatpush1.bf16.msra.mxu0 %v14824_v49  ;;  %15295 = vmatpush1.bf16.msra.mxu1 %v15294_v52  ;;  %v22366_v49 = vunpack.i.l.bf16 %v19662_v8  ;;  %v2191_v52 = vsel %vm770_vm4, %v17170_v5, %v22365_v37  ;;  %v14836_v5 = vpack.c.bf16 %v2755_v9, %v2750_v47  ;;  %v2770_v9 = vld [vmem:[#allocation2 + $0xff0] sm:$0xff] }
 0x3d7   : > { %14827 = vmatprep.subr.bf16.mxu0 %v14826_v4  ;;  %15297 = vmatprep.subr.bf16.mxu1 %v15296_v29  ;;  %v2758_v4 = vld [vmem:[#allocation2 + $0xf90] sm:$0xff]  ;;  %v14832_v29 = vpack.c.bf16 %v2745_v61, %v2740_v11  ;;  %v19677_v53 = vmax.f32 %v19452_v58, %v2191_v52  ;;  %v2761_v11 = vld [vmem:[#allocation2 + $0xfa8] sm:$0xff]  ;;  %v2760_v61 = vld [vmem:[#allocation2 + $0xfa0] sm:$0xff] }
 0x3d8   : > { %v15304_v30 = vpack.c.bf16 %v2758_v4, %v2753_v17  ;;  %v2179_v56 = vsel %vm770_vm4, %v22366_v49, %v22364_v33  ;;  %v2766_v58 = vld [vmem:[#allocation2 + $0xfd0] sm:$0xff]  ;;  %v2771_v17 = vld [vmem:[#allocation2 + $0xff8] sm:$0xff]  ;;  %v2776_v4 = vld [vmem:[#allocation2 + $0x1020] sm:$0xff] }
 0x3d9   : > { %22501 = vst [vmem:[#allocation24_spill] sm:$0xff] %v19677_v53  ;;  %v19695_v25 = vmax.f32 %v19473_v20, %v2179_v56  ;;  %v14838_v13 = vpack.c.bf16 %v2766_v58, %v2761_v11  ;;  %v15310_v20 = vpack.c.bf16 %v2767_v62, %v2762_v59  ;;  %v14842_v47 = vpack.c.bf16 %v2776_v4, %v2771_v17  ;;  %v2781_v11 = vld [vmem:[#allocation2 + $0x1048] sm:$0xff]  ;;  %v2786_v56 = vld [vmem:[#allocation2 + $0x1070] sm:$0xff]  ;;  %v2783_v58 = vld [vmem:[#allocation2 + $0x1058] sm:$0xff] }
 0x3da   : > { %14829 = vmatpush1.bf16.msra.mxu0 %v14828_v43  ;;  %15299 = vmatpush1.bf16.msra.mxu1 %v15298_v6  ;;  %v2752_v43 = vld [vmem:[#allocation2 + $0xf60] sm:$0xff]  ;;  %v2757_v6 = vld [vmem:[#allocation2 + $0xf88] sm:$0xff]  ;;  %v2782_v59 = vld [vmem:[#allocation2 + $0x1050] sm:$0xff] }
 0x3db   : > { %14831 = vmatprep.subr.bf16.mxu0 %v14830_v22  ;;  %15301 = vmatprep.subr.bf16.mxu1 %v15300_v12  ;;  %v2763_v22 = vld [vmem:[#allocation2 + $0xfb8] sm:$0xff]  ;;  %v15306_v12 = vpack.c.bf16 %v2757_v6, %v2752_v43  ;;  %v2777_v6 = vld [vmem:[#allocation2 + $0x1028] sm:$0xff] }
 0x3dc   : > { %v15308_v52 = vpack.c.bf16 %v2768_v40, %v2763_v22  ;;  %v2788_v22 = vld [vmem:[#allocation2 + $0x1080] sm:$0xff]  ;;  %v14844_v40 = vpack.c.bf16 %v2775_v23, %v2770_v9  ;;  %v2787_v17 = vld [vmem:[#allocation2 + $0x1078] sm:$0xff]  ;;  %v2793_v4 = vld [vmem:[#allocation2 + $0x10a8] sm:$0xff] }
 0x3dd   : > { %3671 = vmatmul.mubr.f32.vlgmr.msra.gmra.mrb[14].mxu0 %v19674_v24  ;;  %4287 = vmatmul.mubr.f32.vlgmr.msra.gmra.mrb[16].mxu1 %v19674_v24  ;;  %v15316_v62 = vpack.c.bf16 %v2788_v22, %v2783_v58  ;;  %v2795_v9 = vld [vmem:[#allocation2 + $0x10b8] sm:$0xff]  ;;  %v2792_v23 = vld [vmem:[#allocation2 + $0x10a0] sm:$0xff] }
 0x3de   : > { %3676 = vmatprep.mubr.f32.mxu0 %v19677_v53  ;;  %14833 = vmatpush1.bf16.msra.mxu0 %v14832_v29  ;;  %v2778_v29 = vld [vmem:[#allocation2 + $0x1030] sm:$0xff]  ;;  %v2808_v58 = vld [vmem:[#allocation2 + $0x1120] sm:$0xff] }
 0x3df   : > { %4292 = vmatprep.mubr.f32.mxu1 %v19677_v53  ;;  %15303 = vmatpush1.bf16.msra.mxu1 %v15302_v27  ;;  %v14840_v27 = vpack.c.bf16 %v2765_v44, %v2760_v61  ;;  %v15312_v43 = vpack.c.bf16 %v2778_v29, %v2773_v19  ;;  %v2780_v61 = vld [vmem:[#allocation2 + $0x1040] sm:$0xff]  ;;  %v2785_v44 = vld [vmem:[#allocation2 + $0x1068] sm:$0xff]  ;;  %v2798_v19 = vld [vmem:[#allocation2 + $0x10d0] sm:$0xff] }
 0x3e0   : > { %14835 = vmatprep.subr.bf16.mxu0 %v14834_v57  ;;  %15305 = vmatprep.subr.bf16.mxu1 %v15304_v30  ;;  %v2772_v57 = vld [vmem:[#allocation2 + $0x1000] sm:$0xff]  ;;  %v19701_v30 = vpop.permute.xlu1 %17188  ;;  %v14848_v33 = vpack.c.bf16 %v2785_v44, %v2780_v61  ;;  %v2802_v44 = vld [vmem:[#allocation2 + $0x10f0] sm:$0xff] }
 0x3e1   : > { %3677 = vmatmul.mubr.f32.gmra.mrb[16].mxu0 %v19692_v3  ;;  %4293 = vmatmul.mubr.f32.gmra.mrb[18].mxu1 %v19692_v3 }
 0x3e2   : > { %14837 = vmatpush1.bf16.msra.mxu0 %v14836_v5  ;;  %3747 = vmatprep.mubr.f32.mxu0 %v19695_v25  ;;  %v15314_v5 = vpack.c.bf16 %v2777_v6, %v2772_v57  ;;  %v15320_v57 = vpack.c.bf16 %v2798_v19, %v2793_v4  ;;  %v2801_v6 = vld [vmem:[#allocation2 + $0x10e8] sm:$0xff]  ;;  %v2818_v19 = vld [vmem:[#allocation2 + $0x1170] sm:$0xff] }
 0x3e3   : > { %15307 = vmatpush1.bf16.msra.mxu1 %v15306_v12  ;;  %4363 = vmatprep.mubr.f32.mxu1 %v19695_v25  ;;  %v14846_v12 = vpack.c.bf16 %v2786_v56, %v2781_v11  ;;  %v2806_v11 = vld [vmem:[#allocation2 + $0x1110] sm:$0xff]  ;;  %v2803_v56 = vld [vmem:[#allocation2 + $0x10f8] sm:$0xff]  ;;  %v2813_v4 = vld [vmem:[#allocation2 + $0x1148] sm:$0xff] }
 0x3e4   : > { %14839 = vmatprep.subr.bf16.mxu0 %v14838_v13  ;;  %15309 = vmatprep.subr.bf16.mxu1 %v15308_v52  ;;  %v2791_v13 = vld [vmem:[#allocation2 + $0x1098] sm:$0xff]  ;;  %v2796_v52 = vld [vmem:[#allocation2 + $0x10c0] sm:$0xff]  ;;  %v19703_v29 = vpop.permute.xlu1 %17193  ;;  %v14854_v61 = vpack.c.bf16 %v2806_v11, %v2801_v6  ;;  %v2821_v6 = vld [vmem:[#allocation2 + $0x1188] sm:$0xff] }
 0x3e5   : > { %v2823_v11 = vld [vmem:[#allocation2 + $0x1198] sm:$0xff] }
 0x3e6   : > { %14841 = vmatpush1.bf16.msra.mxu0 %v14840_v27  ;;  %v15318_v27 = vpack.c.bf16 %v2787_v17, %v2782_v59  ;;  %v15324_v17 = vpack.c.bf16 %v2808_v58, %v2803_v56  ;;  %v2828_v56 = vld [vmem:[#allocation2 + $0x11c0] sm:$0xff] }
 0x3e7   : > { %15311 = vmatpush1.bf16.msra.mxu1 %v15310_v20  ;;  %14843 = vmatprep.subr.bf16.mxu0 %v14842_v47  ;;  %v14850_v20 = vpack.c.bf16 %v2796_v52, %v2791_v13  ;;  %v2790_v47 = vld [vmem:[#allocation2 + $0x1090] sm:$0xff]  ;;  %v2811_v13 = vld [vmem:[#allocation2 + $0x1138] sm:$0xff]  ;;  %v2816_v52 = vld [vmem:[#allocation2 + $0x1160] sm:$0xff] }
 0x3e8   : > { %15313 = vmatprep.subr.bf16.mxu1 %v15312_v43  ;;  %v2797_v43 = vld [vmem:[#allocation2 + $0x10c8] sm:$0xff]  ;;  %v14852_v22 = vpack.c.bf16 %v2795_v9, %v2790_v47  ;;  %v19705_v59 = vpop.permute.xlu1 %17208  ;;  %v2815_v47 = vld [vmem:[#allocation2 + $0x1158] sm:$0xff]  ;;  %v2812_v9 = vld [vmem:[#allocation2 + $0x1140] sm:$0xff] }
 0x3ea   : > { %14845 = vmatpush1.bf16.msra.mxu0 %v14844_v40  ;;  %v15322_v40 = vpack.c.bf16 %v2797_v43, %v2792_v23  ;;  %v15328_v23 = vpack.c.bf16 %v2818_v19, %v2813_v4  ;;  %v2817_v43 = vld [vmem:[#allocation2 + $0x1168] sm:$0xff]  ;;  %v2838_v4 = vld [vmem:[#allocation2 + $0x1210] sm:$0xff] }
 0x3eb   : > { %15315 = vmatpush1.bf16.msra.mxu1 %v15314_v5  ;;  %14847 = vmatprep.subr.bf16.mxu0 %v14846_v12  ;;  %v2800_v5 = vld [vmem:[#allocation2 + $0x10e0] sm:$0xff]  ;;  %v2805_v12 = vld [vmem:[#allocation2 + $0x1108] sm:$0xff] }
 0x3ec   : > { %15317 = vmatprep.subr.bf16.mxu1 %v15316_v62  ;;  %v2807_v62 = vld [vmem:[#allocation2 + $0x1118] sm:$0xff]  ;;  %v14856_v37 = vpack.c.bf16 %v2805_v12, %v2800_v5  ;;  %v19707_v58 = vpop.permute.xlu1 %17213  ;;  %v2825_v5 = vld [vmem:[#allocation2 + $0x11a8] sm:$0xff]  ;;  %v2822_v12 = vld [vmem:[#allocation2 + $0x1190] sm:$0xff] }
 0x3ee   : > { %14849 = vmatpush1.bf16.msra.mxu0 %v14848_v33  ;;  %v15326_v33 = vpack.c.bf16 %v2807_v62, %v2802_v44  ;;  %v2827_v44 = vld [vmem:[#allocation2 + $0x11b8] sm:$0xff] }
 0x3ef   : > { %15319 = vmatpush1.bf16.msra.mxu1 %v15318_v27  ;;  %14851 = vmatprep.subr.bf16.mxu0 %v14850_v20  ;;  %v14858_v27 = vpack.c.bf16 %v2816_v52, %v2811_v13  ;;  %v2810_v20 = vld [vmem:[#allocation2 + $0x1130] sm:$0xff]  ;;  %v2831_v62 = vld [vmem:[#allocation2 + $0x11d8] sm:$0xff]  ;;  %v2836_v13 = vld [vmem:[#allocation2 + $0x1200] sm:$0xff] }
 0x3f0   : > { %15321 = vmatprep.subr.bf16.mxu1 %v15320_v57  ;;  %v2826_v57 = vld [vmem:[#allocation2 + $0x11b0] sm:$0xff]  ;;  %v14860_v49 = vpack.c.bf16 %v2815_v47, %v2810_v20  ;;  %v2833_v52 = vld [vmem:[#allocation2 + $0x11e8] sm:$0xff]  ;;  %v22505_v20 = vmax.f32 %v19578_v26, 0.0 }
 0x3f2   : > { %14853 = vmatpush1.bf16.msra.mxu0 %v14852_v22  ;;  %v2820_v22 = vld [vmem:[#allocation2 + $0x1180] sm:$0xff] }
 0x3f3   : > { %15323 = vmatpush1.bf16.msra.mxu1 %v15322_v40  ;;  %14855 = vmatprep.subr.bf16.mxu0 %v14854_v61  ;;  %v15330_v40 = vpack.c.bf16 %v2817_v43, %v2812_v9  ;;  %v14862_v61 = vpack.c.bf16 %v2826_v57, %v2821_v6  ;;  %v14864_v53 = vpack.c.bf16 %v2825_v5, %v2820_v22  ;;  %v2835_v43 = vld [vmem:[#allocation2 + $0x11f8] sm:$0xff]  ;;  %v2832_v6 = vld [vmem:[#allocation2 + $0x11e0] sm:$0xff]  ;;  %v22506_v57 = vmax.f32 %v19303_v1, 0.0  ;;  %v2841_v22 = vld [vmem:[#allocation2 + $0x1228] sm:$0xff] }
 0x3f4   : > { %15325 = vmatprep.subr.bf16.mxu1 %v15324_v17  ;;  %v15332_v17 = vpack.c.bf16 %v2828_v56, %v2823_v11  ;;  %v14866_v9 = vpack.c.bf16 %v2836_v13, %v2831_v62  ;;  %v15336_v11 = vpack.c.bf16 %v2838_v4, %v2833_v52  ;;  %v2837_v56 = vld [vmem:[#allocation2 + $0x1208] sm:$0xff]  ;;  %v22509_v5 = vmax.f32 %v19575_v39, 0.0  ;;  %v2842_v13 = vld [vmem:[#allocation2 + $0x1230] sm:$0xff] }
 0x3f5   : > { %v2845_v62 = vld [vmem:[#allocation2 + $0x1248] sm:$0xff]  ;;  %v22510_v52 = vmax.f32 %v19318_v14, 0.0 }
 0x3f6   : > { %14857 = vmatpush1.bf16.msra.mxu0 %v14856_v37  ;;  %v15334_v37 = vpack.c.bf16 %v2827_v44, %v2822_v12  ;;  %v15338_v44 = vpack.c.bf16 %v2837_v56, %v2832_v6  ;;  %v2853_v39 = vld [vmem:[#allocation2 + $0x1288] sm:$0xff]  ;;  %v2852_v6 = vld [vmem:[#allocation2 + $0x1280] sm:$0xff] }
 0x3f7   : > { %15327 = vmatpush1.bf16.msra.mxu1 %v15326_v33  ;;  %14859 = vmatprep.subr.bf16.mxu0 %v14858_v27  ;;  %v22503_v33 = vunpack.i.h.bf16 %v19531_v50  ;;  %v2846_v50 = vld [vmem:[#allocation2 + $0x1250] sm:$0xff]  ;;  %v2861_v56 = vld [vmem:[#allocation2 + $0x12c8] sm:$0xff] }
 0x3f8   : > { %15329 = vmatprep.subr.bf16.mxu1 %v15328_v23  ;;  %v2830_v23 = vld [vmem:[#allocation2 + $0x11d0] sm:$0xff] }
 0x3f9   : > { %v1993_v19 = vpop.permute.xlu1 %1992  ;;  %v14868_v1 = vpack.c.bf16 %v2835_v43, %v2830_v23  ;;  %v2850_v23 = vld [vmem:[#allocation2 + $0x1270] sm:$0xff]  ;;  %v2855_v43 = vld [vmem:[#allocation2 + $0x1298] sm:$0xff] }
 0x3fa   : > { %14861 = vmatpush1.bf16.msra.mxu0 %v14860_v49  ;;  %v1963_v3 = vpop.permute.xlu0 %1962  ;;  %v19729_v12 = vmax.f32 %v22509_v5, %v1993_v19  ;;  %v2865_v5 = vld [vmem:[#allocation2 + $0x12e8] sm:$0xff] }
 0x3fb   : > { %15331 = vmatpush1.bf16.msra.mxu1 %v15330_v40  ;;  %v2007_v27 = vsel %vm22504_vm10, %v22503_v33, %v1963_v3  ;;  %v19714_v47 = vmax.f32 %v22505_v20, %v1963_v3  ;;  %14863 = vmatprep.subr.bf16.mxu0 %v14862_v61  ;;  %v22507_v40 = vunpack.i.h.bf16 %v19564_v34  ;;  %v2843_v3 = vld [vmem:[#allocation2 + $0x1238] sm:$0xff]  ;;  %v2848_v61 = vld [vmem:[#allocation2 + $0x1260] sm:$0xff]  ;;  %v14870_v34 = vpack.c.bf16 %v2846_v50, %v2841_v22  ;;  %v2866_v22 = vld [vmem:[#allocation2 + $0x12f0] sm:$0xff] }
 0x3fc   : > { %v19718_v49 = vmax.f32 %v22506_v57, %v2007_v27  ;;  %15333 = vmatprep.subr.bf16.mxu1 %v15332_v17  ;;  %v2840_v17 = vld [vmem:[#allocation2 + $0x1220] sm:$0xff]  ;;  %v2847_v33 = vld [vmem:[#allocation2 + $0x1258] sm:$0xff]  ;;  %vm22527_vm10 = vmmov %vm22522_vm1 }
 0x3fd   : > { %v2021_v26 = vsel %vm22508_vm11, %v22507_v40, %v1993_v19  ;;  %2140 = vrot.lane.b32.xlu0 %v19714_v47, %s17859_s24  ;;  %v2851_v27 = vld [vmem:[#allocation2 + $0x1278] sm:$0xff]  ;;  %v2856_v20 = vld [vmem:[#allocation2 + $0x12a0] sm:$0xff]  ;;  %v2858_v19 = vld [vmem:[#allocation2 + $0x12b0] sm:$0xff]  ;;  %v15342_v14 = vpack.c.bf16 %v2847_v33, %v2842_v13 }
 0x3fe   : > { %14865 = vmatpush1.bf16.msra.mxu0 %v14864_v53  ;;  %2138 = vrot.lane.b32.xlu1 %v19718_v49, %s17859_s24  ;;  %v19733_v4 = vmax.f32 %v22510_v52, %v2021_v26  ;;  %v15340_v53 = vpack.c.bf16 %v2848_v61, %v2843_v3  ;;  %v15344_v57 = vpack.c.bf16 %v2858_v19, %v2853_v39  ;;  %v2863_v50 = vld [vmem:[#allocation2 + $0x12d8] sm:$0xff]  ;;  %v2868_v40 = vld [vmem:[#allocation2 + $0x1300] sm:$0xff]  ;;  %v2873_v52 = vld [vmem:[#allocation2 + $0x1328] sm:$0xff] }
 0x3ff   : > { %15335 = vmatpush1.bf16.msra.mxu1 %v15334_v37  ;;  %14867 = vmatprep.subr.bf16.mxu0 %v14866_v9  ;;  %v14872_v37 = vpack.c.bf16 %v2845_v62, %v2840_v17  ;;  %v14874_v9 = vpack.c.bf16 %v2856_v20, %v2851_v27  ;;  %v14876_v26 = vpack.c.bf16 %v2855_v43, %v2850_v23  ;;  %v2867_v17 = vld [vmem:[#allocation2 + $0x12f8] sm:$0xff]  ;;  %v2876_v13 = vld [vmem:[#allocation2 + $0x1340] sm:$0xff]  ;;  %v2870_v39 = vld [vmem:[#allocation2 + $0x1310] sm:$0xff] }
 0x400   : > { %15337 = vmatprep.subr.bf16.mxu1 %v15336_v11  ;;  %v2857_v11 = vld [vmem:[#allocation2 + $0x12a8] sm:$0xff]  ;;  %v14878_v61 = vpack.c.bf16 %v2866_v22, %v2861_v56  ;;  %v2871_v62 = vld [vmem:[#allocation2 + $0x1318] sm:$0xff]  ;;  %v2886_v43 = vld [vmem:[#allocation2 + $0x1390] sm:$0xff] }
 0x401   : > { %2170 = vrot.lane.b32.xlu0 %v19729_v12, %s17859_s24  ;;  %v15346_v3 = vpack.c.bf16 %v2857_v11, %v2852_v6  ;;  %v14882_v20 = vpack.c.bf16 %v2876_v13, %v2871_v62  ;;  %v2875_v19 = vld [vmem:[#allocation2 + $0x1338] sm:$0xff]  ;;  %v2881_v23 = vld [vmem:[#allocation2 + $0x1368] sm:$0xff]  ;;  %vm22528_vm11 = vmmov %vm22522_vm1 }
 0x402   : > { %14869 = vmatpush1.bf16.msra.mxu0 %v14868_v1  ;;  %2168 = vrot.lane.b32.xlu1 %v19733_v4, %s17859_s24  ;;  %v2860_v1 = vld [vmem:[#allocation2 + $0x12c0] sm:$0xff]  ;;  %v2883_v6 = vld [vmem:[#allocation2 + $0x1378] sm:$0xff]  ;;  %v14884_v11 = vpack.c.bf16 %v2875_v19, %v2870_v39  ;;  %v14886_v22 = vpack.c.bf16 %v2886_v43, %v2881_v23  ;;  %v2901_v39 = vld [vmem:[#allocation2 + $0x1408] sm:$0xff]  ;;  %s17867_s24 = smov 109  }
 0x403   : > { %15339 = vmatpush1.bf16.msra.mxu1 %v15338_v44  ;;  %14871 = vmatprep.subr.bf16.mxu0 %v14870_v34  ;;  %v2862_v44 = vld [vmem:[#allocation2 + $0x12d0] sm:$0xff]  ;;  %v15348_v34 = vpack.c.bf16 %v2868_v40, %v2863_v50  ;;  %v14880_v33 = vpack.c.bf16 %v2865_v5, %v2860_v1  ;;  %v2880_v50 = vld [vmem:[#allocation2 + $0x1360] sm:$0xff]  ;;  %v2885_v40 = vld [vmem:[#allocation2 + $0x1388] sm:$0xff] }
 0x404   : > { %15341 = vmatprep.subr.bf16.mxu1 %v15340_v53  ;;  %v2878_v53 = vld [vmem:[#allocation2 + $0x1350] sm:$0xff]  ;;  %v15350_v27 = vpack.c.bf16 %v2867_v17, %v2862_v44  ;;  %v2891_v1 = vld [vmem:[#allocation2 + $0x13b8] sm:$0xff]  ;;  %v2896_v5 = vld [vmem:[#allocation2 + $0x13e0] sm:$0xff]  ;;  %v14888_v17 = vpack.c.bf16 %v2885_v40, %v2880_v50 }
 0x405   : > { %v2893_v44 = vld [vmem:[#allocation2 + $0x13c8] sm:$0xff]  ;;  %v14890_v13 = vpack.c.bf16 %v2896_v5, %v2891_v1  ;;  %v2906_v19 = vld [vmem:[#allocation2 + $0x1430] sm:$0xff]  ;;  %v2908_v23 = vld [vmem:[#allocation2 + $0x1440] sm:$0xff]  ;;  %v17195_v1 = vunpack.i.l.bf16 %v19703_v29 }
 0x406   : > { %14873 = vmatpush1.bf16.msra.mxu0 %v14872_v37  ;;  %v2872_v37 = vld [vmem:[#allocation2 + $0x1320] sm:$0xff] }
 0x407   : > { %15343 = vmatpush1.bf16.msra.mxu1 %v15342_v14  ;;  %14875 = vmatprep.subr.bf16.mxu0 %v14874_v9  ;;  %v15352_v14 = vpack.c.bf16 %v2878_v53, %v2873_v52  ;;  %v2877_v9 = vld [vmem:[#allocation2 + $0x1348] sm:$0xff]  ;;  %v2890_v52 = vld [vmem:[#allocation2 + $0x13b0] sm:$0xff]  ;;  %v2895_v53 = vld [vmem:[#allocation2 + $0x13d8] sm:$0xff] }
 0x408   : > { %15345 = vmatprep.subr.bf16.mxu1 %v15344_v57  ;;  %v2888_v57 = vld [vmem:[#allocation2 + $0x13a0] sm:$0xff]  ;;  %v15354_v56 = vpack.c.bf16 %v2877_v9, %v2872_v37  ;;  %v17191_v37 = vunpack.i.h.bf16 %v19701_v30  ;;  %v2903_v9 = vld [vmem:[#allocation2 + $0x1418] sm:$0xff]  ;;  %v14892_v43 = vpack.c.bf16 %v2895_v53, %v2890_v52 }
 0x409   : > { %v15364_v50 = vpack.c.bf16 %v2908_v23, %v2903_v9  ;;  %v2900_v40 = vld [vmem:[#allocation2 + $0x1400] sm:$0xff]  ;;  %v2915_v9 = vld [vmem:[#allocation2 + $0x1478] sm:$0xff] }
 0x40a   : > { %14877 = vmatpush1.bf16.msra.mxu0 %v14876_v26  ;;  %v2882_v26 = vld [vmem:[#allocation2 + $0x1370] sm:$0xff]  ;;  %v2912_v23 = vld [vmem:[#allocation2 + $0x1460] sm:$0xff] }
 0x40b   : > { %15347 = vmatpush1.bf16.msra.mxu1 %v15346_v3  ;;  %14879 = vmatprep.subr.bf16.mxu0 %v14878_v61  ;;  %v15356_v3 = vpack.c.bf16 %v2888_v57, %v2883_v6  ;;  %v2887_v61 = vld [vmem:[#allocation2 + $0x1398] sm:$0xff]  ;;  %v14894_v57 = vpack.c.bf16 %v2906_v19, %v2901_v39  ;;  %v2910_v19 = vld [vmem:[#allocation2 + $0x1450] sm:$0xff] }
 0x40c   : > { %15349 = vmatprep.subr.bf16.mxu1 %v15348_v34  ;;  %v2898_v34 = vld [vmem:[#allocation2 + $0x13f0] sm:$0xff]  ;;  %v15358_v62 = vpack.c.bf16 %v2887_v61, %v2882_v26  ;;  %v2905_v26 = vld [vmem:[#allocation2 + $0x1428] sm:$0xff]  ;;  %v17196_v61 = vunpack.i.h.bf16 %v19703_v29 }
 0x40d   : > { %v14896_v52 = vpack.c.bf16 %v2905_v26, %v2900_v40  ;;  %v2920_v26 = vld [vmem:[#allocation2 + $0x14a0] sm:$0xff]  ;;  %v3233_v29 = vld [vmem:[#allocation2 + $0x1e68] sm:$0xff] }
 0x40e   : > { %14881 = vmatpush1.bf16.msra.mxu0 %v14880_v33  ;;  %v2892_v33 = vld [vmem:[#allocation2 + $0x13c0] sm:$0xff] }
 0x40f   : > { %15351 = vmatpush1.bf16.msra.mxu1 %v15350_v27  ;;  %14883 = vmatprep.subr.bf16.mxu0 %v14882_v20  ;;  %v15360_v27 = vpack.c.bf16 %v2898_v34, %v2893_v44  ;;  %v2897_v20 = vld [vmem:[#allocation2 + $0x13e8] sm:$0xff]  ;;  %v2907_v44 = vld [vmem:[#allocation2 + $0x1438] sm:$0xff] }
 0x410   : > { %15353 = vmatprep.subr.bf16.mxu1 %v15352_v14  ;;  %v17190_v14 = vunpack.i.l.bf16 %v19701_v30  ;;  %v15362_v6 = vpack.c.bf16 %v2897_v20, %v2892_v33  ;;  %v2911_v34 = vld [vmem:[#allocation2 + $0x1458] sm:$0xff] }
 0x411   : > { %v3083_v30 = vld [vmem:[#allocation2 + $0x19b8] sm:$0xff] }
 0x412   : > { %14885 = vmatpush1.bf16.msra.mxu0 %v14884_v11  ;;  %v22511_v11 = vunpack.i.l.bf16 %v19662_v8  ;;  %v2193_v5 = vsel %vm770_vm4, %v17190_v14, %v17191_v37 }
 0x413   : > { %15355 = vmatpush1.bf16.msra.mxu1 %v15354_v56  ;;  %14887 = vmatprep.subr.bf16.mxu0 %v14886_v22  ;;  %v22512_v56 = vunpack.i.h.bf16 %v19634_v0  ;;  %v2913_v0 = vld [vmem:[#allocation2 + $0x1468] sm:$0xff]  ;;  %v19755_v53 = vmax.f32 %v19494_v7, %v2193_v5  ;;  %v2922_v5 = vld [vmem:[#allocation2 + $0x14b0] sm:$0xff] }
 0x414   : > { %15357 = vmatprep.subr.bf16.mxu1 %v15356_v3  ;;  %v2902_v3 = vld [vmem:[#allocation2 + $0x1410] sm:$0xff]  ;;  %v2917_v7 = vld [vmem:[#allocation2 + $0x1488] sm:$0xff] }
 0x415   : > { %v2178_v22 = vsel %vm770_vm4, %v22512_v56, %v22511_v11  ;;  %v15366_v33 = vpack.c.bf16 %v2907_v44, %v2902_v3  ;;  %v14900_v56 = vpack.c.bf16 %v2915_v9, %v2910_v19  ;;  %v2925_v3 = vld [vmem:[#allocation2 + $0x14c8] sm:$0xff] }
 0x416   : > { %14889 = vmatpush1.bf16.msra.mxu0 %v14888_v17  ;;  %v2916_v17 = vld [vmem:[#allocation2 + $0x1480] sm:$0xff]  ;;  %v2937_v9 = vld [vmem:[#allocation2 + $0x1528] sm:$0xff] }
 0x417   : > { %15359 = vmatpush1.bf16.msra.mxu1 %v15358_v62  ;;  %14891 = vmatprep.subr.bf16.mxu0 %v14890_v13  ;;  %v2918_v62 = vld [vmem:[#allocation2 + $0x1490] sm:$0xff]  ;;  %v19752_v13 = vmax.f32 %v19435_v48, %v2178_v22  ;;  %v14898_v39 = vpack.c.bf16 %v2916_v17, %v2911_v34  ;;  %v2927_v34 = vld [vmem:[#allocation2 + $0x14d8] sm:$0xff] }
 0x418   : > { %15361 = vmatprep.subr.bf16.mxu1 %v15360_v27  ;;  %v22513_v27 = vunpack.i.h.bf16 %v19658_v32  ;;  %v15368_v48 = vpack.c.bf16 %v2918_v62, %v2913_v0  ;;  %v2923_v32 = vld [vmem:[#allocation2 + $0x14b8] sm:$0xff]  ;;  %v2936_v0 = vld [vmem:[#allocation2 + $0x1520] sm:$0xff]  ;;  %v2938_v62 = vld [vmem:[#allocation2 + $0x1530] sm:$0xff] }
 0x419   : > { %v2931_v17 = vld [vmem:[#allocation2 + $0x14f8] sm:$0xff] }
 0x41a   : > { %14893 = vmatpush1.bf16.msra.mxu0 %v14892_v43  ;;  %v2192_v20 = vsel %vm770_vm4, %v22513_v27, %v17190_v14  ;;  %v2181_v43 = vsel %vm770_vm4, %v17195_v1, %v17196_v61  ;;  %v2928_v14 = vld [vmem:[#allocation2 + $0x14e0] sm:$0xff]  ;;  %v2930_v27 = vld [vmem:[#allocation2 + $0x14f0] sm:$0xff] }
 0x41b   : > { %15363 = vmatpush1.bf16.msra.mxu1 %v15362_v6  ;;  %14895 = vmatprep.subr.bf16.mxu0 %v14894_v57  ;;  %v2921_v6 = vld [vmem:[#allocation2 + $0x14a8] sm:$0xff]  ;;  %v2926_v57 = vld [vmem:[#allocation2 + $0x14d0] sm:$0xff]  ;;  %v19770_v11 = vmax.f32 %v19456_v42, %v2192_v20  ;;  %v19773_v22 = vmax.f32 %v19515_v60, %v2181_v43  ;;  %v15372_v44 = vpack.c.bf16 %v2928_v14, %v2923_v32  ;;  %v2935_v20 = vld [vmem:[#allocation2 + $0x1518] sm:$0xff] }
 0x41c   : > { %15365 = vmatprep.subr.bf16.mxu1 %v15364_v50  ;;  %v15370_v50 = vpack.c.bf16 %v2917_v7, %v2912_v23  ;;  %v14902_v40 = vpack.c.bf16 %v2926_v57, %v2921_v6  ;;  %v2933_v42 = vld [vmem:[#allocation2 + $0x1508] sm:$0xff]  ;;  %v14904_v60 = vpack.c.bf16 %v2925_v3, %v2920_v26  ;;  %v2943_v43 = vld [vmem:[#allocation2 + $0x1558] sm:$0xff]  ;;  %v2948_v7 = vld [vmem:[#allocation2 + $0x1580] sm:$0xff]  ;;  %v14908_v6 = vpack.c.bf16 %v2935_v20, %v2930_v27 }
 0x41d   : > { %3748 = vmatmul.mubr.f32.vlgmr.msra.gmra.mrb[14].mxu0 %v19752_v13  ;;  %v15376_v19 = vpack.c.bf16 %v2938_v62, %v2933_v42  ;;  %v2941_v23 = vld [vmem:[#allocation2 + $0x1548] sm:$0xff]  ;;  %v2940_v14 = vld [vmem:[#allocation2 + $0x1540] sm:$0xff]  ;;  %v2947_v26 = vld [vmem:[#allocation2 + $0x1578] sm:$0xff] }
 0x41e   : > { %4364 = vmatmul.mubr.f32.vlgmr.msra.gmra.mrb[16].mxu1 %v19752_v13  ;;  %3753 = vmatprep.mubr.f32.mxu0 %v19755_v53  ;;  %v2951_v3 = vld [vmem:[#allocation2 + $0x1598] sm:$0xff]  ;;  %v2950_v62 = vld [vmem:[#allocation2 + $0x1590] sm:$0xff]  ;;  %v2957_v27 = vld [vmem:[#allocation2 + $0x15c8] sm:$0xff] }
 0x41f   : > { %14897 = vmatpush1.bf16.msra.mxu0 %v14896_v52  ;;  %4369 = vmatprep.mubr.f32.mxu1 %v19755_v53  ;;  %v15374_v52 = vpack.c.bf16 %v2927_v34, %v2922_v5  ;;  %v2956_v5 = vld [vmem:[#allocation2 + $0x15c0] sm:$0xff]  ;;  %v2958_v34 = vld [vmem:[#allocation2 + $0x15d0] sm:$0xff]  ;;  %v2961_v20 = vld [vmem:[#allocation2 + $0x15e8] sm:$0xff] }
 0x420   : > { %15367 = vmatpush1.bf16.msra.mxu1 %v15366_v33  ;;  %14899 = vmatprep.subr.bf16.mxu0 %v14898_v39  ;;  %v14906_v33 = vpack.c.bf16 %v2936_v0, %v2931_v17  ;;  %v2932_v39 = vld [vmem:[#allocation2 + $0x1500] sm:$0xff]  ;;  %v14914_v42 = vpack.c.bf16 %v2956_v5, %v2951_v3 }
 0x421   : > { %3754 = vmatmul.mubr.f32.gmra.mrb[16].mxu0 %v19770_v11  ;;  %15369 = vmatprep.subr.bf16.mxu1 %v15368_v48  ;;  %v2946_v48 = vld [vmem:[#allocation2 + $0x1570] sm:$0xff]  ;;  %v15378_v57 = vpack.c.bf16 %v2937_v9, %v2932_v39  ;;  %v2968_v9 = vld [vmem:[#allocation2 + $0x1620] sm:$0xff] }
 0x422   : > { %4370 = vmatmul.mubr.f32.gmra.mrb[18].mxu1 %v19770_v11  ;;  %3824 = vmatprep.mubr.f32.mxu0 %v19773_v22  ;;  %v14910_v32 = vpack.c.bf16 %v2946_v48, %v2941_v23  ;;  %v2966_v39 = vld [vmem:[#allocation2 + $0x1610] sm:$0xff] }
 0x423   : > { %14901 = vmatpush1.bf16.msra.mxu0 %v14900_v56  ;;  %4440 = vmatprep.mubr.f32.mxu1 %v19773_v22  ;;  %v2945_v56 = vld [vmem:[#allocation2 + $0x1568] sm:$0xff] }
 0x424   : > { %15371 = vmatpush1.bf16.msra.mxu1 %v15370_v50  ;;  %14903 = vmatprep.subr.bf16.mxu0 %v14902_v40  ;;  %v2942_v50 = vld [vmem:[#allocation2 + $0x1550] sm:$0xff]  ;;  %v15380_v40 = vpack.c.bf16 %v2948_v7, %v2943_v43  ;;  %v14912_v17 = vpack.c.bf16 %v2945_v56, %v2940_v14  ;;  %v14918_v43 = vpack.c.bf16 %v2966_v39, %v2961_v20  ;;  %v2960_v7 = vld [vmem:[#allocation2 + $0x15e0] sm:$0xff]  ;;  %v2967_v14 = vld [vmem:[#allocation2 + $0x1618] sm:$0xff] }
 0x425   : > { %15373 = vmatprep.subr.bf16.mxu1 %v15372_v44  ;;  %v2953_v44 = vld [vmem:[#allocation2 + $0x15a8] sm:$0xff]  ;;  %v15382_v0 = vpack.c.bf16 %v2947_v26, %v2942_v50  ;;  %v2971_v56 = vld [vmem:[#allocation2 + $0x1638] sm:$0xff]  ;;  %v2976_v50 = vld [vmem:[#allocation2 + $0x1660] sm:$0xff] }
 0x426   : > { %v2978_v26 = vld [vmem:[#allocation2 + $0x1670] sm:$0xff] }
 0x427   : > { %14905 = vmatpush1.bf16.msra.mxu0 %v14904_v60  ;;  %v2955_v60 = vld [vmem:[#allocation2 + $0x15b8] sm:$0xff] }
 0x428   : > { %15375 = vmatpush1.bf16.msra.mxu1 %v15374_v52  ;;  %14907 = vmatprep.subr.bf16.mxu0 %v14906_v33  ;;  %v2952_v52 = vld [vmem:[#allocation2 + $0x15a0] sm:$0xff]  ;;  %v15384_v33 = vpack.c.bf16 %v2958_v34, %v2953_v44  ;;  %v14916_v23 = vpack.c.bf16 %v2955_v60, %v2950_v62  ;;  %v14922_v44 = vpack.c.bf16 %v2976_v50, %v2971_v56  ;;  %v2970_v34 = vld [vmem:[#allocation2 + $0x1630] sm:$0xff]  ;;  %v2977_v62 = vld [vmem:[#allocation2 + $0x1668] sm:$0xff] }
 0x429   : > { %15377 = vmatprep.subr.bf16.mxu1 %v15376_v19  ;;  %v2963_v19 = vld [vmem:[#allocation2 + $0x15f8] sm:$0xff]  ;;  %v15386_v48 = vpack.c.bf16 %v2957_v27, %v2952_v52  ;;  %v2981_v60 = vld [vmem:[#allocation2 + $0x1688] sm:$0xff]  ;;  %v2986_v52 = vld [vmem:[#allocation2 + $0x16b0] sm:$0xff] }
 0x42a   : > { %v2988_v27 = vld [vmem:[#allocation2 + $0x16c0] sm:$0xff] }
 0x42b   : > { %14909 = vmatpush1.bf16.msra.mxu0 %v14908_v6  ;;  %v2965_v6 = vld [vmem:[#allocation2 + $0x1608] sm:$0xff] }
 0x42c   : > { %15379 = vmatpush1.bf16.msra.mxu1 %v15378_v57  ;;  %14911 = vmatprep.subr.bf16.mxu0 %v14910_v32  ;;  %v2962_v57 = vld [vmem:[#allocation2 + $0x15f0] sm:$0xff]  ;;  %v15388_v32 = vpack.c.bf16 %v2968_v9, %v2963_v19  ;;  %v14920_v3 = vpack.c.bf16 %v2965_v6, %v2960_v7  ;;  %v14926_v19 = vpack.c.bf16 %v2986_v52, %v2981_v60  ;;  %v2980_v9 = vld [vmem:[#allocation2 + $0x1680] sm:$0xff]  ;;  %v2987_v7 = vld [vmem:[#allocation2 + $0x16b8] sm:$0xff] }
 0x42d   : > { %15381 = vmatprep.subr.bf16.mxu1 %v15380_v40  ;;  %v2973_v40 = vld [vmem:[#allocation2 + $0x1648] sm:$0xff]  ;;  %v15390_v5 = vpack.c.bf16 %v2967_v14, %v2962_v57  ;;  %v2991_v6 = vld [vmem:[#allocation2 + $0x16d8] sm:$0xff]  ;;  %v2996_v57 = vld [vmem:[#allocation2 + $0x1700] sm:$0xff] }
 0x42e   : > { %v2998_v14 = vld [vmem:[#allocation2 + $0x1710] sm:$0xff] }
 0x42f   : > { %14913 = vmatpush1.bf16.msra.mxu0 %v14912_v17  ;;  %v2975_v17 = vld [vmem:[#allocation2 + $0x1658] sm:$0xff] }
 0x430   : > { %15383 = vmatpush1.bf16.msra.mxu1 %v15382_v0  ;;  %14915 = vmatprep.subr.bf16.mxu0 %v14914_v42  ;;  %v2972_v0 = vld [vmem:[#allocation2 + $0x1640] sm:$0xff]  ;;  %v15392_v42 = vpack.c.bf16 %v2978_v26, %v2973_v40  ;;  %v14924_v20 = vpack.c.bf16 %v2975_v17, %v2970_v34  ;;  %v14930_v40 = vpack.c.bf16 %v2996_v57, %v2991_v6  ;;  %v2990_v26 = vld [vmem:[#allocation2 + $0x16d0] sm:$0xff]  ;;  %v2997_v34 = vld [vmem:[#allocation2 + $0x1708] sm:$0xff] }
 0x431   : > { %15385 = vmatprep.subr.bf16.mxu1 %v15384_v33  ;;  %v2983_v33 = vld [vmem:[#allocation2 + $0x1698] sm:$0xff]  ;;  %v15394_v39 = vpack.c.bf16 %v2977_v62, %v2972_v0  ;;  %v3001_v17 = vld [vmem:[#allocation2 + $0x1728] sm:$0xff]  ;;  %v3006_v0 = vld [vmem:[#allocation2 + $0x1750] sm:$0xff] }
 0x432   : > { %v3008_v62 = vld [vmem:[#allocation2 + $0x1760] sm:$0xff] }
 0x433   : > { %14917 = vmatpush1.bf16.msra.mxu0 %v14916_v23  ;;  %v2985_v23 = vld [vmem:[#allocation2 + $0x16a8] sm:$0xff] }
 0x434   : > { %15387 = vmatpush1.bf16.msra.mxu1 %v15386_v48  ;;  %14919 = vmatprep.subr.bf16.mxu0 %v14918_v43  ;;  %v2982_v48 = vld [vmem:[#allocation2 + $0x1690] sm:$0xff]  ;;  %v15396_v43 = vpack.c.bf16 %v2988_v27, %v2983_v33  ;;  %v14928_v56 = vpack.c.bf16 %v2985_v23, %v2980_v9  ;;  %v14934_v33 = vpack.c.bf16 %v3006_v0, %v3001_v17  ;;  %v3000_v27 = vld [vmem:[#allocation2 + $0x1720] sm:$0xff]  ;;  %v3007_v9 = vld [vmem:[#allocation2 + $0x1758] sm:$0xff] }
 0x435   : > { %15389 = vmatprep.subr.bf16.mxu1 %v15388_v32  ;;  %v2993_v32 = vld [vmem:[#allocation2 + $0x16e8] sm:$0xff]  ;;  %v15398_v50 = vpack.c.bf16 %v2987_v7, %v2982_v48  ;;  %v3011_v23 = vld [vmem:[#allocation2 + $0x1778] sm:$0xff]  ;;  %v3016_v48 = vld [vmem:[#allocation2 + $0x17a0] sm:$0xff] }
 0x436   : > { %v3018_v7 = vld [vmem:[#allocation2 + $0x17b0] sm:$0xff] }
 0x437   : > { %14921 = vmatpush1.bf16.msra.mxu0 %v14920_v3  ;;  %v2995_v3 = vld [vmem:[#allocation2 + $0x16f8] sm:$0xff] }
 0x438   : > { %15391 = vmatpush1.bf16.msra.mxu1 %v15390_v5  ;;  %14923 = vmatprep.subr.bf16.mxu0 %v14922_v44  ;;  %v2992_v5 = vld [vmem:[#allocation2 + $0x16e0] sm:$0xff]  ;;  %v15400_v44 = vpack.c.bf16 %v2998_v14, %v2993_v32  ;;  %v14932_v60 = vpack.c.bf16 %v2995_v3, %v2990_v26  ;;  %v14938_v32 = vpack.c.bf16 %v3016_v48, %v3011_v23  ;;  %v3010_v14 = vld [vmem:[#allocation2 + $0x1770] sm:$0xff]  ;;  %v3017_v26 = vld [vmem:[#allocation2 + $0x17a8] sm:$0xff] }
 0x439   : > { %15393 = vmatprep.subr.bf16.mxu1 %v15392_v42  ;;  %v3003_v42 = vld [vmem:[#allocation2 + $0x1738] sm:$0xff]  ;;  %v15402_v52 = vpack.c.bf16 %v2997_v34, %v2992_v5  ;;  %v3021_v3 = vld [vmem:[#allocation2 + $0x17c8] sm:$0xff]  ;;  %v3026_v5 = vld [vmem:[#allocation2 + $0x17f0] sm:$0xff] }
 0x43a   : > { %v3028_v34 = vld [vmem:[#allocation2 + $0x1800] sm:$0xff] }
 0x43b   : > { %14925 = vmatpush1.bf16.msra.mxu0 %v14924_v20  ;;  %v3005_v20 = vld [vmem:[#allocation2 + $0x1748] sm:$0xff] }
 0x43c   : > { %15395 = vmatpush1.bf16.msra.mxu1 %v15394_v39  ;;  %14927 = vmatprep.subr.bf16.mxu0 %v14926_v19  ;;  %v3002_v39 = vld [vmem:[#allocation2 + $0x1730] sm:$0xff]  ;;  %v15404_v19 = vpack.c.bf16 %v3008_v62, %v3003_v42  ;;  %v14936_v6 = vpack.c.bf16 %v3005_v20, %v3000_v27  ;;  %v14942_v42 = vpack.c.bf16 %v3026_v5, %v3021_v3  ;;  %v3020_v62 = vld [vmem:[#allocation2 + $0x17c0] sm:$0xff]  ;;  %v3027_v27 = vld [vmem:[#allocation2 + $0x17f8] sm:$0xff] }
 0x43d   : > { %15397 = vmatprep.subr.bf16.mxu1 %v15396_v43  ;;  %v3013_v43 = vld [vmem:[#allocation2 + $0x1788] sm:$0xff]  ;;  %v15406_v57 = vpack.c.bf16 %v3007_v9, %v3002_v39  ;;  %v3031_v20 = vld [vmem:[#allocation2 + $0x1818] sm:$0xff]  ;;  %v3036_v39 = vld [vmem:[#allocation2 + $0x1840] sm:$0xff] }
 0x43e   : > { %v3038_v9 = vld [vmem:[#allocation2 + $0x1850] sm:$0xff] }
 0x43f   : > { %14929 = vmatpush1.bf16.msra.mxu0 %v14928_v56  ;;  %v3015_v56 = vld [vmem:[#allocation2 + $0x1798] sm:$0xff] }
 0x440   : > { %15399 = vmatpush1.bf16.msra.mxu1 %v15398_v50  ;;  %14931 = vmatprep.subr.bf16.mxu0 %v14930_v40  ;;  %v3012_v50 = vld [vmem:[#allocation2 + $0x1780] sm:$0xff]  ;;  %v15408_v40 = vpack.c.bf16 %v3018_v7, %v3013_v43  ;;  %v14940_v17 = vpack.c.bf16 %v3015_v56, %v3010_v14  ;;  %v14946_v43 = vpack.c.bf16 %v3036_v39, %v3031_v20  ;;  %v3030_v7 = vld [vmem:[#allocation2 + $0x1810] sm:$0xff]  ;;  %v3037_v14 = vld [vmem:[#allocation2 + $0x1848] sm:$0xff] }
 0x441   : > { %15401 = vmatprep.subr.bf16.mxu1 %v15400_v44  ;;  %v3023_v44 = vld [vmem:[#allocation2 + $0x17d8] sm:$0xff]  ;;  %v15410_v0 = vpack.c.bf16 %v3017_v26, %v3012_v50  ;;  %v3041_v56 = vld [vmem:[#allocation2 + $0x1868] sm:$0xff]  ;;  %v3046_v50 = vld [vmem:[#allocation2 + $0x1890] sm:$0xff] }
 0x442   : > { %v3048_v26 = vld [vmem:[#allocation2 + $0x18a0] sm:$0xff] }
 0x443   : > { %14933 = vmatpush1.bf16.msra.mxu0 %v14932_v60  ;;  %v3025_v60 = vld [vmem:[#allocation2 + $0x17e8] sm:$0xff] }
 0x444   : > { %15403 = vmatpush1.bf16.msra.mxu1 %v15402_v52  ;;  %14935 = vmatprep.subr.bf16.mxu0 %v14934_v33  ;;  %v3022_v52 = vld [vmem:[#allocation2 + $0x17d0] sm:$0xff]  ;;  %v15412_v33 = vpack.c.bf16 %v3028_v34, %v3023_v44  ;;  %v14944_v23 = vpack.c.bf16 %v3025_v60, %v3020_v62  ;;  %v14950_v44 = vpack.c.bf16 %v3046_v50, %v3041_v56  ;;  %v3040_v34 = vld [vmem:[#allocation2 + $0x1860] sm:$0xff]  ;;  %v3047_v62 = vld [vmem:[#allocation2 + $0x1898] sm:$0xff] }
 0x445   : > { %15405 = vmatprep.subr.bf16.mxu1 %v15404_v19  ;;  %v3033_v19 = vld [vmem:[#allocation2 + $0x1828] sm:$0xff]  ;;  %v15414_v48 = vpack.c.bf16 %v3027_v27, %v3022_v52  ;;  %v3051_v60 = vld [vmem:[#allocation2 + $0x18b8] sm:$0xff]  ;;  %v3056_v52 = vld [vmem:[#allocation2 + $0x18e0] sm:$0xff] }
 0x446   : > { %v3058_v27 = vld [vmem:[#allocation2 + $0x18f0] sm:$0xff]  ;;  %v3063_v56 = vld [vmem:[#allocation2 + $0x1918] sm:$0xff]  ;;  %v3068_v50 = vld [vmem:[#allocation2 + $0x1940] sm:$0xff] }
 0x447   : > { %14937 = vmatpush1.bf16.msra.mxu0 %v14936_v6  ;;  %v3035_v6 = vld [vmem:[#allocation2 + $0x1838] sm:$0xff] }
 0x448   : > { %15407 = vmatpush1.bf16.msra.mxu1 %v15406_v57  ;;  %14939 = vmatprep.subr.bf16.mxu0 %v14938_v32  ;;  %v3032_v57 = vld [vmem:[#allocation2 + $0x1820] sm:$0xff]  ;;  %v15416_v32 = vpack.c.bf16 %v3038_v9, %v3033_v19  ;;  %v14948_v3 = vpack.c.bf16 %v3035_v6, %v3030_v7  ;;  %v14954_v19 = vpack.c.bf16 %v3056_v52, %v3051_v60  ;;  %v3050_v9 = vld [vmem:[#allocation2 + $0x18b0] sm:$0xff]  ;;  %v3057_v7 = vld [vmem:[#allocation2 + $0x18e8] sm:$0xff]  ;;  %v17215_v60 = vunpack.i.l.bf16 %v19707_v58 }
 0x449   : > { %15409 = vmatprep.subr.bf16.mxu1 %v15408_v40  ;;  %v3043_v40 = vld [vmem:[#allocation2 + $0x1878] sm:$0xff]  ;;  %v15418_v5 = vpack.c.bf16 %v3037_v14, %v3032_v57  ;;  %v3061_v6 = vld [vmem:[#allocation2 + $0x1908] sm:$0xff]  ;;  %v3066_v57 = vld [vmem:[#allocation2 + $0x1930] sm:$0xff]  ;;  %v17210_v14 = vunpack.i.l.bf16 %v19705_v59 }
 0x44b   : > { %14941 = vmatpush1.bf16.msra.mxu0 %v14940_v17  ;;  %v3045_v17 = vld [vmem:[#allocation2 + $0x1888] sm:$0xff] }
 0x44c   : > { %15411 = vmatpush1.bf16.msra.mxu1 %v15410_v0  ;;  %14943 = vmatprep.subr.bf16.mxu0 %v14942_v42  ;;  %v3042_v0 = vld [vmem:[#allocation2 + $0x1870] sm:$0xff]  ;;  %v15420_v42 = vpack.c.bf16 %v3048_v26, %v3043_v40  ;;  %v14952_v20 = vpack.c.bf16 %v3045_v17, %v3040_v34  ;;  %v15428_v34 = vpack.c.bf16 %v3068_v50, %v3063_v56  ;;  %v3060_v17 = vld [vmem:[#allocation2 + $0x1900] sm:$0xff]  ;;  %v3081_v50 = vld [vmem:[#allocation2 + $0x19a8] sm:$0xff] }
 0x44d   : > { %15413 = vmatprep.subr.bf16.mxu1 %v15412_v33  ;;  %v3053_v33 = vld [vmem:[#allocation2 + $0x18c8] sm:$0xff]  ;;  %v15422_v39 = vpack.c.bf16 %v3047_v62, %v3042_v0  ;;  %v17216_v62 = vunpack.i.h.bf16 %v19707_v58 }
 0x44e   : > { %v3065_v0 = vld [vmem:[#allocation2 + $0x1928] sm:$0xff] }
 0x44f   : > { %14945 = vmatpush1.bf16.msra.mxu0 %v14944_v23  ;;  %v3055_v23 = vld [vmem:[#allocation2 + $0x18d8] sm:$0xff]  ;;  %v2183_v56 = vsel %vm770_vm4, %v17215_v60, %v17216_v62 }
 0x450   : > { %15415 = vmatpush1.bf16.msra.mxu1 %v15414_v48  ;;  %14947 = vmatprep.subr.bf16.mxu0 %v14946_v43  ;;  %v3052_v48 = vld [vmem:[#allocation2 + $0x18c0] sm:$0xff]  ;;  %v15424_v43 = vpack.c.bf16 %v3058_v27, %v3053_v33  ;;  %v14956_v40 = vpack.c.bf16 %v3055_v23, %v3050_v9  ;;  %v3067_v33 = vld [vmem:[#allocation2 + $0x1938] sm:$0xff] }
 0x451   : > { %15417 = vmatprep.subr.bf16.mxu1 %v15416_v32  ;;  %v17211_v32 = vunpack.i.h.bf16 %v19705_v59  ;;  %v15426_v26 = vpack.c.bf16 %v3057_v7, %v3052_v48  ;;  %v3071_v27 = vld [vmem:[#allocation2 + $0x1958] sm:$0xff]  ;;  %v2194_v48 = vsel %vm770_vm4, %v17191_v37, %v17210_v14  ;;  %v3070_v7 = vld [vmem:[#allocation2 + $0x1950] sm:$0xff]  ;;  %v3088_v37 = vld [vmem:[#allocation2 + $0x19e0] sm:$0xff] }
 0x452   : > { %v3243_v59 = vld [vmem:[#allocation2 + $0x1eb8] sm:$0xff] }
 0x453   : > { %14949 = vmatpush1.bf16.msra.mxu0 %v14948_v3  ;;  %v14958_v3 = vpack.c.bf16 %v3066_v57, %v3061_v6  ;;  %v2195_v52 = vsel %vm770_vm4, %v17210_v14, %v17211_v32  ;;  %v3075_v6 = vld [vmem:[#allocation2 + $0x1978] sm:$0xff]  ;;  %v3072_v57 = vld [vmem:[#allocation2 + $0x1960] sm:$0xff]  ;;  %v19810_v14 = vmax.f32 %v19498_v63, %v2194_v48  ;;  %v3093_v63 = vld [vmem:[#allocation2 + $0x1a08] sm:$0xff] }
 0x454   : > { %15419 = vmatpush1.bf16.msra.mxu1 %v15418_v5  ;;  %14951 = vmatprep.subr.bf16.mxu0 %v14950_v44  ;;  %v22514_v5 = vunpack.i.h.bf16 %v19662_v8  ;;  %v3073_v8 = vld [vmem:[#allocation2 + $0x1968] sm:$0xff]  ;;  %v19795_v9 = vmax.f32 %v19536_v35, %v2195_v52  ;;  %v3087_v52 = vld [vmem:[#allocation2 + $0x19d8] sm:$0xff]  ;;  %v3092_v48 = vld [vmem:[#allocation2 + $0x1a00] sm:$0xff] }
 0x455   : > { %15421 = vmatprep.subr.bf16.mxu1 %v15420_v42  ;;  %v3062_v42 = vld [vmem:[#allocation2 + $0x1910] sm:$0xff]  ;;  %v3077_v35 = vld [vmem:[#allocation2 + $0x1988] sm:$0xff] }
 0x456   : > { %v2180_v44 = vsel %vm770_vm4, %v22514_v5, %v17195_v1  ;;  %v15430_v23 = vpack.c.bf16 %v3067_v33, %v3062_v42  ;;  %v15434_v5 = vpack.c.bf16 %v3077_v35, %v3072_v57  ;;  %v15436_v42 = vpack.c.bf16 %v3088_v37, %v3083_v30  ;;  %v3091_v33 = vld [vmem:[#allocation2 + $0x19f8] sm:$0xff]  ;;  %v3106_v57 = vld [vmem:[#allocation2 + $0x1a70] sm:$0xff]  ;;  %v3100_v30 = vld [vmem:[#allocation2 + $0x1a40] sm:$0xff] }
 0x457   : > { %14953 = vmatpush1.bf16.msra.mxu0 %v14952_v20  ;;  %v3076_v20 = vld [vmem:[#allocation2 + $0x1980] sm:$0xff]  ;;  %v19792_v1 = vmax.f32 %v19477_v10, %v2180_v44  ;;  %v3105_v37 = vld [vmem:[#allocation2 + $0x1a68] sm:$0xff] }
 0x458   : > { %15423 = vmatpush1.bf16.msra.mxu1 %v15422_v39  ;;  %14955 = vmatprep.subr.bf16.mxu0 %v14954_v19  ;;  %v3078_v39 = vld [vmem:[#allocation2 + $0x1990] sm:$0xff]  ;;  %v14960_v19 = vpack.c.bf16 %v3065_v0, %v3060_v17  ;;  %v3085_v17 = vld [vmem:[#allocation2 + $0x19c8] sm:$0xff] }
 0x459   : > { %15425 = vmatprep.subr.bf16.mxu1 %v15424_v43  ;;  %v14962_v43 = vpack.c.bf16 %v3076_v20, %v3071_v27  ;;  %v15432_v10 = vpack.c.bf16 %v3078_v39, %v3073_v8  ;;  %v3082_v0 = vld [vmem:[#allocation2 + $0x19b0] sm:$0xff]  ;;  %v3096_v27 = vld [vmem:[#allocation2 + $0x1a20] sm:$0xff] }
 0x45a   : > { %v3098_v20 = vld [vmem:[#allocation2 + $0x1a30] sm:$0xff]  ;;  %v15438_v8 = vpack.c.bf16 %v3087_v52, %v3082_v0  ;;  %v14970_v39 = vpack.c.bf16 %v3096_v27, %v3091_v33  ;;  %v3113_v0 = vld [vmem:[#allocation2 + $0x1aa8] sm:$0xff]  ;;  %v14976_v52 = vpack.c.bf16 %v3105_v37, %v3100_v30  ;;  %v3131_v30 = vld [vmem:[#allocation2 + $0x1b38] sm:$0xff] }
 0x45b   : > { %14957 = vmatpush1.bf16.msra.mxu0 %v14956_v40  ;;  %v3086_v40 = vld [vmem:[#allocation2 + $0x19d0] sm:$0xff]  ;;  %v3136_v37 = vld [vmem:[#allocation2 + $0x1b60] sm:$0xff] }
 0x45c   : > { %15427 = vmatpush1.bf16.msra.mxu1 %v15426_v26  ;;  %14959 = vmatprep.subr.bf16.mxu0 %v14958_v3  ;;  %v14964_v26 = vpack.c.bf16 %v3075_v6, %v3070_v7  ;;  %v19813_v3 = vmax.f32 %v19554_v38, %v2183_v56  ;;  %v14966_v44 = vpack.c.bf16 %v3086_v40, %v3081_v50  ;;  %v3097_v7 = vld [vmem:[#allocation2 + $0x1a28] sm:$0xff]  ;;  %v3108_v56 = vld [vmem:[#allocation2 + $0x1a80] sm:$0xff] }
 0x45d   : > { %15429 = vmatprep.subr.bf16.mxu1 %v15428_v34  ;;  %v3080_v34 = vld [vmem:[#allocation2 + $0x19a0] sm:$0xff]  ;;  %v3101_v6 = vld [vmem:[#allocation2 + $0x1a48] sm:$0xff]  ;;  %v15442_v50 = vpack.c.bf16 %v3097_v7, %v3092_v48  ;;  %v3123_v48 = vld [vmem:[#allocation2 + $0x1af8] sm:$0xff] }
 0x45e   : > { %3825 = vmatmul.mubr.f32.vlgmr.msra.gmra.mrb[14].mxu0 %v19792_v1  ;;  %v14968_v38 = vpack.c.bf16 %v3085_v17, %v3080_v34  ;;  %v14974_v40 = vpack.c.bf16 %v3106_v57, %v3101_v6  ;;  %v3111_v34 = vld [vmem:[#allocation2 + $0x1a98] sm:$0xff]  ;;  %v3116_v17 = vld [vmem:[#allocation2 + $0x1ac0] sm:$0xff] }
 0x45f   : > { %4441 = vmatmul.mubr.f32.vlgmr.msra.gmra.mrb[16].mxu1 %v19792_v1  ;;  %3830 = vmatprep.mubr.f32.mxu0 %v19795_v9  ;;  %v14978_v27 = vpack.c.bf16 %v3116_v17, %v3111_v34  ;;  %v14986_v17 = vpack.c.bf16 %v3136_v37, %v3131_v30 }
 0x460   : > { %14961 = vmatpush1.bf16.msra.mxu0 %v14960_v19  ;;  %4446 = vmatprep.mubr.f32.mxu1 %v19795_v9  ;;  %v3090_v19 = vld [vmem:[#allocation2 + $0x19f0] sm:$0xff] }
 0x461   : > { %15431 = vmatpush1.bf16.msra.mxu1 %v15430_v23  ;;  %14963 = vmatprep.subr.bf16.mxu0 %v14962_v43  ;;  %v3095_v23 = vld [vmem:[#allocation2 + $0x1a18] sm:$0xff]  ;;  %v15440_v43 = vpack.c.bf16 %v3098_v20, %v3093_v63  ;;  %v3110_v63 = vld [vmem:[#allocation2 + $0x1a90] sm:$0xff] }
 0x462   : > { %3831 = vmatmul.mubr.f32.gmra.mrb[16].mxu0 %v19810_v14  ;;  %15433 = vmatprep.subr.bf16.mxu1 %v15432_v10  ;;  %v3103_v10 = vld [vmem:[#allocation2 + $0x1a58] sm:$0xff]  ;;  %v14972_v35 = vpack.c.bf16 %v3095_v23, %v3090_v19  ;;  %v3121_v19 = vld [vmem:[#allocation2 + $0x1ae8] sm:$0xff]  ;;  %v3126_v23 = vld [vmem:[#allocation2 + $0x1b10] sm:$0xff] }
 0x463   : > { %4447 = vmatmul.mubr.f32.gmra.mrb[18].mxu1 %v19810_v14  ;;  %3901 = vmatprep.mubr.f32.mxu0 %v19813_v3  ;;  %v3115_v20 = vld [vmem:[#allocation2 + $0x1ab8] sm:$0xff]  ;;  %v14982_v57 = vpack.c.bf16 %v3126_v23, %v3121_v19 }
 0x464   : > { %14965 = vmatpush1.bf16.msra.mxu0 %v14964_v26  ;;  %4517 = vmatprep.mubr.f32.mxu1 %v19813_v3  ;;  %v3102_v26 = vld [vmem:[#allocation2 + $0x1a50] sm:$0xff]  ;;  %v14980_v7 = vpack.c.bf16 %v3115_v20, %v3110_v63  ;;  %v3141_v63 = vld [vmem:[#allocation2 + $0x1b88] sm:$0xff] }
 0x465   : > { %15435 = vmatpush1.bf16.msra.mxu1 %v15434_v5  ;;  %14967 = vmatprep.subr.bf16.mxu0 %v14966_v44  ;;  %v15444_v5 = vpack.c.bf16 %v3108_v56, %v3103_v10  ;;  %v3107_v44 = vld [vmem:[#allocation2 + $0x1a78] sm:$0xff]  ;;  %v3120_v10 = vld [vmem:[#allocation2 + $0x1ae0] sm:$0xff]  ;;  %v3125_v56 = vld [vmem:[#allocation2 + $0x1b08] sm:$0xff] }
 0x466   : > { %15437 = vmatprep.subr.bf16.mxu1 %v15436_v42  ;;  %v3118_v42 = vld [vmem:[#allocation2 + $0x1ad0] sm:$0xff]  ;;  %v15446_v33 = vpack.c.bf16 %v3107_v44, %v3102_v26  ;;  %v3133_v26 = vld [vmem:[#allocation2 + $0x1b48] sm:$0xff]  ;;  %v14984_v44 = vpack.c.bf16 %v3125_v56, %v3120_v10  ;;  %v3151_v10 = vld [vmem:[#allocation2 + $0x1bd8] sm:$0xff] }
 0x467   : > { %v3146_v20 = vld [vmem:[#allocation2 + $0x1bb0] sm:$0xff]  ;;  %v3156_v56 = vld [vmem:[#allocation2 + $0x1c00] sm:$0xff] }
 0x468   : > { %14969 = vmatpush1.bf16.msra.mxu0 %v14968_v38  ;;  %v3112_v38 = vld [vmem:[#allocation2 + $0x1aa0] sm:$0xff]  ;;  %v14990_v23 = vpack.c.bf16 %v3146_v20, %v3141_v63  ;;  %v14994_v37 = vpack.c.bf16 %v3156_v56, %v3151_v10 }
 0x469   : > { %15439 = vmatpush1.bf16.msra.mxu1 %v15438_v8  ;;  %14971 = vmatprep.subr.bf16.mxu0 %v14970_v39  ;;  %v15448_v8 = vpack.c.bf16 %v3118_v42, %v3113_v0  ;;  %v3117_v39 = vld [vmem:[#allocation2 + $0x1ac8] sm:$0xff]  ;;  %v3130_v0 = vld [vmem:[#allocation2 + $0x1b30] sm:$0xff]  ;;  %v3135_v42 = vld [vmem:[#allocation2 + $0x1b58] sm:$0xff] }
 0x46a   : > { %15441 = vmatprep.subr.bf16.mxu1 %v15440_v43  ;;  %v3128_v43 = vld [vmem:[#allocation2 + $0x1b20] sm:$0xff]  ;;  %v15450_v6 = vpack.c.bf16 %v3117_v39, %v3112_v38  ;;  %v3143_v38 = vld [vmem:[#allocation2 + $0x1b98] sm:$0xff]  ;;  %v14988_v39 = vpack.c.bf16 %v3135_v42, %v3130_v0  ;;  %v3161_v0 = vld [vmem:[#allocation2 + $0x1c28] sm:$0xff] }
 0x46b   : > { %v3166_v42 = vld [vmem:[#allocation2 + $0x1c50] sm:$0xff] }
 0x46c   : > { %14973 = vmatpush1.bf16.msra.mxu0 %v14972_v35  ;;  %v3122_v35 = vld [vmem:[#allocation2 + $0x1af0] sm:$0xff]  ;;  %v14998_v20 = vpack.c.bf16 %v3166_v42, %v3161_v0 }
 0x46d   : > { %15443 = vmatpush1.bf16.msra.mxu1 %v15442_v50  ;;  %14975 = vmatprep.subr.bf16.mxu0 %v14974_v40  ;;  %v15452_v50 = vpack.c.bf16 %v3128_v43, %v3123_v48  ;;  %v3127_v40 = vld [vmem:[#allocation2 + $0x1b18] sm:$0xff]  ;;  %v3140_v48 = vld [vmem:[#allocation2 + $0x1b80] sm:$0xff]  ;;  %v3145_v43 = vld [vmem:[#allocation2 + $0x1ba8] sm:$0xff] }
 0x46e   : > { %15445 = vmatprep.subr.bf16.mxu1 %v15444_v5  ;;  %v3138_v5 = vld [vmem:[#allocation2 + $0x1b70] sm:$0xff]  ;;  %v15454_v34 = vpack.c.bf16 %v3127_v40, %v3122_v35  ;;  %v3153_v35 = vld [vmem:[#allocation2 + $0x1be8] sm:$0xff]  ;;  %v14992_v40 = vpack.c.bf16 %v3145_v43, %v3140_v48  ;;  %v3171_v48 = vld [vmem:[#allocation2 + $0x1c78] sm:$0xff] }
 0x46f   : > { %v3176_v43 = vld [vmem:[#allocation2 + $0x1ca0] sm:$0xff] }
 0x470   : > { %14977 = vmatpush1.bf16.msra.mxu0 %v14976_v52  ;;  %v3132_v52 = vld [vmem:[#allocation2 + $0x1b40] sm:$0xff]  ;;  %v15002_v56 = vpack.c.bf16 %v3176_v43, %v3171_v48 }
 0x471   : > { %15447 = vmatpush1.bf16.msra.mxu1 %v15446_v33  ;;  %14979 = vmatprep.subr.bf16.mxu0 %v14978_v27  ;;  %v15456_v33 = vpack.c.bf16 %v3138_v5, %v3133_v26  ;;  %v3137_v27 = vld [vmem:[#allocation2 + $0x1b68] sm:$0xff]  ;;  %v3150_v26 = vld [vmem:[#allocation2 + $0x1bd0] sm:$0xff]  ;;  %v3155_v5 = vld [vmem:[#allocation2 + $0x1bf8] sm:$0xff] }
 0x472   : > { %15449 = vmatprep.subr.bf16.mxu1 %v15448_v8  ;;  %v3148_v8 = vld [vmem:[#allocation2 + $0x1bc0] sm:$0xff]  ;;  %v15458_v19 = vpack.c.bf16 %v3137_v27, %v3132_v52  ;;  %v3163_v52 = vld [vmem:[#allocation2 + $0x1c38] sm:$0xff]  ;;  %v14996_v27 = vpack.c.bf16 %v3155_v5, %v3150_v26  ;;  %v3181_v26 = vld [vmem:[#allocation2 + $0x1cc8] sm:$0xff] }
 0x473   : > { %v3186_v5 = vld [vmem:[#allocation2 + $0x1cf0] sm:$0xff] }
 0x474   : > { %14981 = vmatpush1.bf16.msra.mxu0 %v14980_v7  ;;  %v3142_v7 = vld [vmem:[#allocation2 + $0x1b90] sm:$0xff]  ;;  %v15006_v42 = vpack.c.bf16 %v3186_v5, %v3181_v26 }
 0x475   : > { %15451 = vmatpush1.bf16.msra.mxu1 %v15450_v6  ;;  %14983 = vmatprep.subr.bf16.mxu0 %v14982_v57  ;;  %v15460_v6 = vpack.c.bf16 %v3148_v8, %v3143_v38  ;;  %v3147_v57 = vld [vmem:[#allocation2 + $0x1bb8] sm:$0xff]  ;;  %v3160_v38 = vld [vmem:[#allocation2 + $0x1c20] sm:$0xff]  ;;  %v3165_v8 = vld [vmem:[#allocation2 + $0x1c48] sm:$0xff] }
 0x476   : > { %15453 = vmatprep.subr.bf16.mxu1 %v15452_v50  ;;  %v3158_v50 = vld [vmem:[#allocation2 + $0x1c10] sm:$0xff]  ;;  %v15462_v30 = vpack.c.bf16 %v3147_v57, %v3142_v7  ;;  %v3173_v7 = vld [vmem:[#allocation2 + $0x1c88] sm:$0xff]  ;;  %v15000_v57 = vpack.c.bf16 %v3165_v8, %v3160_v38  ;;  %v3191_v38 = vld [vmem:[#allocation2 + $0x1d18] sm:$0xff] }
 0x477   : > { %v3196_v8 = vld [vmem:[#allocation2 + $0x1d40] sm:$0xff] }
 0x478   : > { %14985 = vmatpush1.bf16.msra.mxu0 %v14984_v44  ;;  %v3152_v44 = vld [vmem:[#allocation2 + $0x1be0] sm:$0xff]  ;;  %v15010_v43 = vpack.c.bf16 %v3196_v8, %v3191_v38 }
 0x479   : > { %15455 = vmatpush1.bf16.msra.mxu1 %v15454_v34  ;;  %14987 = vmatprep.subr.bf16.mxu0 %v14986_v17  ;;  %v15464_v34 = vpack.c.bf16 %v3158_v50, %v3153_v35  ;;  %v3157_v17 = vld [vmem:[#allocation2 + $0x1c08] sm:$0xff]  ;;  %v3170_v35 = vld [vmem:[#allocation2 + $0x1c70] sm:$0xff]  ;;  %v3175_v50 = vld [vmem:[#allocation2 + $0x1c98] sm:$0xff] }
 0x47a   : > { %15457 = vmatprep.subr.bf16.mxu1 %v15456_v33  ;;  %v3168_v33 = vld [vmem:[#allocation2 + $0x1c60] sm:$0xff]  ;;  %v15466_v63 = vpack.c.bf16 %v3157_v17, %v3152_v44  ;;  %v3183_v44 = vld [vmem:[#allocation2 + $0x1cd8] sm:$0xff]  ;;  %v15004_v17 = vpack.c.bf16 %v3175_v50, %v3170_v35  ;;  %v3201_v35 = vld [vmem:[#allocation2 + $0x1d68] sm:$0xff] }
 0x47b   : > { %v3206_v50 = vld [vmem:[#allocation2 + $0x1d90] sm:$0xff] }
 0x47c   : > { %14989 = vmatpush1.bf16.msra.mxu0 %v14988_v39  ;;  %v3162_v39 = vld [vmem:[#allocation2 + $0x1c30] sm:$0xff]  ;;  %v15014_v5 = vpack.c.bf16 %v3206_v50, %v3201_v35  ;;  %v3223_v35 = vld [vmem:[#allocation2 + $0x1e18] sm:$0xff]  ;;  %v3228_v50 = vld [vmem:[#allocation2 + $0x1e40] sm:$0xff] }
 0x47d   : > { %15459 = vmatpush1.bf16.msra.mxu1 %v15458_v19  ;;  %14991 = vmatprep.subr.bf16.mxu0 %v14990_v23  ;;  %v15468_v19 = vpack.c.bf16 %v3168_v33, %v3163_v52  ;;  %v3167_v23 = vld [vmem:[#allocation2 + $0x1c58] sm:$0xff]  ;;  %v3180_v52 = vld [vmem:[#allocation2 + $0x1cc0] sm:$0xff]  ;;  %v3185_v33 = vld [vmem:[#allocation2 + $0x1ce8] sm:$0xff] }
 0x47e   : > { %15461 = vmatprep.subr.bf16.mxu1 %v15460_v6  ;;  %v3178_v6 = vld [vmem:[#allocation2 + $0x1cb0] sm:$0xff]  ;;  %v15470_v10 = vpack.c.bf16 %v3167_v23, %v3162_v39  ;;  %v3193_v39 = vld [vmem:[#allocation2 + $0x1d28] sm:$0xff]  ;;  %v15008_v23 = vpack.c.bf16 %v3185_v33, %v3180_v52  ;;  %v3211_v52 = vld [vmem:[#allocation2 + $0x1db8] sm:$0xff] }
 0x47f   : > { %v3216_v33 = vld [vmem:[#allocation2 + $0x1de0] sm:$0xff] }
 0x480   : > { %14993 = vmatpush1.bf16.msra.mxu0 %v14992_v40  ;;  %v3172_v40 = vld [vmem:[#allocation2 + $0x1c80] sm:$0xff] }
 0x481   : > { %15463 = vmatpush1.bf16.msra.mxu1 %v15462_v30  ;;  %14995 = vmatprep.subr.bf16.mxu0 %v14994_v37  ;;  %v15472_v30 = vpack.c.bf16 %v3178_v6, %v3173_v7  ;;  %v3177_v37 = vld [vmem:[#allocation2 + $0x1ca8] sm:$0xff]  ;;  %v3190_v7 = vld [vmem:[#allocation2 + $0x1d10] sm:$0xff]  ;;  %v3195_v6 = vld [vmem:[#allocation2 + $0x1d38] sm:$0xff] }
 0x482   : > { %15465 = vmatprep.subr.bf16.mxu1 %v15464_v34  ;;  %v3188_v34 = vld [vmem:[#allocation2 + $0x1d00] sm:$0xff]  ;;  %v15474_v0 = vpack.c.bf16 %v3177_v37, %v3172_v40  ;;  %v3203_v40 = vld [vmem:[#allocation2 + $0x1d78] sm:$0xff]  ;;  %v15012_v37 = vpack.c.bf16 %v3195_v6, %v3190_v7  ;;  %v3217_v7 = vld [vmem:[#allocation2 + $0x1de8] sm:$0xff] }
 0x483   : > { %v3221_v6 = vld [vmem:[#allocation2 + $0x1e08] sm:$0xff] }
 0x484   : > { %14997 = vmatpush1.bf16.msra.mxu0 %v14996_v27  ;;  %v3182_v27 = vld [vmem:[#allocation2 + $0x1cd0] sm:$0xff] }
 0x485   : > { %15467 = vmatpush1.bf16.msra.mxu1 %v15466_v63  ;;  %14999 = vmatprep.subr.bf16.mxu0 %v14998_v20  ;;  %v15476_v63 = vpack.c.bf16 %v3188_v34, %v3183_v44  ;;  %v3187_v20 = vld [vmem:[#allocation2 + $0x1cf8] sm:$0xff]  ;;  %v3200_v44 = vld [vmem:[#allocation2 + $0x1d60] sm:$0xff]  ;;  %v3205_v34 = vld [vmem:[#allocation2 + $0x1d88] sm:$0xff] }
 0x486   : > { %15469 = vmatprep.subr.bf16.mxu1 %v15468_v19  ;;  %v3198_v19 = vld [vmem:[#allocation2 + $0x1d50] sm:$0xff]  ;;  %v15478_v48 = vpack.c.bf16 %v3187_v20, %v3182_v27  ;;  %v3213_v27 = vld [vmem:[#allocation2 + $0x1dc8] sm:$0xff]  ;;  %v19819_v20 = vpop.permute.xlu0 %17218  ;;  %v15016_v38 = vpack.c.bf16 %v3205_v34, %v3200_v44  ;;  %v3220_v44 = vld [vmem:[#allocation2 + $0x1e00] sm:$0xff] }
 0x487   : > { %v3225_v34 = vld [vmem:[#allocation2 + $0x1e28] sm:$0xff] }
 0x488   : > { %15001 = vmatpush1.bf16.msra.mxu0 %v15000_v57  ;;  %v3192_v57 = vld [vmem:[#allocation2 + $0x1d20] sm:$0xff] }
 0x489   : > { %15471 = vmatpush1.bf16.msra.mxu1 %v15470_v10  ;;  %15003 = vmatprep.subr.bf16.mxu0 %v15002_v56  ;;  %v15480_v10 = vpack.c.bf16 %v3198_v19, %v3193_v39  ;;  %v3197_v56 = vld [vmem:[#allocation2 + $0x1d48] sm:$0xff]  ;;  %v15018_v39 = vpack.c.bf16 %v3216_v33, %v3211_v52  ;;  %v3210_v19 = vld [vmem:[#allocation2 + $0x1db0] sm:$0xff]  ;;  %v3231_v52 = vld [vmem:[#allocation2 + $0x1e58] sm:$0xff] }
 0x48a   : > { %15473 = vmatprep.subr.bf16.mxu1 %v15472_v30  ;;  %v3208_v30 = vld [vmem:[#allocation2 + $0x1da0] sm:$0xff]  ;;  %v15482_v26 = vpack.c.bf16 %v3197_v56, %v3192_v57  ;;  %v3226_v57 = vld [vmem:[#allocation2 + $0x1e30] sm:$0xff]  ;;  %v17220_v56 = vunpack.i.l.bf16 %v19819_v20 }
 0x48b   : > { %v3236_v33 = vld [vmem:[#allocation2 + $0x1e80] sm:$0xff] }
 0x48c   : > { %15005 = vmatpush1.bf16.msra.mxu0 %v15004_v17  ;;  %v3202_v17 = vld [vmem:[#allocation2 + $0x1d70] sm:$0xff] }
 0x48d   : > { %15475 = vmatpush1.bf16.msra.mxu1 %v15474_v0  ;;  %15007 = vmatprep.subr.bf16.mxu0 %v15006_v42  ;;  %v15484_v0 = vpack.c.bf16 %v3208_v30, %v3203_v40  ;;  %v3207_v42 = vld [vmem:[#allocation2 + $0x1d98] sm:$0xff] }
 0x48e   : > { %15477 = vmatprep.subr.bf16.mxu1 %v15476_v63  ;;  %v3218_v63 = vld [vmem:[#allocation2 + $0x1df0] sm:$0xff]  ;;  %v15486_v8 = vpack.c.bf16 %v3207_v42, %v3202_v17  ;;  %v3227_v42 = vld [vmem:[#allocation2 + $0x1e38] sm:$0xff] }
 0x48f   : > { %v3222_v17 = vld [vmem:[#allocation2 + $0x1e10] sm:$0xff] }
 0x490   : > { %15009 = vmatpush1.bf16.msra.mxu0 %v15008_v23  ;;  %v3215_v23 = vld [vmem:[#allocation2 + $0x1dd8] sm:$0xff] }
 0x491   : > { %15479 = vmatpush1.bf16.msra.mxu1 %v15478_v48  ;;  %15011 = vmatprep.subr.bf16.mxu0 %v15010_v43  ;;  %v3212_v48 = vld [vmem:[#allocation2 + $0x1dc0] sm:$0xff]  ;;  %v15488_v43 = vpack.c.bf16 %v3218_v63, %v3213_v27  ;;  %v15020_v40 = vpack.c.bf16 %v3215_v23, %v3210_v19  ;;  %v19831_v27 = vpop.permute.xlu0 %2140  ;;  %v19833_v63 = vpop.permute.xlu1 %2138  ;;  %v2196_v19 = vsel %vm770_vm4, %v17211_v32, %v17220_v56 }
 0x492   : > { %15481 = vmatprep.subr.bf16.mxu1 %v15480_v10  ;;  %v17221_v10 = vunpack.i.h.bf16 %v19819_v20  ;;  %v15490_v30 = vpack.c.bf16 %v3217_v7, %v3212_v48  ;;  %v15026_v23 = vpack.c.bf16 %v3236_v33, %v3231_v52  ;;  %v3230_v48 = vld [vmem:[#allocation2 + $0x1e50] sm:$0xff]  ;;  %v3232_v7 = vld [vmem:[#allocation2 + $0x1e60] sm:$0xff] }
 0x493   : > { %v3248_v32 = vld [vmem:[#allocation2 + $0x1ee0] sm:$0xff]  ;;  %v3258_v52 = vld [vmem:[#allocation2 + $0x1f30] sm:$0xff] }
 0x494   : > { %15013 = vmatpush1.bf16.msra.mxu0 %v15012_v37  ;;  %v15022_v37 = vpack.c.bf16 %v3226_v57, %v3221_v6  ;;  %v3237_v57 = vld [vmem:[#allocation2 + $0x1e88] sm:$0xff]  ;;  %v2524_v20 = vld [vmem:[#allocation2 + $0x840] sm:$0xff] }
 0x495   : > { %15483 = vmatpush1.bf16.msra.mxu1 %v15482_v26  ;;  %15015 = vmatprep.subr.bf16.mxu0 %v15014_v5  ;;  %v2182_v26 = vsel %vm770_vm4, %v17196_v61, %v17215_v60  ;;  %v15492_v5 = vpack.c.bf16 %v3228_v50, %v3223_v35  ;;  %v15024_v60 = vpack.c.bf16 %v3225_v34, %v3220_v44  ;;  %v3241_v35 = vld [vmem:[#allocation2 + $0x1ea8] sm:$0xff]  ;;  %v3242_v44 = vld [vmem:[#allocation2 + $0x1eb0] sm:$0xff] }
 0x496   : > { %15485 = vmatprep.subr.bf16.mxu1 %v15484_v0  ;;  %v2197_v0 = vsel %vm770_vm4, %v17220_v56, %v17221_v10  ;;  %v19836_v61 = vmax.f32 %v19519_v54, %v2182_v26  ;;  %v2185_v54 = vsel %vm770_vm4, %v19833_v63, %v19831_v27  ;;  %v19852_v56 = vmax.f32 %v19540_v18, %v2196_v19  ;;  %v3240_v26 = vld [vmem:[#allocation2 + $0x1ea0] sm:$0xff]  ;;  %v3253_v18 = vld [vmem:[#allocation2 + $0x1f08] sm:$0xff] }
 0x497   : > { %v15500_v34 = vpack.c.bf16 %v3248_v32, %v3243_v59  ;;  %v15504_v19 = vpack.c.bf16 %v3258_v52, %v3253_v18  ;;  %v3265_v59 = vld [vmem:[#allocation2 + $0x1f68] sm:$0xff]  ;;  %v3262_v32 = vld [vmem:[#allocation2 + $0x1f50] sm:$0xff]  ;;  %v3275_v18 = vld [vmem:[#allocation2 + $0x1fb8] sm:$0xff] }
 0x498   : > { %15017 = vmatpush1.bf16.msra.mxu0 %v15016_v38  ;;  %v3238_v38 = vld [vmem:[#allocation2 + $0x1e90] sm:$0xff]  ;;  %v3272_v52 = vld [vmem:[#allocation2 + $0x1fa0] sm:$0xff] }
 0x499   : > { %15487 = vmatpush1.bf16.msra.mxu1 %v15486_v8  ;;  %15019 = vmatprep.subr.bf16.mxu0 %v15018_v39  ;;  %v19839_v8 = vmax.f32 %v19583_v36, %v2197_v0  ;;  %v15494_v39 = vpack.c.bf16 %v3227_v42, %v3222_v17  ;;  %v15496_v6 = vpack.c.bf16 %v3238_v38, %v3233_v29  ;;  %v3246_v36 = vld [vmem:[#allocation2 + $0x1ed0] sm:$0xff]  ;;  %v3247_v17 = vld [vmem:[#allocation2 + $0x1ed8] sm:$0xff]  ;;  %v3256_v42 = vld [vmem:[#allocation2 + $0x1f20] sm:$0xff] }
 0x49a   : > { %15489 = vmatprep.subr.bf16.mxu1 %v15488_v43  ;;  %v3235_v43 = vld [vmem:[#allocation2 + $0x1e78] sm:$0xff]  ;;  %v15502_v33 = vpack.c.bf16 %v3247_v17, %v3242_v44  ;;  %v3250_v38 = vld [vmem:[#allocation2 + $0x1ef0] sm:$0xff] }
 0x49b   : > { %v15028_v50 = vpack.c.bf16 %v3235_v43, %v3230_v48  ;;  %v3251_v0 = vld [vmem:[#allocation2 + $0x1ef8] sm:$0xff]  ;;  %v3261_v48 = vld [vmem:[#allocation2 + $0x1f48] sm:$0xff]  ;;  %v3266_v43 = vld [vmem:[#allocation2 + $0x1f70] sm:$0xff] }
 0x49c   : > { %15021 = vmatpush1.bf16.msra.mxu0 %v15020_v40  ;;  %v19855_v40 = vmax.f32 %v19718_v49, %v2185_v54  ;;  %v15034_v29 = vpack.c.bf16 %v3256_v42, %v3251_v0  ;;  %v3268_v54 = vld [vmem:[#allocation2 + $0x1f80] sm:$0xff]  ;;  %v3278_v44 = vld [vmem:[#allocation2 + $0x1fd0] sm:$0xff] }
 0x49d   : > { %15491 = vmatpush1.bf16.msra.mxu1 %v15490_v30  ;;  %15023 = vmatprep.subr.bf16.mxu0 %v15022_v37  ;;  %v15498_v30 = vpack.c.bf16 %v3237_v57, %v3232_v7  ;;  %v15030_v37 = vpack.c.bf16 %v3246_v36, %v3241_v35  ;;  %v3263_v7 = vld [vmem:[#allocation2 + $0x1f58] sm:$0xff]  ;;  %v15038_v35 = vpack.c.bf16 %v3266_v43, %v3261_v48  ;;  %v3260_v36 = vld [vmem:[#allocation2 + $0x1f40] sm:$0xff]  ;;  %v3270_v42 = vld [vmem:[#allocation2 + $0x1f90] sm:$0xff] }
 0x49e   : > { %15493 = vmatprep.subr.bf16.mxu1 %v15492_v5  ;;  %v3245_v5 = vld [vmem:[#allocation2 + $0x1ec8] sm:$0xff]  ;;  %v3280_v43 = vld [vmem:[#allocation2 + $0x1fe0] sm:$0xff] }
 0x49f   : > { %3902 = vmatmul.mubr.f32.vlgmr.msra.gmra.mrb[14].mxu0 %v19836_v61  ;;  %v15032_v49 = vpack.c.bf16 %v3245_v5, %v3240_v26  ;;  %v3276_v26 = vld [vmem:[#allocation2 + $0x1fc0] sm:$0xff]  ;;  %v3273_v5 = vld [vmem:[#allocation2 + $0x1fa8] sm:$0xff] }
 0x4a0   : > { %4518 = vmatmul.mubr.f32.vlgmr.msra.gmra.mrb[16].mxu1 %v19836_v61  ;;  %3907 = vmatprep.mubr.f32.mxu0 %v19839_v8 }
 0x4a1   : > { %15025 = vmatpush1.bf16.msra.mxu0 %v15024_v60  ;;  %4523 = vmatprep.mubr.f32.mxu1 %v19839_v8  ;;  %v3255_v60 = vld [vmem:[#allocation2 + $0x1f18] sm:$0xff] }
 0x4a2   : > { %15495 = vmatpush1.bf16.msra.mxu1 %v15494_v39  ;;  %15027 = vmatprep.subr.bf16.mxu0 %v15026_v23  ;;  %v3252_v39 = vld [vmem:[#allocation2 + $0x1f00] sm:$0xff]  ;;  %v3257_v23 = vld [vmem:[#allocation2 + $0x1f28] sm:$0xff] }
 0x4a3   : > { %3908 = vmatmul.mubr.f32.gmra.mrb[16].mxu0 %v19852_v56  ;;  %15497 = vmatprep.subr.bf16.mxu1 %v15496_v6  ;;  %v15036_v6 = vpack.c.bf16 %v3255_v60, %v3250_v38  ;;  %v15506_v57 = vpack.c.bf16 %v3257_v23, %v3252_v39  ;;  %v3286_v38 = vld [vmem:[#allocation2 + $0x2010] sm:$0xff]  ;;  %v3283_v60 = vld [vmem:[#allocation2 + $0x1ff8] sm:$0xff]  ;;  %v3288_v39 = vld [vmem:[#allocation2 + $0x2020] sm:$0xff] }
 0x4a4   : > { %4524 = vmatmul.mubr.f32.gmra.mrb[18].mxu1 %v19852_v56  ;;  %3978 = vmatprep.mubr.f32.mxu0 %v19855_v40 }
 0x4a5   : > { %15029 = vmatpush1.bf16.msra.mxu0 %v15028_v50  ;;  %4594 = vmatprep.mubr.f32.mxu1 %v19855_v40  ;;  %v15508_v50 = vpack.c.bf16 %v3268_v54, %v3263_v7  ;;  %v3285_v7 = vld [vmem:[#allocation2 + $0x2008] sm:$0xff]  ;;  %v3282_v54 = vld [vmem:[#allocation2 + $0x1ff0] sm:$0xff] }
 0x4a6   : > { %15499 = vmatpush1.bf16.msra.mxu1 %v15498_v30  ;;  %15031 = vmatprep.subr.bf16.mxu0 %v15030_v37  ;;  %v3267_v30 = vld [vmem:[#allocation2 + $0x1f78] sm:$0xff] }
 0x4a7   : > { %15501 = vmatprep.subr.bf16.mxu1 %v15500_v34  ;;  %v3271_v37 = vld [vmem:[#allocation2 + $0x1f98] sm:$0xff]  ;;  %v15040_v34 = vpack.c.bf16 %v3265_v59, %v3260_v36  ;;  %v15510_v17 = vpack.c.bf16 %v3267_v30, %v3262_v32  ;;  %v3296_v36 = vld [vmem:[#allocation2 + $0x2060] sm:$0xff]  ;;  %v3293_v59 = vld [vmem:[#allocation2 + $0x2048] sm:$0xff] }
 0x4a8   : > { %v15042_v0 = vpack.c.bf16 %v3276_v26, %v3271_v37  ;;  %v3298_v32 = vld [vmem:[#allocation2 + $0x2070] sm:$0xff] }
 0x4a9   : > { %15033 = vmatpush1.bf16.msra.mxu0 %v15032_v49  ;;  %v15512_v49 = vpack.c.bf16 %v3278_v44, %v3273_v5  ;;  %v3290_v26 = vld [vmem:[#allocation2 + $0x2030] sm:$0xff]  ;;  %v3295_v5 = vld [vmem:[#allocation2 + $0x2058] sm:$0xff]  ;;  %v3292_v44 = vld [vmem:[#allocation2 + $0x2040] sm:$0xff] }
 0x4aa   : > { %15503 = vmatpush1.bf16.msra.mxu1 %v15502_v33  ;;  %15035 = vmatprep.subr.bf16.mxu0 %v15034_v29  ;;  %v3277_v33 = vld [vmem:[#allocation2 + $0x1fc8] sm:$0xff] }
 0x4ab   : > { %15505 = vmatprep.subr.bf16.mxu1 %v15504_v19  ;;  %v3281_v29 = vld [vmem:[#allocation2 + $0x1fe8] sm:$0xff]  ;;  %v15044_v19 = vpack.c.bf16 %v3275_v18, %v3270_v42  ;;  %v15514_v23 = vpack.c.bf16 %v3277_v33, %v3272_v52  ;;  %v3306_v42 = vld [vmem:[#allocation2 + $0x20b0] sm:$0xff]  ;;  %v3303_v18 = vld [vmem:[#allocation2 + $0x2098] sm:$0xff] }
 0x4ac   : > { %v15046_v48 = vpack.c.bf16 %v3286_v38, %v3281_v29  ;;  %v3308_v52 = vld [vmem:[#allocation2 + $0x20c0] sm:$0xff] }
 0x4ad   : > { %15037 = vmatpush1.bf16.msra.mxu0 %v15036_v6  ;;  %v15516_v6 = vpack.c.bf16 %v3288_v39, %v3283_v60  ;;  %v3300_v38 = vld [vmem:[#allocation2 + $0x2080] sm:$0xff]  ;;  %v3305_v60 = vld [vmem:[#allocation2 + $0x20a8] sm:$0xff]  ;;  %v3302_v39 = vld [vmem:[#allocation2 + $0x2090] sm:$0xff] }
 0x4ae   : > { %15507 = vmatpush1.bf16.msra.mxu1 %v15506_v57  ;;  %15039 = vmatprep.subr.bf16.mxu0 %v15038_v35  ;;  %v3287_v57 = vld [vmem:[#allocation2 + $0x2018] sm:$0xff] }
 0x4af   : > { %15509 = vmatprep.subr.bf16.mxu1 %v15508_v50  ;;  %v3291_v35 = vld [vmem:[#allocation2 + $0x2038] sm:$0xff]  ;;  %v15048_v50 = vpack.c.bf16 %v3285_v7, %v3280_v43  ;;  %v15518_v30 = vpack.c.bf16 %v3287_v57, %v3282_v54  ;;  %v3316_v43 = vld [vmem:[#allocation2 + $0x2100] sm:$0xff]  ;;  %v3313_v7 = vld [vmem:[#allocation2 + $0x20e8] sm:$0xff] }
 0x4b0   : > { %v15050_v37 = vpack.c.bf16 %v3296_v36, %v3291_v35  ;;  %v3318_v54 = vld [vmem:[#allocation2 + $0x2110] sm:$0xff] }
 0x4b1   : > { %15041 = vmatpush1.bf16.msra.mxu0 %v15040_v34  ;;  %v15520_v34 = vpack.c.bf16 %v3298_v32, %v3293_v59  ;;  %v3310_v36 = vld [vmem:[#allocation2 + $0x20d0] sm:$0xff]  ;;  %v3315_v59 = vld [vmem:[#allocation2 + $0x20f8] sm:$0xff]  ;;  %v3312_v32 = vld [vmem:[#allocation2 + $0x20e0] sm:$0xff] }
 0x4b2   : > { %15511 = vmatpush1.bf16.msra.mxu1 %v15510_v17  ;;  %15043 = vmatprep.subr.bf16.mxu0 %v15042_v0  ;;  %v3297_v17 = vld [vmem:[#allocation2 + $0x2068] sm:$0xff] }
 0x4b3   : > { %15513 = vmatprep.subr.bf16.mxu1 %v15512_v49  ;;  %v3301_v0 = vld [vmem:[#allocation2 + $0x2088] sm:$0xff]  ;;  %v15052_v49 = vpack.c.bf16 %v3295_v5, %v3290_v26  ;;  %v15522_v33 = vpack.c.bf16 %v3297_v17, %v3292_v44  ;;  %v3326_v26 = vld [vmem:[#allocation2 + $0x2150] sm:$0xff]  ;;  %v3323_v5 = vld [vmem:[#allocation2 + $0x2138] sm:$0xff] }
 0x4b4   : > { %v15054_v29 = vpack.c.bf16 %v3306_v42, %v3301_v0  ;;  %v3328_v44 = vld [vmem:[#allocation2 + $0x2160] sm:$0xff] }
 0x4b5   : > { %15045 = vmatpush1.bf16.msra.mxu0 %v15044_v19  ;;  %v15524_v19 = vpack.c.bf16 %v3308_v52, %v3303_v18  ;;  %v3320_v42 = vld [vmem:[#allocation2 + $0x2120] sm:$0xff]  ;;  %v3325_v18 = vld [vmem:[#allocation2 + $0x2148] sm:$0xff]  ;;  %v3322_v52 = vld [vmem:[#allocation2 + $0x2130] sm:$0xff] }
 0x4b6   : > { %15515 = vmatpush1.bf16.msra.mxu1 %v15514_v23  ;;  %15047 = vmatprep.subr.bf16.mxu0 %v15046_v48  ;;  %v3307_v23 = vld [vmem:[#allocation2 + $0x20b8] sm:$0xff] }
 0x4b7   : > { %15517 = vmatprep.subr.bf16.mxu1 %v15516_v6  ;;  %v3311_v48 = vld [vmem:[#allocation2 + $0x20d8] sm:$0xff]  ;;  %v15056_v6 = vpack.c.bf16 %v3305_v60, %v3300_v38  ;;  %v15526_v57 = vpack.c.bf16 %v3307_v23, %v3302_v39  ;;  %v3336_v38 = vld [vmem:[#allocation2 + $0x21a0] sm:$0xff]  ;;  %v3333_v60 = vld [vmem:[#allocation2 + $0x2188] sm:$0xff] }
 0x4b8   : > { %v15058_v35 = vpack.c.bf16 %v3316_v43, %v3311_v48  ;;  %v3338_v39 = vld [vmem:[#allocation2 + $0x21b0] sm:$0xff] }
 0x4b9   : > { %15049 = vmatpush1.bf16.msra.mxu0 %v15048_v50  ;;  %v15528_v50 = vpack.c.bf16 %v3318_v54, %v3313_v7  ;;  %v3330_v43 = vld [vmem:[#allocation2 + $0x2170] sm:$0xff]  ;;  %v3335_v7 = vld [vmem:[#allocation2 + $0x2198] sm:$0xff]  ;;  %v3332_v54 = vld [vmem:[#allocation2 + $0x2180] sm:$0xff] }
 0x4ba   : > { %15519 = vmatpush1.bf16.msra.mxu1 %v15518_v30  ;;  %15051 = vmatprep.subr.bf16.mxu0 %v15050_v37  ;;  %v3317_v30 = vld [vmem:[#allocation2 + $0x2108] sm:$0xff] }
 0x4bb   : > { %15521 = vmatprep.subr.bf16.mxu1 %v15520_v34  ;;  %v3321_v37 = vld [vmem:[#allocation2 + $0x2128] sm:$0xff]  ;;  %v15060_v34 = vpack.c.bf16 %v3315_v59, %v3310_v36  ;;  %v15530_v17 = vpack.c.bf16 %v3317_v30, %v3312_v32  ;;  %v3346_v36 = vld [vmem:[#allocation2 + $0x21f0] sm:$0xff]  ;;  %v3343_v59 = vld [vmem:[#allocation2 + $0x21d8] sm:$0xff] }
 0x4bc   : > { %v15062_v0 = vpack.c.bf16 %v3326_v26, %v3321_v37  ;;  %v3348_v32 = vld [vmem:[#allocation2 + $0x2200] sm:$0xff] }
 0x4bd   : > { %15053 = vmatpush1.bf16.msra.mxu0 %v15052_v49  ;;  %v15532_v49 = vpack.c.bf16 %v3328_v44, %v3323_v5  ;;  %v3340_v26 = vld [vmem:[#allocation2 + $0x21c0] sm:$0xff]  ;;  %v3345_v5 = vld [vmem:[#allocation2 + $0x21e8] sm:$0xff]  ;;  %v3342_v44 = vld [vmem:[#allocation2 + $0x21d0] sm:$0xff] }
 0x4be   : > { %15523 = vmatpush1.bf16.msra.mxu1 %v15522_v33  ;;  %15055 = vmatprep.subr.bf16.mxu0 %v15054_v29  ;;  %v3327_v33 = vld [vmem:[#allocation2 + $0x2158] sm:$0xff] }
 0x4bf   : > { %15525 = vmatprep.subr.bf16.mxu1 %v15524_v19  ;;  %v3331_v29 = vld [vmem:[#allocation2 + $0x2178] sm:$0xff]  ;;  %v15064_v19 = vpack.c.bf16 %v3325_v18, %v3320_v42  ;;  %v15534_v23 = vpack.c.bf16 %v3327_v33, %v3322_v52  ;;  %v3356_v42 = vld [vmem:[#allocation2 + $0x2240] sm:$0xff]  ;;  %v3353_v18 = vld [vmem:[#allocation2 + $0x2228] sm:$0xff] }
 0x4c0   : > { %v15066_v48 = vpack.c.bf16 %v3336_v38, %v3331_v29  ;;  %v3358_v52 = vld [vmem:[#allocation2 + $0x2250] sm:$0xff] }
 0x4c1   : > { %15057 = vmatpush1.bf16.msra.mxu0 %v15056_v6  ;;  %v15536_v6 = vpack.c.bf16 %v3338_v39, %v3333_v60  ;;  %v3350_v38 = vld [vmem:[#allocation2 + $0x2210] sm:$0xff]  ;;  %v3355_v60 = vld [vmem:[#allocation2 + $0x2238] sm:$0xff]  ;;  %v3352_v39 = vld [vmem:[#allocation2 + $0x2220] sm:$0xff] }
 0x4c2   : > { %15527 = vmatpush1.bf16.msra.mxu1 %v15526_v57  ;;  %15059 = vmatprep.subr.bf16.mxu0 %v15058_v35  ;;  %v3337_v57 = vld [vmem:[#allocation2 + $0x21a8] sm:$0xff] }
 0x4c3   : > { %15529 = vmatprep.subr.bf16.mxu1 %v15528_v50  ;;  %v3341_v35 = vld [vmem:[#allocation2 + $0x21c8] sm:$0xff]  ;;  %v15068_v50 = vpack.c.bf16 %v3335_v7, %v3330_v43  ;;  %v15538_v30 = vpack.c.bf16 %v3337_v57, %v3332_v54  ;;  %v3366_v43 = vld [vmem:[#allocation2 + $0x2290] sm:$0xff]  ;;  %v3363_v7 = vld [vmem:[#allocation2 + $0x2278] sm:$0xff] }
 0x4c4   : > { %v15070_v37 = vpack.c.bf16 %v3346_v36, %v3341_v35  ;;  %v3368_v54 = vld [vmem:[#allocation2 + $0x22a0] sm:$0xff] }
 0x4c5   : > { %15061 = vmatpush1.bf16.msra.mxu0 %v15060_v34  ;;  %v15540_v34 = vpack.c.bf16 %v3348_v32, %v3343_v59  ;;  %v3360_v36 = vld [vmem:[#allocation2 + $0x2260] sm:$0xff]  ;;  %v3365_v59 = vld [vmem:[#allocation2 + $0x2288] sm:$0xff]  ;;  %v3362_v32 = vld [vmem:[#allocation2 + $0x2270] sm:$0xff] }
 0x4c6   : > { %15531 = vmatpush1.bf16.msra.mxu1 %v15530_v17  ;;  %15063 = vmatprep.subr.bf16.mxu0 %v15062_v0  ;;  %v3347_v17 = vld [vmem:[#allocation2 + $0x21f8] sm:$0xff] }
 0x4c7   : > { %15533 = vmatprep.subr.bf16.mxu1 %v15532_v49  ;;  %v3351_v0 = vld [vmem:[#allocation2 + $0x2218] sm:$0xff]  ;;  %v15072_v49 = vpack.c.bf16 %v3345_v5, %v3340_v26  ;;  %v15542_v33 = vpack.c.bf16 %v3347_v17, %v3342_v44  ;;  %v3376_v26 = vld [vmem:[#allocation2 + $0x22e0] sm:$0xff]  ;;  %v3373_v5 = vld [vmem:[#allocation2 + $0x22c8] sm:$0xff] }
 0x4c8   : > { %v15074_v29 = vpack.c.bf16 %v3356_v42, %v3351_v0  ;;  %v3378_v44 = vld [vmem:[#allocation2 + $0x22f0] sm:$0xff] }
 0x4c9   : > { %15065 = vmatpush1.bf16.msra.mxu0 %v15064_v19  ;;  %v15544_v19 = vpack.c.bf16 %v3358_v52, %v3353_v18  ;;  %v3370_v42 = vld [vmem:[#allocation2 + $0x22b0] sm:$0xff]  ;;  %v3375_v18 = vld [vmem:[#allocation2 + $0x22d8] sm:$0xff]  ;;  %v3372_v52 = vld [vmem:[#allocation2 + $0x22c0] sm:$0xff] }
 0x4ca   : > { %15535 = vmatpush1.bf16.msra.mxu1 %v15534_v23  ;;  %15067 = vmatprep.subr.bf16.mxu0 %v15066_v48  ;;  %v3357_v23 = vld [vmem:[#allocation2 + $0x2248] sm:$0xff] }
 0x4cb   : > { %15537 = vmatprep.subr.bf16.mxu1 %v15536_v6  ;;  %v3361_v48 = vld [vmem:[#allocation2 + $0x2268] sm:$0xff]  ;;  %v15076_v6 = vpack.c.bf16 %v3355_v60, %v3350_v38  ;;  %v15546_v57 = vpack.c.bf16 %v3357_v23, %v3352_v39  ;;  %v3386_v38 = vld [vmem:[#allocation2 + $0x2330] sm:$0xff]  ;;  %v2504_v60 = vld [vmem:[#allocation2 + $0x7a0] sm:$0xff]  ;;  %v2169_v23 = vpop.permute.xlu1 %2168 }
 0x4cc   : > { %v15078_v35 = vpack.c.bf16 %v3366_v43, %v3361_v48  ;;  %v2509_v39 = vld [vmem:[#allocation2 + $0x7c8] sm:$0xff]  ;;  %v15084_v48 = vpack.c.bf16 %v3375_v18, %v3370_v42  ;;  %v2434_v42 = vld [vmem:[#allocation2 + $0x570] sm:$0xff]  ;;  %v2439_v18 = vld [vmem:[#allocation2 + $0x598] sm:$0xff] }
 0x4cd   : > { %15069 = vmatpush1.bf16.msra.mxu0 %v15068_v50  ;;  %v15548_v50 = vpack.c.bf16 %v3368_v54, %v3363_v7  ;;  %v2184_v54 = vsel %vm770_vm4, %v17216_v62, %v19833_v63  ;;  %v2198_v62 = vsel %vm770_vm4, %v17221_v10, %v2169_v23  ;;  %v2529_v10 = vld [vmem:[#allocation2 + $0x868] sm:$0xff] }
 0x4ce   : > { %15539 = vmatpush1.bf16.msra.mxu1 %v15538_v30  ;;  %15071 = vmatprep.subr.bf16.mxu0 %v15070_v37  ;;  %v3367_v30 = vld [vmem:[#allocation2 + $0x2298] sm:$0xff] }
 0x4cf   : > { %15541 = vmatprep.subr.bf16.mxu1 %v15540_v34  ;;  %v3371_v37 = vld [vmem:[#allocation2 + $0x22b8] sm:$0xff]  ;;  %v15080_v34 = vpack.c.bf16 %v3365_v59, %v3360_v36  ;;  %v15550_v17 = vpack.c.bf16 %v3367_v30, %v3362_v32  ;;  %v2424_v36 = vld [vmem:[#allocation2 + $0x520] sm:$0xff]  ;;  %v2429_v32 = vld [vmem:[#allocation2 + $0x548] sm:$0xff] }
 0x4d0   : > { %v15082_v0 = vpack.c.bf16 %v3376_v26, %v3371_v37  ;;  %v3396_v30 = vld [vmem:[#allocation2 + $0x2380] sm:$0xff]  ;;  %v2514_v37 = vld [vmem:[#allocation2 + $0x7f0] sm:$0xff]  ;;  %v2519_v26 = vld [vmem:[#allocation2 + $0x818] sm:$0xff] }
 0x4d1   : > { %15073 = vmatpush1.bf16.msra.mxu0 %v15072_v49  ;;  %v15552_v49 = vpack.c.bf16 %v3378_v44, %v3373_v5  ;;  %v19870_v5 = vmax.f32 %v19558_v55, %v2184_v54  ;;  %v15612_v44 = vpack.c.bf16 %v2429_v32, %v2424_v36  ;;  %v15614_v55 = vpack.c.bf16 %v2519_v26, %v2514_v37  ;;  %v3416_v54 = vld [vmem:[#allocation2 + $0x2420] sm:$0xff]  ;;  %v3410_v32 = vld [vmem:[#allocation2 + $0x23f0] sm:$0xff]  ;;  %v2459_v26 = vld [vmem:[#allocation2 + $0x638] sm:$0xff] }
 0x4d2   : > { %15543 = vmatpush1.bf16.msra.mxu1 %v15542_v33  ;;  %15075 = vmatprep.subr.bf16.mxu0 %v15074_v29  ;;  %v3377_v33 = vld [vmem:[#allocation2 + $0x22e8] sm:$0xff] }
 0x4d3   : > { %15545 = vmatprep.subr.bf16.mxu1 %v15544_v19  ;;  %v3381_v29 = vld [vmem:[#allocation2 + $0x2308] sm:$0xff]  ;;  %v19861_v19 = vpop.permute.xlu0 %2170  ;;  %v15554_v43 = vpack.c.bf16 %v3377_v33, %v3372_v52 }
 0x4d4   : > { %v15086_v7 = vpack.c.bf16 %v3386_v38, %v3381_v29  ;;  %v2199_v59 = vsel %vm770_vm4, %v2169_v23, %v19861_v19  ;;  %v3401_v52 = vld [vmem:[#allocation2 + $0x23a8] sm:$0xff]  ;;  %v15616_v29 = vpack.c.bf16 %v2439_v18, %v2434_v42  ;;  %v2444_v23 = vld [vmem:[#allocation2 + $0x5c0] sm:$0xff]  ;;  %vm22516_vm4 = vmmov 1  }
 0x4d5   : > { %15077 = vmatpush1.bf16.msra.mxu0 %v15076_v6  ;;  %v15610_v6 = vpack.c.bf16 %v2509_v39, %v2504_v60  ;;  %v19876_v63 = vmax.f32 %v19733_v4, %v2199_v59  ;;  %v19883_v4 = vmax.f32 %v19587_v15, %v2198_v62  ;;  %v3400_v60 = vld [vmem:[#allocation2 + $0x23a0] sm:$0xff]  ;;  %v3405_v39 = vld [vmem:[#allocation2 + $0x23c8] sm:$0xff]  ;;  %v2539_v15 = vld [vmem:[#allocation2 + $0x8b8] sm:$0xff] }
 0x4d6   : > { %15547 = vmatpush1.bf16.msra.mxu1 %v15546_v57  ;;  %15079 = vmatprep.subr.bf16.mxu0 %v15078_v35  ;;  %v3380_v57 = vld [vmem:[#allocation2 + $0x2300] sm:$0xff]  ;;  %v3385_v35 = vld [vmem:[#allocation2 + $0x2328] sm:$0xff]  ;;  %v3426_v62 = vld [vmem:[#allocation2 + $0x2470] sm:$0x7] }
 0x4d7   : > { %15549 = vmatprep.subr.bf16.mxu1 %v15548_v50  ;;  %v3391_v50 = vld [vmem:[#allocation2 + $0x2358] sm:$0xff]  ;;  %v15088_v58 = vpack.c.bf16 %v3385_v35, %v3380_v57  ;;  %v22515_v57 = vmov 0.0   ;;  %v15096_v35 = vpack.c.bf16 %v3405_v39, %v3400_v60  ;;  %vm19891_vm2 = vmpackc.low %vm1133_vm5, %vm22516_vm4  ;;  %v3425_v18 = vld [vmem:[#allocation2 + $0x2468] sm:$0x7] }
 0x4d9   : > { %15081 = vmatpush1.bf16.msra.mxu0 %v15080_v34  ;;  %v15090_v34 = vpack.c.bf16 %v3396_v30, %v3391_v50  ;;  %v3415_v50 = vld [vmem:[#allocation2 + $0x2418] sm:$0xff]  ;;  %v2454_v30 = vld [vmem:[#allocation2 + $0x610] sm:$0xff] }
 0x4da   : > { %15551 = vmatpush1.bf16.msra.mxu1 %v15550_v17  ;;  %15083 = vmatprep.subr.bf16.mxu0 %v15082_v0  ;;  %v3390_v17 = vld [vmem:[#allocation2 + $0x2350] sm:$0xff]  ;;  %v3395_v0 = vld [vmem:[#allocation2 + $0x2378] sm:$0xff] }
 0x4db   : > { %15553 = vmatprep.subr.bf16.mxu1 %v15552_v49  ;;  %v3406_v49 = vld [vmem:[#allocation2 + $0x23d0] sm:$0xff]  ;;  %v15092_v33 = vpack.c.bf16 %v3395_v0, %v3390_v17  ;;  %v15100_v17 = vpack.c.bf16 %v3415_v50, %v3410_v32  ;;  %v15624_v0 = vpack.c.bf16 %v2459_v26, %v2454_v30  ;;  %v19901_v50 = vmax.f32 %v19714_v47, %v19831_v27  ;;  %v3392_v26 = vld [vmem:[#allocation2 + $0x2360] sm:$0xff] }
 0x4dc   : > { %v15094_v38 = vpack.c.bf16 %v3406_v49, %v3401_v52  ;;  %v2464_v52 = vld [vmem:[#allocation2 + $0x660] sm:$0xff]  ;;  %v19908_v27 = vmax.f32 %v19729_v12, %v19861_v19 }
 0x4dd   : > { %15085 = vmatpush1.bf16.msra.mxu0 %v15084_v48  ;;  %v15618_v48 = vpack.c.bf16 %v2529_v10, %v2524_v20  ;;  %v2469_v20 = vld [vmem:[#allocation2 + $0x688] sm:$0xff]  ;;  %v3383_v10 = vld [vmem:[#allocation2 + $0x2318] sm:$0xff] }
 0x4de   : > { %15555 = vmatpush1.bf16.msra.mxu1 %v15554_v43  ;;  %15087 = vmatprep.subr.bf16.mxu0 %v15086_v7  ;;  %v2449_v43 = vld [vmem:[#allocation2 + $0x5e8] sm:$0xff]  ;;  %v3411_v7 = vld [vmem:[#allocation2 + $0x23f8] sm:$0xff]  ;;  %v15628_v39 = vpack.c.bf16 %v2469_v20, %v2464_v52 }
 0x4df   : > { %15611 = vmatprep.subr.bf16.mxu1 %v15610_v6  ;;  %v2534_v6 = vld [vmem:[#allocation2 + $0x890] sm:$0xff]  ;;  %v15620_v36 = vpack.c.bf16 %v2449_v43, %v2444_v23  ;;  %v15098_v59 = vpack.c.bf16 %v3416_v54, %v3411_v7  ;;  %v3387_v43 = vld [vmem:[#allocation2 + $0x2338] sm:$0xff] }
 0x4e0   : > { %3979 = vmatmul.mubr.f32.vlgmr.msra.gmra.mrb[14].mxu0 %v19870_v5  ;;  %v15622_v37 = vpack.c.bf16 %v2539_v15, %v2534_v6  ;;  %v2474_v7 = vld [vmem:[#allocation2 + $0x6b0] sm:$0xff]  ;;  %v2479_v6 = vld [vmem:[#allocation2 + $0x6d8] sm:$0xff]  ;;  %v3393_v15 = vld [vmem:[#allocation2 + $0x2368] sm:$0xff] }
 0x4e1   : > { %4595 = vmatmul.mubr.f32.vlgmr.msra.gmra.mrb[16].mxu1 %v19870_v5  ;;  %3984 = vmatprep.mubr.f32.mxu0 %v19876_v63  ;;  %v15632_v30 = vpack.c.bf16 %v2479_v6, %v2474_v7  ;;  %v3407_v20 = vld [vmem:[#allocation2 + $0x23d8] sm:$0xff]  ;;  %v3417_v7 = vld [vmem:[#allocation2 + $0x2428] sm:$0xff]  ;;  %v2744_v6 = vld [vmem:[#allocation2 + $0xf20] sm:$0xff] }
 0x4e2   : > { %15089 = vmatpush1.bf16.msra.mxu0 %v15088_v58  ;;  %4600 = vmatprep.mubr.f32.mxu1 %v19876_v63  ;;  %v3421_v58 = vld [vmem:[#allocation2 + $0x2448] sm:$0xff] }
 0x4e3   : > { %15613 = vmatpush3.bf16.msra.mxu1 %v15612_v44  ;;  %15091 = vmatprep.subr.bf16.mxu0 %v15090_v34  ;;  %v2544_v44 = vld [vmem:[#allocation2 + $0x8e0] sm:$0xff]  ;;  %v2549_v34 = vld [vmem:[#allocation2 + $0x908] sm:$0xff]  ;;  %v15102_v42 = vpack.c.bf16 %v3426_v62, %v3421_v58 }
 0x4e4   : > { %3985 = vmatmul.mubr.f32.gmra.mrb[16].mxu0 %v19883_v4  ;;  %15615 = vmatprep.subr.bf16.mxu1 %v15614_v55  ;;  %v3420_v55 = vld [vmem:[#allocation2 + $0x2440] sm:$0xff]  ;;  %v15626_v49 = vpack.c.bf16 %v2549_v34, %v2544_v44  ;;  %v3397_v58 = vld [vmem:[#allocation2 + $0x2388] sm:$0xff] }
 0x4e5   : > { %4601 = vmatmul.mubr.f32.gmra.mrb[18].mxu1 %v19883_v4  ;;  %4055 = vmatprep.mubr.f32.mxu0 %v22515_v57  ;;  %v15105_v60 = vpack.c.bf16 %v3425_v18, %v3420_v55  ;;  %v2484_v62 = vld [vmem:[#allocation2 + $0x700] sm:$0xff]  ;;  %v2489_v34 = vld [vmem:[#allocation2 + $0x728] sm:$0xff]  ;;  %v2579_v55 = vld [vmem:[#allocation2 + $0x9f8] sm:$0xff]  ;;  %v15562_v47 = vpack.c.bf16 %v3397_v58, %v3392_v26 }
 0x4e6   : > { %15093 = vmatpush1.bf16.msra.mxu0 %v15092_v33  ;;  %4823 = vmatprep.mubr.f32.mxu1 %v19615_v51  ;;  %v3388_v33 = vld [vmem:[#allocation2 + $0x2340] sm:$0xff]  ;;  %v15636_v18 = vpack.c.bf16 %v2489_v34, %v2484_v62  ;;  %v3422_v26 = vld [vmem:[#allocation2 + $0x2450] sm:$0xff]  ;;  %v3427_v58 = vld [vmem:[#allocation2 + $0x2478] sm:$0x7] }
 0x4e7   : > { %15617 = vmatpush3.bf16.msra.mxu1 %v15616_v29  ;;  %15095 = vmatprep.subr.bf16.mxu0 %v15094_v38  ;;  %v2554_v29 = vld [vmem:[#allocation2 + $0x930] sm:$0xff]  ;;  %v2559_v38 = vld [vmem:[#allocation2 + $0x958] sm:$0xff]  ;;  %v15556_v23 = vpack.c.bf16 %v3388_v33, %v3383_v10 }
 0x4e8   : > { %15619 = vmatprep.subr.bf16.mxu1 %v15618_v48  ;;  %v3382_v48 = vld [vmem:[#allocation2 + $0x2310] sm:$0xff]  ;;  %v15630_v54 = vpack.c.bf16 %v2559_v38, %v2554_v29  ;;  %v2499_v29 = vld [vmem:[#allocation2 + $0x778] sm:$0xff]  ;;  %v3413_v38 = vld [vmem:[#allocation2 + $0x2408] sm:$0xff] }
 0x4e9   : > { %v15558_v32 = vpack.c.bf16 %v3387_v43, %v3382_v48  ;;  %v2494_v10 = vld [vmem:[#allocation2 + $0x750] sm:$0xff]  ;;  %v3412_v43 = vld [vmem:[#allocation2 + $0x2400] sm:$0xff] }
 0x4ea   : > { %15097 = vmatpush1.bf16.msra.mxu0 %v15096_v35  ;;  %v3398_v35 = vld [vmem:[#allocation2 + $0x2390] sm:$0xff]  ;;  %v15640_v19 = vpack.c.bf16 %v2499_v29, %v2494_v10  ;;  %v2764_v10 = vld [vmem:[#allocation2 + $0xfc0] sm:$0xff] }
 0x4eb   : > { %15621 = vmatpush3.bf16.msra.mxu1 %v15620_v36  ;;  %15099 = vmatprep.subr.bf16.mxu0 %v15098_v59  ;;  %v2564_v36 = vld [vmem:[#allocation2 + $0x980] sm:$0xff]  ;;  %v2569_v59 = vld [vmem:[#allocation2 + $0x9a8] sm:$0xff]  ;;  %v2754_v34 = vld [vmem:[#allocation2 + $0xf70] sm:$0xff] }
 0x4ec   : > { %15623 = vmatprep.subr.bf16.mxu1 %v15622_v37  ;;  %v15560_v37 = vpack.c.bf16 %v3398_v35, %v3393_v15  ;;  %v15634_v44 = vpack.c.bf16 %v2569_v59, %v2564_v36  ;;  %v2749_v15 = vld [vmem:[#allocation2 + $0xf48] sm:$0xff]  ;;  %v3423_v35 = vld [vmem:[#allocation2 + $0x2458] sm:$0xff]  ;;  %v3428_v36 = vld [vmem:[#allocation2 + $0x2480] sm:$0x7] }
 0x4ed   : > { %v2834_v59 = vld [vmem:[#allocation2 + $0x11f0] sm:$0xff]  ;;  %v15572_v62 = vpack.c.bf16 %v3428_v36, %v3423_v35  ;;  %v2369_v35 = vld [vmem:[#allocation2 + $0x368] sm:$0xff] }
 0x4ee   : > { %15101 = vmatpush1.bf16.msra.mxu0 %v15100_v17  ;;  %v3403_v17 = vld [vmem:[#allocation2 + $0x23b8] sm:$0xff]  ;;  %v2869_v36 = vld [vmem:[#allocation2 + $0x1308] sm:$0xff] }
 0x4ef   : > { %15625 = vmatpush3.bf16.msra.mxu1 %v15624_v0  ;;  %15104 = vmatprep.subr.msk.bf16.mxu0 %vm19891_vm2, %v15102_v42  ;;  %v3408_v0 = vld [vmem:[#allocation2 + $0x23e0] sm:$0xff]  ;;  %v2574_v42 = vld [vmem:[#allocation2 + $0x9d0] sm:$0xff] }
 0x4f0   : > { %15627 = vmatprep.subr.bf16.mxu1 %v15626_v49  ;;  %v15564_v52 = vpack.c.bf16 %v3408_v0, %v3403_v17  ;;  %v3402_v49 = vld [vmem:[#allocation2 + $0x23b0] sm:$0xff]  ;;  %v15638_v33 = vpack.c.bf16 %v2579_v55, %v2574_v42  ;;  %v2759_v17 = vld [vmem:[#allocation2 + $0xf98] sm:$0xff]  ;;  %v2344_v0 = vld [vmem:[#allocation2 + $0x2a0] sm:$0xff] }
 0x4f1   : > { %v15566_v12 = vpack.c.bf16 %v3407_v20, %v3402_v49  ;;  %v2349_v42 = vld [vmem:[#allocation2 + $0x2c8] sm:$0xff]  ;;  %v2844_v55 = vld [vmem:[#allocation2 + $0x1240] sm:$0xff] }
 0x4f2   : > { %15107 = vmatpush1.bf16.msk.msra.mxu0 %vm19891_vm2, %v15105_v60  ;;  %v3418_v60 = vld [vmem:[#allocation2 + $0x2430] sm:$0xff]  ;;  %v2264_v49 = vld [vmem:[#allocation2 + $0x20] sm:$0xff]  ;;  %v2269_v20 = vld [vmem:[#allocation2 + $0x48] sm:$0xff] }
 0x4f3   : > { %15629 = vmatpush3.bf16.msra.mxu1 %v15628_v39  ;;  %15557 = vmatprep.subr.bf16.mxu0 %v15556_v23  ;;  %v2824_v39 = vld [vmem:[#allocation2 + $0x11a0] sm:$0xff]  ;;  %v2829_v23 = vld [vmem:[#allocation2 + $0x11c8] sm:$0xff]  ;;  %v15568_v48 = vpack.c.bf16 %v3418_v60, %v3413_v38  ;;  %v2354_v60 = vld [vmem:[#allocation2 + $0x2f0] sm:$0xff] }
 0x4f4   : > { %15631 = vmatprep.subr.bf16.mxu1 %v15630_v54  ;;  %v15674_v54 = vpack.c.bf16 %v2829_v23, %v2824_v39  ;;  %v2769_v38 = vld [vmem:[#allocation2 + $0xfe8] sm:$0xff]  ;;  %v2359_v39 = vld [vmem:[#allocation2 + $0x318] sm:$0xff]  ;;  %v2854_v23 = vld [vmem:[#allocation2 + $0x1290] sm:$0xff] }
 0x4f5   : > { %12711 = vmatmul.mubr.msk.f32.vlgmr.msra.gmra.mrb[14].mxu0 %vm3430_vm3, %v19901_v50 }
 0x4f6   : > { %15559 = vmatpush1.bf16.msra.mxu0 %v15558_v32  ;;  %4061 = vmatprep.mubr.f32.mxu0 %v22515_v57  ;;  %v2839_v32 = vld [vmem:[#allocation2 + $0x1218] sm:$0xff] }
 0x4f7   : > { %15633 = vmatpush3.bf16.msra.mxu1 %v15632_v30  ;;  %15561 = vmatprep.subr.bf16.mxu0 %v15560_v37  ;;  %v15570_v30 = vpack.c.bf16 %v3417_v7, %v3412_v43  ;;  %v15676_v37 = vpack.c.bf16 %v2749_v15, %v2744_v6  ;;  %v2279_v43 = vld [vmem:[#allocation2 + $0x98] sm:$0xff]  ;;  %v2774_v7 = vld [vmem:[#allocation2 + $0x1010] sm:$0xff]  ;;  %v2364_v15 = vld [vmem:[#allocation2 + $0x340] sm:$0xff] }
 0x4f8   : > { %15635 = vmatprep.subr.bf16.mxu1 %v15634_v44  ;;  %v15678_v44 = vpack.c.bf16 %v2839_v32, %v2834_v59  ;;  %v2779_v6 = vld [vmem:[#allocation2 + $0x1038] sm:$0xff]  ;;  %v15586_v32 = vpack.c.bf16 %v2369_v35, %v2364_v15 }
 0x4f9   : > { %12712 = vmatmul.mubr.msk.f32.gmra.mrb[16].mxu0 %vm3430_vm3, %v19908_v27  ;;  %v15688_v59 = vpack.c.bf16 %v2779_v6, %v2774_v7  ;;  %v2399_v7 = vld [vmem:[#allocation2 + $0x458] sm:$0xff] }
 0x4fa   : > { %15563 = vmatpush1.bf16.msra.mxu0 %v15562_v47  ;;  %4671 = vmatprep.mubr.f32.mxu0 %v22515_v57  ;;  %v2849_v47 = vld [vmem:[#allocation2 + $0x1268] sm:$0xff]  ;;  %v2899_v6 = vld [vmem:[#allocation2 + $0x13f8] sm:$0xff] }
 0x4fb   : > { %15637 = vmatpush3.bf16.msra.mxu1 %v15636_v18  ;;  %15565 = vmatprep.subr.bf16.mxu0 %v15564_v52  ;;  %v15575_v18 = vpack.c.bf16 %v3427_v58, %v3422_v26  ;;  %v15680_v52 = vpack.c.bf16 %v2759_v17, %v2754_v34  ;;  %v15682_v29 = vpack.c.bf16 %v2849_v47, %v2844_v55  ;;  %v2784_v26 = vld [vmem:[#allocation2 + $0x1060] sm:$0xff]  ;;  %v2379_v34 = vld [vmem:[#allocation2 + $0x3b8] sm:$0xff]  ;;  %v2874_v17 = vld [vmem:[#allocation2 + $0x1330] sm:$0xff] }
 0x4fc   : > { %15639 = vmatprep.subr.bf16.mxu1 %v15638_v33  ;;  %v15578_v33 = vpack.c.bf16 %v2349_v42, %v2344_v0  ;;  %v2879_v0 = vld [vmem:[#allocation2 + $0x1358] sm:$0xff] }
 0x4fe   : > { %15567 = vmatpush1.bf16.msra.mxu0 %v15566_v12  ;;  %v15684_v12 = vpack.c.bf16 %v2769_v38, %v2764_v10  ;;  %v2799_v10 = vld [vmem:[#allocation2 + $0x10d8] sm:$0xff]  ;;  %v2884_v38 = vld [vmem:[#allocation2 + $0x1380] sm:$0xff] }
 0x4ff   : > { %15641 = vmatpush3.bf16.msra.mxu1 %v15640_v19  ;;  %15569 = vmatprep.subr.bf16.mxu0 %v15568_v48  ;;  %v15582_v19 = vpack.c.bf16 %v2359_v39, %v2354_v60  ;;  %v2274_v48 = vld [vmem:[#allocation2 + $0x70] sm:$0xff]  ;;  %v2889_v60 = vld [vmem:[#allocation2 + $0x13a8] sm:$0xff] }
 0x500   : > { %15675 = vmatprep.subr.bf16.mxu1 %v15674_v54 }
 0x502   : > { %4824 = vmatmul.mubr.f32.vlgmr.msra.gmra.mrb[20].mxu1 %v19618_v16  ;;  %15571 = vmatpush1.bf16.msra.mxu0 %v15570_v30  ;;  %v2859_v16 = vld [vmem:[#allocation2 + $0x12b8] sm:$0xff]  ;;  %v2284_v30 = vld [vmem:[#allocation2 + $0xc0] sm:$0xff] }
 0x503   : > { %4828 = vmatprep.mubr.f32.mxu1 %v19637_v31  ;;  %15677 = vmatpush3.bf16.msra.mxu1 %v15676_v37  ;;  %v15580_v31 = vpack.c.bf16 %v2269_v20, %v2264_v49  ;;  %v15686_v54 = vpack.c.bf16 %v2859_v16, %v2854_v23  ;;  %v2289_v37 = vld [vmem:[#allocation2 + $0xe8] sm:$0xff]  ;;  %v2794_v49 = vld [vmem:[#allocation2 + $0x10b0] sm:$0xff]  ;;  %v15694_v20 = vpack.c.bf16 %v2879_v0, %v2874_v17  ;;  %v2304_v16 = vld [vmem:[#allocation2 + $0x160] sm:$0xff] }
 0x504   : > { %15574 = vmatprep.subr.msk.bf16.mxu0 %vm19891_vm2, %v15572_v62  ;;  %15679 = vmatprep.subr.bf16.mxu1 %v15678_v44  ;;  %v2789_v62 = vld [vmem:[#allocation2 + $0x1088] sm:$0xff]  ;;  %v2374_v44 = vld [vmem:[#allocation2 + $0x390] sm:$0xff]  ;;  %v15588_v42 = vpack.c.bf16 %v2289_v37, %v2284_v30  ;;  %v2819_v30 = vld [vmem:[#allocation2 + $0x1178] sm:$0xff] }
 0x505   : > { %v15692_v55 = vpack.c.bf16 %v2789_v62, %v2784_v26  ;;  %v15590_v47 = vpack.c.bf16 %v2379_v34, %v2374_v44  ;;  %v2404_v37 = vld [vmem:[#allocation2 + $0x480] sm:$0xff]  ;;  %v2409_v26 = vld [vmem:[#allocation2 + $0x4a8] sm:$0xff] }
 0x506   : > { %4829 = vmatmul.mubr.f32.gmra.mrb[22].mxu1 %v19640_v46  ;;  %15577 = vmatpush1.bf16.msk.msra.mxu0 %vm19891_vm2, %v15575_v18  ;;  %v2864_v46 = vld [vmem:[#allocation2 + $0x12e0] sm:$0xff]  ;;  %v2294_v18 = vld [vmem:[#allocation2 + $0x110] sm:$0xff]  ;;  %v3149_v62 = vld [vmem:[#allocation2 + $0x1bc8] sm:$0xff]  ;;  %v15602_v17 = vpack.c.bf16 %v2409_v26, %v2404_v37 }
 0x507   : > { %15681 = vmatpush3.bf16.msra.mxu1 %v15680_v52  ;;  %4973 = vmatprep.mubr.f32.mxu1 %v19695_v25  ;;  %v15584_v25 = vpack.c.bf16 %v2279_v43, %v2274_v48  ;;  %v15690_v58 = vpack.c.bf16 %v2869_v36, %v2864_v46  ;;  %v2299_v52 = vld [vmem:[#allocation2 + $0x138] sm:$0xff]  ;;  %v2809_v48 = vld [vmem:[#allocation2 + $0x1128] sm:$0xff]  ;;  %v2394_v43 = vld [vmem:[#allocation2 + $0x430] sm:$0xff] }
 0x508   : > { %15579 = vmatprep.subr.bf16.mxu0 %v15578_v33  ;;  %15683 = vmatprep.subr.bf16.mxu1 %v15682_v29  ;;  %v2384_v33 = vld [vmem:[#allocation2 + $0x3e0] sm:$0xff]  ;;  %v2389_v29 = vld [vmem:[#allocation2 + $0x408] sm:$0xff]  ;;  %v15592_v39 = vpack.c.bf16 %v2299_v52, %v2294_v18  ;;  %v15598_v46 = vpack.c.bf16 %v2399_v7, %v2394_v43  ;;  %v2314_v36 = vld [vmem:[#allocation2 + $0x1b0] sm:$0xff] }
 0x509   : > { %12715 = vmatmul.mubr.msk.f32.vlgmr.msra.gmra.mrb[18].mxu0 %vm3430_vm3, %v19901_v50  ;;  %v15594_v23 = vpack.c.bf16 %v2389_v29, %v2384_v33  ;;  %v2324_v0 = vld [vmem:[#allocation2 + $0x200] sm:$0xff]  ;;  %v3069_v18 = vld [vmem:[#allocation2 + $0x1948] sm:$0xff]  ;;  %v2414_v52 = vld [vmem:[#allocation2 + $0x4d0] sm:$0xff] }
 0x50a   : > { %15581 = vmatpush3.bf16.msra.mxu0 %v15580_v31  ;;  %4677 = vmatprep.mubr.f32.mxu0 %v22515_v57  ;;  %v2309_v31 = vld [vmem:[#allocation2 + $0x188] sm:$0xff]  ;;  %v2594_v26 = vld [vmem:[#allocation2 + $0xa70] sm:$0xff] }
 0x50b   : > { %15685 = vmatpush3.bf16.msra.mxu1 %v15684_v12  ;;  %15583 = vmatprep.subr.bf16.mxu0 %v15582_v19  ;;  %v2804_v12 = vld [vmem:[#allocation2 + $0x1100] sm:$0xff]  ;;  %v15698_v19 = vpack.c.bf16 %v2889_v60, %v2884_v38  ;;  %v15596_v15 = vpack.c.bf16 %v2309_v31, %v2304_v16  ;;  %v2334_v38 = vld [vmem:[#allocation2 + $0x250] sm:$0xff]  ;;  %v2339_v60 = vld [vmem:[#allocation2 + $0x278] sm:$0xff] }
 0x50c   : > { %15687 = vmatprep.subr.bf16.mxu1 %v15686_v54  ;;  %v2894_v54 = vld [vmem:[#allocation2 + $0x13d0] sm:$0xff]  ;;  %v15700_v35 = vpack.c.bf16 %v2809_v48, %v2804_v12  ;;  %v3079_v16 = vld [vmem:[#allocation2 + $0x1998] sm:$0xff]  ;;  %v2664_v31 = vld [vmem:[#allocation2 + $0xca0] sm:$0xff]  ;;  %v15608_v43 = vpack.c.bf16 %v2339_v60, %v2334_v38 }
 0x50d   : > { %12716 = vmatmul.mubr.msk.f32.gmra.mrb[20].mxu0 %vm3430_vm3, %v19908_v27  ;;  %v2669_v12 = vld [vmem:[#allocation2 + $0xcc8] sm:$0xff]  ;;  %v3199_v38 = vld [vmem:[#allocation2 + $0x1d58] sm:$0xff] }
 0x50e   : > { %15585 = vmatpush3.bf16.msra.mxu0 %v15584_v25  ;;  %4748 = vmatprep.mubr.f32.mxu0 %v19348_v41  ;;  %v15696_v41 = vpack.c.bf16 %v2799_v10, %v2794_v49  ;;  %v2319_v25 = vld [vmem:[#allocation2 + $0x1d8] sm:$0xff]  ;;  %v3169_v48 = vld [vmem:[#allocation2 + $0x1c68] sm:$0xff] }
 0x50f   : > { %15689 = vmatpush3.bf16.msra.mxu1 %v15688_v59  ;;  %15587 = vmatprep.subr.bf16.mxu0 %v15586_v32  ;;  %v2814_v59 = vld [vmem:[#allocation2 + $0x1150] sm:$0xff]  ;;  %v15702_v32 = vpack.c.bf16 %v2899_v6, %v2894_v54  ;;  %v15600_v44 = vpack.c.bf16 %v2319_v25, %v2314_v36  ;;  %v2419_v49 = vld [vmem:[#allocation2 + $0x4f8] sm:$0xff]  ;;  %v2584_v54 = vld [vmem:[#allocation2 + $0xa20] sm:$0xff] }
 0x510   : > { %15691 = vmatprep.subr.bf16.mxu1 %v15690_v58  ;;  %v3144_v58 = vld [vmem:[#allocation2 + $0x1ba0] sm:$0xff]  ;;  %v15704_v34 = vpack.c.bf16 %v2819_v30, %v2814_v59  ;;  %v3159_v10 = vld [vmem:[#allocation2 + $0x1c18] sm:$0xff]  ;;  %v2589_v6 = vld [vmem:[#allocation2 + $0xa48] sm:$0xff] }
 0x511   : > { %v3089_v36 = vld [vmem:[#allocation2 + $0x19e8] sm:$0xff]  ;;  %v2674_v25 = vld [vmem:[#allocation2 + $0xcf0] sm:$0xff]  ;;  %v2679_v59 = vld [vmem:[#allocation2 + $0xd18] sm:$0xff] }
 0x512   : > { %15589 = vmatpush3.bf16.msra.mxu0 %v15588_v42  ;;  %v2329_v42 = vld [vmem:[#allocation2 + $0x228] sm:$0xff]  ;;  %v3179_v30 = vld [vmem:[#allocation2 + $0x1cb8] sm:$0xff]  ;;  %v15646_v37 = vpack.c.bf16 %v2679_v59, %v2674_v25  ;;  %v2714_v25 = vld [vmem:[#allocation2 + $0xe30] sm:$0xff] }
 0x513   : > { %15693 = vmatpush3.bf16.msra.mxu1 %v15692_v55  ;;  %15591 = vmatprep.subr.bf16.mxu0 %v15590_v47  ;;  %v15738_v55 = vpack.c.bf16 %v3149_v62, %v3144_v58  ;;  %v3064_v47 = vld [vmem:[#allocation2 + $0x1920] sm:$0xff]  ;;  %v15604_v33 = vpack.c.bf16 %v2329_v42, %v2324_v0  ;;  %v2599_v58 = vld [vmem:[#allocation2 + $0xa98] sm:$0xff]  ;;  %v3094_v62 = vld [vmem:[#allocation2 + $0x1a10] sm:$0xff] }
 0x514   : > { %15695 = vmatprep.subr.bf16.mxu1 %v15694_v20  ;;  %v3154_v20 = vld [vmem:[#allocation2 + $0x1bf0] sm:$0xff]  ;;  %v15740_v29 = vpack.c.bf16 %v3069_v18, %v3064_v47  ;;  %v2689_v0 = vld [vmem:[#allocation2 + $0xd68] sm:$0xff]  ;;  %v3184_v42 = vld [vmem:[#allocation2 + $0x1ce0] sm:$0xff] }
 0x515   : > { %v2604_v18 = vld [vmem:[#allocation2 + $0xac0] sm:$0xff]  ;;  %v2719_v59 = vld [vmem:[#allocation2 + $0xe58] sm:$0xff] }
 0x516   : > { %15593 = vmatpush3.bf16.msra.mxu0 %v15592_v39  ;;  %v15606_v39 = vpack.c.bf16 %v2419_v49, %v2414_v52  ;;  %v2609_v52 = vld [vmem:[#allocation2 + $0xae8] sm:$0xff]  ;;  %v3104_v49 = vld [vmem:[#allocation2 + $0x1a60] sm:$0xff] }
 0x517   : > { %15697 = vmatpush3.bf16.msra.mxu1 %v15696_v41  ;;  %15595 = vmatprep.subr.bf16.mxu0 %v15594_v23  ;;  %v15742_v41 = vpack.c.bf16 %v3159_v10, %v3154_v20  ;;  %v3074_v23 = vld [vmem:[#allocation2 + $0x1970] sm:$0xff]  ;;  %v3109_v10 = vld [vmem:[#allocation2 + $0x1a88] sm:$0xff] }
 0x518   : > { %15699 = vmatprep.subr.bf16.mxu1 %v15698_v19  ;;  %v3164_v19 = vld [vmem:[#allocation2 + $0x1c40] sm:$0xff]  ;;  %v15744_v7 = vpack.c.bf16 %v3079_v16, %v3074_v23  ;;  %v15756_v60 = vpack.c.bf16 %v3109_v10, %v3104_v49  ;;  %v2619_v23 = vld [vmem:[#allocation2 + $0xb38] sm:$0xff]  ;;  %v3114_v16 = vld [vmem:[#allocation2 + $0x1ab0] sm:$0xff] }
 0x519   : > { %v2739_v10 = vld [vmem:[#allocation2 + $0xef8] sm:$0xff] }
 0x51a   : > { %15597 = vmatpush3.bf16.msra.mxu0 %v15596_v15  ;;  %v3084_v15 = vld [vmem:[#allocation2 + $0x19c0] sm:$0xff] }
 0x51b   : > { %15701 = vmatpush3.bf16.msra.mxu1 %v15700_v35  ;;  %15599 = vmatprep.subr.bf16.mxu0 %v15598_v46  ;;  %v15642_v35 = vpack.c.bf16 %v2669_v12, %v2664_v31  ;;  %v15746_v46 = vpack.c.bf16 %v3169_v48, %v3164_v19  ;;  %v3119_v12 = vld [vmem:[#allocation2 + $0x1ad8] sm:$0xff]  ;;  %v2704_v19 = vld [vmem:[#allocation2 + $0xde0] sm:$0xff]  ;;  %v2709_v48 = vld [vmem:[#allocation2 + $0xe08] sm:$0xff] }
 0x51c   : > { %15703 = vmatprep.subr.bf16.mxu1 %v15702_v32  ;;  %v3174_v32 = vld [vmem:[#allocation2 + $0x1c90] sm:$0xff] }
 0x51e   : > { %15601 = vmatpush3.bf16.msra.mxu0 %v15600_v44  ;;  %v15750_v44 = vpack.c.bf16 %v3179_v30, %v3174_v32  ;;  %v3214_v32 = vld [vmem:[#allocation2 + $0x1dd0] sm:$0xff]  ;;  %v3219_v30 = vld [vmem:[#allocation2 + $0x1df8] sm:$0xff] }
 0x51f   : > { %15705 = vmatpush3.bf16.msra.mxu1 %v15704_v34  ;;  %15603 = vmatprep.subr.bf16.mxu0 %v15602_v17  ;;  %v3099_v34 = vld [vmem:[#allocation2 + $0x1a38] sm:$0xff]  ;;  %v2684_v17 = vld [vmem:[#allocation2 + $0xd40] sm:$0xff] }
 0x520   : > { %15739 = vmatprep.subr.bf16.mxu1 %v15738_v55  ;;  %v15648_v55 = vpack.c.bf16 %v2599_v58, %v2594_v26  ;;  %v15650_v47 = vpack.c.bf16 %v2689_v0, %v2684_v17  ;;  %v2634_v26 = vld [vmem:[#allocation2 + $0xbb0] sm:$0xff]  ;;  %v2639_v58 = vld [vmem:[#allocation2 + $0xbd8] sm:$0xff]  ;;  %v2724_v17 = vld [vmem:[#allocation2 + $0xe80] sm:$0xff] }
 0x521   : > { %v2729_v0 = vld [vmem:[#allocation2 + $0xea8] sm:$0xff] }
 0x522   : > { %4974 = vmatmul.mubr.f32.vlgmr.msra.gmra.mrb[24].mxu1 %v19752_v13  ;;  %15605 = vmatpush3.bf16.msra.mxu0 %v15604_v33  ;;  %v15644_v13 = vpack.c.bf16 %v2589_v6, %v2584_v54  ;;  %v2694_v33 = vld [vmem:[#allocation2 + $0xd90] sm:$0xff]  ;;  %v15658_v54 = vpack.c.bf16 %v2709_v48, %v2704_v19  ;;  %v2624_v6 = vld [vmem:[#allocation2 + $0xb60] sm:$0xff]  ;;  %v2909_v48 = vld [vmem:[#allocation2 + $0x1448] sm:$0xff] }
 0x523   : > { %4978 = vmatprep.mubr.f32.mxu1 %v19755_v53  ;;  %15741 = vmatpush3.bf16.msra.mxu1 %v15740_v29  ;;  %v15748_v53 = vpack.c.bf16 %v3089_v36, %v3084_v15  ;;  %v2699_v29 = vld [vmem:[#allocation2 + $0xdb8] sm:$0xff]  ;;  %v2629_v15 = vld [vmem:[#allocation2 + $0xb88] sm:$0xff]  ;;  %v2904_v19 = vld [vmem:[#allocation2 + $0x1420] sm:$0xff] }
 0x524   : > { %15607 = vmatprep.subr.bf16.mxu0 %v15606_v39  ;;  %15743 = vmatprep.subr.bf16.mxu1 %v15742_v41  ;;  %v15654_v39 = vpack.c.bf16 %v2699_v29, %v2694_v33  ;;  %v2614_v41 = vld [vmem:[#allocation2 + $0xb10] sm:$0xff]  ;;  %v3129_v36 = vld [vmem:[#allocation2 + $0x1b28] sm:$0xff]  ;;  %v3399_v29 = vld [vmem:[#allocation2 + $0x2398] sm:$0xff] }
 0x525   : > { %v3394_v33 = vld [vmem:[#allocation2 + $0x2370] sm:$0xff] }
 0x526   : > { %4979 = vmatmul.mubr.f32.gmra.mrb[26].mxu1 %v19770_v11  ;;  %15609 = vmatpush3.bf16.msra.mxu0 %v15608_v43  ;;  %v3189_v11 = vld [vmem:[#allocation2 + $0x1d08] sm:$0xff]  ;;  %v3204_v43 = vld [vmem:[#allocation2 + $0x1d80] sm:$0xff] }
 0x527   : > { %15745 = vmatpush3.bf16.msra.mxu1 %v15744_v7  ;;  %5123 = vmatprep.mubr.f32.mxu1 %v19813_v3  ;;  %v15752_v3 = vpack.c.bf16 %v3099_v34, %v3094_v62  ;;  %v15754_v20 = vpack.c.bf16 %v3189_v11, %v3184_v42  ;;  %v15656_v7 = vpack.c.bf16 %v2619_v23, %v2614_v41  ;;  %v3134_v62 = vld [vmem:[#allocation2 + $0x1b50] sm:$0xff]  ;;  %v3139_v34 = vld [vmem:[#allocation2 + $0x1b78] sm:$0xff]  ;;  %v3384_v42 = vld [vmem:[#allocation2 + $0x2320] sm:$0xff] }
 0x528   : > { %15643 = vmatprep.subr.bf16.mxu0 %v15642_v35  ;;  %15747 = vmatprep.subr.bf16.mxu1 %v15746_v46  ;;  %v3124_v35 = vld [vmem:[#allocation2 + $0x1b00] sm:$0xff]  ;;  %v3389_v11 = vld [vmem:[#allocation2 + $0x2348] sm:$0xff] }
 0x529   : > { %4749 = vmatmul.mubr.f32.vlgmr.msra.gmra.mrb[22].mxu0 %v19343_v21  ;;  %v3194_v21 = vld [vmem:[#allocation2 + $0x1d30] sm:$0xff]  ;;  %v15802_v49 = vpack.c.bf16 %v3389_v11, %v3384_v42  ;;  %v2984_v41 = vld [vmem:[#allocation2 + $0x16a0] sm:$0xff]  ;;  %v2989_v23 = vld [vmem:[#allocation2 + $0x16c8] sm:$0xff] }
 0x52a   : > { %4753 = vmatprep.mubr.f32.mxu0 %v19394_v45  ;;  %15645 = vmatpush3.bf16.msra.mxu0 %v15644_v13  ;;  %v15652_v45 = vpack.c.bf16 %v2609_v52, %v2604_v18  ;;  %v15758_v31 = vpack.c.bf16 %v3199_v38, %v3194_v21  ;;  %v15660_v13 = vpack.c.bf16 %v2629_v15, %v2624_v6  ;;  %v2644_v18 = vld [vmem:[#allocation2 + $0xc00] sm:$0xff]  ;;  %v2649_v52 = vld [vmem:[#allocation2 + $0xc28] sm:$0xff]  ;;  %v2654_v38 = vld [vmem:[#allocation2 + $0xc50] sm:$0xff] }
 0x52b   : > { %15749 = vmatpush3.bf16.msra.mxu1 %v15748_v53  ;;  %15647 = vmatprep.subr.bf16.mxu0 %v15646_v37  ;;  %v15764_v53 = vpack.c.bf16 %v3129_v36, %v3124_v35  ;;  %v15662_v37 = vpack.c.bf16 %v2719_v59, %v2714_v25  ;;  %v15668_v21 = vpack.c.bf16 %v2649_v52, %v2644_v18  ;;  %v3419_v6 = vld [vmem:[#allocation2 + $0x2438] sm:$0xff]  ;;  %v3004_v36 = vld [vmem:[#allocation2 + $0x1740] sm:$0xff]  ;;  %v3009_v25 = vld [vmem:[#allocation2 + $0x1768] sm:$0xff] }
 0x52c   : > { %15751 = vmatprep.subr.bf16.mxu1 %v15750_v44  ;;  %v15766_v44 = vpack.c.bf16 %v3219_v30, %v3214_v32  ;;  %v15708_v15 = vpack.c.bf16 %v2909_v48, %v2904_v19  ;;  %v2919_v35 = vld [vmem:[#allocation2 + $0x1498] sm:$0xff]  ;;  %v3424_v59 = vld [vmem:[#allocation2 + $0x2460] sm:$0xff]  ;;  %v3429_v32 = vld [vmem:[#allocation2 + $0x2488] sm:$0x7] }
 0x52d   : > { %4754 = vmatmul.mubr.f32.gmra.mrb[24].mxu0 %v19605_v2  ;;  %v3209_v2 = vld [vmem:[#allocation2 + $0x1da8] sm:$0xff]  ;;  %v3039_v18 = vld [vmem:[#allocation2 + $0x1858] sm:$0xff] }
 0x52e   : > { %15649 = vmatpush3.bf16.msra.mxu0 %v15648_v55  ;;  %4898 = vmatprep.mubr.f32.mxu0 %v19654_v28  ;;  %v15760_v28 = vpack.c.bf16 %v3119_v12, %v3114_v16  ;;  %v15762_v46 = vpack.c.bf16 %v3209_v2, %v3204_v43  ;;  %v15664_v55 = vpack.c.bf16 %v2639_v58, %v2634_v26  ;;  %v3404_v16 = vld [vmem:[#allocation2 + $0x23c0] sm:$0xff]  ;;  %v3014_v26 = vld [vmem:[#allocation2 + $0x1790] sm:$0xff]  ;;  %v3019_v58 = vld [vmem:[#allocation2 + $0x17b8] sm:$0xff] }
 0x52f   : > { %15753 = vmatpush3.bf16.msra.mxu1 %v15752_v3  ;;  %15651 = vmatprep.subr.bf16.mxu0 %v15650_v47  ;;  %v15768_v3 = vpack.c.bf16 %v3139_v34, %v3134_v62  ;;  %v15666_v47 = vpack.c.bf16 %v2729_v0, %v2724_v17  ;;  %v15706_v43 = vpack.c.bf16 %v2989_v23, %v2984_v41  ;;  %v22519_v30 = vld [vmem:[#allocation24_spill] sm:$0xff]  ;;  %v22520_v62 = vld [vmem:[#allocation25_spill] sm:$0xff]  ;;  %v2939_v17 = vld [vmem:[#allocation2 + $0x1538] sm:$0xff] }
 0x530   : > { %15755 = vmatprep.subr.bf16.mxu1 %v15754_v20  ;;  %v2734_v20 = vld [vmem:[#allocation2 + $0xed0] sm:$0xff]  ;;  %v3024_v0 = vld [vmem:[#allocation2 + $0x17e0] sm:$0xff]  ;;  %v3029_v42 = vld [vmem:[#allocation2 + $0x1808] sm:$0xff] }
 0x531   : > { %v2934_v34 = vld [vmem:[#allocation2 + $0x1510] sm:$0xff] }
 0x532   : > { %15653 = vmatpush3.bf16.msra.mxu0 %v15652_v45  ;;  %v2659_v45 = vld [vmem:[#allocation2 + $0xc78] sm:$0xff]  ;;  %v15720_v11 = vpack.c.bf16 %v2939_v17, %v2934_v34  ;;  %v2974_v23 = vld [vmem:[#allocation2 + $0x1650] sm:$0xff] }
 0x533   : > { %15757 = vmatpush3.bf16.msra.mxu1 %v15756_v60  ;;  %15655 = vmatprep.subr.bf16.mxu0 %v15654_v39  ;;  %v15670_v60 = vpack.c.bf16 %v2739_v10, %v2734_v20  ;;  %v15806_v39 = vpack.c.bf16 %v3399_v29, %v3394_v33  ;;  %v15672_v12 = vpack.c.bf16 %v2659_v45, %v2654_v38  ;;  %v2954_v20 = vld [vmem:[#allocation2 + $0x15b0] sm:$0xff]  ;;  %v2959_v10 = vld [vmem:[#allocation2 + $0x15d8] sm:$0xff]  ;;  %v3044_v33 = vld [vmem:[#allocation2 + $0x1880] sm:$0xff] }
 0x534   : > { %15759 = vmatprep.subr.bf16.mxu1 %v15758_v31  ;;  %v3409_v31 = vld [vmem:[#allocation2 + $0x23e8] sm:$0xff]  ;;  %v15728_v51 = vpack.c.bf16 %v2959_v10, %v2954_v20  ;;  %v2964_v38 = vld [vmem:[#allocation2 + $0x1600] sm:$0xff]  ;;  %v3279_v17 = vld [vmem:[#allocation2 + $0x1fd8] sm:$0xff] }
 0x535   : > { %v15810_v2 = vpack.c.bf16 %v3409_v31, %v3404_v16  ;;  %v3049_v29 = vld [vmem:[#allocation2 + $0x18a8] sm:$0xff]  ;;  %v2979_v16 = vld [vmem:[#allocation2 + $0x1678] sm:$0xff]  ;;  %v3304_v31 = vld [vmem:[#allocation2 + $0x20a0] sm:$0xff] }
 0x536   : > { %15657 = vmatpush3.bf16.msra.mxu0 %v15656_v7  ;;  %v2994_v7 = vld [vmem:[#allocation2 + $0x16f0] sm:$0xff]  ;;  %v2969_v45 = vld [vmem:[#allocation2 + $0x1628] sm:$0xff]  ;;  %v15736_v19 = vpack.c.bf16 %v2979_v16, %v2974_v23  ;;  %v3299_v10 = vld [vmem:[#allocation2 + $0x2078] sm:$0xff] }
 0x537   : > { %15761 = vmatpush3.bf16.msra.mxu1 %v15760_v28  ;;  %15659 = vmatprep.subr.bf16.mxu0 %v15658_v54  ;;  %v2999_v28 = vld [vmem:[#allocation2 + $0x1718] sm:$0xff]  ;;  %v3414_v54 = vld [vmem:[#allocation2 + $0x2410] sm:$0xff]  ;;  %v15732_v41 = vpack.c.bf16 %v2969_v45, %v2964_v38 }
 0x538   : > { %15763 = vmatprep.subr.bf16.mxu1 %v15762_v46  ;;  %v15814_v46 = vpack.c.bf16 %v3419_v6, %v3414_v54  ;;  %v3294_v20 = vld [vmem:[#allocation2 + $0x2050] sm:$0xff] }
 0x53a   : > { %15661 = vmatpush3.bf16.msra.mxu0 %v15660_v13  ;;  %v15714_v13 = vpack.c.bf16 %v3009_v25, %v3004_v36  ;;  %v3244_v25 = vld [vmem:[#allocation2 + $0x1ec0] sm:$0xff] }
 0x53b   : > { %15765 = vmatpush3.bf16.msra.mxu1 %v15764_v53  ;;  %15663 = vmatprep.subr.bf16.mxu0 %v15662_v37  ;;  %v2929_v53 = vld [vmem:[#allocation2 + $0x14e8] sm:$0xff]  ;;  %v15818_v37 = vpack.c.bf16 %v3429_v32, %v3424_v59  ;;  %v3334_v32 = vld [vmem:[#allocation2 + $0x2190] sm:$0xff] }
 0x53c   : > { %15767 = vmatprep.subr.bf16.mxu1 %v15766_v44  ;;  %v15718_v44 = vpack.c.bf16 %v3019_v58, %v3014_v26  ;;  %v3249_v59 = vld [vmem:[#allocation2 + $0x1ee8] sm:$0xff]  ;;  %v3264_v58 = vld [vmem:[#allocation2 + $0x1f60] sm:$0xff] }
 0x53e   : > { %15665 = vmatpush3.bf16.msra.mxu0 %v15664_v55  ;;  %v15722_v55 = vpack.c.bf16 %v3029_v42, %v3024_v0  ;;  %v3364_v0 = vld [vmem:[#allocation2 + $0x2280] sm:$0xff]  ;;  %v3369_v42 = vld [vmem:[#allocation2 + $0x22a8] sm:$0xff] }
 0x53f   : > { %15769 = vmatpush3.bf16.msra.mxu1 %v15768_v3  ;;  %15667 = vmatprep.subr.bf16.mxu0 %v15666_v47  ;;  %v2944_v3 = vld [vmem:[#allocation2 + $0x1560] sm:$0xff]  ;;  %v3034_v47 = vld [vmem:[#allocation2 + $0x1830] sm:$0xff] }
 0x540   : > { %15803 = vmatprep.subr.bf16.mxu1 %v15802_v49 }
 0x542   : > { %5124 = vmatmul.mubr.f32.vlgmr.msra.gmra.mrb[28].mxu1 %v19836_v61  ;;  %15669 = vmatpush3.bf16.msra.mxu0 %v15668_v21  ;;  %v15710_v61 = vpack.c.bf16 %v2999_v28, %v2994_v7  ;;  %v15730_v21 = vpack.c.bf16 %v3049_v29, %v3044_v33  ;;  %v3314_v7 = vld [vmem:[#allocation2 + $0x20f0] sm:$0xff]  ;;  %v3319_v28 = vld [vmem:[#allocation2 + $0x2118] sm:$0xff]  ;;  %v15800_v33 = vpack.c.bf16 %v3299_v10, %v3294_v20 }
 0x543   : > { %5128 = vmatprep.mubr.f32.mxu1 %v19839_v8  ;;  %15805 = vmatpush3.bf16.msra.mxu1 %v15802_v49  ;;  %v2914_v8 = vld [vmem:[#allocation2 + $0x1470] sm:$0xff]  ;;  %v15726_v49 = vpack.c.bf16 %v3039_v18, %v3034_v47  ;;  %v15774_v6 = vpack.c.bf16 %v3319_v28, %v3314_v7  ;;  %v3379_v18 = vld [vmem:[#allocation2 + $0x22f8] sm:$0xff] }
 0x544   : > { %15671 = vmatprep.subr.bf16.mxu0 %v15670_v60  ;;  %15807 = vmatprep.subr.bf16.mxu1 %v15806_v39  ;;  %v3054_v60 = vld [vmem:[#allocation2 + $0x18d0] sm:$0xff] }
 0x545   : > { %v3374_v47 = vld [vmem:[#allocation2 + $0x22d0] sm:$0xff] }
 0x546   : > { %5129 = vmatmul.mubr.f32.gmra.mrb[30].mxu1 %v19852_v56  ;;  %15673 = vmatpush3.bf16.msra.mxu0 %v15672_v12  ;;  %v15712_v56 = vpack.c.bf16 %v2919_v35, %v2914_v8  ;;  %v3309_v12 = vld [vmem:[#allocation2 + $0x20c8] sm:$0xff]  ;;  %v3324_v8 = vld [vmem:[#allocation2 + $0x2140] sm:$0xff] }
 0x547   : > { %15809 = vmatpush3.bf16.msra.mxu1 %v15806_v39  ;;  %13804 = vmatprep.mubr.msk.f32.mxu1 %vm3430_vm3, %v19901_v50  ;;  %v2924_v50 = vld [vmem:[#allocation2 + $0x14c0] sm:$0xff]  ;;  %v3059_v39 = vld [vmem:[#allocation2 + $0x18f8] sm:$0xff]  ;;  %v15770_v48 = vpack.c.bf16 %v3309_v12, %v3304_v31  ;;  %v3329_v35 = vld [vmem:[#allocation2 + $0x2168] sm:$0xff] }
 0x548   : > { %15707 = vmatprep.subr.bf16.mxu0 %v15706_v43  ;;  %15811 = vmatprep.subr.bf16.mxu1 %v15810_v2  ;;  %v3224_v43 = vld [vmem:[#allocation2 + $0x1e20] sm:$0xff]  ;;  %v15778_v36 = vpack.c.bf16 %v3329_v35, %v3324_v8 }
 0x549   : > { %4899 = vmatmul.mubr.f32.vlgmr.msra.gmra.mrb[26].mxu0 %v19674_v24  ;;  %v15716_v24 = vpack.c.bf16 %v2929_v53, %v2924_v50  ;;  %v3254_v50 = vld [vmem:[#allocation2 + $0x1f10] sm:$0xff]  ;;  %v3344_v53 = vld [vmem:[#allocation2 + $0x21e0] sm:$0xff] }
 0x54a   : > { %4903 = vmatprep.mubr.f32.mxu0 %v22519_v30  ;;  %15709 = vmatpush3.bf16.msra.mxu0 %v15708_v15  ;;  %v3234_v15 = vld [vmem:[#allocation2 + $0x1e70] sm:$0xff]  ;;  %v3339_v30 = vld [vmem:[#allocation2 + $0x21b8] sm:$0xff] }
 0x54b   : > { %15813 = vmatpush3.bf16.msra.mxu1 %v15810_v2  ;;  %15711 = vmatprep.subr.bf16.mxu0 %v15710_v61  ;;  %v3229_v2 = vld [vmem:[#allocation2 + $0x1e48] sm:$0xff]  ;;  %v3239_v61 = vld [vmem:[#allocation2 + $0x1e98] sm:$0xff] }
 0x54c   : > { %15815 = vmatprep.subr.bf16.mxu1 %v15814_v46  ;;  %v15772_v54 = vpack.c.bf16 %v3229_v2, %v3224_v43 }
 0x54d   : > { %4904 = vmatmul.mubr.f32.gmra.mrb[28].mxu0 %v22520_v62  ;;  %v3269_v62 = vld [vmem:[#allocation2 + $0x1f88] sm:$0xff] }
 0x54e   : > { %15713 = vmatpush3.bf16.msra.mxu0 %v15712_v56  ;;  %5048 = vmatprep.mubr.f32.mxu0 %v19773_v22  ;;  %v2949_v22 = vld [vmem:[#allocation2 + $0x1588] sm:$0xff]  ;;  %v15780_v56 = vpack.c.bf16 %v3249_v59, %v3244_v25 }
 0x54f   : > { %15817 = vmatpush3.bf16.msra.mxu1 %v15814_v46  ;;  %15715 = vmatprep.subr.bf16.mxu0 %v15714_v13  ;;  %v15724_v52 = vpack.c.bf16 %v2949_v22, %v2944_v3  ;;  %v15776_v46 = vpack.c.bf16 %v3239_v61, %v3234_v15  ;;  %v15782_v13 = vpack.c.bf16 %v3339_v30, %v3334_v32  ;;  %v3284_v3 = vld [vmem:[#allocation2 + $0x2000] sm:$0xff]  ;;  %v3289_v22 = vld [vmem:[#allocation2 + $0x2028] sm:$0xff] }
 0x550   : > { %15820 = vmatprep.subr.msk.bf16.mxu1 %vm19891_vm2, %v15818_v37 }
 0x552   : > { %15717 = vmatpush3.bf16.msra.mxu0 %v15716_v24  ;;  %v3354_v24 = vld [vmem:[#allocation2 + $0x2230] sm:$0xff] }
 0x553   : > { %15823 = vmatpush3.bf16.msk.msra.mxu1 %vm19891_vm2, %v15818_v37  ;;  %15719 = vmatprep.subr.bf16.mxu0 %v15718_v44  ;;  %v3359_v44 = vld [vmem:[#allocation2 + $0x2258] sm:$0xff]  ;;  %vm22529_vm2 = vmmov %vm22523_vm0 }
 0x554   : > { %v15790_v34 = vpack.c.bf16 %v3359_v44, %v3354_v24 }
 0x556   : > { %13805 = vmatmul.mubr.msk.f32.vlgmr.msra.gmra.mrb[32].mxu1 %vm3430_vm3, %v19908_v27  ;;  %15721 = vmatpush3.bf16.msra.mxu0 %v15720_v11  ;;  %v15734_v27 = vpack.c.bf16 %v3059_v39, %v3054_v60  ;;  %vm22530_vm3 = vmmov %vm22523_vm0 }
 0x557   : > { %15723 = vmatprep.subr.bf16.mxu0 %v15722_v55  ;;  %v15794_v55 = vpack.c.bf16 %v3369_v42, %v3364_v0 }
 0x55a   : > { %15725 = vmatpush3.bf16.msra.mxu0 %v15724_v52  ;;  %v15796_v52 = vpack.c.bf16 %v3289_v22, %v3284_v3 }
 0x55b   : > { %15727 = vmatprep.subr.bf16.mxu0 %v15726_v49  ;;  %v15798_v49 = vpack.c.bf16 %v3379_v18, %v3374_v47 }
 0x55e   : > { %15729 = vmatpush3.bf16.msra.mxu0 %v15728_v51 }
 0x55f   : > { %15731 = vmatprep.subr.bf16.mxu0 %v15730_v21 }
 0x562   : > { %15733 = vmatpush3.bf16.msra.mxu0 %v15732_v41 }
 0x563   : > { %15735 = vmatprep.subr.bf16.mxu0 %v15734_v27 }
 0x566   : > { %15737 = vmatpush3.bf16.msra.mxu0 %v15736_v19 }
 0x567   : > { %15771 = vmatprep.subr.bf16.mxu0 %v15770_v48 }
 0x569   : > { %5049 = vmatmul.mubr.f32.vlgmr.msra.gmra.mrb[30].mxu0 %v19792_v1  ;;  %v3259_v1 = vld [vmem:[#allocation2 + $0x1f38] sm:$0xff] }
 0x56a   : > { %5053 = vmatprep.mubr.f32.mxu0 %v19795_v9  ;;  %15773 = vmatpush3.bf16.msra.mxu0 %v15772_v54  ;;  %v3349_v9 = vld [vmem:[#allocation2 + $0x2208] sm:$0xff]  ;;  %v15784_v37 = vpack.c.bf16 %v3259_v1, %v3254_v50 }
 0x56b   : > { %15775 = vmatprep.subr.bf16.mxu0 %v15774_v6  ;;  %v15786_v26 = vpack.c.bf16 %v3349_v9, %v3344_v53 }
 0x56d   : > { %5054 = vmatmul.mubr.f32.gmra.mrb[32].mxu0 %v19810_v14  ;;  %v15788_v14 = vpack.c.bf16 %v3269_v62, %v3264_v58 }
 0x56e   : > { %15777 = vmatpush3.bf16.msra.mxu0 %v15776_v46  ;;  %5198 = vmatprep.mubr.f32.mxu0 %v19855_v40  ;;  %v3274_v40 = vld [vmem:[#allocation2 + $0x1fb0] sm:$0xff] }
 0x56f   : > { %15779 = vmatprep.subr.bf16.mxu0 %v15778_v36  ;;  %v15792_v11 = vpack.c.bf16 %v3279_v17, %v3274_v40 }
 0x572   : > { %15781 = vmatpush3.bf16.msra.mxu0 %v15780_v56 }
 0x573   : > { %15783 = vmatprep.subr.bf16.mxu0 %v15782_v13 }
 0x576   : > { %15785 = vmatpush3.bf16.msra.mxu0 %v15784_v37 }
 0x577   : > { %15787 = vmatprep.subr.bf16.mxu0 %v15786_v26 }
 0x57a   : > { %15789 = vmatpush3.bf16.msra.mxu0 %v15788_v14 }
 0x57b   : > { %15791 = vmatprep.subr.bf16.mxu0 %v15790_v34 }
 0x57e   : > { %15793 = vmatpush3.bf16.msra.mxu0 %v15792_v11 }
 0x57f   : > { %15795 = vmatprep.subr.bf16.mxu0 %v15794_v55 }
 0x582   : > { %15797 = vmatpush3.bf16.msra.mxu0 %v15796_v52 }
 0x583   : > { %15799 = vmatprep.subr.bf16.mxu0 %v15798_v49 }
 0x586   : > { %15801 = vmatpush3.bf16.msra.mxu0 %v15800_v33 }
 0x589   : > { %5199 = vmatmul.mubr.f32.vlgmr.msra.gmra.mrb[34].mxu0 %v19870_v5 }
 0x58a   : > { %5203 = vmatprep.mubr.f32.mxu0 %v19876_v63 }
 0x58d   : > { %5204 = vmatmul.mubr.f32.gmra.mrb[36].mxu0 %v19883_v4 }
 0x5b4   : > { %v4596_v29 = vpop.f32.mrb[16].mxu1 }
 0x5b5   : > { %v4598_v51 = vpop.f32.mrb[17].mxu1 }
 0x5b8   : > { %v4602_v21 = vpop.f32.mrb[18].mxu1 }
 0x5b9   : > { %v4604_v38 = vpop.f32.mrb[19].mxu1 }
 0x5c8   : > { %v4057_v45 = vpop.f32.mrb[14].mxu0 }
 0x5c9   : > { %v4059_v60 = vpop.f32.mrb[15].mxu0 }
 0x5cc   : > { %v4063_v39 = vpop.f32.mrb[16].mxu0 }
 0x5cd   : > { %v4065_v41 = vpop.f32.mrb[17].mxu0  ;;  %v19957_v27 = vpack.i.bf16 %v4063_v39, %v4057_v45  ;;  %v15826_v23 = vpack.c.bf16 %v4063_v39, %v4057_v45 }
 0x5ce   : > { %v15824_v16 = vpack.c.bf16 %v4065_v41, %v4059_v60 }
 0x5cf   : > { %17228 = vrot.lane.b32.xlu0 %v19957_v27, %s17867_s24  ;;  %17223 = vrot.lane.b32.xlu1 %v19957_v27, %s17868_s21 }
 0x5d0   : > { %15825 = vmatprep.subr.bf16.mxu1 %v15824_v16 }
 0x5d1   : > { %15827 = vmatpush1.bf16.msra.mxu1 %v15826_v23 }
 0x5d3   : > { %17238 = vrot.lane.b32.xlu0 %v19957_v27, %s17861_s18  ;;  %17233 = vrot.lane.b32.xlu1 %v19957_v27, %s17869_s29 }
 0x5d5   : > { %v13208_v5 = vpop.f32.mrb[20].mxu1 }
 0x5d6   : > { %v13209_v63 = vpop.f32.mrb[21].mxu1 }
 0x5d7   : > { %v13210_v4 = vadd.f32 %v13209_v63, %v13208_v5 }
 0x5d9   : > { %v13211_v31 = vpop.f32.mrb[22].mxu1 }
 0x5da   : > { %v13212_v12 = vpop.f32.mrb[23].mxu1 }
 0x5db   : > { %v13213_v19 = vadd.f32 %v13212_v12, %v13211_v31 }
 0x5dc   : > { %v4673_v48 = vpop.f32.mrb[18].mxu0 }
 0x5dd   : > { %v16596_v43 = vadd.f32 %v4673_v48, %v4596_v29  ;;  %v4675_v2 = vpop.f32.mrb[19].mxu0 }
 0x5de   : > { %v19967_v7 = vadd.f32 %v4675_v2, %v4598_v51 }
 0x5df   : > { %v19969_v28 = vpack.i.bf16 %v16596_v43, %v4059_v60 }
 0x5e0   : > { %v4679_v54 = vpop.f32.mrb[20].mxu0  ;;  %v17277_v36 = vpack.i.bf16 %v19967_v7, %v4057_v45 }
 0x5e1   : > { %v16598_v6 = vadd.f32 %v4679_v54, %v4602_v21  ;;  %v4681_v15 = vpop.f32.mrb[21].mxu0  ;;  %17258 = vrot.lane.b32.xlu0 %v19969_v28, %s17867_s24  ;;  %17243 = vrot.lane.b32.xlu1 %v19969_v28, %s17858_s19 }
 0x5e2   : > { %v19975_v61 = vadd.f32 %v4681_v15, %v4604_v38 }
 0x5e3   : > { %v15862_v8 = vpack.c.bf16 %v16598_v6, %v16596_v43  ;;  %v19977_v35 = vpack.i.bf16 %v16598_v6, %v4065_v41 }
 0x5e4   : > { %v15860_v46 = vpack.c.bf16 %v19975_v61, %v19967_v7  ;;  %v17317_v30 = vpack.i.bf16 %v19975_v61, %v4063_v39 }
 0x5e5   : > { %17268 = vrot.lane.b32.xlu0 %v19969_v28, %s17861_s18  ;;  %17248 = vrot.lane.b32.xlu1 %v19969_v28, %s17857_s15 }
 0x5e6   : > { %15861 = vmatprep.subr.bf16.mxu0 %v15860_v46 }
 0x5e7   : > { %15863 = vmatpush1.bf16.msra.mxu0 %v15862_v8 }
 0x5e9   : > { %17288 = vrot.lane.b32.xlu0 %v19977_v35, %s17858_s19  ;;  %17253 = vrot.lane.b32.xlu1 %v19969_v28, %s17868_s21 }
 0x5ed   : > { %17293 = vrot.lane.b32.xlu0 %v19977_v35, %s17857_s15  ;;  %17263 = vrot.lane.b32.xlu1 %v19969_v28, %s17869_s29 }
 0x5f1   : > { %17303 = vrot.lane.b32.xlu0 %v19977_v35, %s17867_s24  ;;  %17273 = vrot.lane.b32.xlu1 %v19969_v28, %s17870_s22 }
 0x5f5   : > { %v13284_v25 = vpop.f32.mrb[24].mxu1  ;;  %17313 = vrot.lane.b32.xlu0 %v19977_v35, %s17861_s18  ;;  %17278 = vrot.lane.b32.xlu1 %v17277_v36, %s17858_s19 }
 0x5f6   : > { %v13285_v59 = vpop.f32.mrb[25].mxu1 }
 0x5f7   : > { %v13286_v32 = vadd.f32 %v13285_v59, %v13284_v25 }
 0x5f9   : > { %v13287_v56 = vpop.f32.mrb[26].mxu1  ;;  %17318 = vrot.lane.b32.xlu0 %v17317_v30, %s17858_s19  ;;  %17283 = vrot.lane.b32.xlu1 %v17277_v36, %s17857_s15 }
 0x5fa   : > { %v13288_v13 = vpop.f32.mrb[27].mxu1 }
 0x5fb   : > { %v13289_v50 = vadd.f32 %v13288_v13, %v13287_v56 }
 0x5fc   : > { %v13170_v1 = vpop.f32.mrb[22].mxu0 }
 0x5fd   : > { %v13171_v53 = vpop.f32.mrb[23].mxu0  ;;  %17323 = vrot.lane.b32.xlu0 %v17317_v30, %s17857_s15  ;;  %17298 = vrot.lane.b32.xlu1 %v19977_v35, %s17868_s21 }
 0x5fe   : > { %v13172_v9 = vadd.f32 %v13171_v53, %v13170_v1 }
 0x600   : > { %v4826_v37 = vadd.f32 %v13210_v4, %v13172_v9  ;;  %v13173_v26 = vpop.f32.mrb[24].mxu0 }
 0x601   : > { %v13174_v58 = vpop.f32.mrb[25].mxu0  ;;  %17308 = vrot.lane.b32.xlu1 %v19977_v35, %s17869_s29 }
 0x602   : > { %v13175_v62 = vadd.f32 %v13174_v58, %v13173_v26 }
 0x604   : > { %v4831_v24 = vadd.f32 %v13213_v19, %v13175_v62 }
 0x615   : > { %v13360_v44 = vpop.f32.mrb[28].mxu1 }
 0x616   : > { %v13361_v14 = vpop.f32.mrb[29].mxu1 }
 0x617   : > { %v13362_v34 = vadd.f32 %v13361_v14, %v13360_v44 }
 0x619   : > { %v13363_v40 = vpop.f32.mrb[30].mxu1 }
 0x61a   : > { %v13364_v17 = vpop.f32.mrb[31].mxu1 }
 0x61b   : > { %v13365_v0 = vadd.f32 %v13364_v17, %v13363_v40 }
 0x61c   : > { %v13246_v42 = vpop.f32.mrb[26].mxu0 }
 0x61d   : > { %v13247_v11 = vpop.f32.mrb[27].mxu0 }
 0x61e   : > { %v13248_v55 = vadd.f32 %v13247_v11, %v13246_v42 }
 0x620   : > { %v4901_v3 = vadd.f32 %v13248_v55, %v4826_v37  ;;  %v13249_v22 = vpop.f32.mrb[28].mxu0 }
 0x621   : > { %v13250_v47 = vpop.f32.mrb[29].mxu0 }
 0x622   : > { %v13251_v18 = vadd.f32 %v13250_v47, %v13249_v22  ;;  %v4976_v52 = vadd.f32 %v13286_v32, %v4901_v3 }
 0x624   : > { %v4906_v49 = vadd.f32 %v13251_v18, %v4831_v24 }
 0x626   : > { %v4981_v20 = vadd.f32 %v13289_v50, %v4906_v49 }
 0x629   : > { %v13806_v10 = vpop.f32.mrb[32].mxu1 }
 0x62a   : > { %v5275_v33 = vpop.f32.mrb[33].mxu1 }
 0x63c   : > { %v13322_v29 = vpop.f32.mrb[30].mxu0 }
 0x63d   : > { %v13323_v51 = vpop.f32.mrb[31].mxu0 }
 0x63e   : > { %v13324_v21 = vadd.f32 %v13323_v51, %v13322_v29 }
 0x640   : > { %v5051_v38 = vadd.f32 %v13324_v21, %v4976_v52  ;;  %v13325_v45 = vpop.f32.mrb[32].mxu0 }
 0x641   : > { %v13326_v60 = vpop.f32.mrb[33].mxu0  ;;  %v20009_v5 = vpop.permute.xlu0 %17228 }
 0x642   : > { %v13327_v39 = vadd.f32 %v13326_v60, %v13325_v45  ;;  %v5126_v41 = vadd.f32 %v13362_v34, %v5051_v38  ;;  %v20011_v63 = vpop.permute.xlu1 %17223 }
 0x644   : > { %v5056_v23 = vadd.f32 %v13327_v39, %v4981_v20 }
 0x645   : > { %v20013_v4 = vpop.permute.xlu0 %17238 }
 0x646   : > { %v5131_v16 = vadd.f32 %v13365_v0, %v5056_v23  ;;  %v20015_v31 = vpop.permute.xlu1 %17233 }
 0x653   : > { %v20017_v12 = vpop.permute.xlu0 %17258  ;;  %v17244_v19 = vpop.permute.xlu1 %17243 }
 0x654   : > { %v17246_v2 = vunpack.i.h.bf16 %v17244_v19  ;;  %v17245_v54 = vunpack.i.l.bf16 %v17244_v19 }
 0x656   : > { %v5321_v32 = vsel %vm22521_vm15, %v17245_v54, %v17246_v2  ;;  %vm22531_vm15 = vmmov %vm22523_vm0 }
 0x657   : > { %v20019_v48 = vpop.permute.xlu0 %17268  ;;  %v20021_v43 = vpop.permute.xlu1 %17248 }
 0x658   : > { %v17251_v17 = vunpack.i.h.bf16 %v20021_v43  ;;  %v17250_v0 = vunpack.i.l.bf16 %v20021_v43 }
 0x65a   : > { %v5351_v49 = vsel %vm22524_vm14, %v17250_v0, %v17251_v17  ;;  %vm5607_vm14 = vcmask 130048  }
 0x65b   : > { %v17289_v6 = vpop.permute.xlu0 %17288  ;;  %v20023_v15 = vpop.permute.xlu1 %17253 }
 0x65c   : > { %v17291_v8 = vunpack.i.h.bf16 %v17289_v6  ;;  %v17290_v46 = vunpack.i.l.bf16 %v17289_v6  ;;  %v13398_v36 = vpop.f32.mrb[34].mxu0  ;;  %v17256_v47 = vunpack.i.h.bf16 %v20023_v15  ;;  %v17255_v20 = vunpack.i.l.bf16 %v20023_v15 }
 0x65d   : > { %v13399_v25 = vpop.f32.mrb[35].mxu0 }
 0x65e   : > { %v13400_v59 = vadd.f32 %v13399_v25, %v13398_v36  ;;  %v5324_v30 = vsel %vm22522_vm1, %v17290_v46, %v17291_v8  ;;  %v17225_v25 = vunpack.i.l.bf16 %v20011_v63  ;;  %vm22532_vm1 = vmmov %vm22523_vm0 }
 0x65f   : > { %v20027_v56 = vpop.permute.xlu0 %17293  ;;  %v20029_v13 = vpop.permute.xlu1 %17263  ;;  %v15828_v50 = vpack.c.bf16 %v5324_v30, %v5321_v32  ;;  %v17261_v32 = vunpack.i.h.bf16 %v20017_v12 }
 0x660   : > { %v5201_v1 = vadd.f32 %v13400_v59, %v5126_v41  ;;  %v13401_v53 = vpop.f32.mrb[36].mxu0  ;;  %v17296_v44 = vunpack.i.h.bf16 %v20027_v56  ;;  %v17295_v14 = vunpack.i.l.bf16 %v20027_v56 }
 0x661   : > { %v13402_v9 = vpop.f32.mrb[37].mxu0  ;;  %15829 = vmatprep.subr.bf16.mxu1 %v15828_v50 }
 0x662   : > { %v5276_v37 = vadd.f32 %v5275_v33, %v5201_v1  ;;  %v13403_v26 = vadd.f32 %v13402_v9, %v13401_v53  ;;  %v5354_v3 = vsel %vm22523_vm0, %v17295_v14, %v17296_v44  ;;  %v17260_v1 = vunpack.i.l.bf16 %v20017_v12 }
 0x663   : > { %v20031_v58 = vpop.permute.xlu0 %17303  ;;  %v20033_v62 = vpop.permute.xlu1 %17273  ;;  %v15832_v29 = vpack.c.bf16 %v5354_v3, %v5351_v49  ;;  %v17266_v3 = vunpack.i.h.bf16 %v20029_v13  ;;  %vm5460_vm0 = vcmask 883712  }
 0x664   : > { %v5206_v24 = vadd.f32 %v13403_v26, %v5131_v16  ;;  %v20038_v34 = vpack.i.bf16 %v5276_v37, %v19967_v7  ;;  %v17226_v7 = vunpack.i.h.bf16 %v20011_v63  ;;  %v17306_v51 = vunpack.i.h.bf16 %v20031_v58 }
 0x665   : > { %v17305_v16 = vunpack.i.l.bf16 %v20031_v58 }
 0x666   : > { %v5281_v40 = vadd.f32 %v13806_v10, %v5206_v24  ;;  %17328 = vrot.lane.b32.xlu0 %v20038_v34, %s17868_s21  ;;  %17333 = vrot.lane.b32.xlu1 %v20038_v34, %s17867_s24  ;;  %v5388_v24 = vsel %vm5386_vm13, %v17255_v20, %v17256_v47 }
 0x667   : > { %v20046_v42 = vpop.permute.xlu0 %17313  ;;  %v17279_v11 = vpop.permute.xlu1 %17278 }
 0x668   : > { %v17280_v55 = vunpack.i.l.bf16 %v17279_v11  ;;  %v17281_v22 = vunpack.i.h.bf16 %v17279_v11  ;;  %v20060_v45 = vpack.i.bf16 %v5281_v40, %v19975_v61  ;;  %v17231_v11 = vunpack.i.h.bf16 %v20009_v5 }
 0x66a   : > { %17338 = vrot.lane.b32.xlu0 %v20038_v34, %s17869_s29  ;;  %17343 = vrot.lane.b32.xlu1 %v20038_v34, %s17861_s18  ;;  %v5320_v21 = vsel %vm22525_vm6, %v17280_v55, %v17245_v54  ;;  %v5322_v60 = vsel %vm22526_vm9, %v17246_v2, %v17281_v22  ;;  %v5387_v55 = vsel %vm5386_vm13, %v17225_v25, %v17255_v20  ;;  %vm5533_vm6 = vcmask 744448  }
 0x66b   : > { %v17319_v18 = vpop.permute.xlu0 %17318  ;;  %v17284_v52 = vpop.permute.xlu1 %17283  ;;  %v5428_v49 = vsel %vm5423_vm12, %v17231_v11, %v17305_v16 }
 0x66c   : > { %v17321_v10 = vunpack.i.h.bf16 %v17319_v18  ;;  %v17320_v33 = vunpack.i.l.bf16 %v17319_v18  ;;  %v17285_v38 = vunpack.i.l.bf16 %v17284_v52  ;;  %v17286_v23 = vunpack.i.h.bf16 %v17284_v52 }
 0x66d   : > { %v5425_v18 = vsel %vm5423_vm12, %v17260_v1, %v17261_v32  ;;  %v17230_v52 = vunpack.i.l.bf16 %v20009_v5  ;;  %v17271_v5 = vunpack.i.h.bf16 %v20019_v48 }
 0x66e   : > { %v5323_v39 = vsel %vm22527_vm10, %v17320_v33, %v17290_v46  ;;  %v5325_v41 = vsel %vm22528_vm11, %v17291_v8, %v17321_v10  ;;  %17348 = vrot.lane.b32.xlu0 %v20060_v45, %s17868_s21  ;;  %17358 = vrot.lane.b32.xlu1 %v19977_v35, %s17870_s22  ;;  %v15864_v61 = vpack.c.bf16 %v17321_v10, %v17281_v22  ;;  %v17265_v22 = vunpack.i.l.bf16 %v20029_v13 }
 0x66f   : > { %v17324_v19 = vpop.permute.xlu0 %17323  ;;  %v20070_v43 = vpop.permute.xlu1 %17298  ;;  %v15830_v54 = vpack.c.bf16 %v5323_v39, %v5320_v21  ;;  %v15866_v6 = vpack.c.bf16 %v5325_v41, %v5322_v60  ;;  %v5350_v59 = vsel %vm22529_vm2, %v17285_v38, %v17250_v0  ;;  %v5352_v30 = vsel %vm22530_vm3, %v17251_v17, %v17286_v23 }
 0x670   : > { %v17326_v2 = vunpack.i.h.bf16 %v17324_v19  ;;  %v17325_v36 = vunpack.i.l.bf16 %v17324_v19  ;;  %v17301_v46 = vunpack.i.h.bf16 %v20070_v43  ;;  %v17300_v8 = vunpack.i.l.bf16 %v20070_v43  ;;  %15865 = vmatprep.subr.bf16.mxu0 %v15864_v61  ;;  %v5285_v61 = vld [vmem:[%s22297_s4 + $0x8] sm:$0xff] }
 0x671   : > { %15831 = vmatpush1.bf16.msra.mxu1 %v15830_v54  ;;  %15867 = vmatpush1.bf16.msra.mxu0 %v15866_v6  ;;  %v17316_v10 = vunpack.i.h.bf16 %v20046_v42  ;;  %v17315_v33 = vunpack.i.l.bf16 %v20046_v42  ;;  %v17236_v21 = vunpack.i.h.bf16 %v20015_v31  ;;  %v5424_v38 = vsel %vm5423_vm12, %v17230_v52, %v17260_v1 }
 0x672   : > { %v5353_v56 = vsel %vm22531_vm15, %v17325_v36, %v17295_v14  ;;  %v5355_v50 = vsel %vm22532_vm1, %v17296_v44, %v17326_v2  ;;  %15833 = vmatprep.subr.bf16.mxu1 %v15832_v29  ;;  %17353 = vrot.lane.b32.xlu0 %v20038_v34, %s17870_s22  ;;  %v15868_v53 = vpack.c.bf16 %v17326_v2, %v17286_v23  ;;  %v17270_v60 = vunpack.i.l.bf16 %v20019_v48 }
 0x673   : > { %17363 = vrot.lane.b32.xlu1 %v20060_v45, %s17867_s24  ;;  %v20085_v63 = vpop.permute.xlu1 %17308  ;;  %v15834_v9 = vpack.c.bf16 %v5353_v56, %v5350_v59  ;;  %v15870_v37 = vpack.c.bf16 %v5355_v50, %v5352_v30  ;;  %v5391_v26 = vsel %vm5386_vm13, %v17226_v7, %v17300_v8  ;;  %v5392_v44 = vsel %vm5386_vm13, %v17300_v8, %v17301_v46  ;;  %v5295_v30 = vld [vmem:[%s22298_s5 + $0x18] sm:$0xff]  ;;  %s22572_s24 = sld [smem:[#allocation17_spill]] }
 0x674   : > { %v5429_v14 = vsel %vm5423_vm12, %v17305_v16, %v17306_v51  ;;  %v17311_v40 = vunpack.i.h.bf16 %v20085_v63  ;;  %v17310_v17 = vunpack.i.l.bf16 %v20085_v63  ;;  %15869 = vmatprep.subr.bf16.mxu0 %v15868_v53  ;;  %v15836_v0 = vpack.c.bf16 %v5392_v44, %v5388_v24  ;;  %12724 = vmatprep.mubr.msk.f32.mxu0 %vm5607_vm14, %v5285_v61 }
 0x675   : > { %15835 = vmatpush1.bf16.msra.mxu1 %v15834_v9  ;;  %15871 = vmatpush1.bf16.msra.mxu0 %v15870_v37  ;;  %v15838_v7 = vpack.c.bf16 %v5391_v26, %v5387_v55  ;;  %v15840_v20 = vpack.c.bf16 %v5429_v14, %v5425_v18  ;;  %v15842_v39 = vpack.c.bf16 %v5428_v49, %v5424_v38  ;;  %v17235_v23 = vunpack.i.l.bf16 %v20015_v31 }
 0x676   : > { %17373 = vrot.lane.b32.xlu0 %v20060_v45, %s17869_s29  ;;  %15837 = vmatprep.subr.bf16.mxu1 %v15836_v0  ;;  %v5466_v29 = vsel %vm5460_vm0, %v17310_v17, %v17311_v40  ;;  %v5462_v41 = vsel %vm5460_vm0, %v17265_v22, %v17266_v3  ;;  %v5465_v16 = vsel %vm5460_vm0, %v17236_v21, %v17310_v17  ;;  %v17241_v54 = vunpack.i.h.bf16 %v20013_v4 }
 0x677   : > { %17368 = vrot.lane.b32.xlu1 %v19957_v27, %s17870_s22  ;;  %v15844_v19 = vpack.c.bf16 %v5466_v29, %v5462_v41  ;;  %v5461_v6 = vsel %vm5460_vm0, %v17235_v23, %v17265_v22  ;;  %12720 = vmatprep.mubr.msk.f32.mxu1 %vm5607_vm14, %v5285_v61  ;;  %v5498_v2 = vsel %vm896_vm7, %v17270_v60, %v17271_v5  ;;  %v17240_v36 = vunpack.i.l.bf16 %v20013_v4  ;;  %v5293_v4 = vld [vmem:[%s22298_s5 + $0x8] sm:$0xff] }
 0x678   : > { %v15846_v31 = vpack.c.bf16 %v5465_v16, %v5461_v6  ;;  %v5501_v8 = vsel %vm896_vm7, %v17241_v54, %v17315_v33  ;;  %v17276_v53 = vunpack.i.h.bf16 %v20033_v62  ;;  %v17275_v9 = vunpack.i.l.bf16 %v20033_v62 }
 0x679   : > { %15839 = vmatpush1.bf16.msra.mxu1 %v15838_v7  ;;  %v5497_v59 = vsel %vm896_vm7, %v17240_v36, %v17270_v60 }
 0x67a   : > { %15841 = vmatprep.subr.bf16.mxu1 %v15840_v20  ;;  %17378 = vrot.lane.b32.xlu0 %v19969_v28, %s17871_s23  ;;  %v5502_v28 = vsel %vm896_vm7, %v17315_v33, %v17316_v10  ;;  %v5535_v18 = vsel %vm5533_vm6, %v17275_v9, %v17276_v53 }
 0x67b   : > { %17383 = vrot.lane.b32.xlu1 %v20060_v45, %s17861_s18  ;;  %v15848_v25 = vpack.c.bf16 %v5502_v28, %v5498_v2  ;;  %s17876_s18 = smov 106  }
 0x67d   : > { %15843 = vmatpush1.bf16.msra.mxu1 %v15842_v39 }
 0x67e   : > { %15845 = vmatprep.subr.bf16.mxu1 %v15844_v19  ;;  %17393 = vrot.lane.b32.xlu0 %v20060_v45, %s17870_s22  ;;  %s17873_s22 = smov 117  }
 0x67f   : > { %17388 = vrot.lane.b32.xlu1 %v20038_v34, %s17871_s23  ;;  %v15850_v34 = vpack.c.bf16 %v5501_v8, %v5497_v59 }
 0x681   : > { %15847 = vmatpush1.bf16.msra.mxu1 %v15846_v31 }
 0x682   : > { %15849 = vmatprep.subr.bf16.mxu1 %v15848_v25  ;;  %17398 = vrot.lane.b32.xlu0 %v19977_v35, %s17871_s23  ;;  %v5292_v35 = vld [vmem:[%s22298_s5] sm:$0xff] }
 0x683   : > { %17403 = vrot.lane.b32.xlu1 %v20060_v45, %s17871_s23  ;;  %v5294_v45 = vld [vmem:[%s22298_s5 + $0x10] sm:$0xff] }
 0x685   : > { %15851 = vmatpush1.bf16.msra.mxu1 %v15850_v34 }
 0x686   : > { %17408 = vrot.lane.b32.xlu0 %v19957_v27, %s17871_s23  ;;  %s17874_s23 = smov 116  }
 0x687   : > { %5589 = vperm.xlu1 %17412, %v5292_v35  }
 0x68a   : > { %5594 = vperm.xlu0 %17011, %v5293_v4  }
 0x68b   : > { %5599 = vperm.xlu1 %17412, %v5294_v45  }
 0x68e   : > { %5604 = vperm.xlu0 %17011, %v5295_v30  }
 0x6d8   : > { %v17329_v27 = vpop.permute.xlu0 %17328  ;;  %v17334_v56 = vpop.permute.xlu1 %17333 }
 0x6d9   : > { %v17330_v37 = vunpack.i.l.bf16 %v17329_v27  ;;  %v17331_v26 = vunpack.i.h.bf16 %v17329_v27  ;;  %v17336_v22 = vunpack.i.h.bf16 %v17334_v56  ;;  %v17335_v7 = vunpack.i.l.bf16 %v17334_v56 }
 0x6db   : > { %v5389_v55 = vsel %vm5386_vm13, %v17256_v47, %v17330_v37  ;;  %v5390_v20 = vsel %vm5386_vm13, %v17330_v37, %v17331_v26  ;;  %v5427_v16 = vsel %vm5423_vm12, %v17335_v7, %v17336_v22 }
 0x6dc   : > { %v17339_v50 = vpop.permute.xlu0 %17338  ;;  %v20168_v1 = vpop.permute.xlu1 %17343 }
 0x6dd   : > { %v17341_v41 = vunpack.i.h.bf16 %v17339_v50  ;;  %v17340_v43 = vunpack.i.l.bf16 %v17339_v50  ;;  %v17346_v58 = vunpack.i.h.bf16 %v20168_v1 }
 0x6df   : > { %v5463_v12 = vsel %vm5460_vm0, %v17266_v3, %v17340_v43 }
 0x6e0   : > { %v17349_v24 = vpop.permute.xlu0 %17348  ;;  %v20172_v44 = vpop.permute.xlu1 %17358 }
 0x6e1   : > { %v17351_v14 = vunpack.i.h.bf16 %v17349_v24  ;;  %v17350_v17 = vunpack.i.l.bf16 %v17349_v24  ;;  %v17361_v0 = vunpack.i.h.bf16 %v20172_v44  ;;  %v17360_v11 = vunpack.i.l.bf16 %v20172_v44 }
 0x6e3   : > { %v5393_v52 = vsel %vm5386_vm13, %v17301_v46, %v17350_v17  ;;  %v5539_v49 = vsel %vm5533_vm6, %v17360_v11, %v17361_v0  ;;  %v5394_v15 = vsel %vm5386_vm13, %v17350_v17, %v17351_v14  ;;  %v5426_v46 = vsel %vm5423_vm12, %v17261_v32, %v17335_v7 }
 0x6e4   : > { %v20190_v33 = vpop.permute.xlu0 %17353  ;;  %v15852_v29 = vpack.c.bf16 %v5539_v49, %v5535_v18  ;;  %v15872_v21 = vpack.c.bf16 %v5394_v15, %v5390_v20  ;;  %v15874_v38 = vpack.c.bf16 %v5393_v52, %v5389_v55  ;;  %v5464_v32 = vsel %vm5460_vm0, %v17340_v43, %v17341_v41 }
 0x6e5   : > { %v17364_v47 = vpop.permute.xlu1 %17363  ;;  %v17356_v50 = vunpack.i.h.bf16 %v20190_v33 }
 0x6e6   : > { %v17366_v60 = vunpack.i.h.bf16 %v17364_v47  ;;  %v17365_v39 = vunpack.i.l.bf16 %v17364_v47  ;;  %15853 = vmatprep.subr.bf16.mxu1 %v15852_v29  ;;  %15873 = vmatprep.subr.bf16.mxu0 %v15872_v21 }
 0x6e7   : > { %15875 = vmatpush1.bf16.msra.mxu0 %v15874_v38 }
 0x6e8   : > { %v5430_v23 = vsel %vm5423_vm12, %v17306_v51, %v17365_v39  ;;  %v5431_v19 = vsel %vm5423_vm12, %v17365_v39, %v17366_v60  ;;  %v17374_v61 = vpop.permute.xlu0 %17373  ;;  %v17345_v51 = vunpack.i.l.bf16 %v20168_v1  ;;  %vm5570_vm12 = vcmask 736256  }
 0x6e9   : > { %v17369_v28 = vpop.permute.xlu1 %17368  ;;  %v15876_v54 = vpack.c.bf16 %v5431_v19, %v5427_v16  ;;  %v15878_v6 = vpack.c.bf16 %v5430_v23, %v5426_v46  ;;  %v17376_v31 = vunpack.i.h.bf16 %v17374_v61  ;;  %v17375_v2 = vunpack.i.l.bf16 %v17374_v61 }
 0x6ea   : > { %v17371_v36 = vunpack.i.h.bf16 %v17369_v28  ;;  %v17370_v8 = vunpack.i.l.bf16 %v17369_v28  ;;  %v5499_v63 = vsel %vm896_vm7, %v17271_v5, %v17345_v51 }
 0x6eb   : > { %15877 = vmatprep.subr.bf16.mxu0 %v15876_v54  ;;  %v5467_v25 = vsel %vm5460_vm0, %v17311_v40, %v17375_v2  ;;  %v5468_v13 = vsel %vm5460_vm0, %v17375_v2, %v17376_v31  ;;  %v17355_v40 = vunpack.i.l.bf16 %v20190_v33  ;;  %v5284_v54 = vld [vmem:[%s22297_s4] sm:$0xff]  ;;  %v5287_v31 = vld [vmem:[%s22297_s4 + $0x18] sm:$0xff]  ;;  %v5286_v2 = vld [vmem:[%s22297_s4 + $0x10] sm:$0xff] }
 0x6ec   : > { %v5534_v59 = vsel %vm5533_vm6, %v17370_v8, %v17275_v9  ;;  %v5538_v34 = vsel %vm5533_vm6, %v17371_v36, %v17360_v11  ;;  %15879 = vmatpush1.bf16.msra.mxu0 %v15878_v6  ;;  %v17379_v4 = vpop.permute.xlu0 %17378  ;;  %v15880_v35 = vpack.c.bf16 %v5468_v13, %v5464_v32  ;;  %v15882_v45 = vpack.c.bf16 %v5467_v25, %v5463_v12  ;;  %v5289_v36 = vld [vmem:[%s22297_s4 + $0x28] sm:$0xff]  ;;  %v5288_v8 = vld [vmem:[%s22297_s4 + $0x20] sm:$0xff]  ;;  %v5291_v12 = vld [vmem:[%s22297_s4 + $0x38] sm:$0xff] }
 0x6ed   : > { %v17384_v3 = vpop.permute.xlu1 %17383  ;;  %v15854_v30 = vpack.c.bf16 %v5538_v34, %v5534_v59  ;;  %v5500_v9 = vsel %vm896_vm7, %v17345_v51, %v17346_v58  ;;  %v5536_v11 = vsel %vm5533_vm6, %v17276_v53, %v17355_v40  ;;  %v17381_v55 = vunpack.i.h.bf16 %v17379_v4  ;;  %v5290_v58 = vld [vmem:[%s22297_s4 + $0x30] sm:$0xff] }
 0x6ee   : > { %v17386_v27 = vunpack.i.h.bf16 %v17384_v3  ;;  %v17385_v56 = vunpack.i.l.bf16 %v17384_v3  ;;  %15881 = vmatprep.subr.bf16.mxu0 %v15880_v35  ;;  %v17380_v42 = vunpack.i.l.bf16 %v17379_v4  ;;  %v5537_v18 = vsel %vm5533_vm6, %v17355_v40, %v17356_v50 }
 0x6ef   : > { %15855 = vmatpush1.bf16.msra.mxu1 %v15854_v30 }
 0x6f0   : > { %v5503_v1 = vsel %vm896_vm7, %v17316_v10, %v17385_v56  ;;  %15883 = vmatpush1.bf16.msra.mxu0 %v15882_v45  ;;  %v5504_v37 = vsel %vm896_vm7, %v17385_v56, %v17386_v27  ;;  %v17394_v26 = vpop.permute.xlu0 %17393  ;;  %v5572_v44 = vsel %vm5570_vm12, %v17380_v42, %v17381_v55  ;;  %vm22533_vm7 = vmmov %vm22526_vm9 }
 0x6f1   : > { %v17389_v24 = vpop.permute.xlu1 %17388  ;;  %v15884_v48 = vpack.c.bf16 %v5504_v37, %v5500_v9  ;;  %v15886_v14 = vpack.c.bf16 %v5503_v1, %v5499_v63  ;;  %v17396_v5 = vunpack.i.h.bf16 %v17394_v26  ;;  %v17395_v17 = vunpack.i.l.bf16 %v17394_v26  ;;  %vm22534_vm9 = vmmov %vm22533_vm7 }
 0x6f2   : > { %v17390_v22 = vunpack.i.l.bf16 %v17389_v24  ;;  %v17391_v7 = vunpack.i.h.bf16 %v17389_v24  ;;  %vm22535_vm10 = vmmov %vm22533_vm7 }
 0x6f3   : > { %15885 = vmatprep.subr.bf16.mxu0 %v15884_v48  ;;  %v5540_v10 = vsel %vm5533_vm6, %v17361_v0, %v17395_v17  ;;  %v5541_v52 = vsel %vm5533_vm6, %v17395_v17, %v17396_v5  ;;  %vm22536_vm11 = vmmov %vm22533_vm7 }
 0x6f4   : > { %15887 = vmatpush1.bf16.msra.mxu0 %v15886_v14  ;;  %v17399_v49 = vpop.permute.xlu0 %17398  ;;  %v15888_v15 = vpack.c.bf16 %v5541_v52, %v5537_v18  ;;  %v15890_v62 = vpack.c.bf16 %v5540_v10, %v5536_v11  ;;  %v5573_v21 = vsel %vm5570_vm12, %v17381_v55, %v17390_v22  ;;  %v5574_v60 = vsel %vm5570_vm12, %v17390_v22, %v17391_v7  ;;  %vm22537_vm2 = vmmov %vm22533_vm7 }
 0x6f5   : > { %v17404_v20 = vpop.permute.xlu1 %17403  ;;  %v17401_v33 = vunpack.i.h.bf16 %v17399_v49  ;;  %v17400_v53 = vunpack.i.l.bf16 %v17399_v49  ;;  %vm22538_vm3 = vmmov %vm22537_vm2 }
 0x6f6   : > { %v17406_v47 = vunpack.i.h.bf16 %v17404_v20  ;;  %v17405_v29 = vunpack.i.l.bf16 %v17404_v20  ;;  %15889 = vmatprep.subr.bf16.mxu0 %v15888_v15  ;;  %vm22539_vm15 = vmmov %vm22537_vm2 }
 0x6f7   : > { %v5576_v38 = vsel %vm5570_vm12, %v17400_v53, %v17401_v33  ;;  %vm22540_vm1 = vmmov %vm22537_vm2 }
 0x6f8   : > { %v5577_v0 = vsel %vm5570_vm12, %v17401_v33, %v17405_v29  ;;  %15891 = vmatpush1.bf16.msra.mxu0 %v15890_v62  ;;  %v5578_v39 = vsel %vm5570_vm12, %v17405_v29, %v17406_v47  ;;  %v17409_v41 = vpop.permute.xlu0 %17408  ;;  %v15856_v43 = vpack.c.bf16 %v5576_v38, %v5572_v44  ;;  %vm22542_vm6 = vmmov %vm22540_vm1 }
 0x6f9   : > { %v15892_v46 = vpack.c.bf16 %v5578_v39, %v5574_v60  ;;  %v15894_v23 = vpack.c.bf16 %v5577_v0, %v5573_v21  ;;  %v17411_v16 = vunpack.i.h.bf16 %v17409_v41  ;;  %v17410_v19 = vunpack.i.l.bf16 %v17409_v41 }
 0x6fa   : > { %15857 = vmatprep.subr.bf16.mxu1 %v15856_v43 }
 0x6fb   : > { %15893 = vmatprep.subr.bf16.mxu0 %v15892_v46  ;;  %v5571_v61 = vsel %vm5570_vm12, %v17410_v19, %v17380_v42  ;;  %v5575_v28 = vsel %vm5570_vm12, %v17411_v16, %v17400_v53  ;;  %vm22543_vm12 = vmmov %vm22540_vm1 }
 0x6fc   : > { %15895 = vmatpush1.bf16.msra.mxu0 %v15894_v23  ;;  %v15858_v6 = vpack.c.bf16 %v5575_v28, %v5571_v61 }
 0x6fe   : > { %15859 = vmatpush1.bf16.msra.mxu1 %v15858_v6 }
 0x6ff   : > { %5774 = vmatmul.mubr.f32.vlgmr.msra.gmra.mrb[38].mxu0 %v5284_v54 }
 0x700   : > { %12725 = vmatprep.mubr.msk.f32.mxu0 %vm5607_vm14, %v5287_v31 }
 0x701   : > { %5685 = vmatmul.mubr.f32.vlgmr.msra.gmra.mrb[34].mxu1 %v5284_v54 }
 0x702   : > { %12721 = vmatprep.mubr.msk.f32.mxu1 %vm5607_vm14, %v5287_v31  ;;  %v5999_v31 = vld [vmem:[#allocation5 + $0x8] sm:$0xff] }
 0x703   : > { %5780 = vmatmul.mubr.f32.gmra.mrb[40].mxu0 %v5286_v2 }
 0x704   : > { %12726 = vmatprep.mubr.msk.f32.mxu0 %vm5607_vm14, %v5289_v36 }
 0x705   : > { %5691 = vmatmul.mubr.f32.gmra.mrb[36].mxu1 %v5286_v2  ;;  %v6001_v2 = vld [vmem:[#allocation5 + $0x18] sm:$0xff] }
 0x706   : > { %12722 = vmatprep.mubr.msk.f32.mxu1 %vm5607_vm14, %v5289_v36  ;;  %v5590_v51 = vpop.permute.xlu1 %5589  ;;  %v5998_v36 = vld [vmem:[#allocation5] sm:$0xff] }
 0x707   : > { %5786 = vmatmul.mubr.f32.gmra.mrb[42].mxu0 %v5288_v8 }
 0x708   : > { %12727 = vmatprep.mubr.msk.f32.mxu0 %vm5607_vm14, %v5291_v12 }
 0x709   : > { %5697 = vmatmul.mubr.f32.gmra.mrb[38].mxu1 %v5288_v8  ;;  %v5595_v26 = vpop.permute.xlu0 %5594  ;;  %v15896_v8 = vpack.c.bf16 %v6001_v2, %v5999_v31 }
 0x70a   : > { %12723 = vmatprep.mubr.msk.f32.mxu1 %vm5607_vm14, %v5291_v12  ;;  %v5600_v24 = vpop.permute.xlu1 %5599  ;;  %v6000_v12 = vld [vmem:[#allocation5 + $0x10] sm:$0xff]  ;;  %vm22541_vm14 = vmmov %vm22540_vm1 }
 0x70b   : > { %5792 = vmatmul.mubr.f32.gmra.mrb[44].mxu0 %v5290_v58  ;;  %15897 = vmatprep.subr.bf16.mxu1 %v15896_v8  ;;  %v6020_v8 = vld [vmem:[#allocation5 + $0xb0] sm:$0xff] }
 0x70d   : > { %5703 = vmatmul.mubr.f32.gmra.mrb[40].mxu1 %v5290_v58  ;;  %v5605_v62 = vpop.permute.xlu0 %5604  ;;  %v6003_v58 = vld [vmem:[#allocation5 + $0x28] sm:$0xff] }
 0x7d2   : > { %v5775_v32 = vpop.f32.mrb[38].mxu0 }
 0x7d3   : > { %v20265_v25 = vadd.f32 %v5775_v32, %v5590_v51  ;;  %v5777_v59 = vpop.f32.mrb[39].mxu0  ;;  %v15898_v32 = vpack.c.bf16 %v6000_v12, %v5998_v36  ;;  %v6018_v36 = vld [vmem:[#allocation5 + $0xa0] sm:$0xff]  ;;  %v6023_v12 = vld [vmem:[#allocation5 + $0xc8] sm:$0xff] }
 0x7d4   : > { %v20267_v34 = vadd.f32 %v5777_v59, %v5590_v51  ;;  %v5686_v13 = vpop.f32.mrb[34].mxu1 }
 0x7d5   : > { %v5688_v3 = vpop.f32.mrb[35].mxu1  ;;  %v5800_v35 = vmax.f32 %v20265_v25, 0.0  ;;  %v20277_v1 = vadd.f32 %v5686_v13, %v5590_v51  ;;  %v6002_v13 = vld [vmem:[#allocation5 + $0x20] sm:$0xff]  ;;  %15899 = vmatpush1.bf16.msra.mxu1 %v15898_v32 }
 0x7d6   : > { %v5801_v4 = vmax.f32 %v20267_v34, 0.0  ;;  %v5781_v30 = vpop.f32.mrb[40].mxu0  ;;  %v20271_v45 = vadd.f32 %v5688_v3, %v5590_v51  ;;  %v6005_v51 = vld [vmem:[#allocation5 + $0x38] sm:$0xff]  ;;  %v6004_v3 = vld [vmem:[#allocation5 + $0x30] sm:$0xff] }
 0x7d7   : > { %v5783_v27 = vpop.f32.mrb[41].mxu0  ;;  %v5798_v55 = vmax.f32 %v20277_v1, 0.0  ;;  %v20295_v18 = vadd.f32 %v5781_v30, %v5595_v26  ;;  %v15900_v59 = vpack.c.bf16 %v6005_v51, %v6003_v58  ;;  %v6007_v30 = vld [vmem:[#allocation5 + $0x48] sm:$0xff]  ;;  %v6025_v58 = vld [vmem:[#allocation5 + $0xd8] sm:$0xff]  ;;  %v15918_v51 = vpack.c.bf16 %v6020_v8, %v6018_v36  ;;  %v6040_v36 = vld [vmem:[#allocation5 + $0x150] sm:$0xff] }
 0x7d8   : > { %5836 = vrot.lane.b32.xlu0 %v5801_v4, %s17858_s19  ;;  %v5799_v56 = vmax.f32 %v20271_v45, 0.0  ;;  %v5692_v63 = vpop.f32.mrb[36].mxu1  ;;  %v20286_v5 = vadd.f32 %v5783_v27, %v5595_v26  ;;  %v6009_v27 = vld [vmem:[#allocation5 + $0x58] sm:$0xff]  ;;  %v15920_v32 = vpack.c.bf16 %v6025_v58, %v6023_v12  ;;  %v6043_v8 = vld [vmem:[#allocation5 + $0x168] sm:$0xff] }
 0x7d9   : > { %v5694_v40 = vpop.f32.mrb[37].mxu1  ;;  %v20283_v48 = vadd.f32 %v5692_v63, %v5595_v26  ;;  %v5804_v0 = vmax.f32 %v20295_v18, 0.0  ;;  %v15902_v63 = vpack.c.bf16 %v6004_v3, %v6002_v13  ;;  %15901 = vmatprep.subr.bf16.mxu1 %v15900_v59  ;;  %v6022_v59 = vld [vmem:[#allocation5 + $0xc0] sm:$0xff]  ;;  %v6024_v13 = vld [vmem:[#allocation5 + $0xd0] sm:$0xff]  ;;  %v6027_v3 = vld [vmem:[#allocation5 + $0xe8] sm:$0xff] }
 0x7da   : > { %v5787_v50 = vpop.f32.mrb[42].mxu0  ;;  %v17413_v9 = vpack.i.bf16 %v5800_v35, %v5799_v56  ;;  %v20289_v42 = vadd.f32 %v5694_v40, %v5595_v26  ;;  %v5805_v33 = vmax.f32 %v20286_v5, 0.0  ;;  %v15904_v40 = vpack.c.bf16 %v6009_v27, %v6007_v30  ;;  %v6013_v26 = vld [vmem:[#allocation5 + $0x78] sm:$0xff] }
 0x7db   : > { %v5789_v37 = vpop.f32.mrb[43].mxu0  ;;  %v5802_v52 = vmax.f32 %v20283_v48, 0.0  ;;  %v20298_v49 = vadd.f32 %v5787_v50, %v5600_v24  ;;  %v6006_v50 = vld [vmem:[#allocation5 + $0x40] sm:$0xff]  ;;  %15903 = vmatpush1.bf16.msra.mxu1 %v15902_v63  ;;  %v6029_v30 = vld [vmem:[#allocation5 + $0xf8] sm:$0xff]  ;;  %v15922_v27 = vpack.c.bf16 %v6024_v13, %v6022_v59  ;;  %v6044_v59 = vld [vmem:[#allocation5 + $0x170] sm:$0xff] }
 0x7dc   : > { %v5698_v14 = vpop.f32.mrb[38].mxu1  ;;  %17414 = vrot.lane.b32.xlu1 %v17413_v9, %s17858_s19  ;;  %v5803_v47 = vmax.f32 %v20289_v42, 0.0  ;;  %v20325_v41 = vadd.f32 %v5789_v37, %v5600_v24  ;;  %v6008_v9 = vld [vmem:[#allocation5 + $0x50] sm:$0xff]  ;;  %v6011_v37 = vld [vmem:[#allocation5 + $0x68] sm:$0xff]  ;;  %15905 = vmatprep.subr.bf16.mxu1 %v15904_v40  ;;  %v15924_v63 = vpack.c.bf16 %v6029_v30, %v6027_v3  ;;  %v6026_v40 = vld [vmem:[#allocation5 + $0xe0] sm:$0xff] }
 0x7dd   : > { %v5700_v17 = vpop.f32.mrb[39].mxu1  ;;  %v20291_v22 = vadd.f32 %v5698_v14, %v5600_v24  ;;  %v5808_v38 = vmax.f32 %v20298_v49, 0.0  ;;  %v15908_v14 = vpack.c.bf16 %v6013_v26, %v6011_v37  ;;  %v6033_v37 = vld [vmem:[#allocation5 + $0x118] sm:$0xff]  ;;  %v6047_v13 = vld [vmem:[#allocation5 + $0x188] sm:$0xff] }
 0x7de   : > { %v5793_v11 = vpop.f32.mrb[44].mxu0  ;;  %v20293_v10 = vadd.f32 %v5700_v17, %v5600_v24  ;;  %v17423_v39 = vpack.i.bf16 %v5804_v0, %v5803_v47  ;;  %v5809_v16 = vmax.f32 %v20325_v41, 0.0  ;;  %v15906_v24 = vpack.c.bf16 %v6008_v9, %v6006_v50  ;;  %v6010_v17 = vld [vmem:[#allocation5 + $0x60] sm:$0xff]  ;;  %v6028_v50 = vld [vmem:[#allocation5 + $0xf0] sm:$0xff]  ;;  %v6031_v9 = vld [vmem:[#allocation5 + $0x108] sm:$0xff] }
 0x7df   : > { %v5795_v7 = vpop.f32.mrb[45].mxu0  ;;  %v5806_v29 = vmax.f32 %v20291_v22, 0.0  ;;  %v20315_v60 = vadd.f32 %v5793_v11, %v5605_v62  ;;  %v6012_v11 = vld [vmem:[#allocation5 + $0x70] sm:$0xff]  ;;  %v15926_v26 = vpack.c.bf16 %v6028_v50, %v6026_v40  ;;  %v6045_v12 = vld [vmem:[#allocation5 + $0x178] sm:$0xff]  ;;  %v6051_v50 = vld [vmem:[#allocation5 + $0x1a8] sm:$0xff] }
 0x7e0   : > { %v5807_v20 = vmax.f32 %v20293_v10, 0.0  ;;  %v5704_v15 = vpop.f32.mrb[40].mxu1  ;;  %5830 = vrot.lane.b32.xlu1 %v5798_v55, %s17858_s19  ;;  %v20336_v19 = vadd.f32 %v5795_v7, %v5605_v62  ;;  %v6015_v7 = vld [vmem:[#allocation5 + $0x88] sm:$0xff]  ;;  %15907 = vmatpush1.bf16.msra.mxu1 %v15906_v24  ;;  %v15928_v24 = vpack.c.bf16 %v6033_v37, %v6031_v9  ;;  %v6049_v3 = vld [vmem:[#allocation5 + $0x198] sm:$0xff]  ;;  %v6048_v40 = vld [vmem:[#allocation5 + $0x190] sm:$0xff] }
 0x7e1   : > { %v5706_v53 = vpop.f32.mrb[41].mxu1  ;;  %v17428_v43 = vpack.i.bf16 %v5806_v29, %v5808_v38  ;;  %v5812_v23 = vmax.f32 %v20315_v60, 0.0  ;;  %v20338_v61 = vadd.f32 %v5704_v15, %v5605_v62  ;;  %v6017_v15 = vld [vmem:[#allocation5 + $0x98] sm:$0xff]  ;;  %15909 = vmatprep.subr.bf16.mxu1 %v15908_v14  ;;  %v6030_v14 = vld [vmem:[#allocation5 + $0x100] sm:$0xff] }
 0x7e2   : > { %v17418_v21 = vpack.i.bf16 %v5807_v20, %v5802_v52  ;;  %v20311_v44 = vadd.f32 %v5706_v53, %v5605_v62  ;;  %v5813_v54 = vmax.f32 %v20336_v19, 0.0  ;;  %v15910_v62 = vpack.c.bf16 %v6012_v11, %v6010_v17  ;;  %v6032_v17 = vld [vmem:[#allocation5 + $0x110] sm:$0xff]  ;;  %v6035_v11 = vld [vmem:[#allocation5 + $0x128] sm:$0xff]  ;;  %v6053_v9 = vld [vmem:[#allocation5 + $0x1b8] sm:$0xff] }
 0x7e3   : > { %v5810_v6 = vmax.f32 %v20338_v61, 0.0  ;;  %v15912_v53 = vpack.c.bf16 %v6017_v15, %v6015_v7  ;;  %v6037_v7 = vld [vmem:[#allocation5 + $0x138] sm:$0xff]  ;;  %v15930_v15 = vpack.c.bf16 %v6032_v17, %v6030_v14  ;;  %v6052_v14 = vld [vmem:[#allocation5 + $0x1b0] sm:$0xff]  ;;  %v6055_v17 = vld [vmem:[#allocation5 + $0x1c8] sm:$0xff] }
 0x7e4   : > { %17419 = vrot.lane.b32.xlu0 %v17418_v21, %s17858_s19  ;;  %5844 = vrot.lane.b32.xlu1 %v5805_v33, %s17858_s19  ;;  %v5811_v46 = vmax.f32 %v20311_v44, 0.0  ;;  %v6014_v21 = vld [vmem:[#allocation5 + $0x80] sm:$0xff]  ;;  %v6067_v61 = vld [vmem:[#allocation5 + $0x228] sm:$0xff] }
 0x7e5   : > { %15911 = vmatpush1.bf16.msra.mxu1 %v15910_v62  ;;  %v15932_v62 = vpack.c.bf16 %v6037_v7, %v6035_v11  ;;  %v6057_v11 = vld [vmem:[#allocation5 + $0x1d8] sm:$0xff]  ;;  %v6062_v41 = vld [vmem:[#allocation5 + $0x200] sm:$0xff] }
 0x7e6   : > { %v17433_v28 = vpack.i.bf16 %v5812_v23, %v5811_v46  ;;  %15913 = vmatprep.subr.bf16.mxu1 %v15912_v53  ;;  %v6034_v53 = vld [vmem:[#allocation5 + $0x120] sm:$0xff] }
 0x7e8   : > { %17424 = vrot.lane.b32.xlu0 %v17423_v39, %s17858_s19  ;;  %17429 = vrot.lane.b32.xlu1 %v17428_v43, %s17858_s19  ;;  %v6016_v39 = vld [vmem:[#allocation5 + $0x90] sm:$0xff]  ;;  %v6019_v43 = vld [vmem:[#allocation5 + $0xa8] sm:$0xff] }
 0x7e9   : > { %v15914_v31 = vpack.c.bf16 %v6016_v39, %v6014_v21  ;;  %v6036_v21 = vld [vmem:[#allocation5 + $0x130] sm:$0xff]  ;;  %v6039_v39 = vld [vmem:[#allocation5 + $0x148] sm:$0xff] }
 0x7eb   : > { %15915 = vmatpush1.bf16.msra.mxu1 %v15914_v31 }
 0x7ec   : > { %5852 = vrot.lane.b32.xlu0 %v5809_v16, %s17858_s19  ;;  %17434 = vrot.lane.b32.xlu1 %v17433_v28, %s17858_s19  ;;  %v6021_v28 = vld [vmem:[#allocation5 + $0xb8] sm:$0xff] }
 0x7ed   : > { %v15916_v2 = vpack.c.bf16 %v6021_v28, %v6019_v43  ;;  %v6041_v43 = vld [vmem:[#allocation5 + $0x158] sm:$0xff]  ;;  %v15934_v28 = vpack.c.bf16 %v6036_v21, %v6034_v53  ;;  %v6056_v53 = vld [vmem:[#allocation5 + $0x1d0] sm:$0xff] }
 0x7ee   : > { %v15936_v31 = vpack.c.bf16 %v6041_v43, %v6039_v39  ;;  %v6059_v39 = vld [vmem:[#allocation5 + $0x1e8] sm:$0xff]  ;;  %v6061_v43 = vld [vmem:[#allocation5 + $0x1f8] sm:$0xff] }
 0x7ef   : > { %15917 = vmatprep.subr.bf16.mxu1 %v15916_v2  ;;  %v6038_v2 = vld [vmem:[#allocation5 + $0x140] sm:$0xff] }
 0x7f0   : > { %5860 = vrot.lane.b32.xlu0 %v5813_v54, %s17858_s19  ;;  %5854 = vrot.lane.b32.xlu1 %v5810_v6, %s17858_s19  ;;  %v15938_v58 = vpack.c.bf16 %v6040_v36, %v6038_v2  ;;  %v6060_v2 = vld [vmem:[#allocation5 + $0x1f0] sm:$0xff] }
 0x7f1   : > { %15919 = vmatpush1.bf16.msra.mxu1 %v15918_v51  ;;  %v15940_v51 = vpack.c.bf16 %v6045_v12, %v6043_v8  ;;  %v6063_v12 = vld [vmem:[#allocation5 + $0x208] sm:$0xff] }
 0x7f2   : > { %15921 = vmatprep.subr.bf16.mxu1 %v15920_v32  ;;  %v6042_v32 = vld [vmem:[#allocation5 + $0x160] sm:$0xff] }
 0x7f3   : > { %v15942_v30 = vpack.c.bf16 %v6044_v59, %v6042_v32 }
 0x7f5   : > { %15923 = vmatpush1.bf16.msra.mxu1 %v15922_v27  ;;  %v15944_v27 = vpack.c.bf16 %v6049_v3, %v6047_v13 }
 0x7f6   : > { %15925 = vmatprep.subr.bf16.mxu1 %v15924_v63  ;;  %v6046_v63 = vld [vmem:[#allocation5 + $0x180] sm:$0xff] }
 0x7f7   : > { %v15946_v37 = vpack.c.bf16 %v6048_v40, %v6046_v63 }
 0x7f9   : > { %15927 = vmatpush1.bf16.msra.mxu1 %v15926_v26  ;;  %v15948_v26 = vpack.c.bf16 %v6053_v9, %v6051_v50 }
 0x7fa   : > { %15929 = vmatprep.subr.bf16.mxu1 %v15928_v24  ;;  %v6050_v24 = vld [vmem:[#allocation5 + $0x1a0] sm:$0xff] }
 0x7fb   : > { %v15950_v7 = vpack.c.bf16 %v6052_v14, %v6050_v24 }
 0x7fd   : > { %15931 = vmatpush1.bf16.msra.mxu1 %v15930_v15  ;;  %v15952_v15 = vpack.c.bf16 %v6057_v11, %v6055_v17 }
 0x7fe   : > { %15933 = vmatprep.subr.bf16.mxu1 %v15932_v62  ;;  %v6054_v62 = vld [vmem:[#allocation5 + $0x1c0] sm:$0xff] }
 0x7ff   : > { %v15954_v21 = vpack.c.bf16 %v6056_v53, %v6054_v62 }
 0x801   : > { %15935 = vmatpush1.bf16.msra.mxu1 %v15934_v28  ;;  %v6058_v28 = vld [vmem:[#allocation5 + $0x1e0] sm:$0xff] }
 0x802   : > { %15937 = vmatprep.subr.bf16.mxu1 %v15936_v31  ;;  %v15956_v31 = vpack.c.bf16 %v6061_v43, %v6059_v39  ;;  %v15958_v8 = vpack.c.bf16 %v6060_v2, %v6058_v28 }
 0x805   : > { %15939 = vmatpush1.bf16.msra.mxu1 %v15938_v58  ;;  %v6065_v58 = vld [vmem:[#allocation5 + $0x218] sm:$0xff] }
 0x806   : > { %15941 = vmatprep.subr.bf16.mxu1 %v15940_v51  ;;  %v15960_v59 = vpack.c.bf16 %v6065_v58, %v6063_v12 }
 0x809   : > { %15943 = vmatpush1.bf16.msra.mxu1 %v15942_v30 }
 0x80a   : > { %15945 = vmatprep.subr.bf16.mxu1 %v15944_v27 }
 0x80d   : > { %15947 = vmatpush1.bf16.msra.mxu1 %v15946_v37 }
 0x80e   : > { %15949 = vmatprep.subr.bf16.mxu1 %v15948_v26 }
 0x811   : > { %15951 = vmatpush1.bf16.msra.mxu1 %v15950_v7 }
 0x812   : > { %15953 = vmatprep.subr.bf16.mxu1 %v15952_v15 }
 0x815   : > { %15955 = vmatpush1.bf16.msra.mxu1 %v15954_v21 }
 0x816   : > { %15957 = vmatprep.subr.bf16.mxu1 %v15956_v31 }
 0x819   : > { %15959 = vmatpush1.bf16.msra.mxu1 %v15958_v8 }
 0x81a   : > { %15961 = vmatprep.subr.bf16.mxu1 %v15960_v59 }
 0x84a   : > { %v5837_v13 = vpop.permute.xlu0 %5836 }
 0x84b   : > { %v20435_v44 = vmax.f32 %v5801_v4, %v5837_v13 }
 0x84e   : > { %v17415_v36 = vpop.permute.xlu1 %17414 }
 0x84f   : > { %v17417_v51 = vunpack.i.h.bf16 %v17415_v36  ;;  %v17416_v32 = vunpack.i.l.bf16 %v17415_v36 }
 0x851   : > { %v5864_v3 = vsel %vm22533_vm7, %v17417_v51, %v5837_v13  ;;  %v5863_v30 = vsel %vm22534_vm9, %v17416_v32, %v17417_v51  ;;  %vm22544_vm7 = vmmov %vm22540_vm1  ;;  %vm6120_vm9 = vcmask 809984  }
 0x852   : > { %v20360_v27 = vmax.f32 %v5800_v35, %v5864_v3  ;;  %v20364_v63 = vmax.f32 %v5799_v56, %v5863_v30  ;;  %v5831_v40 = vpop.permute.xlu1 %5830  ;;  %v6066_v30 = vld [vmem:[#allocation5 + $0x220] sm:$0xff] }
 0x853   : > { %v5862_v50 = vsel %vm22535_vm10, %v5831_v40, %v17416_v32  ;;  %v6068_v40 = vld [vmem:[#allocation5 + $0x230] sm:$0xff]  ;;  %vm22547_vm10 = vmmov %vm22540_vm1 }
 0x854   : > { %v20369_v9 = vmax.f32 %v5798_v55, %v5862_v50  ;;  %v17438_v37 = vpack.i.bf16 %v20360_v27, %v20364_v63  ;;  %v6071_v50 = vld [vmem:[#allocation5 + $0x248] sm:$0xff] }
 0x856   : > { %v17420_v26 = vpop.permute.xlu0 %17419  ;;  %v5845_v24 = vpop.permute.xlu1 %5844  ;;  %17439 = vrot.lane.b32.xlu0 %v17438_v37, %s17868_s21  ;;  %5922 = vrot.lane.b32.xlu1 %v20369_v9, %s17868_s21  ;;  %v6073_v37 = vld [vmem:[#allocation5 + $0x258] sm:$0xff] }
 0x857   : > { %v17421_v25 = vunpack.i.l.bf16 %v17420_v26  ;;  %v17422_v1 = vunpack.i.h.bf16 %v17420_v26  ;;  %v20441_v60 = vmax.f32 %v5805_v33, %v5845_v24  ;;  %v15966_v26 = vpack.c.bf16 %v6068_v40, %v6066_v30  ;;  %v6087_v40 = vld [vmem:[#allocation5 + $0x2c8] sm:$0xff] }
 0x85a   : > { %v17425_v35 = vpop.permute.xlu0 %17424  ;;  %v17430_v45 = vpop.permute.xlu1 %17429 }
 0x85b   : > { %v17427_v56 = vunpack.i.h.bf16 %v17425_v35  ;;  %v17426_v14 = vunpack.i.l.bf16 %v17425_v35  ;;  %v17432_v17 = vunpack.i.h.bf16 %v17430_v45  ;;  %v17431_v11 = vunpack.i.l.bf16 %v17430_v45  ;;  %v6072_v35 = vld [vmem:[#allocation5 + $0x250] sm:$0xff]  ;;  %v6075_v45 = vld [vmem:[#allocation5 + $0x268] sm:$0xff] }
 0x85d   : > { %v5865_v55 = vsel %vm22536_vm11, %v17421_v25, %v17426_v14  ;;  %v5866_v7 = vsel %vm22537_vm2, %v17426_v14, %v17427_v56  ;;  %v5867_v15 = vsel %vm22538_vm3, %v17427_v56, %v5845_v24  ;;  %v5869_v39 = vsel %vm22539_vm15, %v17422_v1, %v17431_v11  ;;  %v6070_v25 = vld [vmem:[#allocation5 + $0x240] sm:$0xff]  ;;  %v6077_v56 = vld [vmem:[#allocation5 + $0x278] sm:$0xff]  ;;  %vm22548_vm11 = vmmov %vm22540_vm1 }
 0x85e   : > { %v20381_v62 = vmax.f32 %v5802_v52, %v5865_v55  ;;  %v20385_v53 = vmax.f32 %v5803_v47, %v5866_v7  ;;  %v20389_v21 = vmax.f32 %v5804_v0, %v5867_v15  ;;  %v5853_v43 = vpop.permute.xlu0 %5852  ;;  %v17435_v28 = vpop.permute.xlu1 %17434  ;;  %v5868_v31 = vsel %vm22540_vm1, %v17432_v17, %v17422_v1  ;;  %v6074_v14 = vld [vmem:[#allocation5 + $0x260] sm:$0xff]  ;;  %v6076_v7 = vld [vmem:[#allocation5 + $0x270] sm:$0xff]  ;;  %v6079_v15 = vld [vmem:[#allocation5 + $0x288] sm:$0xff] }
 0x85f   : > { %v20395_v2 = vmax.f32 %v5807_v20, %v5869_v39  ;;  %v5870_v48 = vsel %vm22541_vm14, %v17431_v11, %v5853_v43  ;;  %v17437_v52 = vunpack.i.h.bf16 %v17435_v28  ;;  %v17436_v18 = vunpack.i.l.bf16 %v17435_v28  ;;  %v6081_v39 = vld [vmem:[#allocation5 + $0x298] sm:$0xff] }
 0x860   : > { %v20400_v42 = vmax.f32 %v5808_v38, %v5870_v48  ;;  %v17443_v47 = vpack.i.bf16 %v20389_v21, %v20385_v53  ;;  %v20408_v36 = vmax.f32 %v5806_v29, %v5868_v31  ;;  %v15968_v24 = vpack.c.bf16 %v6073_v37, %v6071_v50  ;;  %v6089_v50 = vld [vmem:[#allocation5 + $0x2d8] sm:$0xff] }
 0x861   : > { %v17448_v0 = vpack.i.bf16 %v20395_v2, %v20381_v62  ;;  %v5872_v10 = vsel %vm22542_vm6, %v17436_v18, %v17437_v52  ;;  %v15972_v55 = vpack.c.bf16 %v6077_v56, %v6075_v45  ;;  %v6091_v45 = vld [vmem:[#allocation5 + $0x2e8] sm:$0xff]  ;;  %vm22549_vm2 = vcmask 1031168  }
 0x862   : > { %v5861_v20 = vpop.permute.xlu0 %5860  ;;  %v5855_v8 = vpop.permute.xlu1 %5854  ;;  %17444 = vrot.lane.b32.xlu0 %v17443_v47, %s17868_s21  ;;  %v17453_v38 = vpack.i.bf16 %v20408_v36, %v20400_v42  ;;  %v20418_v12 = vmax.f32 %v5811_v46, %v5872_v10  ;;  %v20447_v46 = vmax.f32 %v5809_v16, %v5853_v43  ;;  %v15976_v47 = vpack.c.bf16 %v6081_v39, %v6079_v15  ;;  %v6094_v15 = vld [vmem:[#allocation5 + $0x300] sm:$0xff]  ;;  %v6096_v39 = vld [vmem:[#allocation5 + $0x310] sm:$0xff]  ;;  %vm22550_vm3 = vmmov %vm22549_vm2 }
 0x863   : > { %v5873_v49 = vsel %vm22543_vm12, %v17437_v52, %v5861_v20  ;;  %17449 = vrot.lane.b32.xlu1 %v17448_v0, %s17868_s21  ;;  %v5871_v29 = vsel %vm22544_vm7, %v5855_v8, %v17436_v18  ;;  %v20453_v34 = vmax.f32 %v5813_v54, %v5861_v20  ;;  %v15974_v18 = vpack.c.bf16 %v6076_v7, %v6074_v14  ;;  %v6090_v14 = vld [vmem:[#allocation5 + $0x2e0] sm:$0xff]  ;;  %vm22551_vm15 = vmmov %vm22549_vm2 }
 0x864   : > { %v20422_v22 = vmax.f32 %v5812_v23, %v5873_v49  ;;  %v20430_v51 = vmax.f32 %v5810_v6, %v5871_v29  ;;  %v6064_v23 = vld [vmem:[#allocation5 + $0x210] sm:$0xff]  ;;  %v6069_v6 = vld [vmem:[#allocation5 + $0x238] sm:$0xff]  ;;  %v6078_v49 = vld [vmem:[#allocation5 + $0x280] sm:$0xff]  ;;  %vm6458_vm6 = vcmask 957440   ;;  %vm6487_vm12 = vcmask 949248  }
 0x865   : > { %v15962_v13 = vpack.c.bf16 %v6064_v23, %v6062_v41  ;;  %v15964_v3 = vpack.c.bf16 %v6069_v6, %v6067_v61  ;;  %vm22552_vm14 = vmmov %vm22549_vm2  ;;  %vm6544_vm7 = vcmask 875520  }
 0x866   : > { %v17458_v58 = vpack.i.bf16 %v20422_v22, %v20418_v12  ;;  %17454 = vrot.lane.b32.xlu0 %v17453_v38, %s17868_s21  ;;  %v6080_v38 = vld [vmem:[#allocation5 + $0x290] sm:$0xff] }
 0x868   : > { %17459 = vrot.lane.b32.xlu1 %v17458_v58, %s17868_s21  ;;  %v6083_v58 = vld [vmem:[#allocation5 + $0x2a8] sm:$0xff] }
 0x86a   : > { %5946 = vrot.lane.b32.xlu0 %v20430_v51, %s17868_s21 }
 0x86c   : > { %5928 = vrot.lane.b32.xlu1 %v20435_v44, %s17868_s21 }
 0x86e   : > { %5936 = vrot.lane.b32.xlu0 %v20441_v60, %s17868_s21 }
 0x870   : > { %5944 = vrot.lane.b32.xlu1 %v20447_v46, %s17868_s21 }
 0x872   : > { %5952 = vrot.lane.b32.xlu0 %v20453_v34, %s17868_s21  ;;  %s17872_s21 = smov 118  }
 0x8c8   : > { %v20459_v4 = vpop.permute.xlu0 %17439  ;;  %v5923_v16 = vpop.permute.xlu1 %5922 }
 0x8c9   : > { %v17442_v5 = vunpack.i.h.bf16 %v20459_v4  ;;  %v17441_v33 = vunpack.i.l.bf16 %v20459_v4 }
 0x8cb   : > { %v5954_v19 = vsel %vm5386_vm13, %v5923_v16, %v17441_v33  ;;  %v5955_v54 = vsel %vm5386_vm13, %v17441_v33, %v17442_v5  ;;  %v6085_v33 = vld [vmem:[#allocation5 + $0x2b8] sm:$0xff] }
 0x8cc   : > { %v5982_v32 = vmax.f32 %v20369_v9, %v5954_v19  ;;  %v5983_v59 = vmax.f32 %v20364_v63, %v5955_v54  ;;  %v15970_v63 = vpack.c.bf16 %v6072_v35, %v6070_v25  ;;  %v15978_v19 = vpack.c.bf16 %v6080_v38, %v6078_v49  ;;  %v6088_v25 = vld [vmem:[#allocation5 + $0x2d0] sm:$0xff]  ;;  %v6102_v49 = vld [vmem:[#allocation5 + $0x340] sm:$0xff] }
 0x8cd   : > { %v6104_v38 = vld [vmem:[#allocation5 + $0x350] sm:$0xff] }
 0x8ce   : > { %6203 = vmatprep.mubr.f32.mxu1 %v5983_v59  ;;  %v6082_v59 = vld [vmem:[#allocation5 + $0x2a0] sm:$0xff] }
 0x8cf   : > { %6204 = vmatmul.mubr.f32.vlgmr.msra.gmra.mrb[42].mxu1 %v5982_v32  ;;  %v15980_v32 = vpack.c.bf16 %v6085_v33, %v6083_v58  ;;  %v6107_v58 = vld [vmem:[#allocation5 + $0x368] sm:$0xff]  ;;  %v6109_v33 = vld [vmem:[#allocation5 + $0x378] sm:$0xff] }
 0x8d0   : > { %15963 = vmatpush1.bf16.msra.mxu1 %v15962_v13  ;;  %v6084_v13 = vld [vmem:[#allocation5 + $0x2b0] sm:$0xff] }
 0x8d1   : > { %15965 = vmatprep.subr.bf16.mxu1 %v15964_v3 }
 0x8d4   : > { %15967 = vmatpush1.bf16.msra.mxu1 %v15966_v26  ;;  %v20469_v9 = vpop.permute.xlu0 %17444  ;;  %v15984_v26 = vpack.c.bf16 %v6089_v50, %v6087_v40  ;;  %v6114_v50 = vld [vmem:[#allocation5 + $0x3a0] sm:$0xff] }
 0x8d5   : > { %v17447_v17 = vunpack.i.h.bf16 %v20469_v9  ;;  %v17446_v11 = vunpack.i.l.bf16 %v20469_v9  ;;  %v17450_v1 = vpop.permute.xlu1 %17449  ;;  %15969 = vmatprep.subr.bf16.mxu1 %v15968_v24  ;;  %v6086_v24 = vld [vmem:[#allocation5 + $0x2c0] sm:$0xff] }
 0x8d6   : > { %v17451_v43 = vunpack.i.l.bf16 %v17450_v1  ;;  %v17452_v0 = vunpack.i.h.bf16 %v17450_v1  ;;  %v15986_v56 = vpack.c.bf16 %v6088_v25, %v6086_v24  ;;  %v6097_v1 = vld [vmem:[#allocation5 + $0x318] sm:$0xff] }
 0x8d7   : > { %v5958_v28 = vsel %vm5386_vm13, %v17446_v11, %v17447_v17 }
 0x8d8   : > { %15971 = vmatpush1.bf16.msra.mxu1 %v15970_v63  ;;  %v20476_v31 = vpop.permute.xlu0 %17454  ;;  %v5987_v48 = vmax.f32 %v20385_v53, %v5958_v28  ;;  %v5957_v52 = vsel %vm5386_vm13, %v17451_v43, %v17446_v11  ;;  %v6092_v11 = vld [vmem:[#allocation5 + $0x2f0] sm:$0xff]  ;;  %v6101_v43 = vld [vmem:[#allocation5 + $0x338] sm:$0xff]  ;;  %v15994_v28 = vpack.c.bf16 %v6096_v39, %v6094_v15 }
 0x8d9   : > { %v17457_v10 = vunpack.i.h.bf16 %v20476_v31  ;;  %v17456_v20 = vunpack.i.l.bf16 %v20476_v31  ;;  %15973 = vmatprep.subr.bf16.mxu1 %v15972_v55  ;;  %v5986_v8 = vmax.f32 %v20381_v62, %v5957_v52  ;;  %v15990_v55 = vpack.c.bf16 %v6092_v11, %v6090_v14  ;;  %v6098_v52 = vld [vmem:[#allocation5 + $0x320] sm:$0xff] }
 0x8da   : > { %6209 = vmatprep.mubr.f32.mxu1 %v5987_v48  ;;  %v20483_v29 = vpop.permute.xlu1 %17459 }
 0x8db   : > { %v17462_v53 = vunpack.i.h.bf16 %v20483_v29  ;;  %v17461_v41 = vunpack.i.l.bf16 %v20483_v29  ;;  %6210 = vmatmul.mubr.f32.gmra.mrb[44].mxu1 %v5986_v8  ;;  %v5961_v23 = vsel %vm5386_vm13, %v17452_v0, %v17456_v20  ;;  %v5960_v16 = vsel %vm5386_vm13, %v17457_v10, %v17452_v0  ;;  %v6105_v0 = vld [vmem:[#allocation5 + $0x358] sm:$0xff] }
 0x8dc   : > { %15975 = vmatpush1.bf16.msra.mxu1 %v15974_v18  ;;  %v5947_v62 = vpop.permute.xlu0 %5946  ;;  %v5991_v61 = vmax.f32 %v20395_v2, %v5961_v23  ;;  %v5990_v6 = vmax.f32 %v20408_v36, %v5960_v16  ;;  %v15982_v2 = vpack.c.bf16 %v6084_v13, %v6082_v59  ;;  %v6100_v18 = vld [vmem:[#allocation5 + $0x330] sm:$0xff]  ;;  %v16004_v23 = vpack.c.bf16 %v6109_v33, %v6107_v58  ;;  %v6106_v16 = vld [vmem:[#allocation5 + $0x360] sm:$0xff]  ;;  %v6115_v13 = vld [vmem:[#allocation5 + $0x3a8] sm:$0xff] }
 0x8dd   : > { %15977 = vmatprep.subr.bf16.mxu1 %v15976_v47  ;;  %v5964_v54 = vsel %vm5386_vm13, %v17461_v41, %v17462_v53  ;;  %v5963_v3 = vsel %vm5386_vm13, %v5947_v62, %v17461_v41  ;;  %v6103_v47 = vld [vmem:[#allocation5 + $0x348] sm:$0xff]  ;;  %v15998_v10 = vpack.c.bf16 %v6100_v18, %v6098_v52  ;;  %v16002_v41 = vpack.c.bf16 %v6104_v38, %v6102_v49  ;;  %v6108_v62 = vld [vmem:[#allocation5 + $0x370] sm:$0xff] }
 0x8de   : > { %6215 = vmatprep.mubr.f32.mxu1 %v5991_v61  ;;  %v5995_v30 = vmax.f32 %v20418_v12, %v5964_v54  ;;  %v20498_v37 = vpop.permute.xlu1 %5928  ;;  %v5994_v36 = vmax.f32 %v20430_v51, %v5963_v3  ;;  %v6093_v12 = vld [vmem:[#allocation5 + $0x2f8] sm:$0xff]  ;;  %v6095_v51 = vld [vmem:[#allocation5 + $0x308] sm:$0xff]  ;;  %v16000_v8 = vpack.c.bf16 %v6105_v0, %v6103_v47  ;;  %v6112_v59 = vld [vmem:[#allocation5 + $0x390] sm:$0xff] }
 0x8df   : > { %6216 = vmatmul.mubr.f32.gmra.mrb[46].mxu1 %v5990_v6  ;;  %v5985_v35 = vmax.f32 %v20435_v44, %v20498_v37  ;;  %v15988_v63 = vpack.c.bf16 %v6093_v12, %v6091_v45  ;;  %v15992_v7 = vpack.c.bf16 %v6097_v1, %v6095_v51  ;;  %v6099_v44 = vld [vmem:[#allocation5 + $0x328] sm:$0xff]  ;;  %v6113_v6 = vld [vmem:[#allocation5 + $0x398] sm:$0xff]  ;;  %v5956_v24 = vsel %vm5386_vm13, %v17442_v5, %v20498_v37 }
 0x8e0   : > { %15979 = vmatpush1.bf16.msra.mxu1 %v15978_v19  ;;  %6221 = vmatprep.mubr.f32.mxu1 %v5995_v30  ;;  %v15996_v48 = vpack.c.bf16 %v6101_v43, %v6099_v44  ;;  %v6111_v61 = vld [vmem:[#allocation5 + $0x388] sm:$0xff]  ;;  %v16006_v19 = vpack.c.bf16 %v6108_v62, %v6106_v16  ;;  %v6117_v3 = vld [vmem:[#allocation5 + $0x3b8] sm:$0xff]  ;;  %v5937_v25 = vpop.permute.xlu0 %5936  ;;  %v5984_v45 = vmax.f32 %v20360_v27, %v5956_v24  ;;  %v6341_v43 = vld [vmem:[%s22301_s8] sm:$0xff] }
 0x8e1   : > { %15981 = vmatprep.subr.bf16.mxu1 %v15980_v32  ;;  %v16008_v54 = vpack.c.bf16 %v6113_v6, %v6111_v61  ;;  %v6110_v32 = vld [vmem:[#allocation5 + $0x380] sm:$0xff]  ;;  %v16012_v40 = vpack.c.bf16 %v6117_v3, %v6115_v13  ;;  %v5959_v12 = vsel %vm5386_vm13, %v17447_v17, %v5937_v25  ;;  %v6318_v44 = vld [vmem:[%s22300_s7 + $0x8] sm:$0xff] }
 0x8e2   : > { %v16010_v30 = vpack.c.bf16 %v6112_v59, %v6110_v32  ;;  %v5988_v4 = vmax.f32 %v20389_v21, %v5959_v12  ;;  %6715 = vmatprep.mubr.f32.mxu0 %v6318_v44 }
 0x8e3   : > { %6222 = vmatmul.mubr.f32.gmra.mrb[48].mxu1 %v5994_v36 }
 0x8e4   : > { %15983 = vmatpush1.bf16.msra.mxu1 %v15982_v2  ;;  %12730 = vmatprep.mubr.msk.f32.mxu1 %vm6120_vm9, %v5985_v35  ;;  %v6116_v2 = vld [vmem:[#allocation5 + $0x3b0] sm:$0xff]  ;;  %v6118_v35 = vld [vmem:[#allocation5 + $0x3c0] sm:$0x7]  ;;  %v5953_v37 = vpop.permute.xlu0 %5952 }
 0x8e5   : > { %15985 = vmatprep.subr.bf16.mxu1 %v15984_v26  ;;  %v16014_v36 = vpack.c.bf16 %v6116_v2, %v6114_v50  ;;  %v6119_v26 = vld [vmem:[#allocation5 + $0x3c8] sm:$0x7]  ;;  %v5965_v9 = vsel %vm5386_vm13, %v17462_v53, %v5953_v37  ;;  %v5997_v17 = vmax.f32 %v20453_v34, %v5953_v37 }
 0x8e6   : > { %v5996_v21 = vmax.f32 %v20422_v22, %v5965_v9 }
 0x8e8   : > { %15987 = vmatpush1.bf16.msra.mxu1 %v15986_v56  ;;  %v5989_v56 = vmax.f32 %v20441_v60, %v5937_v25 }
 0x8e9   : > { %15989 = vmatprep.subr.bf16.mxu1 %v15988_v63  ;;  %v5945_v63 = vpop.permute.xlu1 %5944 }
 0x8ea   : > { %v5962_v5 = vsel %vm5386_vm13, %v17456_v20, %v5945_v63  ;;  %v5993_v27 = vmax.f32 %v20447_v46, %v5945_v63  ;;  %vm22546_vm13 = vmmov %vm22540_vm1 }
 0x8eb   : > { %v5992_v60 = vmax.f32 %v20400_v42, %v5962_v5 }
 0x8ec   : > { %15991 = vmatpush1.bf16.msra.mxu1 %v15990_v55 }
 0x8ed   : > { %15993 = vmatprep.subr.bf16.mxu1 %v15992_v7 }
 0x8f0   : > { %15995 = vmatpush1.bf16.msra.mxu1 %v15994_v28  ;;  %v6342_v28 = vld [vmem:[%s22301_s8 + $0x8] sm:$0xff] }
 0x8f1   : > { %15997 = vmatprep.subr.bf16.mxu1 %v15996_v48 }
 0x8f4   : > { %15999 = vmatpush1.bf16.msra.mxu1 %v15998_v10 }
 0x8f5   : > { %16001 = vmatprep.subr.bf16.mxu1 %v16000_v8 }
 0x8f8   : > { %16003 = vmatpush1.bf16.msra.mxu1 %v16002_v41 }
 0x8f9   : > { %16005 = vmatprep.subr.bf16.mxu1 %v16004_v23 }
 0x8fc   : > { %16007 = vmatpush1.bf16.msra.mxu1 %v16006_v19 }
 0x8fd   : > { %16009 = vmatprep.subr.bf16.mxu1 %v16008_v54 }
 0x900   : > { %16011 = vmatpush1.bf16.msra.mxu1 %v16010_v30 }
 0x901   : > { %16013 = vmatprep.subr.bf16.mxu1 %v16012_v40 }
 0x904   : > { %16015 = vmatpush1.bf16.msra.mxu1 %v16014_v36 }
 0x905   : > { %12728 = vmatprep.subr.msk.mxu1 %vm1133_vm5, %v6119_v26 }
 0x908   : > { %12729 = vmatpush1.msk.msra.mxu1 %vm1133_vm5, %v6118_v35  ;;  %vm22545_vm5 = vmmov %vm22540_vm1  ;;  %vm6429_vm1 = vcmask 965632  }
 0x909   : > { %6293 = vmatmul.mubr.f32.vlgmr.msra.gmra.mrb[42].mxu1 %v5984_v45 }
 0x90a   : > { %12731 = vmatprep.mubr.msk.f32.mxu1 %vm6120_vm9, %v5989_v56 }
 0x90d   : > { %6299 = vmatmul.mubr.f32.gmra.mrb[44].mxu1 %v5988_v4 }
 0x90e   : > { %12732 = vmatprep.mubr.msk.f32.mxu1 %vm6120_vm9, %v5993_v27 }
 0x911   : > { %6305 = vmatmul.mubr.f32.gmra.mrb[46].mxu1 %v5992_v60 }
 0x912   : > { %12733 = vmatprep.mubr.msk.f32.mxu1 %vm6120_vm9, %v5997_v17  ;;  %vm6626_vm9 = vcmask 261120  }
 0x915   : > { %6311 = vmatmul.mubr.f32.gmra.mrb[48].mxu1 %v5996_v21 }
 0x9dc   : > { %v6294_v31 = vpop.f32.mrb[42].mxu1 }
 0x9dd   : > { %v6296_v46 = vpop.f32.mrb[43].mxu1 }
 0x9de   : > { %v17463_v20 = vpack.i.bf16 %v6296_v46, %v6294_v31 }
 0x9e0   : > { %17464 = vrot.lane.b32.xlu1 %v17463_v20, %s17858_s19  ;;  %v6300_v14 = vpop.f32.mrb[44].mxu1 }
 0x9e1   : > { %v6302_v11 = vpop.f32.mrb[45].mxu1  ;;  %v16018_v42 = vpack.c.bf16 %v6300_v14, %v6294_v31 }
 0x9e2   : > { %v17468_v51 = vpack.i.bf16 %v6302_v11, %v6300_v14  ;;  %v16016_v29 = vpack.c.bf16 %v6302_v11, %v6296_v46 }
 0x9e4   : > { %17469 = vrot.lane.b32.xlu0 %v17468_v51, %s17858_s19  ;;  %v6306_v53 = vpop.f32.mrb[46].mxu1  ;;  %16017 = vmatprep.subr.bf16.mxu0 %v16016_v29 }
 0x9e5   : > { %v6308_v34 = vpop.f32.mrb[47].mxu1  ;;  %16019 = vmatpush1.bf16.msra.mxu0 %v16018_v42 }
 0x9e6   : > { %v17473_v1 = vpack.i.bf16 %v6308_v34, %v6306_v53 }
 0x9e8   : > { %17474 = vrot.lane.b32.xlu1 %v17473_v1, %s17858_s19  ;;  %v6312_v22 = vpop.f32.mrb[48].mxu1 }
 0x9e9   : > { %v6314_v55 = vpop.f32.mrb[49].mxu1  ;;  %v16022_v7 = vpack.c.bf16 %v6312_v22, %v6306_v53 }
 0x9ea   : > { %v17483_v15 = vpack.i.bf16 %v6314_v55, %v6312_v22  ;;  %v16020_v39 = vpack.c.bf16 %v6314_v55, %v6308_v34 }
 0x9ec   : > { %17479 = vrot.lane.b32.xlu1 %v17463_v20, %s17857_s15  ;;  %17484 = vrot.lane.b32.xlu0 %v17483_v15, %s17858_s19 }
 0x9ed   : > { %16021 = vmatprep.subr.bf16.mxu0 %v16020_v39 }
 0x9ee   : > { %16023 = vmatpush1.bf16.msra.mxu0 %v16022_v7 }
 0x9f0   : > { %17494 = vrot.lane.b32.xlu1 %v17473_v1, %s17857_s15  ;;  %17489 = vrot.lane.b32.xlu0 %v17468_v51, %s17857_s15 }
 0x9f4   : > { %17499 = vrot.lane.b32.xlu1 %v17463_v20, %s17872_s21  ;;  %17504 = vrot.lane.b32.xlu0 %v17483_v15, %s17857_s15  ;;  %s17875_s15 = smov 107  }
 0x9f8   : > { %17514 = vrot.lane.b32.xlu1 %v17473_v1, %s17872_s21  ;;  %17509 = vrot.lane.b32.xlu0 %v17468_v51, %s17872_s21 }
 0x9fc   : > { %17519 = vrot.lane.b32.xlu1 %v17463_v20, %s17873_s22  ;;  %17524 = vrot.lane.b32.xlu0 %v17483_v15, %s17872_s21 }
 0xa00   : > { %17534 = vrot.lane.b32.xlu1 %v17473_v1, %s17873_s22  ;;  %17529 = vrot.lane.b32.xlu0 %v17468_v51, %s17873_s22 }
 0xa04   : > { %17539 = vrot.lane.b32.xlu1 %v17463_v20, %s17874_s23  ;;  %17544 = vrot.lane.b32.xlu0 %v17483_v15, %s17873_s22  ;;  %s22573_s22 = sld [smem:[#allocation22_spill]] }
 0xa08   : > { %17554 = vrot.lane.b32.xlu1 %v17473_v1, %s17874_s23  ;;  %17549 = vrot.lane.b32.xlu0 %v17468_v51, %s17874_s23 }
 0xa0a   : > { %p22576_p11 = scmp.ne.s32.totalorder %s22573_s22, 0 }
 0xa0c   : > { %17559 = vrot.lane.b32.xlu1 %v17463_v20, %s17869_s29  ;;  %17564 = vrot.lane.b32.xlu0 %v17483_v15, %s17874_s23  ;;  %s22571_s23 = sld [smem:[#allocation26_spill]] }
 0xa10   : > { %17574 = vrot.lane.b32.xlu1 %v17473_v1, %s17869_s29  ;;  %17569 = vrot.lane.b32.xlu0 %v17468_v51, %s17869_s29 }
 0xa14   : > { %17579 = vrot.lane.b32.xlu1 %v17463_v20, %s17875_s15  ;;  %17584 = vrot.lane.b32.xlu0 %v17483_v15, %s17869_s29  ;;  %s22251_s29 = scalar_lea.hbm %s22574_s16, %s13131_s20 }
 0xa18   : > { %17594 = vrot.lane.b32.xlu1 %v17473_v1, %s17875_s15  ;;  %17589 = vrot.lane.b32.xlu0 %v17468_v51, %s17875_s15 }
 0xa1c   : > { %17604 = vrot.lane.b32.xlu1 %v17463_v20, %s17876_s18  ;;  %17599 = vrot.lane.b32.xlu0 %v17483_v15, %s17875_s15  ;;  %s525_s15 = sand.u32 1, %s22572_s24  }
 0xa1d   : > { %s526_s27 = scalar_lea.vmem [#allocation11], %s525_s15  ;;  %s12546_s28 = scalar_lea.sflag [#allocation4], %s525_s15 }
 0xa20   : > { %17614 = vrot.lane.b32.xlu1 %v17473_v1, %s17876_s18  ;;  %17609 = vrot.lane.b32.xlu0 %v17468_v51, %s17876_s18 }
 0xa24   : > { %6588 = vperm.xlu1 %17412, %v6341_v43   ;;  %17619 = vrot.lane.b32.xlu0 %v17483_v15, %s17876_s18 }
 0xa28   : > { %6593 = vperm.xlu0 %17011, %v6342_v28  }
 0xa52   : > { %v17465_v48 = vpop.permute.xlu1 %17464 }
 0xa53   : > { %v17467_v52 = vunpack.i.h.bf16 %v17465_v48  ;;  %v17466_v18 = vunpack.i.l.bf16 %v17465_v48 }
 0xa55   : > { %v6373_v8 = vsel %vm22545_vm5, %v17466_v18, %v17467_v52  ;;  %vm22553_vm5 = vcmask 1046528  }
 0xa56   : > { %v17470_v47 = vpop.permute.xlu0 %17469 }
 0xa57   : > { %v17472_v0 = vunpack.i.h.bf16 %v17470_v47  ;;  %v17471_v10 = vunpack.i.l.bf16 %v17470_v47 }
 0xa59   : > { %v16024_v49 = vpack.c.bf16 %v17472_v0, %v17467_v52  ;;  %v6374_v38 = vsel %vm22546_vm13, %v17471_v10, %v17472_v0  ;;  %vm16117_vm13 = vmpackc.low %vm22553_vm5, %vm22516_vm4  ;;  %vm7212_vm5 = vcmask 228352  }
 0xa5a   : > { %v16026_v58 = vpack.c.bf16 %v6374_v38, %v6373_v8  ;;  %v17475_v33 = vpop.permute.xlu1 %17474 }
 0xa5b   : > { %16025 = vmatprep.subr.bf16.mxu0 %v16024_v49  ;;  %v17477_v41 = vunpack.i.h.bf16 %v17475_v33  ;;  %v17476_v23 = vunpack.i.l.bf16 %v17475_v33 }
 0xa5c   : > { %16027 = vmatpush1.bf16.msra.mxu0 %v16026_v58 }
 0xa5d   : > { %v6375_v32 = vsel %vm22547_vm10, %v17476_v23, %v17477_v41 }
 0xa5e   : > { %v17480_v16 = vpop.permute.xlu1 %17479  ;;  %v17485_v62 = vpop.permute.xlu0 %17484 }
 0xa5f   : > { %v17487_v61 = vunpack.i.h.bf16 %v17485_v62  ;;  %v17486_v6 = vunpack.i.l.bf16 %v17485_v62  ;;  %v17482_v19 = vunpack.i.h.bf16 %v17480_v16  ;;  %v17481_v54 = vunpack.i.l.bf16 %v17480_v16 }
 0xa61   : > { %v16028_v59 = vpack.c.bf16 %v17487_v61, %v17477_v41  ;;  %v6376_v13 = vsel %vm22548_vm11, %v17486_v6, %v17487_v61  ;;  %v6401_v36 = vsel %vm22549_vm2, %v17481_v54, %v17482_v19  ;;  %vm22554_vm11 = vmmov %vm22547_vm10 }
 0xa62   : > { %v16030_v3 = vpack.c.bf16 %v6376_v13, %v6375_v32  ;;  %v17495_v30 = vpop.permute.xlu1 %17494  ;;  %v17490_v40 = vpop.permute.xlu0 %17489  ;;  %vm22555_vm2 = vmmov %vm22547_vm10 }
 0xa63   : > { %v17492_v50 = vunpack.i.h.bf16 %v17490_v40  ;;  %v17491_v2 = vunpack.i.l.bf16 %v17490_v40  ;;  %16029 = vmatprep.subr.bf16.mxu0 %v16028_v59  ;;  %v17497_v26 = vunpack.i.h.bf16 %v17495_v30  ;;  %v17496_v24 = vunpack.i.l.bf16 %v17495_v30 }
 0xa64   : > { %16031 = vmatpush1.bf16.msra.mxu0 %v16030_v3 }
 0xa65   : > { %v16032_v25 = vpack.c.bf16 %v17492_v50, %v17482_v19  ;;  %v6402_v35 = vsel %vm22550_vm3, %v17491_v2, %v17492_v50  ;;  %v6403_v37 = vsel %vm22551_vm15, %v17496_v24, %v17497_v26  ;;  %vm22556_vm3 = vmmov %vm22555_vm2 }
 0xa66   : > { %v16034_v45 = vpack.c.bf16 %v6402_v35, %v6401_v36  ;;  %v17500_v12 = vpop.permute.xlu1 %17499  ;;  %v17505_v56 = vpop.permute.xlu0 %17504  ;;  %vm22557_vm15 = vmmov %vm22555_vm2 }
 0xa67   : > { %v17507_v63 = vunpack.i.h.bf16 %v17505_v56  ;;  %v17506_v4 = vunpack.i.l.bf16 %v17505_v56  ;;  %16033 = vmatprep.subr.bf16.mxu0 %v16032_v25  ;;  %v17502_v5 = vunpack.i.h.bf16 %v17500_v12  ;;  %v17501_v27 = vunpack.i.l.bf16 %v17500_v12 }
 0xa68   : > { %16035 = vmatpush1.bf16.msra.mxu0 %v16034_v45 }
 0xa69   : > { %v16036_v60 = vpack.c.bf16 %v17507_v63, %v17497_v26  ;;  %v6404_v9 = vsel %vm22552_vm14, %v17506_v4, %v17507_v63  ;;  %v6430_v14 = vsel %vm6429_vm1, %v17501_v27, %v17502_v5  ;;  %vm22558_vm14 = vmmov %vm22555_vm2 }
 0xa6a   : > { %v16038_v17 = vpack.c.bf16 %v6404_v9, %v6403_v37  ;;  %v17515_v21 = vpop.permute.xlu1 %17514  ;;  %v17510_v31 = vpop.permute.xlu0 %17509 }
 0xa6b   : > { %v17512_v46 = vunpack.i.h.bf16 %v17510_v31  ;;  %v17511_v20 = vunpack.i.l.bf16 %v17510_v31  ;;  %16037 = vmatprep.subr.bf16.mxu0 %v16036_v60  ;;  %v17517_v11 = vunpack.i.h.bf16 %v17515_v21  ;;  %v17516_v42 = vunpack.i.l.bf16 %v17515_v21 }
 0xa6c   : > { %16039 = vmatpush1.bf16.msra.mxu0 %v16038_v17 }
 0xa6d   : > { %v16040_v51 = vpack.c.bf16 %v17512_v46, %v17502_v5  ;;  %v6431_v29 = vsel %vm6429_vm1, %v17511_v20, %v17512_v46  ;;  %v6432_v39 = vsel %vm6429_vm1, %v17516_v42, %v17517_v11 }
 0xa6e   : > { %v16042_v53 = vpack.c.bf16 %v6431_v29, %v6430_v14  ;;  %v17520_v34 = vpop.permute.xlu1 %17519  ;;  %v17525_v1 = vpop.permute.xlu0 %17524 }
 0xa6f   : > { %v17527_v22 = vunpack.i.h.bf16 %v17525_v1  ;;  %v17526_v55 = vunpack.i.l.bf16 %v17525_v1  ;;  %16041 = vmatprep.subr.bf16.mxu0 %v16040_v51  ;;  %v17522_v7 = vunpack.i.h.bf16 %v17520_v34  ;;  %v17521_v15 = vunpack.i.l.bf16 %v17520_v34 }
 0xa70   : > { %16043 = vmatpush1.bf16.msra.mxu0 %v16042_v53 }
 0xa71   : > { %v16044_v44 = vpack.c.bf16 %v17527_v22, %v17517_v11  ;;  %v6433_v43 = vsel %vm6429_vm1, %v17526_v55, %v17527_v22  ;;  %v6459_v0 = vsel %vm6458_vm6, %v17521_v15, %v17522_v7 }
 0xa72   : > { %v16046_v28 = vpack.c.bf16 %v6433_v43, %v6432_v39  ;;  %v17535_v48 = vpop.permute.xlu1 %17534  ;;  %v17530_v52 = vpop.permute.xlu0 %17529 }
 0xa73   : > { %v17532_v18 = vunpack.i.h.bf16 %v17530_v52  ;;  %v17531_v47 = vunpack.i.l.bf16 %v17530_v52  ;;  %16045 = vmatprep.subr.bf16.mxu0 %v16044_v44  ;;  %v17537_v10 = vunpack.i.h.bf16 %v17535_v48  ;;  %v17536_v8 = vunpack.i.l.bf16 %v17535_v48 }
 0xa74   : > { %16047 = vmatpush1.bf16.msra.mxu0 %v16046_v28 }
 0xa75   : > { %v16048_v49 = vpack.c.bf16 %v17532_v18, %v17522_v7  ;;  %v6460_v38 = vsel %vm6458_vm6, %v17531_v47, %v17532_v18  ;;  %v6461_v6 = vsel %vm6458_vm6, %v17536_v8, %v17537_v10 }
 0xa76   : > { %v16050_v58 = vpack.c.bf16 %v6460_v38, %v6459_v0  ;;  %v17540_v33 = vpop.permute.xlu1 %17539  ;;  %v17545_v41 = vpop.permute.xlu0 %17544 }
 0xa77   : > { %v17547_v23 = vunpack.i.h.bf16 %v17545_v41  ;;  %v17546_v16 = vunpack.i.l.bf16 %v17545_v41  ;;  %16049 = vmatprep.subr.bf16.mxu0 %v16048_v49  ;;  %v17542_v62 = vunpack.i.h.bf16 %v17540_v33  ;;  %v17541_v61 = vunpack.i.l.bf16 %v17540_v33 }
 0xa78   : > { %16051 = vmatpush1.bf16.msra.mxu0 %v16050_v58 }
 0xa79   : > { %v16052_v19 = vpack.c.bf16 %v17547_v23, %v17537_v10  ;;  %v6462_v54 = vsel %vm6458_vm6, %v17546_v16, %v17547_v23  ;;  %v6488_v40 = vsel %vm6487_vm12, %v17541_v61, %v17542_v62  ;;  %vm20794_vm6 = vmpackc.low %vm1149_vm8, %vm22516_vm4 }
 0xa7a   : > { %v16054_v32 = vpack.c.bf16 %v6462_v54, %v6461_v6  ;;  %v17555_v59 = vpop.permute.xlu1 %17554  ;;  %v17550_v13 = vpop.permute.xlu0 %17549  ;;  %vm22561_vm8 = vmmov %vm22555_vm2 }
 0xa7b   : > { %v17552_v3 = vunpack.i.h.bf16 %v17550_v13  ;;  %v17551_v30 = vunpack.i.l.bf16 %v17550_v13  ;;  %16053 = vmatprep.subr.bf16.mxu0 %v16052_v19  ;;  %v17557_v50 = vunpack.i.h.bf16 %v17555_v59  ;;  %v17556_v2 = vunpack.i.l.bf16 %v17555_v59  ;;  %vm22562_vm4 = vmmov %vm22555_vm2 }
 0xa7c   : > { %16055 = vmatpush1.bf16.msra.mxu0 %v16054_v32 }
 0xa7d   : > { %v16056_v36 = vpack.c.bf16 %v17552_v3, %v17542_v62  ;;  %v6489_v26 = vsel %vm6487_vm12, %v17551_v30, %v17552_v3  ;;  %v6490_v4 = vsel %vm6487_vm12, %v17556_v2, %v17557_v50  ;;  %v6317_v3 = vld [vmem:[%s22300_s7] sm:$0xff] }
 0xa7e   : > { %v16058_v24 = vpack.c.bf16 %v6489_v26, %v6488_v40  ;;  %v17560_v25 = vpop.permute.xlu1 %17559  ;;  %v17565_v35 = vpop.permute.xlu0 %17564 }
 0xa7f   : > { %v17567_v45 = vunpack.i.h.bf16 %v17565_v35  ;;  %v17566_v12 = vunpack.i.l.bf16 %v17565_v35  ;;  %16057 = vmatprep.subr.bf16.mxu0 %v16056_v36  ;;  %v17562_v56 = vunpack.i.h.bf16 %v17560_v25  ;;  %v17561_v63 = vunpack.i.l.bf16 %v17560_v25  ;;  %v6321_v36 = vld [vmem:[%s22300_s7 + $0x20] sm:$0xff] }
 0xa80   : > { %16059 = vmatpush1.bf16.msra.mxu0 %v16058_v24 }
 0xa81   : > { %v16060_v5 = vpack.c.bf16 %v17567_v45, %v17557_v50  ;;  %v6491_v27 = vsel %vm6487_vm12, %v17566_v12, %v17567_v45  ;;  %v6516_v31 = vsel %vm5460_vm0, %v17561_v63, %v17562_v56  ;;  %v6320_v45 = vld [vmem:[%s22300_s7 + $0x18] sm:$0xff]  ;;  %vm17878_vm12 = vmmov 0  }
 0xa82   : > { %v16062_v37 = vpack.c.bf16 %v6491_v27, %v6490_v4  ;;  %v17575_v60 = vpop.permute.xlu1 %17574  ;;  %v17570_v9 = vpop.permute.xlu0 %17569  ;;  %v6324_v4 = vld [vmem:[%s22300_s7 + $0x38] sm:$0xff]  ;;  %v6323_v27 = vld [vmem:[%s22300_s7 + $0x30] sm:$0xff]  ;;  %13859 = vmatprep.mubr.msk.f32.mxu1 %vm17878_vm12, %v22515_v57 }
 0xa83   : > { %v17572_v17 = vunpack.i.h.bf16 %v17570_v9  ;;  %v17571_v21 = vunpack.i.l.bf16 %v17570_v9  ;;  %16061 = vmatprep.subr.bf16.mxu0 %v16060_v5  ;;  %v17577_v46 = vunpack.i.h.bf16 %v17575_v60  ;;  %v17576_v20 = vunpack.i.l.bf16 %v17575_v60  ;;  %v6326_v60 = vld [vmem:[%s22300_s7 + $0x48] sm:$0xff] }
 0xa84   : > { %16063 = vmatpush1.bf16.msra.mxu0 %v16062_v37  ;;  %v6327_v37 = vld [vmem:[%s22300_s7 + $0x50] sm:$0xff]  ;;  %v6330_v9 = vld [vmem:[%s22300_s7 + $0x68] sm:$0xff] }
 0xa85   : > { %v16064_v14 = vpack.c.bf16 %v17572_v17, %v17562_v56  ;;  %v6517_v11 = vsel %vm5460_vm0, %v17571_v21, %v17572_v17  ;;  %v6518_v55 = vsel %vm5460_vm0, %v17576_v20, %v17577_v46  ;;  %v6329_v17 = vld [vmem:[%s22300_s7 + $0x60] sm:$0xff]  ;;  %v6335_v20 = vld [vmem:[%s22300_s7 + $0x90] sm:$0xff] }
 0xa86   : > { %v16066_v42 = vpack.c.bf16 %v6517_v11, %v6516_v31  ;;  %v17580_v51 = vpop.permute.xlu1 %17579  ;;  %v17585_v29 = vpop.permute.xlu0 %17584  ;;  %v6333_v21 = vld [vmem:[%s22300_s7 + $0x80] sm:$0xff]  ;;  %v6332_v31 = vld [vmem:[%s22300_s7 + $0x78] sm:$0xff]  ;;  %v6338_v11 = vld [vmem:[%s22300_s7 + $0xa8] sm:$0xff] }
 0xa87   : > { %v17587_v53 = vunpack.i.h.bf16 %v17585_v29  ;;  %v17586_v34 = vunpack.i.l.bf16 %v17585_v29  ;;  %16065 = vmatprep.subr.bf16.mxu0 %v16064_v14  ;;  %v17582_v1 = vunpack.i.h.bf16 %v17580_v51  ;;  %v17581_v22 = vunpack.i.l.bf16 %v17580_v51  ;;  %v6339_v14 = vld [vmem:[%s22300_s7 + $0xb0] sm:$0xff]  ;;  %v6322_v51 = vld [vmem:[%s22300_s7 + $0x28] sm:$0xff]  ;;  %v6325_v29 = vld [vmem:[%s22300_s7 + $0x40] sm:$0xff] }
 0xa88   : > { %16067 = vmatpush1.bf16.msra.mxu0 %v16066_v42  ;;  %v6319_v42 = vld [vmem:[%s22300_s7 + $0x10] sm:$0xff] }
 0xa89   : > { %v16068_v7 = vpack.c.bf16 %v17587_v53, %v17577_v46  ;;  %v6519_v15 = vsel %vm5460_vm0, %v17586_v34, %v17587_v53  ;;  %v6545_v52 = vsel %vm6544_vm7, %v17581_v22, %v17582_v1  ;;  %vm6573_vm0 = vcmask 867328   ;;  %v6336_v46 = vld [vmem:[%s22300_s7 + $0x98] sm:$0xff]  ;;  %v6331_v34 = vld [vmem:[%s22300_s7 + $0x70] sm:$0xff]  ;;  %v6337_v22 = vld [vmem:[%s22300_s7 + $0xa0] sm:$0xff] }
 0xa8a   : > { %v16070_v39 = vpack.c.bf16 %v6519_v15, %v6518_v55  ;;  %v17595_v44 = vpop.permute.xlu1 %17594  ;;  %v17590_v43 = vpop.permute.xlu0 %17589  ;;  %v6328_v53 = vld [vmem:[%s22300_s7 + $0x58] sm:$0xff] }
 0xa8b   : > { %v17592_v28 = vunpack.i.h.bf16 %v17590_v43  ;;  %v17591_v48 = vunpack.i.l.bf16 %v17590_v43  ;;  %16069 = vmatprep.subr.bf16.mxu0 %v16068_v7  ;;  %v17597_v18 = vunpack.i.h.bf16 %v17595_v44  ;;  %v17596_v47 = vunpack.i.l.bf16 %v17595_v44  ;;  %v6340_v55 = vld [vmem:[%s22300_s7 + $0xb8] sm:$0xff] }
 0xa8c   : > { %16071 = vmatpush1.bf16.msra.mxu0 %v16070_v39 }
 0xa8d   : > { %v16072_v0 = vpack.c.bf16 %v17592_v28, %v17582_v1  ;;  %v6546_v10 = vsel %vm6544_vm7, %v17591_v48, %v17592_v28  ;;  %v6547_v16 = vsel %vm6544_vm7, %v17596_v47, %v17597_v18  ;;  %v6334_v1 = vld [vmem:[%s22300_s7 + $0x88] sm:$0xff] }
 0xa8e   : > { %v16074_v8 = vpack.c.bf16 %v6546_v10, %v6545_v52  ;;  %v17605_v49 = vpop.permute.xlu1 %17604  ;;  %v17600_v38 = vpop.permute.xlu0 %17599 }
 0xa8f   : > { %v17602_v58 = vunpack.i.h.bf16 %v17600_v38  ;;  %v17601_v33 = vunpack.i.l.bf16 %v17600_v38  ;;  %16073 = vmatprep.subr.bf16.mxu0 %v16072_v0  ;;  %v17607_v41 = vunpack.i.h.bf16 %v17605_v49  ;;  %v17606_v23 = vunpack.i.l.bf16 %v17605_v49 }
 0xa90   : > { %16075 = vmatpush1.bf16.msra.mxu0 %v16074_v8 }
 0xa91   : > { %v16076_v62 = vpack.c.bf16 %v17602_v58, %v17597_v18  ;;  %v6548_v61 = vsel %vm6544_vm7, %v17601_v33, %v17602_v58  ;;  %v6574_v13 = vsel %vm6573_vm0, %v17606_v23, %v17607_v41  ;;  %v6343_v33 = vld [vmem:[%s22301_s8 + $0x10] sm:$0xff]  ;;  %vm22563_vm7 = vmmov %vm22555_vm2 }
 0xa92   : > { %v16078_v6 = vpack.c.bf16 %v6548_v61, %v6547_v16  ;;  %v17615_v19 = vpop.permute.xlu1 %17614  ;;  %v17610_v54 = vpop.permute.xlu0 %17609 }
 0xa93   : > { %v17612_v32 = vunpack.i.h.bf16 %v17610_v54  ;;  %v17611_v59 = vunpack.i.l.bf16 %v17610_v54  ;;  %16077 = vmatprep.subr.bf16.mxu0 %v16076_v62  ;;  %v17617_v30 = vunpack.i.h.bf16 %v17615_v19  ;;  %v17616_v40 = vunpack.i.l.bf16 %v17615_v19 }
 0xa94   : > { %16079 = vmatpush1.bf16.msra.mxu0 %v16078_v6 }
 0xa95   : > { %v16080_v50 = vpack.c.bf16 %v17612_v32, %v17607_v41  ;;  %v6575_v2 = vsel %vm6573_vm0, %v17611_v59, %v17612_v32  ;;  %v6576_v12 = vsel %vm6573_vm0, %v17616_v40, %v17617_v30  ;;  %v6344_v41 = vld [vmem:[%s22301_s8 + $0x18] sm:$0xff]  ;;  %v7053_v59 = vld [vmem:[#allocation7] sm:$0xff] }
 0xa96   : > { %v16082_v26 = vpack.c.bf16 %v6575_v2, %v6574_v13  ;;  %v17620_v24 = vpop.permute.xlu0 %17619  ;;  %v7054_v13 = vld [vmem:[#allocation7 + $0x8] sm:$0xff]  ;;  %v7056_v40 = vld [vmem:[#allocation7 + $0x18] sm:$0xff]  ;;  %v7057_v2 = vld [vmem:[#allocation7 + $0x20] sm:$0xff] }
 0xa97   : > { %v17622_v25 = vunpack.i.h.bf16 %v17620_v24  ;;  %v17621_v35 = vunpack.i.l.bf16 %v17620_v24  ;;  %6716 = vmatmul.mubr.f32.vlgmr.msra.gmra.mrb[46].mxu0 %v6317_v3  ;;  %16081 = vmatprep.subr.bf16.mxu0 %v16080_v50  ;;  %v16088_v3 = vpack.c.bf16 %v7054_v13, %v7053_v59 }
 0xa98   : > { %16083 = vmatpush1.bf16.msra.mxu0 %v16082_v26  ;;  %6721 = vmatprep.mubr.f32.mxu0 %v6321_v36  ;;  %v7058_v36 = vld [vmem:[#allocation7 + $0x28] sm:$0xff] }
 0xa99   : > { %v16084_v56 = vpack.c.bf16 %v17622_v25, %v17617_v30  ;;  %v6577_v63 = vsel %vm6573_vm0, %v17621_v35, %v17622_v25  ;;  %v7055_v30 = vld [vmem:[#allocation7 + $0x10] sm:$0xff]  ;;  %v16096_v25 = vpack.c.bf16 %v7058_v36, %v7057_v2  ;;  %vm22564_vm0 = vmmov %vm22555_vm2 }
 0xa9a   : > { %v16086_v5 = vpack.c.bf16 %v6577_v63, %v6576_v12  ;;  %v16092_v50 = vpack.c.bf16 %v7056_v40, %v7055_v30  ;;  %v7059_v35 = vld [vmem:[#allocation7 + $0x30] sm:$0xff]  ;;  %v7062_v63 = vld [vmem:[#allocation7 + $0x48] sm:$0xff] }
 0xa9b   : > { %6722 = vmatmul.mubr.f32.gmra.mrb[48].mxu0 %v6320_v45  ;;  %16085 = vmatprep.subr.bf16.mxu0 %v16084_v56  ;;  %v7060_v45 = vld [vmem:[#allocation7 + $0x38] sm:$0xff]  ;;  %v7061_v56 = vld [vmem:[#allocation7 + $0x40] sm:$0xff] }
 0xa9c   : > { %16087 = vmatpush1.bf16.msra.mxu0 %v16086_v5  ;;  %6727 = vmatprep.mubr.f32.mxu0 %v6324_v4  ;;  %v16100_v12 = vpack.c.bf16 %v7060_v45, %v7059_v35  ;;  %v16104_v4 = vpack.c.bf16 %v7062_v63, %v7061_v56  ;;  %v7063_v5 = vld [vmem:[#allocation7 + $0x50] sm:$0xff] }
 0xa9d   : > { %16089 = vmatprep.subr.bf16.mxu0 %v16088_v3 }
 0xa9f   : > { %6728 = vmatmul.mubr.f32.gmra.mrb[50].mxu0 %v6323_v27  ;;  %v7064_v27 = vld [vmem:[#allocation7 + $0x58] sm:$0xff] }
 0xaa0   : > { %6733 = vmatprep.mubr.f32.mxu0 %v6327_v37  ;;  %v16108_v37 = vpack.c.bf16 %v7064_v27, %v7063_v5 }
 0xaa3   : > { %6734 = vmatmul.mubr.f32.gmra.mrb[52].mxu0 %v6326_v60  ;;  %v6589_v7 = vpop.permute.xlu1 %6588  ;;  %v7065_v60 = vld [vmem:[#allocation7 + $0x60] sm:$0xff] }
 0xaa4   : > { %6739 = vmatprep.mubr.f32.mxu0 %v6330_v9  ;;  %v7066_v9 = vld [vmem:[#allocation7 + $0x68] sm:$0xff] }
 0xaa7   : > { %6740 = vmatmul.mubr.f32.gmra.mrb[54].mxu0 %v6329_v17  ;;  %v6594_v48 = vpop.permute.xlu0 %6593  ;;  %v16112_v17 = vpack.c.bf16 %v7066_v9, %v7065_v60  ;;  %v12751_v9 = vld [vmem:[%s22303_s10 + $0x20] sm:$0xff] }
 0xaa8   : > { %6745 = vmatprep.mubr.f32.mxu0 %v6333_v21  ;;  %v7067_v21 = vld [vmem:[#allocation7 + $0x70] sm:$0xff] }
 0xaab   : > { %6746 = vmatmul.mubr.f32.gmra.mrb[56].mxu0 %v6332_v31  ;;  %v7068_v31 = vld [vmem:[#allocation7 + $0x78] sm:$0x7f] }
 0xaac   : > { %6751 = vmatprep.mubr.f32.mxu0 %v6336_v46  ;;  %v16116_v46 = vpack.c.bf16 %v7068_v31, %v7067_v21 }
 0xaaf   : > { %6752 = vmatmul.mubr.f32.gmra.mrb[58].mxu0 %v6335_v20 }
 0xab0   : > { %6757 = vmatprep.mubr.f32.mxu0 %v6339_v14 }
 0xab3   : > { %6758 = vmatmul.mubr.f32.gmra.mrb[60].mxu0 %v6338_v11 }
 0xab4   : > { %6828 = vmatprep.mubr.f32.mxu0 %v22515_v57 }
 0xab7   : > { %12734 = vmatmul.mubr.msk.f32.vlgmr.msra.gmra.mrb[46].mxu0 %vm6626_vm9, %v6319_v42 }
 0xab8   : > { %6834 = vmatprep.mubr.f32.mxu0 %v22515_v57  ;;  %16091 = vmatpush3.bf16.msra.mxu0 %v16088_v3 }
 0xab9   : > { %16093 = vmatprep.subr.bf16.mxu0 %v16092_v50 }
 0xabb   : > { %12735 = vmatmul.mubr.msk.f32.gmra.mrb[48].mxu0 %vm6626_vm9, %v6322_v51 }
 0xabc   : > { %6840 = vmatprep.mubr.f32.mxu0 %v22515_v57  ;;  %16095 = vmatpush3.bf16.msra.mxu0 %v16092_v50 }
 0xabd   : > { %16097 = vmatprep.subr.bf16.mxu0 %v16096_v25 }
 0xabf   : > { %12736 = vmatmul.mubr.msk.f32.gmra.mrb[50].mxu0 %vm6626_vm9, %v6325_v29 }
 0xac0   : > { %6846 = vmatprep.mubr.f32.mxu0 %v22515_v57  ;;  %16099 = vmatpush3.bf16.msra.mxu0 %v16096_v25 }
 0xac1   : > { %16101 = vmatprep.subr.bf16.mxu0 %v16100_v12 }
 0xac3   : > { %12737 = vmatmul.mubr.msk.f32.gmra.mrb[52].mxu0 %vm6626_vm9, %v6328_v53 }
 0xac4   : > { %6852 = vmatprep.mubr.f32.mxu0 %v22515_v57  ;;  %16103 = vmatpush3.bf16.msra.mxu0 %v16100_v12 }
 0xac5   : > { %16105 = vmatprep.subr.bf16.mxu0 %v16104_v4 }
 0xac7   : > { %12738 = vmatmul.mubr.msk.f32.gmra.mrb[54].mxu0 %vm6626_vm9, %v6331_v34 }
 0xac8   : > { %6858 = vmatprep.mubr.f32.mxu0 %v22515_v57  ;;  %16107 = vmatpush3.bf16.msra.mxu0 %v16104_v4 }
 0xac9   : > { %16109 = vmatprep.subr.bf16.mxu0 %v16108_v37 }
 0xacb   : > { %12739 = vmatmul.mubr.msk.f32.gmra.mrb[56].mxu0 %vm6626_vm9, %v6334_v1 }
 0xacc   : > { %6864 = vmatprep.mubr.f32.mxu0 %v22515_v57  ;;  %16111 = vmatpush3.bf16.msra.mxu0 %v16108_v37 }
 0xacd   : > { %16113 = vmatprep.subr.bf16.mxu0 %v16112_v17 }
 0xacf   : > { %12740 = vmatmul.mubr.msk.f32.gmra.mrb[58].mxu0 %vm6626_vm9, %v6337_v22 }
 0xad0   : > { %6870 = vmatprep.mubr.f32.mxu0 %v22515_v57  ;;  %16115 = vmatpush3.bf16.msra.mxu0 %v16112_v17  ;;  %v12752_v17 = vld [vmem:[%s22303_s10 + $0x28] sm:$0xff] }
 0xad1   : > { %16118 = vmatprep.subr.msk.bf16.mxu0 %vm16117_vm13, %v16116_v46 }
 0xad3   : > { %12741 = vmatmul.mubr.msk.f32.gmra.mrb[60].mxu0 %vm6626_vm9, %v6340_v55  ;;  %v6346_v55 = vld [vmem:[%s22301_s8 + $0x28] sm:$0xff]  ;;  %vm22565_vm9 = vmmov %vm22564_vm0 }
 0xad4   : > { %16121 = vmatpush3.bf16.msk.msra.mxu0 %vm16117_vm13, %v16116_v46  ;;  %vm22566_vm13 = vmmov %vm22564_vm0 }
 0xb8a   : > { %v6830_v15 = vpop.f32.mrb[46].mxu0 }
 0xb8b   : > { %v20671_v39 = vadd.f32 %v6830_v15, %v6589_v7  ;;  %v6832_v44 = vpop.f32.mrb[47].mxu0 }
 0xb8c   : > { %v20673_v43 = vadd.f32 %v6832_v44, %v6589_v7  ;;  %v6345_v7 = vld [vmem:[%s22301_s8 + $0x20] sm:$0xff] }
 0xb8d   : > { %v6877_v28 = vmax.f32 %v20671_v39, 0.0 }
 0xb8e   : > { %v6878_v52 = vmax.f32 %v20673_v43, 0.0  ;;  %v6836_v18 = vpop.f32.mrb[48].mxu0 }
 0xb8f   : > { %v20677_v47 = vadd.f32 %v6836_v18, %v6594_v48  ;;  %v6838_v0 = vpop.f32.mrb[49].mxu0  ;;  %6909 = vrot.lane.b32.xlu1 %v6877_v28, %s17858_s19 }
 0xb90   : > { %v20682_v10 = vadd.f32 %v6838_v0, %v6594_v48  ;;  %6911 = vrot.lane.b32.xlu0 %v6878_v52, %s17858_s19 }
 0xb91   : > { %v6879_v8 = vmax.f32 %v20677_v47, 0.0 }
 0xb92   : > { %v6880_v49 = vmax.f32 %v20682_v10, 0.0  ;;  %v20689_v38 = vpop.f32.mrb[50].mxu0  ;;  %v6348_v10 = vld [vmem:[%s22301_s8 + $0x38] sm:$0xff] }
 0xb93   : > { %v20691_v58 = vpop.f32.mrb[51].mxu0  ;;  %6913 = vrot.lane.b32.xlu1 %v6879_v8, %s17858_s19 }
 0xb94   : > { %6915 = vrot.lane.b32.xlu0 %v6880_v49, %s17858_s19 }
 0xb96   : > { %v20705_v23 = vpop.f32.mrb[52].mxu0 }
 0xb97   : > { %v20707_v16 = vpop.f32.mrb[53].mxu0  ;;  %6598 = vperm.xlu1 %17412, %v6343_v33  }
 0xb98   : > { %6603 = vperm.xlu0 %17011, %v6344_v41  }
 0xb9a   : > { %v20709_v62 = vpop.f32.mrb[54].mxu0 }
 0xb9b   : > { %v20711_v61 = vpop.f32.mrb[55].mxu0 }
 0xb9e   : > { %v20713_v6 = vpop.f32.mrb[56].mxu0 }
 0xb9f   : > { %v20715_v19 = vpop.f32.mrb[57].mxu0 }
 0xba2   : > { %v20717_v54 = vpop.f32.mrb[58].mxu0 }
 0xba3   : > { %v20719_v32 = vpop.f32.mrb[59].mxu0 }
 0xba6   : > { %v20721_v26 = vpop.f32.mrb[60].mxu0 }
 0xba7   : > { %v20723_v24 = vpop.f32.mrb[61].mxu0 }
 0xc01   : > { %v6910_v20 = vpop.permute.xlu1 %6909 }
 0xc02   : > { %v6912_v14 = vpop.permute.xlu0 %6911 }
 0xc03   : > { %v6941_v11 = vsel %vm22547_vm10, %v6910_v20, %v6912_v14  ;;  %v6966_v42 = vmax.f32 %v6878_v52, %v6912_v14  ;;  %vm22567_vm10 = vmmov %vm22564_vm0 }
 0xc04   : > { %v6965_v51 = vmax.f32 %v6877_v28, %v6941_v11 }
 0xc05   : > { %6999 = vrot.lane.b32.xlu0 %v6966_v42, %s17872_s21  ;;  %v6914_v29 = vpop.permute.xlu1 %6913  ;;  %v12753_v42 = vld [vmem:[%s22303_s10 + $0x30] sm:$0xff] }
 0xc06   : > { %v6916_v53 = vpop.permute.xlu0 %6915  ;;  %6997 = vrot.lane.b32.xlu1 %v6965_v51, %s17872_s21 }
 0xc07   : > { %v6942_v34 = vsel %vm22554_vm11, %v6914_v29, %v6916_v53  ;;  %v6968_v1 = vmax.f32 %v6880_v49, %v6916_v53  ;;  %vm22568_vm11 = vmmov %vm22564_vm0 }
 0xc08   : > { %v6967_v22 = vmax.f32 %v6879_v8, %v6942_v34  ;;  %v6347_v8 = vld [vmem:[%s22301_s8 + $0x30] sm:$0xff] }
 0xc09   : > { %7003 = vrot.lane.b32.xlu0 %v6968_v1, %s17872_s21 }
 0xc0a   : > { %7001 = vrot.lane.b32.xlu1 %v6967_v22, %s17872_s21 }
 0xc0d   : > { %6613 = vperm.xlu0 %17011, %v6346_v55  }
 0xc0e   : > { %6608 = vperm.xlu1 %17412, %v6345_v7  }
 0xc16   : > { %v6599_v15 = vpop.permute.xlu1 %6598 }
 0xc17   : > { %v16604_v39 = vadd.f32 %v20689_v38, %v6599_v15  ;;  %v16605_v44 = vadd.f32 %v20691_v58, %v6599_v15  ;;  %v6604_v43 = vpop.permute.xlu0 %6603 }
 0xc18   : > { %v16606_v52 = vadd.f32 %v20705_v23, %v6604_v43  ;;  %v16607_v18 = vadd.f32 %v20707_v16, %v6604_v43 }
 0xc19   : > { %v6881_v28 = vmax.f32 %v16604_v39, 0.0  ;;  %v6882_v48 = vmax.f32 %v16605_v44, 0.0 }
 0xc1a   : > { %v6883_v47 = vmax.f32 %v16606_v52, 0.0  ;;  %v6884_v0 = vmax.f32 %v16607_v18, 0.0 }
 0xc1b   : > { %6919 = vrot.lane.b32.xlu0 %v6882_v48, %s17858_s19  ;;  %6917 = vrot.lane.b32.xlu1 %v6881_v28, %s17858_s19 }
 0xc1f   : > { %6923 = vrot.lane.b32.xlu0 %v6884_v0, %s17858_s19  ;;  %6921 = vrot.lane.b32.xlu1 %v6883_v47, %s17858_s19 }
 0xc23   : > { %6623 = vperm.xlu0 %17011, %v6348_v10   ;;  %6618 = vperm.xlu1 %17412, %v6347_v8  }
 0xc77   : > { %v7000_v49 = vpop.permute.xlu0 %6999 }
 0xc78   : > { %v6998_v38 = vpop.permute.xlu1 %6997 }
 0xc79   : > { %v7029_v58 = vsel %vm6429_vm1, %v6998_v38, %v7000_v49 }
 0xc7a   : > { %v7045_v33 = vmax.f32 %v6965_v51, %v7029_v58 }
 0xc7b   : > { %v7004_v41 = vpop.permute.xlu0 %7003 }
 0xc7c   : > { %13839 = vmatprep.mubr.msk.f32.mxu0 %vm22555_vm2, %v7045_v33  ;;  %v7002_v23 = vpop.permute.xlu1 %7001  ;;  %vm22569_vm2 = vmmov %vm22564_vm0 }
 0xc7d   : > { %v7030_v16 = vsel %vm6429_vm1, %v7002_v23, %v7004_v41 }
 0xc7e   : > { %v7046_v59 = vmax.f32 %v6967_v22, %v7030_v16  ;;  %v7201_v16 = vld [vmem:[%s22303_s10] sm:$0xff] }
 0xc80   : > { %13840 = vmatmul.mubr.msk.f32.vlgmr.msra.gmra.mrb[62].mxu0 %vm22556_vm3, %v7046_v59  ;;  %v7202_v59 = vld [vmem:[%s22303_s10 + $0x8] sm:$0xff]  ;;  %vm12543_vm3 = vcmask 8192  }
 0xc8c   : > { %v6614_v13 = vpop.permute.xlu0 %6613 }
 0xc8d   : > { %v6609_v3 = vpop.permute.xlu1 %6608  ;;  %v16611_v5 = vadd.f32 %v20715_v19, %v6614_v13  ;;  %v17877_v19 = vmov 0.0|0.0  }
 0xc8e   : > { %v16608_v30 = vadd.f32 %v20709_v62, %v6609_v3  ;;  %v16609_v40 = vadd.f32 %v20711_v61, %v6609_v3  ;;  %v16610_v61 = vadd.f32 %v20713_v6, %v6614_v13  ;;  %v16123_v6 = vpack.c.bf16 %v12752_v17, %v12751_v9  ;;  %16122 = vmatprep.subr.bf16.mxu1 %v17877_v19  ;;  %v12783_v9 = vld [vmem:[%s22303_s10 + $0xc0] sm:$0xff]  ;;  %v12784_v17 = vld [vmem:[%s22303_s10 + $0xc8] sm:$0xff] }
 0xc8f   : > { %v6888_v60 = vmax.f32 %v16611_v5, 0.0  ;;  %16143 = vmatprep.subr.bf16.mxu0 %v17877_v19 }
 0xc90   : > { %v6885_v50 = vmax.f32 %v16608_v30, 0.0  ;;  %v6886_v2 = vmax.f32 %v16609_v40, 0.0  ;;  %v6920_v36 = vpop.permute.xlu0 %6919  ;;  %v6887_v37 = vmax.f32 %v16610_v61, 0.0  ;;  %16124 = vmatpush3.bf16.msra.mxu1 %v16123_v6  ;;  %v16130_v30 = vpack.c.bf16 %v7202_v59, %v7201_v16  ;;  %v12821_v59 = vld [vmem:[%s22303_s10 + $0x190] sm:$0xff] }
 0xc91   : > { %v6918_v25 = vpop.permute.xlu1 %6917  ;;  %v6970_v12 = vmax.f32 %v6882_v48, %v6920_v36  ;;  %16125 = vmatprep.subr.bf16.mxu1 %v17877_v19  ;;  %v16165_v6 = vpack.c.bf16 %v12784_v17, %v12783_v9  ;;  %v12844_v9 = vld [vmem:[%s22303_s10 + $0x208] sm:$0xff] }
 0xc92   : > { %v6943_v35 = vsel %vm22557_vm15, %v6918_v25, %v6920_v36  ;;  %6927 = vrot.lane.b32.xlu0 %v6886_v2, %s17858_s19  ;;  %6925 = vrot.lane.b32.xlu1 %v6885_v50, %s17858_s19  ;;  %v12759_v25 = vld [vmem:[%s22303_s10 + $0x40] sm:$0xff] }
 0xc93   : > { %v6969_v45 = vmax.f32 %v6881_v28, %v6943_v35  ;;  %v12760_v35 = vld [vmem:[%s22303_s10 + $0x48] sm:$0xff] }
 0xc94   : > { %v6924_v56 = vpop.permute.xlu0 %6923 }
 0xc95   : > { %v6922_v63 = vpop.permute.xlu1 %6921  ;;  %v6972_v27 = vmax.f32 %v6884_v0, %v6924_v56 }
 0xc96   : > { %v6944_v4 = vsel %vm22558_vm14, %v6922_v63, %v6924_v56  ;;  %7007 = vrot.lane.b32.xlu0 %v6970_v12, %s17872_s21  ;;  %7005 = vrot.lane.b32.xlu1 %v6969_v45, %s17872_s21  ;;  %v12761_v12 = vld [vmem:[%s22303_s10 + $0x50] sm:$0xff]  ;;  %v12762_v56 = vld [vmem:[%s22303_s10 + $0x58] sm:$0xf] }
 0xc97   : > { %v6971_v62 = vmax.f32 %v6883_v47, %v6944_v4  ;;  %v16140_v63 = vpack.c.bf16 %v12762_v56, %v12761_v12  ;;  %v12771_v4 = vld [vmem:[%s22303_s10 + $0x80] sm:$0xff]  ;;  %v12832_v12 = vld [vmem:[%s22303_s10 + $0x1c8] sm:$0xff] }
 0xc9a   : > { %7011 = vrot.lane.b32.xlu0 %v6972_v27, %s17872_s21  ;;  %7009 = vrot.lane.b32.xlu1 %v6971_v62, %s17872_s21  ;;  %v12773_v27 = vld [vmem:[%s22303_s10 + $0x90] sm:$0xff] }
 0xc9e   : > { %6931 = vrot.lane.b32.xlu0 %v6888_v60, %s17858_s19  ;;  %6929 = vrot.lane.b32.xlu1 %v6887_v37, %s17858_s19 }
 0xca2   : > { %v6619_v21 = vpop.permute.xlu1 %6618  ;;  %v6624_v51 = vpop.permute.xlu0 %6623 }
 0xca3   : > { %v16612_v31 = vadd.f32 %v20717_v54, %v6619_v21  ;;  %v16613_v46 = vadd.f32 %v20719_v32, %v6619_v21  ;;  %v12754_v54 = vld [vmem:[%s22303_s10 + $0x38] sm:$0xf]  ;;  %v20820_v47 = vadd.f32 %v20723_v24, %v6624_v51  ;;  %v20824_v8 = vadd.f32 %v20721_v26, %v6624_v51  ;;  %v12797_v51 = vld [vmem:[%s22303_s10 + $0x110] sm:$0xff] }
 0xca4   : > { %v16126_v32 = vpack.c.bf16 %v12754_v54, %v12753_v42  ;;  %v12796_v42 = vld [vmem:[%s22303_s10 + $0x108] sm:$0xff] }
 0xca5   : > { %v6889_v20 = vmax.f32 %v16612_v31, 0.0  ;;  %v6890_v14 = vmax.f32 %v16613_v46, 0.0  ;;  %v6892_v38 = vmax.f32 %v20820_v47, 0.0  ;;  %v6891_v58 = vmax.f32 %v20824_v8, 0.0  ;;  %v12785_v31 = vld [vmem:[%s22303_s10 + $0xd0] sm:$0xff] }
 0xca6   : > { %16128 = vmatpush3.bf16.msk.msra.mxu1 %vm20794_vm6, %v16126_v32  ;;  %v12786_v46 = vld [vmem:[%s22303_s10 + $0xd8] sm:$0xf]  ;;  %v12833_v47 = vld [vmem:[%s22303_s10 + $0x1d0] sm:$0xff] }
 0xca7   : > { %6935 = vrot.lane.b32.xlu0 %v6890_v14, %s17858_s19  ;;  %6933 = vrot.lane.b32.xlu1 %v6889_v20, %s17858_s19  ;;  %v12834_v8 = vld [vmem:[%s22303_s10 + $0x1d8] sm:$0xf] }
 0xca8   : > { %16129 = vmatprep.subr.bf16.mxu1 %v17877_v19 }
 0xd04   : > { %v6928_v29 = vpop.permute.xlu0 %6927  ;;  %v6926_v53 = vpop.permute.xlu1 %6925 }
 0xd05   : > { %v6974_v34 = vmax.f32 %v6886_v2, %v6928_v29  ;;  %v6945_v1 = vsel %vm22561_vm8, %v6926_v53, %v6928_v29  ;;  %v7204_v2 = vld [vmem:[%s22303_s10 + $0x18] sm:$0xf] }
 0xd06   : > { %v20810_v22 = vmax.f32 %v6885_v50, %v6945_v1  ;;  %v7203_v50 = vld [vmem:[%s22303_s10 + $0x10] sm:$0xff]  ;;  %v12798_v29 = vld [vmem:[%s22303_s10 + $0x118] sm:$0xf]  ;;  %v12807_v1 = vld [vmem:[%s22303_s10 + $0x140] sm:$0xff] }
 0xd07   : > { %7015 = vrot.lane.b32.xlu0 %v6974_v34, %s17872_s21  ;;  %v16133_v36 = vpack.c.bf16 %v7204_v2, %v7203_v50  ;;  %v16182_v53 = vpack.c.bf16 %v12798_v29, %v12797_v51 }
 0xd08   : > { %v7008_v55 = vpop.permute.xlu0 %7007  ;;  %7013 = vrot.lane.b32.xlu1 %v20810_v22, %s17872_s21  ;;  %v7006_v7 = vpop.permute.xlu1 %7005 }
 0xd09   : > { %v7031_v15 = vsel %vm6429_vm1, %v7006_v7, %v7008_v55  ;;  %v12808_v55 = vld [vmem:[%s22303_s10 + $0x148] sm:$0xff] }
 0xd0a   : > { %v7047_v39 = vmax.f32 %v6969_v45, %v7031_v15  ;;  %v16137_v45 = vpack.c.bf16 %v12760_v35, %v12759_v25 }
 0xd0c   : > { %v7012_v44 = vpop.permute.xlu0 %7011  ;;  %13842 = vmatprep.mubr.msk.f32.mxu0 %vm22562_vm4, %v7047_v39  ;;  %v7010_v43 = vpop.permute.xlu1 %7009 }
 0xd0d   : > { %v7032_v28 = vsel %vm6429_vm1, %v7010_v43, %v7012_v44  ;;  %v16193_v44 = vpack.c.bf16 %v12808_v55, %v12807_v1  ;;  %v12809_v43 = vld [vmem:[%s22303_s10 + $0x150] sm:$0xff] }
 0xd0e   : > { %v7048_v48 = vmax.f32 %v6971_v62, %v7032_v28  ;;  %v12772_v62 = vld [vmem:[%s22303_s10 + $0x88] sm:$0xff]  ;;  %v12810_v28 = vld [vmem:[%s22303_s10 + $0x158] sm:$0xf] }
 0xd0f   : > { %v16151_v61 = vpack.c.bf16 %v12772_v62, %v12771_v4 }
 0xd10   : > { %v6932_v52 = vpop.permute.xlu0 %6931  ;;  %13843 = vmatmul.mubr.msk.f32.gmra.mrb[64].mxu0 %vm22563_vm7, %v7048_v48  ;;  %v6930_v18 = vpop.permute.xlu1 %6929  ;;  %v12766_v48 = vld [vmem:[%s22303_s10 + $0x68] sm:$0xff] }
 0xd11   : > { %v6976_v0 = vmax.f32 %v6888_v60, %v6932_v52  ;;  %v6946_v10 = vsel %vm22564_vm0, %v6930_v18, %v6932_v52  ;;  %v16196_v18 = vpack.c.bf16 %v12810_v28, %v12809_v43  ;;  %v12880_v43 = vld [vmem:[%s22303_s10 + $0x2c8] sm:$0xff] }
 0xd12   : > { %v20826_v49 = vmax.f32 %v6887_v37, %v6946_v10  ;;  %v12774_v37 = vld [vmem:[%s22303_s10 + $0x98] sm:$0xf]  ;;  %v12820_v10 = vld [vmem:[%s22303_s10 + $0x188] sm:$0xff] }
 0xd13   : > { %7019 = vrot.lane.b32.xlu0 %v6976_v0, %s17872_s21  ;;  %v16154_v60 = vpack.c.bf16 %v12774_v37, %v12773_v27  ;;  %v12819_v0 = vld [vmem:[%s22303_s10 + $0x180] sm:$0xff]  ;;  %v16224_v27 = vpack.c.bf16 %v12834_v8, %v12833_v47  ;;  %v12916_v8 = vld [vmem:[%s22303_s10 + $0x388] sm:$0xff] }
 0xd14   : > { %7017 = vrot.lane.b32.xlu1 %v20826_v49, %s17872_s21  ;;  %v12915_v47 = vld [vmem:[%s22303_s10 + $0x380] sm:$0xff] }
 0xd17   : > { %6939 = vrot.lane.b32.xlu0 %v6892_v38, %s17858_s19 }
 0xd18   : > { %6937 = vrot.lane.b32.xlu1 %v6891_v58, %s17858_s19  ;;  %s12558_s19 = sshll.u32 %s526_s27, 4  ;;  %s22253_s19 = int_to_ptr.vmem [resolvable:$true] %s12558_s19 }
 0xd19   : > { %v6936_v26 = vpop.permute.xlu0 %6935  ;;  %v6934_v24 = vpop.permute.xlu1 %6933  ;;  %p17776_p6 = scmp.lt.s32.totalorder %s22253_s19, %s17774_s12 }
 0xd1a   : > { %v6978_v33 = vmax.f32 %v6890_v14, %v6936_v26  ;;  %v6947_v41 = vsel %vm22565_vm9, %v6934_v24, %v6936_v26  ;;  %v12795_v14 = vld [vmem:[%s22303_s10 + $0x100] sm:$0xff]  ;;  %v16207_v26 = vpack.c.bf16 %v12820_v10, %v12819_v0  ;;  %v12767_v24 = vld [vmem:[%s22303_s10 + $0x70] sm:$0xff]  ;;  %v12892_v10 = vld [vmem:[%s22303_s10 + $0x308] sm:$0xff] }
 0xd1b   : > { %v20840_v23 = vmax.f32 %v6889_v20, %v6947_v41  ;;  %v16168_v20 = vpack.c.bf16 %v12786_v46, %v12785_v31  ;;  %v16179_v54 = vpack.c.bf16 %v12796_v42, %v12795_v14  ;;  %v12855_v46 = vld [vmem:[%s22303_s10 + $0x240] sm:$0xff] }
 0xd1c   : > { %7023 = vrot.lane.b32.xlu0 %v6978_v33, %s17872_s21  ;;  %v12768_v33 = vld [vmem:[%s22303_s10 + $0x78] sm:$0xf]  ;;  %v12891_v0 = vld [vmem:[%s22303_s10 + $0x300] sm:$0xff] }
 0xd1d   : > { %7021 = vrot.lane.b32.xlu1 %v20840_v23, %s17872_s21 }
 0xd53   : > { %v20851_v13 = vpop.f32.mrb[62].mxu0 }
 0xd54   : > { %v20853_v3 = vpop.f32.mrb[63].mxu0  ;;  %v8024_v16 = vrot.slane %v20851_v13, 2 }
 0xd55   : > { %v7211_v40 = vrot.slane %v20853_v3, 1  ;;  %v7368_v5 = vrot.slane %v20853_v3, 2  ;;  %v7532_v21 = vrot.slane %v20853_v3, 4  ;;  %v7696_v32 = vrot.slane %v20853_v3, 6 }
 0xd57   : > { %13860 = vmatmul.mubr.msk.f32.vlgmr.msra.gmra.mrb[50].mxu1 %vm7212_vm5, %v7211_v40  ;;  %v16147_v40 = vpack.c.bf16 %v12768_v33, %v12767_v24  ;;  %v12893_v33 = vld [vmem:[%s22303_s10 + $0x310] sm:$0xff] }
 0xd58   : > { %16131 = vmatpush3.bf16.msra.mxu1 %v16130_v30  ;;  %13870 = vmatprep.mubr.msk.f32.mxu1 %vm17878_vm12, %v22515_v57  ;;  %v12822_v30 = vld [vmem:[%s22303_s10 + $0x198] sm:$0xf] }
 0xd59   : > { %16132 = vmatprep.subr.bf16.mxu1 %v17877_v19  ;;  %v16210_v25 = vpack.c.bf16 %v12822_v30, %v12821_v59  ;;  %v12903_v59 = vld [vmem:[%s22303_s10 + $0x340] sm:$0xff]  ;;  %v12904_v30 = vld [vmem:[%s22303_s10 + $0x348] sm:$0xff] }
 0xd5c   : > { %16135 = vmatpush3.bf16.msk.msra.mxu1 %vm20794_vm6, %v16133_v36 }
 0xd5d   : > { %16136 = vmatprep.subr.bf16.mxu1 %v17877_v19 }
 0xd5f   : > { %13871 = vmatmul.mubr.msk.f32.vlgmr.msra.gmra.mrb[52].mxu1 %vm7212_vm5, %v20853_v3 }
 0xd60   : > { %16138 = vmatpush3.bf16.msra.mxu1 %v16137_v45  ;;  %13881 = vmatprep.mubr.msk.f32.mxu1 %vm17878_vm12, %v22515_v57  ;;  %v12831_v45 = vld [vmem:[%s22303_s10 + $0x1c0] sm:$0xff] }
 0xd61   : > { %16139 = vmatprep.subr.bf16.mxu1 %v17877_v19  ;;  %v16221_v62 = vpack.c.bf16 %v12832_v12, %v12831_v45  ;;  %v12778_v45 = vld [vmem:[%s22303_s10 + $0xa8] sm:$0xff]  ;;  %v12905_v12 = vld [vmem:[%s22303_s10 + $0x350] sm:$0xff] }
 0xd64   : > { %16142 = vmatpush3.bf16.msk.msra.mxu1 %vm20794_vm6, %v16140_v63 }
 0xd65   : > { %16150 = vmatprep.subr.bf16.mxu1 %v17877_v19 }
 0xd67   : > { %13882 = vmatmul.mubr.msk.f32.vlgmr.msra.gmra.mrb[54].mxu1 %vm7212_vm5, %v7368_v5 }
 0xd68   : > { %16152 = vmatpush3.bf16.msra.mxu1 %v16151_v61  ;;  %13903 = vmatprep.mubr.msk.f32.mxu1 %vm17878_vm12, %v22515_v57  ;;  %v8188_v61 = vrot.slane %v20851_v13, 4 }
 0xd69   : > { %16153 = vmatprep.subr.bf16.mxu1 %v17877_v19 }
 0xd6c   : > { %16156 = vmatpush3.bf16.msk.msra.mxu1 %vm20794_vm6, %v16154_v60  ;;  %v12843_v60 = vld [vmem:[%s22303_s10 + $0x200] sm:$0xff] }
 0xd6d   : > { %16164 = vmatprep.subr.bf16.mxu1 %v17877_v19  ;;  %v16235_v17 = vpack.c.bf16 %v12844_v9, %v12843_v60  ;;  %v12917_v60 = vld [vmem:[%s22303_s10 + $0x390] sm:$0xff]  ;;  %v12918_v9 = vld [vmem:[%s22303_s10 + $0x398] sm:$0xf] }
 0xd6f   : > { %13904 = vmatmul.mubr.msk.f32.vlgmr.msra.gmra.mrb[56].mxu1 %vm7212_vm5, %v7532_v21  ;;  %v12846_v21 = vld [vmem:[%s22303_s10 + $0x218] sm:$0xf] }
 0xd70   : > { %16166 = vmatpush3.bf16.msra.mxu1 %v16165_v6  ;;  %13925 = vmatprep.mubr.msk.f32.mxu1 %vm17878_vm12, %v22515_v57  ;;  %v8352_v6 = vrot.slane %v20851_v13, 6 }
 0xd71   : > { %16167 = vmatprep.subr.bf16.mxu1 %v17877_v19 }
 0xd74   : > { %16170 = vmatpush3.bf16.msk.msra.mxu1 %vm20794_vm6, %v16168_v20  ;;  %v12856_v20 = vld [vmem:[%s22303_s10 + $0x248] sm:$0xff] }
 0xd75   : > { %16178 = vmatprep.subr.bf16.mxu1 %v17877_v19  ;;  %v16249_v14 = vpack.c.bf16 %v12856_v20, %v12855_v46  ;;  %v12927_v46 = vld [vmem:[%s22303_s10 + $0x3c0] sm:$0xff]  ;;  %v12928_v20 = vld [vmem:[%s22303_s10 + $0x3c8] sm:$0xff] }
 0xd77   : > { %13926 = vmatmul.mubr.msk.f32.vlgmr.msra.gmra.mrb[58].mxu1 %vm7212_vm5, %v7696_v32  ;;  %v12858_v32 = vld [vmem:[%s22303_s10 + $0x258] sm:$0xf] }
 0xd78   : > { %16180 = vmatpush3.bf16.msra.mxu1 %v16179_v54  ;;  %13947 = vmatprep.mubr.msk.f32.mxu1 %vm17878_vm12, %v22515_v57  ;;  %v12857_v54 = vld [vmem:[%s22303_s10 + $0x250] sm:$0xff] }
 0xd79   : > { %v7016_v34 = vpop.permute.xlu0 %7015  ;;  %16181 = vmatprep.subr.bf16.mxu1 %v17877_v19  ;;  %v16252_v29 = vpack.c.bf16 %v12858_v32, %v12857_v54  ;;  %v16333_v54 = vpack.c.bf16 %v12928_v20, %v12927_v46  ;;  %v12801_v32 = vld [vmem:[%s22303_s10 + $0x120] sm:$0xff] }
 0xd7a   : > { %v7014_v7 = vpop.permute.xlu1 %7013 }
 0xd7b   : > { %v7033_v15 = vsel %vm6429_vm1, %v7014_v7, %v7016_v34  ;;  %v12868_v34 = vld [vmem:[%s22303_s10 + $0x288] sm:$0xff]  ;;  %v12869_v7 = vld [vmem:[%s22303_s10 + $0x290] sm:$0xff] }
 0xd7c   : > { %v7049_v39 = vmax.f32 %v20810_v22, %v7033_v15  ;;  %16184 = vmatpush3.bf16.msk.msra.mxu1 %vm20794_vm6, %v16182_v53  ;;  %v12765_v22 = vld [vmem:[%s22303_s10 + $0x60] sm:$0xff]  ;;  %v12870_v15 = vld [vmem:[%s22303_s10 + $0x298] sm:$0xf] }
 0xd7d   : > { %16192 = vmatprep.subr.bf16.mxu1 %v17877_v19  ;;  %v16144_v52 = vpack.c.bf16 %v12766_v48, %v12765_v22  ;;  %v12867_v53 = vld [vmem:[%s22303_s10 + $0x280] sm:$0xff]  ;;  %v12881_v48 = vld [vmem:[%s22303_s10 + $0x2d0] sm:$0xff] }
 0xd7e   : > { %13845 = vmatprep.mubr.msk.f32.mxu0 %vm22566_vm13, %v7049_v39  ;;  %v16263_v1 = vpack.c.bf16 %v12868_v34, %v12867_v53  ;;  %v16266_v39 = vpack.c.bf16 %v12870_v15, %v12869_v7  ;;  %v12929_v34 = vld [vmem:[%s22303_s10 + $0x3d0] sm:$0xff]  ;;  %v7778_v7 = vrot.slane %v20853_v3, 7 }
 0xd7f   : > { %13948 = vmatmul.mubr.msk.f32.vlgmr.msra.gmra.mrb[60].mxu1 %vm7212_vm5, %v20851_v13  ;;  %16145 = vmatpush3.bf16.msra.mxu0 %v16144_v52  ;;  %v12882_v52 = vld [vmem:[%s22303_s10 + $0x2d8] sm:$0xf] }
 0xd80   : > { %16194 = vmatpush3.bf16.msra.mxu1 %v16193_v44  ;;  %13969 = vmatprep.mubr.msk.f32.mxu1 %vm17878_vm12, %v22515_v57  ;;  %v12879_v44 = vld [vmem:[%s22303_s10 + $0x2c0] sm:$0xff] }
 0xd81   : > { %16195 = vmatprep.subr.bf16.mxu1 %v17877_v19  ;;  %16146 = vmatprep.subr.bf16.mxu0 %v17877_v19  ;;  %v16277_v28 = vpack.c.bf16 %v12880_v43, %v12879_v44  ;;  %v12804_v44 = vld [vmem:[%s22303_s10 + $0x138] sm:$0xf]  ;;  %v12940_v43 = vld [vmem:[%s22303_s10 + $0x408] sm:$0xff] }
 0xd83   : > { %16149 = vmatpush3.bf16.msk.msra.mxu0 %vm20794_vm6, %v16147_v40 }
 0xd84   : > { %16198 = vmatpush3.bf16.msk.msra.mxu1 %vm20794_vm6, %v16196_v18  ;;  %16157 = vmatprep.subr.bf16.mxu0 %v17877_v19  ;;  %v16280_v18 = vpack.c.bf16 %v12882_v52, %v12881_v48  ;;  %v12814_v48 = vld [vmem:[%s22303_s10 + $0x168] sm:$0xff] }
 0xd85   : > { %v7020_v41 = vpop.permute.xlu0 %7019  ;;  %16206 = vmatprep.subr.bf16.mxu1 %v17877_v19 }
 0xd86   : > { %v7018_v50 = vpop.permute.xlu1 %7017 }
 0xd87   : > { %13970 = vmatmul.mubr.msk.f32.vlgmr.msra.gmra.mrb[62].mxu1 %vm7212_vm5, %v8024_v16  ;;  %v7034_v2 = vsel %vm6429_vm1, %v7018_v50, %v7020_v41  ;;  %v12894_v41 = vld [vmem:[%s22303_s10 + $0x318] sm:$0xf] }
 0xd88   : > { %v7050_v36 = vmax.f32 %v20826_v49, %v7034_v2  ;;  %16208 = vmatpush3.bf16.msra.mxu1 %v16207_v26  ;;  %13991 = vmatprep.mubr.msk.f32.mxu1 %vm17878_vm12, %v22515_v57  ;;  %v16291_v26 = vpack.c.bf16 %v12892_v10, %v12891_v0  ;;  %v16294_v16 = vpack.c.bf16 %v12894_v41, %v12893_v33  ;;  %v12941_v0 = vld [vmem:[%s22303_s10 + $0x410] sm:$0xff]  ;;  %v12942_v10 = vld [vmem:[%s22303_s10 + $0x418] sm:$0xf] }
 0xd89   : > { %v6940_v35 = vpop.permute.xlu0 %6939  ;;  %16209 = vmatprep.subr.bf16.mxu1 %v17877_v19  ;;  %v12815_v33 = vld [vmem:[%s22303_s10 + $0x170] sm:$0xff]  ;;  %v12816_v41 = vld [vmem:[%s22303_s10 + $0x178] sm:$0xf] }
 0xd8a   : > { %v6980_v49 = vmax.f32 %v6892_v38, %v6940_v35  ;;  %13846 = vmatmul.mubr.msk.f32.gmra.mrb[66].mxu0 %vm22567_vm10, %v7050_v36  ;;  %v6938_v56 = vpop.permute.xlu1 %6937 }
 0xd8b   : > { %v6948_v63 = vsel %vm22568_vm11, %v6938_v56, %v6940_v35  ;;  %v12777_v35 = vld [vmem:[%s22303_s10 + $0xa0] sm:$0xff] }
 0xd8c   : > { %v21019_v4 = vmax.f32 %v6891_v58, %v6948_v63  ;;  %16212 = vmatpush3.bf16.msk.msra.mxu1 %vm20794_vm6, %v16210_v25  ;;  %7027 = vrot.lane.b32.xlu0 %v6980_v49, %s17872_s21  ;;  %v16305_v25 = vpack.c.bf16 %v12904_v30, %v12903_v59  ;;  %v12906_v49 = vld [vmem:[%s22303_s10 + $0x358] sm:$0xf]  ;;  %v16158_v56 = vpack.c.bf16 %v12778_v45, %v12777_v35  ;;  %v7450_v63 = vrot.slane %v20853_v3, 3  ;;  %v12825_v30 = vld [vmem:[%s22303_s10 + $0x1a0] sm:$0xff] }
 0xd8d   : > { %16220 = vmatprep.subr.bf16.mxu1 %v17877_v19  ;;  %v16203_v59 = vpack.c.bf16 %v12816_v41, %v12815_v33  ;;  %v12897_v33 = vld [vmem:[%s22303_s10 + $0x320] sm:$0xff]  ;;  %v12898_v41 = vld [vmem:[%s22303_s10 + $0x328] sm:$0xff] }
 0xd8e   : > { %v7024_v38 = vpop.permute.xlu0 %7023  ;;  %7025 = vrot.lane.b32.xlu1 %v21019_v4, %s17872_s21  ;;  %s17769_s21 = scalar_lea.vmem %s22253_s19, 16 }
 0xd8f   : > { %13992 = vmatmul.mubr.msk.f32.vlgmr.msra.gmra.mrb[64].mxu1 %vm7212_vm5, %v8188_v61  ;;  %v7022_v58 = vpop.permute.xlu1 %7021  ;;  %v12780_v61 = vld [vmem:[%s22303_s10 + $0xb8] sm:$0xf]  ;;  %p17770_p8 = scmp.ne.s32.totalorder %s22253_s19, %s17769_s21  ;;  %p17777_p9 = scmp.lt.s32.totalorder %s17775_s14, %s17769_s21 }
 0xd90   : > { %16222 = vmatpush3.bf16.msra.mxu1 %v16221_v62  ;;  %v7035_v5 = vsel %vm6429_vm1, %v7022_v58, %v7024_v38  ;;  %14013 = vmatprep.mubr.msk.f32.mxu1 %vm17878_vm12, %v22515_v57  ;;  %v12779_v62 = vld [vmem:[%s22303_s10 + $0xb0] sm:$0xff]  ;;  %v16319_v58 = vpack.c.bf16 %v12916_v8, %v12915_v47 }
 0xd91   : > { %v7051_v37 = vmax.f32 %v20840_v23, %v7035_v5  ;;  %16223 = vmatprep.subr.bf16.mxu1 %v17877_v19  ;;  %v12845_v23 = vld [vmem:[%s22303_s10 + $0x210] sm:$0xff]  ;;  %v16161_v38 = vpack.c.bf16 %v12780_v61, %v12779_v62  ;;  %v12789_v5 = vld [vmem:[%s22303_s10 + $0xe0] sm:$0xff]  ;;  %v12840_v61 = vld [vmem:[%s22303_s10 + $0x1f8] sm:$0xf]  ;;  %p17771_p13 = pnand %p17770_p8, %p22576_p11  ;;  %p17778_p5 = por %p17777_p9, %p17776_p6 }
 0xd92   : > { %v16238_v31 = vpack.c.bf16 %v12846_v21, %v12845_v23  ;;  %v16322_v23 = vpack.c.bf16 %v12918_v9, %v12917_v60  ;;  %v12791_v21 = vld [vmem:[%s22303_s10 + $0xf0] sm:$0xff]  ;;  %v8434_v60 = vrot.slane %v20851_v13, 7 }
 0xd93   : > { %13848 = vmatprep.mubr.msk.f32.mxu0 %vm22569_vm2, %v7051_v37  ;;  %v12839_v62 = vld [vmem:[%s22303_s10 + $0x1f0] sm:$0xff]  ;;  %p17772_p1 = pneg %p17771_p13 }
 0xd94   : > { %16226 = vmatpush3.bf16.msk.msra.mxu1 %vm20794_vm6, %v16224_v27  ;;  %v12790_v27 = vld [vmem:[%s22303_s10 + $0xe8] sm:$0xff]  ;;  %v16231_v47 = vpack.c.bf16 %v12840_v61, %v12839_v62  ;;  %v12851_v9 = vld [vmem:[%s22303_s10 + $0x230] sm:$0xff]  ;;  %v12954_v62 = vld [vmem:[%s22303_s10 + $0x458] sm:$0xf] }
 0xd95   : > { %16234 = vmatprep.subr.bf16.mxu1 %v17877_v19  ;;  %p17779_p10 = pnand %p17778_p5, %p17772_p1 }
 0xd97   : > { %14014 = vmatmul.mubr.msk.f32.vlgmr.msra.gmra.mrb[66].mxu1 %vm7212_vm5, %v8352_v6  ;;  %v7614_v6 = vrot.slane %v20853_v3, 5  ;;  %v12939_v3 = vld [vmem:[%s22303_s10 + $0x400] sm:$0xff] }
 0xd98   : > { %16236 = vmatpush3.bf16.msra.mxu1 %v16235_v17  ;;  %14035 = vmatprep.mubr.msk.f32.mxu1 %vm17878_vm12, %v22515_v57  ;;  %v16172_v17 = vpack.c.bf16 %v12790_v27, %v12789_v5  ;;  %v16347_v52 = vpack.c.bf16 %v12940_v43, %v12939_v3 }
 0xd99   : > { %16237 = vmatprep.subr.bf16.mxu1 %v17877_v19 }
 0xd9c   : > { %16240 = vmatpush3.bf16.msk.msra.mxu1 %vm20794_vm6, %v16238_v31  ;;  %v12792_v31 = vld [vmem:[%s22303_s10 + $0xf8] sm:$0xf] }
 0xd9d   : > { %16248 = vmatprep.subr.bf16.mxu1 %v17877_v19 }
 0xde3   : > { %v21070_v42 = vpop.f32.mrb[64].mxu0 }
 0xde4   : > { %v21078_v51 = vpop.f32.mrb[65].mxu0  ;;  %v9336_v37 = vrot.slane %v21070_v42, 2  ;;  %v9500_v53 = vrot.slane %v21070_v42, 4 }
 0xde5   : > { %14036 = vmatmul.mubr.msk.f32.vlgmr.msra.gmra.mrb[68].mxu1 %vm7212_vm5, %v21078_v51  ;;  %v8680_v55 = vrot.slane %v21078_v51, 2  ;;  %v8844_v22 = vrot.slane %v21078_v51, 4  ;;  %v9008_v24 = vrot.slane %v21078_v51, 6 }
 0xde6   : > { %16250 = vmatpush3.bf16.msra.mxu1 %v16249_v14  ;;  %14057 = vmatprep.mubr.msk.f32.mxu1 %vm17878_vm12, %v22515_v57  ;;  %v16175_v14 = vpack.c.bf16 %v12792_v31, %v12791_v21  ;;  %v12862_v21 = vld [vmem:[%s22303_s10 + $0x268] sm:$0xff] }
 0xde7   : > { %16251 = vmatprep.subr.bf16.mxu1 %v17877_v19 }
 0xdea   : > { %16254 = vmatpush3.bf16.msk.msra.mxu1 %vm20794_vm6, %v16252_v29  ;;  %v12802_v29 = vld [vmem:[%s22303_s10 + $0x128] sm:$0xff] }
 0xdeb   : > { %16262 = vmatprep.subr.bf16.mxu1 %v17877_v19 }
 0xded   : > { %14058 = vmatmul.mubr.msk.f32.vlgmr.msra.gmra.mrb[70].mxu1 %vm7212_vm5, %v8680_v55  ;;  %v16186_v55 = vpack.c.bf16 %v12802_v29, %v12801_v32  ;;  %v12864_v32 = vld [vmem:[%s22303_s10 + $0x278] sm:$0xf] }
 0xdee   : > { %16264 = vmatpush3.bf16.msra.mxu1 %v16263_v1  ;;  %14079 = vmatprep.mubr.msk.f32.mxu1 %vm17878_vm12, %v22515_v57  ;;  %v12930_v1 = vld [vmem:[%s22303_s10 + $0x3d8] sm:$0xf] }
 0xdef   : > { %16265 = vmatprep.subr.bf16.mxu1 %v17877_v19  ;;  %v16336_v15 = vpack.c.bf16 %v12930_v1, %v12929_v34  ;;  %v12873_v34 = vld [vmem:[%s22303_s10 + $0x2a0] sm:$0xff]  ;;  %v12874_v1 = vld [vmem:[%s22303_s10 + $0x2a8] sm:$0xff] }
 0xdf2   : > { %16268 = vmatpush3.bf16.msk.msra.mxu1 %vm20794_vm6, %v16266_v39  ;;  %v12803_v39 = vld [vmem:[%s22303_s10 + $0x130] sm:$0xff] }
 0xdf3   : > { %16276 = vmatprep.subr.bf16.mxu1 %v17877_v19 }
 0xdf5   : > { %14080 = vmatmul.mubr.msk.f32.vlgmr.msra.gmra.mrb[72].mxu1 %vm7212_vm5, %v8844_v22  ;;  %v12813_v22 = vld [vmem:[%s22303_s10 + $0x160] sm:$0xff] }
 0xdf6   : > { %16278 = vmatpush3.bf16.msra.mxu1 %v16277_v28  ;;  %14101 = vmatprep.mubr.msk.f32.mxu1 %vm17878_vm12, %v22515_v57  ;;  %v16189_v28 = vpack.c.bf16 %v12804_v44, %v12803_v39  ;;  %v12875_v39 = vld [vmem:[%s22303_s10 + $0x2b0] sm:$0xff]  ;;  %v12876_v44 = vld [vmem:[%s22303_s10 + $0x2b8] sm:$0xf] }
 0xdf7   : > { %16279 = vmatprep.subr.bf16.mxu1 %v17877_v19  ;;  %v16273_v3 = vpack.c.bf16 %v12876_v44, %v12875_v39  ;;  %v12934_v39 = vld [vmem:[%s22303_s10 + $0x3e8] sm:$0xff] }
 0xdfa   : > { %16282 = vmatpush3.bf16.msk.msra.mxu1 %vm20794_vm6, %v16280_v18  ;;  %v9664_v18 = vrot.slane %v21070_v42, 6 }
 0xdfb   : > { %16290 = vmatprep.subr.bf16.mxu1 %v17877_v19 }
 0xdfd   : > { %14102 = vmatmul.mubr.msk.f32.vlgmr.msra.gmra.mrb[74].mxu1 %vm7212_vm5, %v9008_v24  ;;  %v7942_v24 = vrot.slane %v20851_v13, 1 }
 0xdfe   : > { %16292 = vmatpush3.bf16.msra.mxu1 %v16291_v26  ;;  %14123 = vmatprep.mubr.msk.f32.mxu1 %vm17878_vm12, %v22515_v57  ;;  %v7028_v40 = vpop.permute.xlu0 %7027  ;;  %v16200_v26 = vpack.c.bf16 %v12814_v48, %v12813_v22  ;;  %v12886_v22 = vld [vmem:[%s22303_s10 + $0x2e8] sm:$0xff] }
 0xdff   : > { %16293 = vmatprep.subr.bf16.mxu1 %v17877_v19 }
 0xe00   : > { %v7026_v50 = vpop.permute.xlu1 %7025 }
 0xe01   : > { %v7036_v2 = vsel %vm6429_vm1, %v7026_v50, %v7028_v40  ;;  %vm22570_vm1 = vmmov %vm22564_vm0  ;;  %v12826_v40 = vld [vmem:[%s22303_s10 + $0x1a8] sm:$0xff] }
 0xe02   : > { %v7052_v36 = vmax.f32 %v21019_v4, %v7036_v2  ;;  %16296 = vmatpush3.bf16.msk.msra.mxu1 %vm20794_vm6, %v16294_v16  ;;  %v16308_v4 = vpack.c.bf16 %v12906_v49, %v12905_v12  ;;  %v16350_v16 = vpack.c.bf16 %v12942_v10, %v12941_v0  ;;  %v16214_v50 = vpack.c.bf16 %v12826_v40, %v12825_v30  ;;  %v12837_v12 = vld [vmem:[%s22303_s10 + $0x1e0] sm:$0xff]  ;;  %v12838_v49 = vld [vmem:[%s22303_s10 + $0x1e8] sm:$0xff]  ;;  %v12887_v0 = vld [vmem:[%s22303_s10 + $0x2f0] sm:$0xff] }
 0xe03   : > { %16304 = vmatprep.subr.bf16.mxu1 %v17877_v19  ;;  %v8106_v2 = vrot.slane %v20851_v13, 3  ;;  %v12888_v10 = vld [vmem:[%s22303_s10 + $0x2f8] sm:$0xf]  ;;  %v9090_v30 = vrot.slane %v21078_v51, 7  ;;  %v12899_v40 = vld [vmem:[%s22303_s10 + $0x330] sm:$0xff] }
 0xe04   : > { %13849 = vmatmul.mubr.msk.f32.gmra.mrb[68].mxu0 %vm22570_vm1, %v7052_v36  ;;  %v12827_v36 = vld [vmem:[%s22303_s10 + $0x1b0] sm:$0xff] }
 0xe05   : > { %14124 = vmatmul.mubr.msk.f32.vlgmr.msra.gmra.mrb[76].mxu1 %vm7212_vm5, %v21070_v42  ;;  %13892 = vmatprep.mubr.msk.f32.mxu0 %vm17878_vm12, %v22515_v57 }
 0xe06   : > { %16306 = vmatpush3.bf16.msra.mxu1 %v16305_v25  ;;  %14145 = vmatprep.mubr.msk.f32.mxu1 %vm17878_vm12, %v22515_v57  ;;  %v12828_v25 = vld [vmem:[%s22303_s10 + $0x1b8] sm:$0xf] }
 0xe07   : > { %16307 = vmatprep.subr.bf16.mxu1 %v17877_v19  ;;  %v16217_v35 = vpack.c.bf16 %v12828_v25, %v12827_v36  ;;  %v12952_v36 = vld [vmem:[%s22303_s10 + $0x448] sm:$0xff] }
 0xe08   : > { %13893 = vmatmul.mubr.msk.f32.vlgmr.msra.gmra.mrb[70].mxu0 %vm7212_vm5, %v7450_v63  ;;  %v16228_v63 = vpack.c.bf16 %v12838_v49, %v12837_v12 }
 0xe09   : > { %16159 = vmatpush3.bf16.msra.mxu0 %v16158_v56  ;;  %13914 = vmatprep.mubr.msk.f32.mxu0 %vm17878_vm12, %v22515_v57 }
 0xe0a   : > { %16310 = vmatpush3.bf16.msk.msra.mxu1 %vm20794_vm6, %v16308_v4  ;;  %16160 = vmatprep.subr.bf16.mxu0 %v17877_v19  ;;  %v8270_v4 = vrot.slane %v20851_v13, 5  ;;  %v12861_v13 = vld [vmem:[%s22303_s10 + $0x260] sm:$0xff] }
 0xe0b   : > { %16318 = vmatprep.subr.bf16.mxu1 %v17877_v19  ;;  %v16256_v20 = vpack.c.bf16 %v12862_v21, %v12861_v13 }
 0xe0d   : > { %16163 = vmatpush3.bf16.msk.msra.mxu0 %vm20794_vm6, %v16161_v38  ;;  %14146 = vmatmul.mubr.msk.f32.vlgmr.msra.gmra.mrb[78].mxu1 %vm7212_vm5, %v9336_v37  ;;  %v12849_v38 = vld [vmem:[%s22303_s10 + $0x220] sm:$0xff] }
 0xe0e   : > { %16320 = vmatpush3.bf16.msra.mxu1 %v16319_v58  ;;  %16171 = vmatprep.subr.bf16.mxu0 %v17877_v19  ;;  %v12850_v58 = vld [vmem:[%s22303_s10 + $0x228] sm:$0xff] }
 0xe0f   : > { %16321 = vmatprep.subr.bf16.mxu1 %v17877_v19  ;;  %14167 = vmatprep.mubr.msk.f32.mxu1 %vm17878_vm12, %v22515_v57  ;;  %v16242_v37 = vpack.c.bf16 %v12850_v58, %v12849_v38  ;;  %v12912_v38 = vld [vmem:[%s22303_s10 + $0x378] sm:$0xf] }
 0xe10   : > { %13915 = vmatmul.mubr.msk.f32.vlgmr.msra.gmra.mrb[72].mxu0 %vm7212_vm5, %v7614_v6 }
 0xe11   : > { %16173 = vmatpush3.bf16.msra.mxu0 %v16172_v17  ;;  %13936 = vmatprep.mubr.msk.f32.mxu0 %vm17878_vm12, %v22515_v57  ;;  %v12852_v17 = vld [vmem:[%s22303_s10 + $0x238] sm:$0xf] }
 0xe12   : > { %16324 = vmatpush3.bf16.msk.msra.mxu1 %vm20794_vm6, %v16322_v23  ;;  %16174 = vmatprep.subr.bf16.mxu0 %v17877_v19  ;;  %v16245_v6 = vpack.c.bf16 %v12852_v17, %v12851_v9  ;;  %v12921_v9 = vld [vmem:[%s22303_s10 + $0x3a0] sm:$0xff]  ;;  %v12922_v17 = vld [vmem:[%s22303_s10 + $0x3a8] sm:$0xff] }
 0xe13   : > { %16332 = vmatprep.subr.bf16.mxu1 %v17877_v19  ;;  %v16326_v21 = vpack.c.bf16 %v12922_v17, %v12921_v9  ;;  %v12960_v9 = vld [vmem:[%s22303_s10 + $0x478] sm:$0xf] }
 0xe15   : > { %16177 = vmatpush3.bf16.msk.msra.mxu0 %vm20794_vm6, %v16175_v14  ;;  %14168 = vmatmul.mubr.msk.f32.vlgmr.msra.gmra.mrb[80].mxu1 %vm7212_vm5, %v9500_v53  ;;  %v8598_v14 = vrot.slane %v21078_v51, 1 }
 0xe16   : > { %16334 = vmatpush3.bf16.msra.mxu1 %v16333_v54  ;;  %16185 = vmatprep.subr.bf16.mxu0 %v17877_v19  ;;  %v12863_v54 = vld [vmem:[%s22303_s10 + $0x270] sm:$0xff] }
 0xe17   : > { %16335 = vmatprep.subr.bf16.mxu1 %v17877_v19  ;;  %14189 = vmatprep.mubr.msk.f32.mxu1 %vm17878_vm12, %v22515_v57  ;;  %v16259_v29 = vpack.c.bf16 %v12864_v32, %v12863_v54  ;;  %v12923_v54 = vld [vmem:[%s22303_s10 + $0x3b0] sm:$0xff]  ;;  %v12924_v32 = vld [vmem:[%s22303_s10 + $0x3b8] sm:$0xf] }
 0xe18   : > { %13937 = vmatmul.mubr.msk.f32.vlgmr.msra.gmra.mrb[74].mxu0 %vm7212_vm5, %v7778_v7  ;;  %v16270_v7 = vpack.c.bf16 %v12874_v1, %v12873_v34  ;;  %v16329_v34 = vpack.c.bf16 %v12924_v32, %v12923_v54  ;;  %v12975_v1 = vld [vmem:[%s22303_s10 + $0x4c0] sm:$0xff]  ;;  %v13013_v32 = vld [vmem:[%s22303_s10 + $0x590] sm:$0xff] }
 0xe19   : > { %16187 = vmatpush3.bf16.msra.mxu0 %v16186_v55  ;;  %13958 = vmatprep.mubr.msk.f32.mxu0 %vm17878_vm12, %v22515_v57 }
 0xe1a   : > { %16338 = vmatpush3.bf16.msk.msra.mxu1 %vm20794_vm6, %v16336_v15  ;;  %16188 = vmatprep.subr.bf16.mxu0 %v17877_v19  ;;  %v8762_v15 = vrot.slane %v21078_v51, 3 }
 0xe1b   : > { %16346 = vmatprep.subr.bf16.mxu1 %v17877_v19 }
 0xe1d   : > { %16191 = vmatpush3.bf16.msk.msra.mxu0 %vm20794_vm6, %v16189_v28  ;;  %14190 = vmatmul.mubr.msk.f32.vlgmr.msra.gmra.mrb[82].mxu1 %vm7212_vm5, %v9664_v18  ;;  %v12885_v28 = vld [vmem:[%s22303_s10 + $0x2e0] sm:$0xff]  ;;  %v8926_v18 = vrot.slane %v21078_v51, 5 }
 0xe1e   : > { %16199 = vmatprep.subr.bf16.mxu0 %v17877_v19  ;;  %16348 = vmatpush3.bf16.msra.mxu1 %v16347_v52  ;;  %v16284_v52 = vpack.c.bf16 %v12886_v22, %v12885_v28  ;;  %v12951_v51 = vld [vmem:[%s22303_s10 + $0x440] sm:$0xff] }
 0xe1f   : > { %16349 = vmatprep.subr.bf16.mxu1 %v17877_v19  ;;  %14211 = vmatprep.mubr.msk.f32.mxu1 %vm17878_vm12, %v22515_v57  ;;  %v16361_v49 = vpack.c.bf16 %v12952_v36, %v12951_v51  ;;  %v12989_v51 = vld [vmem:[%s22303_s10 + $0x510] sm:$0xff]  ;;  %v12990_v36 = vld [vmem:[%s22303_s10 + $0x518] sm:$0xf] }
 0xe20   : > { %13959 = vmatmul.mubr.msk.f32.vlgmr.msra.gmra.mrb[76].mxu0 %vm7212_vm5, %v7942_v24 }
 0xe21   : > { %16201 = vmatpush3.bf16.msra.mxu0 %v16200_v26  ;;  %13980 = vmatprep.mubr.msk.f32.mxu0 %vm17878_vm12, %v22515_v57  ;;  %v16287_v26 = vpack.c.bf16 %v12888_v10, %v12887_v0  ;;  %v12935_v0 = vld [vmem:[%s22303_s10 + $0x3f0] sm:$0xff]  ;;  %v12936_v10 = vld [vmem:[%s22303_s10 + $0x3f8] sm:$0xf] }
 0xe22   : > { %16202 = vmatprep.subr.bf16.mxu0 %v17877_v19  ;;  %16352 = vmatpush3.bf16.msk.msra.mxu1 %vm20794_vm6, %v16350_v16 }
 0xe23   : > { %16360 = vmatprep.subr.bf16.mxu1 %v17877_v19 }
 0xe25   : > { %16205 = vmatpush3.bf16.msk.msra.mxu0 %vm20794_vm6, %v16203_v59  ;;  %v16298_v59 = vpack.c.bf16 %v12898_v41, %v12897_v33  ;;  %v16343_v33 = vpack.c.bf16 %v12936_v10, %v12935_v0  ;;  %v12987_v41 = vld [vmem:[%s22303_s10 + $0x500] sm:$0xff]  ;;  %v13025_v0 = vld [vmem:[%s22303_s10 + $0x5d0] sm:$0xff]  ;;  %v13026_v10 = vld [vmem:[%s22303_s10 + $0x5d8] sm:$0xf] }
 0xe26   : > { %16213 = vmatprep.subr.bf16.mxu0 %v17877_v19 }
 0xe28   : > { %13981 = vmatmul.mubr.msk.f32.vlgmr.msra.gmra.mrb[78].mxu0 %vm7212_vm5, %v8106_v2 }
 0xe29   : > { %16215 = vmatpush3.bf16.msra.mxu0 %v16214_v50  ;;  %14002 = vmatprep.mubr.msk.f32.mxu0 %vm17878_vm12, %v22515_v57  ;;  %v12900_v50 = vld [vmem:[%s22303_s10 + $0x338] sm:$0xf] }
 0xe2a   : > { %v7284_v45 = vpop.f32.mrb[50].mxu1  ;;  %16216 = vmatprep.subr.bf16.mxu0 %v17877_v19  ;;  %v16301_v2 = vpack.c.bf16 %v12900_v50, %v12899_v40 }
 0xe2b   : > { %v13861_v56 = vpop.f32.mrb[51].mxu1 }
 0xe2d   : > { %16219 = vmatpush3.bf16.msk.msra.mxu0 %vm20794_vm6, %v16217_v35  ;;  %v12909_v35 = vld [vmem:[%s22303_s10 + $0x360] sm:$0xff] }
 0xe2e   : > { %16227 = vmatprep.subr.bf16.mxu0 %v17877_v19 }
 0xe30   : > { %14003 = vmatmul.mubr.msk.f32.vlgmr.msra.gmra.mrb[80].mxu0 %vm7212_vm5, %v8270_v4  ;;  %v12953_v4 = vld [vmem:[%s22303_s10 + $0x450] sm:$0xff] }
 0xe31   : > { %16229 = vmatpush3.bf16.msra.mxu0 %v16228_v63  ;;  %14024 = vmatprep.mubr.msk.f32.mxu0 %vm17878_vm12, %v22515_v57  ;;  %v16364_v58 = vpack.c.bf16 %v12954_v62, %v12953_v4  ;;  %v13000_v4 = vld [vmem:[%s22303_s10 + $0x548] sm:$0xff]  ;;  %v12957_v62 = vld [vmem:[%s22303_s10 + $0x460] sm:$0xff] }
 0xe32   : > { %v7359_v8 = vpop.f32.mrb[52].mxu1  ;;  %16230 = vmatprep.subr.bf16.mxu0 %v17877_v19 }
 0xe33   : > { %v7360_v5 = vadd.f32 %v7359_v8, %v7284_v45  ;;  %v13872_v27 = vpop.f32.mrb[53].mxu1  ;;  %v12910_v45 = vld [vmem:[%s22303_s10 + $0x368] sm:$0xff]  ;;  %v12911_v8 = vld [vmem:[%s22303_s10 + $0x370] sm:$0xff] }
 0xe34   : > { %v16312_v63 = vpack.c.bf16 %v12910_v45, %v12909_v35  ;;  %v12963_v27 = vld [vmem:[%s22303_s10 + $0x480] sm:$0xff]  ;;  %v9746_v35 = vrot.slane %v21070_v42, 7  ;;  %v12947_v45 = vld [vmem:[%s22303_s10 + $0x430] sm:$0xff] }
 0xe35   : > { %16233 = vmatpush3.bf16.msk.msra.mxu0 %vm20794_vm6, %v16231_v47  ;;  %v9254_v47 = vrot.slane %v21070_v42, 1 }
 0xe36   : > { %16241 = vmatprep.subr.bf16.mxu0 %v17877_v19 }
 0xe38   : > { %14025 = vmatmul.mubr.msk.f32.vlgmr.msra.gmra.mrb[82].mxu0 %vm7212_vm5, %v8434_v60 }
 0xe39   : > { %16243 = vmatpush3.bf16.msra.mxu0 %v16242_v37  ;;  %14046 = vmatprep.mubr.msk.f32.mxu0 %vm17878_vm12, %v22515_v57  ;;  %v12964_v37 = vld [vmem:[%s22303_s10 + $0x488] sm:$0xff] }
 0xe3a   : > { %v7440_v23 = vpop.f32.mrb[54].mxu1  ;;  %16244 = vmatprep.subr.bf16.mxu0 %v17877_v19 }
 0xe3b   : > { %v21376_v31 = vadd.f32 %v7440_v23, %v7360_v5  ;;  %v13883_v46 = vpop.f32.mrb[55].mxu1  ;;  %v16315_v5 = vpack.c.bf16 %v12912_v38, %v12911_v8  ;;  %v16375_v23 = vpack.c.bf16 %v12964_v37, %v12963_v27  ;;  %v12959_v37 = vld [vmem:[%s22303_s10 + $0x470] sm:$0xff] }
 0xe3c   : > { %v12965_v46 = vld [vmem:[%s22303_s10 + $0x490] sm:$0xff] }
 0xe3d   : > { %16247 = vmatpush3.bf16.msk.msra.mxu0 %vm20794_vm6, %v16245_v6 }
 0xe3e   : > { %16255 = vmatprep.subr.bf16.mxu0 %v17877_v19 }
 0xe40   : > { %14047 = vmatmul.mubr.msk.f32.vlgmr.msra.gmra.mrb[84].mxu0 %vm7212_vm5, %v8598_v14  ;;  %v9418_v14 = vrot.slane %v21070_v42, 3 }
 0xe41   : > { %16257 = vmatpush3.bf16.msra.mxu0 %v16256_v20  ;;  %14068 = vmatprep.mubr.msk.f32.mxu0 %vm17878_vm12, %v22515_v57  ;;  %v12966_v20 = vld [vmem:[%s22303_s10 + $0x498] sm:$0xf] }
 0xe42   : > { %v21391_v53 = vpop.f32.mrb[56].mxu1  ;;  %16258 = vmatprep.subr.bf16.mxu0 %v17877_v19 }
 0xe43   : > { %v13905_v55 = vpop.f32.mrb[57].mxu1 }
 0xe44   : > { %v12976_v55 = vld [vmem:[%s22303_s10 + $0x4c8] sm:$0xff] }
 0xe45   : > { %16261 = vmatpush3.bf16.msk.msra.mxu0 %vm20794_vm6, %v16259_v29  ;;  %v16378_v29 = vpack.c.bf16 %v12966_v20, %v12965_v46  ;;  %v12970_v46 = vld [vmem:[%s22303_s10 + $0x4a8] sm:$0xff] }
 0xe46   : > { %16269 = vmatprep.subr.bf16.mxu0 %v17877_v19 }
 0xe48   : > { %14069 = vmatmul.mubr.msk.f32.vlgmr.msra.gmra.mrb[86].mxu0 %vm7212_vm5, %v8762_v15  ;;  %v12933_v15 = vld [vmem:[%s22303_s10 + $0x3e0] sm:$0xff] }
 0xe49   : > { %16271 = vmatpush3.bf16.msra.mxu0 %v16270_v7  ;;  %14090 = vmatprep.mubr.msk.f32.mxu0 %vm17878_vm12, %v22515_v57  ;;  %v16340_v22 = vpack.c.bf16 %v12934_v39, %v12933_v15 }
 0xe4a   : > { %v21413_v43 = vpop.f32.mrb[58].mxu1  ;;  %16272 = vmatprep.subr.bf16.mxu0 %v17877_v19 }
 0xe4b   : > { %v13927_v48 = vpop.f32.mrb[59].mxu1 }
 0xe4c   : > { %v12977_v48 = vld [vmem:[%s22303_s10 + $0x4d0] sm:$0xff] }
 0xe4d   : > { %16275 = vmatpush3.bf16.msk.msra.mxu0 %vm20794_vm6, %v16273_v3  ;;  %v16389_v3 = vpack.c.bf16 %v12976_v55, %v12975_v1  ;;  %v12971_v1 = vld [vmem:[%s22303_s10 + $0x4b0] sm:$0xff]  ;;  %v12972_v55 = vld [vmem:[%s22303_s10 + $0x4b8] sm:$0xf] }
 0xe4e   : > { %16283 = vmatprep.subr.bf16.mxu0 %v17877_v19  ;;  %v16385_v39 = vpack.c.bf16 %v12972_v55, %v12971_v1  ;;  %v13041_v1 = vld [vmem:[%s22303_s10 + $0x620] sm:$0xff]  ;;  %v13042_v55 = vld [vmem:[%s22303_s10 + $0x628] sm:$0xff] }
 0xe50   : > { %14091 = vmatmul.mubr.msk.f32.vlgmr.msra.gmra.mrb[88].mxu0 %vm7212_vm5, %v8926_v18  ;;  %v9582_v18 = vrot.slane %v21070_v42, 5 }
 0xe51   : > { %16285 = vmatpush3.bf16.msra.mxu0 %v16284_v52  ;;  %14112 = vmatprep.mubr.msk.f32.mxu0 %vm17878_vm12, %v22515_v57  ;;  %v12978_v52 = vld [vmem:[%s22303_s10 + $0x4d8] sm:$0xf] }
 0xe52   : > { %v21435_v24 = vpop.f32.mrb[60].mxu1  ;;  %16286 = vmatprep.subr.bf16.mxu0 %v17877_v19 }
 0xe53   : > { %v13949_v16 = vpop.f32.mrb[61].mxu1 }
 0xe54   : > { %v12988_v16 = vld [vmem:[%s22303_s10 + $0x508] sm:$0xff] }
 0xe55   : > { %16289 = vmatpush3.bf16.msk.msra.mxu0 %vm20794_vm6, %v16287_v26  ;;  %v16392_v26 = vpack.c.bf16 %v12978_v52, %v12977_v48  ;;  %v16403_v40 = vpack.c.bf16 %v12988_v16, %v12987_v41  ;;  %v12984_v41 = vld [vmem:[%s22303_s10 + $0x4f8] sm:$0xf]  ;;  %v16448_v16 = vpack.c.bf16 %v13026_v10, %v13025_v0 }
 0xe56   : > { %16297 = vmatprep.subr.bf16.mxu0 %v17877_v19 }
 0xe58   : > { %14113 = vmatmul.mubr.msk.f32.vlgmr.msra.gmra.mrb[90].mxu0 %vm7212_vm5, %v9090_v30  ;;  %v12946_v30 = vld [vmem:[%s22303_s10 + $0x428] sm:$0xff] }
 0xe59   : > { %16299 = vmatpush3.bf16.msra.mxu0 %v16298_v59  ;;  %14134 = vmatprep.mubr.msk.f32.mxu0 %vm17878_vm12, %v22515_v57  ;;  %v12945_v59 = vld [vmem:[%s22303_s10 + $0x420] sm:$0xff] }
 0xe5a   : > { %v21463_v25 = vpop.f32.mrb[62].mxu1  ;;  %16300 = vmatprep.subr.bf16.mxu0 %v17877_v19 }
 0xe5b   : > { %v13971_v12 = vpop.f32.mrb[63].mxu1 }
 0xe5c   : > { %v12948_v12 = vld [vmem:[%s22303_s10 + $0x438] sm:$0xf] }
 0xe5d   : > { %16303 = vmatpush3.bf16.msk.msra.mxu0 %vm20794_vm6, %v16301_v2  ;;  %v21474_v56 = vpop.f32.mrb[66].mxu0  ;;  %v16354_v2 = vpack.c.bf16 %v12946_v30, %v12945_v59  ;;  %v16357_v42 = vpack.c.bf16 %v12948_v12, %v12947_v45  ;;  %v13035_v30 = vld [vmem:[%s22303_s10 + $0x600] sm:$0xff]  ;;  %v13037_v45 = vld [vmem:[%s22303_s10 + $0x610] sm:$0xff]  ;;  %v13038_v12 = vld [vmem:[%s22303_s10 + $0x618] sm:$0xf] }
 0xe5e   : > { %v21482_v61 = vpop.f32.mrb[67].mxu0  ;;  %16311 = vmatprep.subr.bf16.mxu0 %v17877_v19  ;;  %v10812_v52 = vrot.slane %v21474_v56, 4 }
 0xe5f   : > { %14212 = vmatmul.mubr.msk.f32.vlgmr.msra.gmra.mrb[84].mxu1 %vm7212_vm5, %v21482_v61  ;;  %v9992_v13 = vrot.slane %v21482_v61, 2  ;;  %v10156_v28 = vrot.slane %v21482_v61, 4  ;;  %v10320_v50 = vrot.slane %v21482_v61, 6  ;;  %v9910_v27 = vrot.slane %v21482_v61, 1 }
 0xe60   : > { %14135 = vmatmul.mubr.msk.f32.vlgmr.msra.gmra.mrb[92].mxu0 %vm7212_vm5, %v9254_v47  ;;  %16362 = vmatpush3.bf16.msra.mxu1 %v16361_v49  ;;  %v16406_v49 = vpack.c.bf16 %v12990_v36, %v12989_v51  ;;  %v12958_v47 = vld [vmem:[%s22303_s10 + $0x468] sm:$0xff]  ;;  %v10976_v36 = vrot.slane %v21474_v56, 6 }
 0xe61   : > { %16313 = vmatpush3.bf16.msra.mxu0 %v16312_v63  ;;  %16363 = vmatprep.subr.bf16.mxu1 %v17877_v19  ;;  %v12999_v63 = vld [vmem:[%s22303_s10 + $0x540] sm:$0xff]  ;;  %v16368_v38 = vpack.c.bf16 %v12958_v47, %v12957_v62  ;;  %v13006_v47 = vld [vmem:[%s22303_s10 + $0x568] sm:$0xff] }
 0xe62   : > { %v21502_v60 = vpop.f32.mrb[64].mxu1  ;;  %16314 = vmatprep.subr.bf16.mxu0 %v17877_v19  ;;  %14233 = vmatprep.mubr.msk.f32.mxu1 %vm17878_vm12, %v22515_v57  ;;  %v16417_v8 = vpack.c.bf16 %v13000_v4, %v12999_v63  ;;  %v12996_v63 = vld [vmem:[%s22303_s10 + $0x538] sm:$0xf]  ;;  %v16462_v4 = vpack.c.bf16 %v13038_v12, %v13037_v45 }
 0xe63   : > { %v13993_v6 = vpop.f32.mrb[65].mxu1  ;;  %14156 = vmatprep.mubr.msk.f32.mxu0 %vm17878_vm12, %v22515_v57 }
 0xe64   : > { %16366 = vmatpush3.bf16.msk.msra.mxu1 %vm20794_vm6, %v16364_v58  ;;  %v13001_v58 = vld [vmem:[%s22303_s10 + $0x550] sm:$0xff]  ;;  %v16371_v6 = vpack.c.bf16 %v12960_v9, %v12959_v37  ;;  %v13017_v37 = vld [vmem:[%s22303_s10 + $0x5a0] sm:$0xff]  ;;  %v13018_v9 = vld [vmem:[%s22303_s10 + $0x5a8] sm:$0xff] }
 0xe65   : > { %16317 = vmatpush3.bf16.msk.msra.mxu0 %vm20794_vm6, %v16315_v5  ;;  %16374 = vmatprep.subr.bf16.mxu1 %v17877_v19  ;;  %v13002_v5 = vld [vmem:[%s22303_s10 + $0x558] sm:$0xf] }
 0xe66   : > { %16325 = vmatprep.subr.bf16.mxu0 %v17877_v19  ;;  %v16420_v17 = vpack.c.bf16 %v13002_v5, %v13001_v58  ;;  %v13007_v58 = vld [vmem:[%s22303_s10 + $0x570] sm:$0xff]  ;;  %v13008_v5 = vld [vmem:[%s22303_s10 + $0x578] sm:$0xf] }
 0xe67   : > { %14234 = vmatmul.mubr.msk.f32.vlgmr.msra.gmra.mrb[86].mxu1 %vm7212_vm5, %v9992_v13  ;;  %v13012_v13 = vld [vmem:[%s22303_s10 + $0x588] sm:$0xff] }
 0xe68   : > { %14157 = vmatmul.mubr.msk.f32.vlgmr.msra.gmra.mrb[94].mxu0 %vm7212_vm5, %v9418_v14  ;;  %16376 = vmatpush3.bf16.msra.mxu1 %v16375_v23  ;;  %v13011_v23 = vld [vmem:[%s22303_s10 + $0x580] sm:$0xff]  ;;  %v10648_v14 = vrot.slane %v21474_v56, 2 }
 0xe69   : > { %16327 = vmatpush3.bf16.msra.mxu0 %v16326_v21  ;;  %16377 = vmatprep.subr.bf16.mxu1 %v17877_v19  ;;  %v12969_v21 = vld [vmem:[%s22303_s10 + $0x4a0] sm:$0xff]  ;;  %v16431_v20 = vpack.c.bf16 %v13012_v13, %v13011_v23  ;;  %v13019_v23 = vld [vmem:[%s22303_s10 + $0x5b0] sm:$0xff]  ;;  %v13020_v13 = vld [vmem:[%s22303_s10 + $0x5b8] sm:$0xf] }
 0xe6a   : > { %v21544_v7 = vpop.f32.mrb[66].mxu1  ;;  %16328 = vmatprep.subr.bf16.mxu0 %v17877_v19  ;;  %14255 = vmatprep.mubr.msk.f32.mxu1 %vm17878_vm12, %v22515_v57  ;;  %v16382_v54 = vpack.c.bf16 %v12970_v46, %v12969_v21  ;;  %v16441_v21 = vpack.c.bf16 %v13020_v13, %v13019_v23  ;;  %v13029_v46 = vld [vmem:[%s22303_s10 + $0x5e0] sm:$0xff] }
 0xe6b   : > { %v14015_v44 = vpop.f32.mrb[67].mxu1  ;;  %14178 = vmatprep.mubr.msk.f32.mxu0 %vm17878_vm12, %v22515_v57 }
 0xe6c   : > { %16380 = vmatpush3.bf16.msk.msra.mxu1 %vm20794_vm6, %v16378_v29  ;;  %v13014_v29 = vld [vmem:[%s22303_s10 + $0x598] sm:$0xf]  ;;  %v13023_v44 = vld [vmem:[%s22303_s10 + $0x5c0] sm:$0xff] }
 0xe6d   : > { %16331 = vmatpush3.bf16.msk.msra.mxu0 %vm20794_vm6, %v16329_v34  ;;  %16388 = vmatprep.subr.bf16.mxu1 %v17877_v19  ;;  %v10074_v34 = vrot.slane %v21482_v61, 3  ;;  %v16434_v15 = vpack.c.bf16 %v13014_v29, %v13013_v32  ;;  %v13031_v32 = vld [vmem:[%s22303_s10 + $0x5f0] sm:$0xff]  ;;  %v13032_v29 = vld [vmem:[%s22303_s10 + $0x5f8] sm:$0xf] }
 0xe6e   : > { %16339 = vmatprep.subr.bf16.mxu0 %v17877_v19 }
 0xe6f   : > { %14256 = vmatmul.mubr.msk.f32.vlgmr.msra.gmra.mrb[88].mxu1 %vm7212_vm5, %v10156_v28  ;;  %v12981_v28 = vld [vmem:[%s22303_s10 + $0x4e0] sm:$0xff] }
 0xe70   : > { %14179 = vmatmul.mubr.msk.f32.vlgmr.msra.gmra.mrb[96].mxu0 %vm7212_vm5, %v9582_v18  ;;  %16390 = vmatpush3.bf16.msra.mxu1 %v16389_v3  ;;  %v13024_v3 = vld [vmem:[%s22303_s10 + $0x5c8] sm:$0xff] }
 0xe71   : > { %16341 = vmatpush3.bf16.msra.mxu0 %v16340_v22  ;;  %16391 = vmatprep.subr.bf16.mxu1 %v17877_v19  ;;  %v12982_v22 = vld [vmem:[%s22303_s10 + $0x4e8] sm:$0xff]  ;;  %v16445_v48 = vpack.c.bf16 %v13024_v3, %v13023_v44  ;;  %v13043_v44 = vld [vmem:[%s22303_s10 + $0x630] sm:$0xff]  ;;  %v13044_v3 = vld [vmem:[%s22303_s10 + $0x638] sm:$0xf] }
 0xe72   : > { %16342 = vmatprep.subr.bf16.mxu0 %v17877_v19  ;;  %14277 = vmatprep.mubr.msk.f32.mxu1 %vm17878_vm12, %v22515_v57  ;;  %v16396_v18 = vpack.c.bf16 %v12982_v22, %v12981_v28 }
 0xe73   : > { %14200 = vmatprep.mubr.msk.f32.mxu0 %vm17878_vm12, %v22515_v57 }
 0xe74   : > { %16394 = vmatpush3.bf16.msk.msra.mxu1 %vm20794_vm6, %v16392_v26  ;;  %v10238_v26 = vrot.slane %v21482_v61, 5 }
 0xe75   : > { %16345 = vmatpush3.bf16.msk.msra.mxu0 %vm20794_vm6, %v16343_v33  ;;  %16402 = vmatprep.subr.bf16.mxu1 %v17877_v19  ;;  %v12983_v33 = vld [vmem:[%s22303_s10 + $0x4f0] sm:$0xff] }
 0xe76   : > { %16353 = vmatprep.subr.bf16.mxu0 %v17877_v19  ;;  %v16399_v59 = vpack.c.bf16 %v12984_v41, %v12983_v33  ;;  %v13047_v33 = vld [vmem:[%s22303_s10 + $0x640] sm:$0xff]  ;;  %v13048_v41 = vld [vmem:[%s22303_s10 + $0x648] sm:$0xff] }
 0xe77   : > { %14278 = vmatmul.mubr.msk.f32.vlgmr.msra.gmra.mrb[90].mxu1 %vm7212_vm5, %v10320_v50  ;;  %v12993_v50 = vld [vmem:[%s22303_s10 + $0x520] sm:$0xff] }
 0xe78   : > { %14201 = vmatmul.mubr.msk.f32.vlgmr.msra.gmra.mrb[98].mxu0 %vm7212_vm5, %v9746_v35  ;;  %16404 = vmatpush3.bf16.msra.mxu1 %v16403_v40  ;;  %v13036_v40 = vld [vmem:[%s22303_s10 + $0x608] sm:$0xff] }
 0xe79   : > { %16355 = vmatpush3.bf16.msra.mxu0 %v16354_v2  ;;  %16405 = vmatprep.subr.bf16.mxu1 %v17877_v19  ;;  %v12994_v2 = vld [vmem:[%s22303_s10 + $0x528] sm:$0xff]  ;;  %v16459_v51 = vpack.c.bf16 %v13036_v40, %v13035_v30  ;;  %v16473_v30 = vpack.c.bf16 %v13048_v41, %v13047_v33  ;;  %v13079_v33 = vld [vmem:[%s22303_s10 + $0x6f0] sm:$0xff]  ;;  %v13080_v41 = vld [vmem:[%s22303_s10 + $0x6f8] sm:$0xf] }
 0xe7a   : > { %16356 = vmatprep.subr.bf16.mxu0 %v17877_v19  ;;  %14299 = vmatprep.mubr.msk.f32.mxu1 %vm17878_vm12, %v22515_v57  ;;  %v16410_v35 = vpack.c.bf16 %v12994_v2, %v12993_v50  ;;  %v13049_v50 = vld [vmem:[%s22303_s10 + $0x650] sm:$0xff]  ;;  %v13050_v2 = vld [vmem:[%s22303_s10 + $0x658] sm:$0xf] }
 0xe7b   : > { %14222 = vmatprep.mubr.msk.f32.mxu0 %vm17878_vm12, %v22515_v57 }
 0xe7c   : > { %16408 = vmatpush3.bf16.msk.msra.mxu1 %vm20794_vm6, %v16406_v49  ;;  %v10402_v49 = vrot.slane %v21482_v61, 7  ;;  %v13005_v61 = vld [vmem:[%s22303_s10 + $0x560] sm:$0xff] }
 0xe7d   : > { %16359 = vmatpush3.bf16.msk.msra.mxu0 %vm20794_vm6, %v16357_v42  ;;  %16416 = vmatprep.subr.bf16.mxu1 %v17877_v19  ;;  %v12995_v42 = vld [vmem:[%s22303_s10 + $0x530] sm:$0xff] }
 0xe7e   : > { %16367 = vmatprep.subr.bf16.mxu0 %v17877_v19  ;;  %v16413_v62 = vpack.c.bf16 %v12996_v63, %v12995_v42  ;;  %v13056_v42 = vld [vmem:[%s22303_s10 + $0x678] sm:$0xf]  ;;  %v16476_v63 = vpack.c.bf16 %v13050_v2, %v13049_v50  ;;  %v13084_v50 = vld [vmem:[%s22303_s10 + $0x708] sm:$0xff] }
 0xe7f   : > { %14300 = vmatmul.mubr.msk.f32.vlgmr.msra.gmra.mrb[92].mxu1 %vm7212_vm5, %v21474_v56 }
 0xe80   : > { %14223 = vmatmul.mubr.msk.f32.vlgmr.msra.gmra.mrb[100].mxu0 %vm7212_vm5, %v9910_v27  ;;  %16418 = vmatpush3.bf16.msra.mxu1 %v16417_v8  ;;  %v16424_v8 = vpack.c.bf16 %v13006_v47, %v13005_v61  ;;  %v16427_v27 = vpack.c.bf16 %v13008_v5, %v13007_v58  ;;  %v13060_v61 = vld [vmem:[%s22303_s10 + $0x688] sm:$0xff]  ;;  %v13065_v58 = vld [vmem:[%s22303_s10 + $0x6a0] sm:$0xff] }
 0xe81   : > { %16369 = vmatpush3.bf16.msra.mxu0 %v16368_v38  ;;  %16419 = vmatprep.subr.bf16.mxu1 %v17877_v19  ;;  %v10566_v38 = vrot.slane %v21474_v56, 1  ;;  %v13066_v5 = vld [vmem:[%s22303_s10 + $0x6a8] sm:$0xff] }
 0xe82   : > { %16370 = vmatprep.subr.bf16.mxu0 %v17877_v19  ;;  %14321 = vmatprep.mubr.msk.f32.mxu1 %vm17878_vm12, %v22515_v57 }
 0xe83   : > { %14244 = vmatprep.mubr.msk.f32.mxu0 %vm17878_vm12, %v22515_v57 }
 0xe84   : > { %16422 = vmatpush3.bf16.msk.msra.mxu1 %vm20794_vm6, %v16420_v17  ;;  %v16438_v17 = vpack.c.bf16 %v13018_v9, %v13017_v37  ;;  %v13061_v9 = vld [vmem:[%s22303_s10 + $0x690] sm:$0xff] }
 0xe85   : > { %16373 = vmatpush3.bf16.msk.msra.mxu0 %vm20794_vm6, %v16371_v6  ;;  %16430 = vmatprep.subr.bf16.mxu1 %v17877_v19  ;;  %v10730_v6 = vrot.slane %v21474_v56, 3 }
 0xe86   : > { %16381 = vmatprep.subr.bf16.mxu0 %v17877_v19 }
 0xe87   : > { %14322 = vmatmul.mubr.msk.f32.vlgmr.msra.gmra.mrb[94].mxu1 %vm7212_vm5, %v10648_v14 }
 0xe88   : > { %14245 = vmatmul.mubr.msk.f32.vlgmr.msra.gmra.mrb[102].mxu0 %vm7212_vm5, %v10074_v34  ;;  %16432 = vmatpush3.bf16.msra.mxu1 %v16431_v20  ;;  %v13030_v20 = vld [vmem:[%s22303_s10 + $0x5e8] sm:$0xff]  ;;  %v16455_v34 = vpack.c.bf16 %v13032_v29, %v13031_v32 }
 0xe89   : > { %16383 = vmatpush3.bf16.msra.mxu0 %v16382_v54  ;;  %16433 = vmatprep.subr.bf16.mxu1 %v17877_v19  ;;  %v16452_v14 = vpack.c.bf16 %v13030_v20, %v13029_v46  ;;  %v10894_v54 = vrot.slane %v21474_v56, 5  ;;  %v13068_v46 = vld [vmem:[%s22303_s10 + $0x6b8] sm:$0xf]  ;;  %v13072_v32 = vld [vmem:[%s22303_s10 + $0x6c8] sm:$0xff] }
 0xe8a   : > { %16384 = vmatprep.subr.bf16.mxu0 %v17877_v19  ;;  %14343 = vmatprep.mubr.msk.f32.mxu1 %vm17878_vm12, %v22515_v57 }
 0xe8b   : > { %14266 = vmatprep.mubr.msk.f32.mxu0 %vm17878_vm12, %v22515_v57 }
 0xe8c   : > { %16436 = vmatpush3.bf16.msk.msra.mxu1 %vm20794_vm6, %v16434_v15  ;;  %v16466_v15 = vpack.c.bf16 %v13042_v55, %v13041_v1  ;;  %v13077_v55 = vld [vmem:[%s22303_s10 + $0x6e0] sm:$0xff] }
 0xe8d   : > { %16387 = vmatpush3.bf16.msk.msra.mxu0 %vm20794_vm6, %v16385_v39  ;;  %16444 = vmatprep.subr.bf16.mxu1 %v17877_v19  ;;  %v11058_v39 = vrot.slane %v21474_v56, 7 }
 0xe8e   : > { %16395 = vmatprep.subr.bf16.mxu0 %v17877_v19 }
 0xe8f   : > { %14344 = vmatmul.mubr.msk.f32.vlgmr.msra.gmra.mrb[96].mxu1 %vm7212_vm5, %v10812_v52 }
 0xe90   : > { %14267 = vmatmul.mubr.msk.f32.vlgmr.msra.gmra.mrb[104].mxu0 %vm7212_vm5, %v10238_v26  ;;  %16446 = vmatpush3.bf16.msra.mxu1 %v16445_v48  ;;  %v16469_v48 = vpack.c.bf16 %v13044_v3, %v13043_v44 }
 0xe91   : > { %16397 = vmatpush3.bf16.msra.mxu0 %v16396_v18  ;;  %16447 = vmatprep.subr.bf16.mxu1 %v17877_v19 }
 0xe92   : > { %16398 = vmatprep.subr.bf16.mxu0 %v17877_v19  ;;  %14365 = vmatprep.mubr.msk.f32.mxu1 %vm17878_vm12, %v22515_v57 }
 0xe93   : > { %14288 = vmatprep.mubr.msk.f32.mxu0 %vm17878_vm12, %v22515_v57 }
 0xe94   : > { %16450 = vmatpush3.bf16.msk.msra.mxu1 %vm20794_vm6, %v16448_v16  ;;  %v13053_v16 = vld [vmem:[%s22303_s10 + $0x660] sm:$0xff] }
 0xe95   : > { %16401 = vmatpush3.bf16.msk.msra.mxu0 %vm20794_vm6, %v16399_v59  ;;  %16458 = vmatprep.subr.bf16.mxu1 %v17877_v19  ;;  %v13054_v59 = vld [vmem:[%s22303_s10 + $0x668] sm:$0xff] }
 0xe96   : > { %16409 = vmatprep.subr.bf16.mxu0 %v17877_v19 }
 0xe97   : > { %14366 = vmatmul.mubr.msk.f32.vlgmr.msra.gmra.mrb[98].mxu1 %vm7212_vm5, %v10976_v36 }
 0xe98   : > { %14289 = vmatmul.mubr.msk.f32.vlgmr.msra.gmra.mrb[106].mxu0 %vm7212_vm5, %v10402_v49  ;;  %16460 = vmatpush3.bf16.msra.mxu1 %v16459_v51  ;;  %v13055_v49 = vld [vmem:[%s22303_s10 + $0x670] sm:$0xff] }
 0xe99   : > { %16411 = vmatpush3.bf16.msra.mxu0 %v16410_v35  ;;  %14310 = vmatprep.mubr.msk.f32.mxu0 %vm17878_vm12, %v22515_v57  ;;  %v16480_v35 = vpack.c.bf16 %v13054_v59, %v13053_v16 }
 0xe9a   : > { %16412 = vmatprep.subr.bf16.mxu0 %v17877_v19  ;;  %16461 = vmatprep.subr.bf16.mxu1 %v17877_v19 }
 0xe9b   : > { %14387 = vmatprep.mubr.msk.f32.mxu1 %vm17878_vm12, %v22515_v57 }
 0xe9c   : > { %16464 = vmatpush3.bf16.msk.msra.mxu1 %vm20794_vm6, %v16462_v4 }
 0xe9d   : > { %16415 = vmatpush3.bf16.msk.msra.mxu0 %vm20794_vm6, %v16413_v62  ;;  %16472 = vmatprep.subr.bf16.mxu1 %v17877_v19  ;;  %v13059_v62 = vld [vmem:[%s22303_s10 + $0x680] sm:$0xff] }
 0xe9e   : > { %16423 = vmatprep.subr.bf16.mxu0 %v17877_v19 }
 0xea0   : > { %14311 = vmatmul.mubr.msk.f32.vlgmr.msra.gmra.mrb[108].mxu0 %vm7212_vm5, %v10566_v38  ;;  %v16483_v38 = vpack.c.bf16 %v13056_v42, %v13055_v49  ;;  %v13090_v49 = vld [vmem:[%s22303_s10 + $0x728] sm:$0xff] }
 0xea1   : > { %16425 = vmatpush3.bf16.msra.mxu0 %v16424_v8  ;;  %14332 = vmatprep.mubr.msk.f32.mxu0 %vm17878_vm12, %v22515_v57 }
 0xea2   : > { %16426 = vmatprep.subr.bf16.mxu0 %v17877_v19 }
 0xea5   : > { %16429 = vmatpush3.bf16.msk.msra.mxu0 %vm20794_vm6, %v16427_v27 }
 0xea6   : > { %16437 = vmatprep.subr.bf16.mxu0 %v17877_v19 }
 0xea8   : > { %14333 = vmatmul.mubr.msk.f32.vlgmr.msra.gmra.mrb[110].mxu0 %vm7212_vm5, %v10730_v6 }
 0xea9   : > { %16439 = vmatpush3.bf16.msra.mxu0 %v16438_v17  ;;  %14354 = vmatprep.mubr.msk.f32.mxu0 %vm17878_vm12, %v22515_v57  ;;  %v13062_v17 = vld [vmem:[%s22303_s10 + $0x698] sm:$0xf] }
 0xeaa   : > { %16440 = vmatprep.subr.bf16.mxu0 %v17877_v19  ;;  %v16490_v20 = vpack.c.bf16 %v13062_v17, %v13061_v9 }
 0xead   : > { %16443 = vmatpush3.bf16.msk.msra.mxu0 %vm20794_vm6, %v16441_v21  ;;  %v13067_v21 = vld [vmem:[%s22303_s10 + $0x6b0] sm:$0xff] }
 0xeae   : > { %16451 = vmatprep.subr.bf16.mxu0 %v17877_v19  ;;  %v16497_v1 = vpack.c.bf16 %v13068_v46, %v13067_v21 }
 0xeb0   : > { %14355 = vmatmul.mubr.msk.f32.vlgmr.msra.gmra.mrb[112].mxu0 %vm7212_vm5, %v10894_v54  ;;  %v13071_v54 = vld [vmem:[%s22303_s10 + $0x6c0] sm:$0xff] }
 0xeb1   : > { %16453 = vmatpush3.bf16.msra.mxu0 %v16452_v14  ;;  %14376 = vmatprep.mubr.msk.f32.mxu0 %vm17878_vm12, %v22515_v57  ;;  %v16501_v44 = vpack.c.bf16 %v13072_v32, %v13071_v54  ;;  %v13103_v32 = vld [vmem:[%s22303_s10 + $0x770] sm:$0xff] }
 0xeb2   : > { %16454 = vmatprep.subr.bf16.mxu0 %v17877_v19 }
 0xeb5   : > { %16457 = vmatpush3.bf16.msk.msra.mxu0 %vm20794_vm6, %v16455_v34 }
 0xeb6   : > { %16465 = vmatprep.subr.bf16.mxu0 %v17877_v19 }
 0xeb8   : > { %14377 = vmatmul.mubr.msk.f32.vlgmr.msra.gmra.mrb[114].mxu0 %vm7212_vm5, %v11058_v39  ;;  %v21865_v28 = vpop.f32.mrb[68].mxu1 }
 0xeb9   : > { %v14037_v22 = vpop.f32.mrb[69].mxu1  ;;  %16467 = vmatpush3.bf16.msra.mxu0 %v16466_v15  ;;  %14398 = vmatprep.mubr.msk.f32.mxu0 %vm17878_vm12, %v22515_v57  ;;  %v13078_v15 = vld [vmem:[%s22303_s10 + $0x6e8] sm:$0xff] }
 0xeba   : > { %16468 = vmatprep.subr.bf16.mxu0 %v17877_v19  ;;  %v13073_v22 = vld [vmem:[%s22303_s10 + $0x6d0] sm:$0xff] }
 0xebd   : > { %16471 = vmatpush3.bf16.msk.msra.mxu0 %vm20794_vm6, %v16469_v48  ;;  %v13074_v48 = vld [vmem:[%s22303_s10 + $0x6d8] sm:$0xf] }
 0xebe   : > { %16479 = vmatprep.subr.bf16.mxu0 %v17877_v19  ;;  %v16504_v16 = vpack.c.bf16 %v13074_v48, %v13073_v22  ;;  %v13113_v22 = vld [vmem:[%s22303_s10 + $0x7a0] sm:$0xff]  ;;  %v13114_v48 = vld [vmem:[%s22303_s10 + $0x7a8] sm:$0xff] }
 0xec0   : > { %v21873_v56 = vpop.f32.mrb[70].mxu1 }
 0xec1   : > { %v14059_v52 = vpop.f32.mrb[71].mxu1 }
 0xec8   : > { %v21875_v18 = vpop.f32.mrb[72].mxu1 }
 0xec9   : > { %v14081_v0 = vpop.f32.mrb[73].mxu1 }
 0xed0   : > { %v21877_v10 = vpop.f32.mrb[74].mxu1 }
 0xed1   : > { %v14103_v26 = vpop.f32.mrb[75].mxu1 }
 0xed7   : > { %v21891_v40 = vpop.f32.mrb[68].mxu0 }
 0xed8   : > { %v21899_v51 = vpop.f32.mrb[76].mxu1  ;;  %v21901_v36 = vpop.f32.mrb[69].mxu0 }
 0xed9   : > { %v14125_v45 = vpop.f32.mrb[77].mxu1  ;;  %14388 = vmatmul.mubr.msk.f32.vlgmr.msra.gmra.mrb[100].mxu1 %vm7212_vm5, %v21901_v36  ;;  %v11222_v12 = vrot.slane %v21901_v36, 1  ;;  %v11304_v37 = vrot.slane %v21901_v36, 2  ;;  %v11386_v13 = vrot.slane %v21901_v36, 3  ;;  %v11468_v3 = vrot.slane %v21901_v36, 4 }
 0xeda   : > { %16474 = vmatpush3.bf16.msra.mxu1 %v16473_v30  ;;  %14409 = vmatprep.mubr.msk.f32.mxu1 %vm17878_vm12, %v22515_v57  ;;  %v11550_v26 = vrot.slane %v21901_v36, 5  ;;  %v13083_v30 = vld [vmem:[%s22303_s10 + $0x700] sm:$0xff]  ;;  %v16511_v45 = vpack.c.bf16 %v13080_v41, %v13079_v33  ;;  %v13109_v33 = vld [vmem:[%s22303_s10 + $0x790] sm:$0xff]  ;;  %v13110_v41 = vld [vmem:[%s22303_s10 + $0x798] sm:$0xf] }
 0xedb   : > { %v7522_v4 = vpop.f32.mrb[70].mxu0  ;;  %14399 = vmatmul.mubr.msk.f32.vlgmr.msra.gmra.mrb[116].mxu0 %vm7212_vm5, %v11222_v12  ;;  %16475 = vmatprep.subr.bf16.mxu1 %v17877_v19  ;;  %v13089_v12 = vld [vmem:[%s22303_s10 + $0x720] sm:$0xff] }
 0xedc   : > { %v7526_v47 = vadd.f32 %v7522_v4, %v21376_v31  ;;  %16481 = vmatpush3.bf16.msra.mxu0 %v16480_v35  ;;  %v13894_v8 = vpop.f32.mrb[71].mxu0  ;;  %14420 = vmatprep.mubr.msk.f32.mxu0 %vm17878_vm12, %v22515_v57  ;;  %v16487_v31 = vpack.c.bf16 %v13060_v61, %v13059_v62  ;;  %v11632_v4 = vrot.slane %v21901_v36, 6  ;;  %v13085_v62 = vld [vmem:[%s22303_s10 + $0x710] sm:$0xff]  ;;  %v13086_v61 = vld [vmem:[%s22303_s10 + $0x718] sm:$0xf] }
 0xedd   : > { %16482 = vmatprep.subr.bf16.mxu0 %v17877_v19 }
 0xede   : > { %v7608_v27 = vadd.f32 %v21391_v53, %v7526_v47  ;;  %16478 = vmatpush3.bf16.msk.msra.mxu1 %vm20794_vm6, %v16476_v63  ;;  %v16494_v53 = vpack.c.bf16 %v13066_v5, %v13065_v58  ;;  %v16515_v63 = vpack.c.bf16 %v13084_v50, %v13083_v30  ;;  %v13091_v58 = vld [vmem:[%s22303_s10 + $0x730] sm:$0xff]  ;;  %v13092_v5 = vld [vmem:[%s22303_s10 + $0x738] sm:$0xf]  ;;  %v16546_v50 = vpack.c.bf16 %v13110_v41, %v13109_v33 }
 0xedf   : > { %16486 = vmatprep.subr.bf16.mxu1 %v17877_v19  ;;  %v13116_v30 = vld [vmem:[%s22303_s10 + $0x7b8] sm:$0xf] }
 0xee0   : > { %v21943_v6 = vpop.f32.mrb[78].mxu1  ;;  %16485 = vmatpush3.bf16.msk.msra.mxu0 %vm20794_vm6, %v16483_v38  ;;  %v11714_v38 = vrot.slane %v21901_v36, 7  ;;  %v13095_v36 = vld [vmem:[%s22303_s10 + $0x740] sm:$0xff] }
 0xee1   : > { %v14147_v23 = vpop.f32.mrb[79].mxu1  ;;  %14410 = vmatmul.mubr.msk.f32.vlgmr.msra.gmra.mrb[102].mxu1 %vm7212_vm5, %v11304_v37  ;;  %16493 = vmatprep.subr.bf16.mxu0 %v17877_v19  ;;  %v13096_v37 = vld [vmem:[%s22303_s10 + $0x748] sm:$0xff] }
 0xee2   : > { %16488 = vmatpush3.bf16.msra.mxu1 %v16487_v31  ;;  %14431 = vmatprep.mubr.msk.f32.mxu1 %vm17878_vm12, %v22515_v57  ;;  %v13101_v23 = vld [vmem:[%s22303_s10 + $0x760] sm:$0xff]  ;;  %v16529_v46 = vpack.c.bf16 %v13096_v37, %v13095_v36 }
 0xee3   : > { %v7686_v14 = vpop.f32.mrb[72].mxu0  ;;  %14421 = vmatmul.mubr.msk.f32.vlgmr.msra.gmra.mrb[118].mxu0 %vm7212_vm5, %v11386_v13  ;;  %16489 = vmatprep.subr.bf16.mxu1 %v17877_v19  ;;  %v13102_v13 = vld [vmem:[%s22303_s10 + $0x768] sm:$0xff] }
 0xee4   : > { %v7690_v29 = vadd.f32 %v7686_v14, %v7608_v27  ;;  %v13916_v34 = vpop.f32.mrb[73].mxu0  ;;  %16495 = vmatpush3.bf16.msra.mxu0 %v16494_v53  ;;  %14442 = vmatprep.mubr.msk.f32.mxu0 %vm17878_vm12, %v22515_v57  ;;  %v16518_v27 = vpack.c.bf16 %v13086_v61, %v13085_v62  ;;  %v16525_v53 = vpack.c.bf16 %v13092_v5, %v13091_v58  ;;  %v13098_v14 = vld [vmem:[%s22303_s10 + $0x758] sm:$0xf]  ;;  %v12206_v58 = vrot.slane %v21891_v40, 5  ;;  %v13127_v5 = vld [vmem:[%s22303_s10 + $0x7f0] sm:$0xff] }
 0xee5   : > { %16496 = vmatprep.subr.bf16.mxu0 %v17877_v19  ;;  %v16536_v54 = vpack.c.bf16 %v13102_v13, %v13101_v23  ;;  %v12288_v23 = vrot.slane %v21891_v40, 6  ;;  %v12370_v13 = vrot.slane %v21891_v40, 7 }
 0xee6   : > { %v7772_v39 = vadd.f32 %v21413_v43, %v7690_v29  ;;  %16492 = vmatpush3.bf16.msk.msra.mxu1 %vm20794_vm6, %v16490_v20  ;;  %v16508_v43 = vpack.c.bf16 %v13078_v15, %v13077_v55  ;;  %v13097_v20 = vld [vmem:[%s22303_s10 + $0x750] sm:$0xff]  ;;  %v13104_v29 = vld [vmem:[%s22303_s10 + $0x778] sm:$0xf]  ;;  %v13107_v55 = vld [vmem:[%s22303_s10 + $0x780] sm:$0xff] }
 0xee7   : > { %16500 = vmatprep.subr.bf16.mxu1 %v17877_v19  ;;  %v16532_v34 = vpack.c.bf16 %v13098_v14, %v13097_v20  ;;  %v13108_v15 = vld [vmem:[%s22303_s10 + $0x788] sm:$0xff] }
 0xee8   : > { %v21986_v52 = vpop.f32.mrb[80].mxu1  ;;  %16499 = vmatpush3.bf16.msk.msra.mxu0 %vm20794_vm6, %v16497_v1 }
 0xee9   : > { %v14169_v0 = vpop.f32.mrb[81].mxu1  ;;  %14432 = vmatmul.mubr.msk.f32.vlgmr.msra.gmra.mrb[104].mxu1 %vm7212_vm5, %v11468_v3  ;;  %16507 = vmatprep.subr.bf16.mxu0 %v17877_v19  ;;  %v16539_v3 = vpack.c.bf16 %v13104_v29, %v13103_v32 }
 0xeea   : > { %16502 = vmatpush3.bf16.msra.mxu1 %v16501_v44  ;;  %14453 = vmatprep.mubr.msk.f32.mxu1 %vm17878_vm12, %v22515_v57  ;;  %v16543_v0 = vpack.c.bf16 %v13108_v15, %v13107_v55 }
 0xeeb   : > { %v7850_v59 = vpop.f32.mrb[74].mxu0  ;;  %14443 = vmatmul.mubr.msk.f32.vlgmr.msra.gmra.mrb[120].mxu0 %vm7212_vm5, %v11550_v26  ;;  %16503 = vmatprep.subr.bf16.mxu1 %v17877_v19  ;;  %v11960_v26 = vrot.slane %v21891_v40, 2 }
 0xeec   : > { %v7854_v2 = vadd.f32 %v7850_v59, %v7772_v39  ;;  %v13938_v35 = vpop.f32.mrb[75].mxu0  ;;  %16509 = vmatpush3.bf16.msra.mxu0 %v16508_v43  ;;  %14464 = vmatprep.mubr.msk.f32.mxu0 %vm17878_vm12, %v22515_v57  ;;  %v13115_v59 = vld [vmem:[%s22303_s10 + $0x7b0] sm:$0xff] }
 0xeed   : > { %16510 = vmatprep.subr.bf16.mxu0 %v17877_v19  ;;  %v13119_v35 = vld [vmem:[%s22303_s10 + $0x7c0] sm:$0xff] }
 0xeee   : > { %v7936_v42 = vadd.f32 %v21435_v24, %v7854_v2  ;;  %16506 = vmatpush3.bf16.msk.msra.mxu1 %vm20794_vm6, %v16504_v16  ;;  %v16522_v24 = vpack.c.bf16 %v13090_v49, %v13089_v12  ;;  %v12042_v16 = vrot.slane %v21891_v40, 3 }
 0xeef   : > { %16514 = vmatprep.subr.bf16.mxu1 %v17877_v19 }
 0xef0   : > { %v22029_v47 = vpop.f32.mrb[82].mxu1  ;;  %16513 = vmatpush3.bf16.msk.msra.mxu0 %vm20794_vm6, %v16511_v45  ;;  %v13120_v45 = vld [vmem:[%s22303_s10 + $0x7c8] sm:$0xff] }
 0xef1   : > { %v14191_v8 = vpop.f32.mrb[83].mxu1  ;;  %14454 = vmatmul.mubr.msk.f32.vlgmr.msra.gmra.mrb[106].mxu1 %vm7212_vm5, %v11632_v4  ;;  %16521 = vmatprep.subr.bf16.mxu0 %v17877_v19  ;;  %v13126_v4 = vld [vmem:[%s22303_s10 + $0x7e8] sm:$0xff]  ;;  %v16557_v61 = vpack.c.bf16 %v13120_v45, %v13119_v35 }
 0xef2   : > { %16516 = vmatpush3.bf16.msra.mxu1 %v16515_v63  ;;  %14475 = vmatprep.mubr.msk.f32.mxu1 %vm17878_vm12, %v22515_v57  ;;  %v13125_v63 = vld [vmem:[%s22303_s10 + $0x7e0] sm:$0xff]  ;;  %v13121_v8 = vld [vmem:[%s22303_s10 + $0x7d0] sm:$0xff] }
 0xef3   : > { %v8014_v31 = vpop.f32.mrb[76].mxu0  ;;  %14465 = vmatmul.mubr.msk.f32.vlgmr.msra.gmra.mrb[122].mxu0 %vm7212_vm5, %v11714_v38  ;;  %16517 = vmatprep.subr.bf16.mxu1 %v17877_v19  ;;  %v13122_v38 = vld [vmem:[%s22303_s10 + $0x7d8] sm:$0xf] }
 0xef4   : > { %v8018_v9 = vadd.f32 %v8014_v31, %v7936_v42  ;;  %v13960_v17 = vpop.f32.mrb[77].mxu0  ;;  %16523 = vmatpush3.bf16.msra.mxu0 %v16522_v24  ;;  %14486 = vmatprep.mubr.msk.f32.mxu0 %vm17878_vm12, %v22515_v57  ;;  %v16553_v42 = vpack.c.bf16 %v13116_v30, %v13115_v59  ;;  %v12124_v24 = vrot.slane %v21891_v40, 4  ;;  %v16560_v31 = vpack.c.bf16 %v13122_v38, %v13121_v8 }
 0xef5   : > { %16524 = vmatprep.subr.bf16.mxu0 %v17877_v19 }
 0xef6   : > { %v8100_v21 = vadd.f32 %v21463_v25, %v8018_v9  ;;  %16520 = vmatpush3.bf16.msk.msra.mxu1 %vm20794_vm6, %v16518_v27  ;;  %v11878_v25 = vrot.slane %v21891_v40, 1  ;;  %v13128_v27 = vld [vmem:[%s22303_s10 + $0x7f8] sm:$0xf] }
 0xef7   : > { %16528 = vmatprep.subr.bf16.mxu1 %v17877_v19  ;;  %v16567_v17 = vpack.c.bf16 %v13128_v27, %v13127_v5  ;;  %v12455_v5 = vld [vmem:[%s22571_s23 + $0x28] sm:$0xff]  ;;  %v12456_v27 = vld [vmem:[%s22571_s23 + $0x30] sm:$0xff] }
 0xef8   : > { %16527 = vmatpush3.bf16.msk.msra.mxu0 %vm20794_vm6, %v16525_v53 }
 0xef9   : > { %14476 = vmatmul.mubr.msk.f32.vlgmr.msra.gmra.mrb[108].mxu1 %vm7212_vm5, %v21891_v40  ;;  %16535 = vmatprep.subr.bf16.mxu0 %v17877_v19 }
 0xefa   : > { %16530 = vmatpush3.bf16.msra.mxu1 %v16529_v46  ;;  %14497 = vmatprep.mubr.msk.f32.mxu1 %vm17878_vm12, %v22515_v57 }
 0xefb   : > { %v8178_v1 = vpop.f32.mrb[78].mxu0  ;;  %14487 = vmatmul.mubr.msk.f32.vlgmr.msra.gmra.mrb[124].mxu0 %vm7212_vm5, %v11878_v25  ;;  %16531 = vmatprep.subr.bf16.mxu1 %v17877_v19 }
 0xefc   : > { %v8182_v39 = vadd.f32 %v8178_v1, %v8100_v21  ;;  %v13982_v44 = vpop.f32.mrb[79].mxu0  ;;  %16537 = vmatpush3.bf16.msra.mxu0 %v16536_v54  ;;  %14508 = vmatprep.mubr.msk.f32.mxu0 %vm17878_vm12, %v22515_v57 }
 0xefd   : > { %16538 = vmatprep.subr.bf16.mxu0 %v17877_v19 }
 0xefe   : > { %v8264_v43 = vadd.f32 %v21502_v60, %v8182_v39  ;;  %16534 = vmatpush3.bf16.msk.msra.mxu1 %vm20794_vm6, %v16532_v34  ;;  %v16550_v60 = vpack.c.bf16 %v13114_v48, %v13113_v22 }
 0xeff   : > { %16542 = vmatprep.subr.bf16.mxu1 %v17877_v19 }
 0xf00   : > { %16541 = vmatpush3.bf16.msk.msra.mxu0 %vm20794_vm6, %v16539_v3 }
 0xf01   : > { %14498 = vmatmul.mubr.msk.f32.vlgmr.msra.gmra.mrb[110].mxu1 %vm7212_vm5, %v11960_v26  ;;  %16549 = vmatprep.subr.bf16.mxu0 %v17877_v19 }
 0xf02   : > { %16544 = vmatpush3.bf16.msra.mxu1 %v16543_v0  ;;  %14519 = vmatprep.mubr.msk.f32.mxu1 %vm17878_vm12, %v22515_v57 }
 0xf03   : > { %v8342_v2 = vpop.f32.mrb[80].mxu0  ;;  %14509 = vmatmul.mubr.msk.f32.vlgmr.msra.gmra.mrb[126].mxu0 %vm7212_vm5, %v12042_v16  ;;  %16545 = vmatprep.subr.bf16.mxu1 %v17877_v19 }
 0xf04   : > { %v8346_v12 = vadd.f32 %v8342_v2, %v8264_v43  ;;  %v14004_v49 = vpop.f32.mrb[81].mxu0  ;;  %16551 = vmatpush3.bf16.msra.mxu0 %v16550_v60  ;;  %14530 = vmatprep.mubr.msk.f32.mxu0 %vm17878_vm12, %v22515_v57 }
 0xf05   : > { %16552 = vmatprep.subr.bf16.mxu0 %v17877_v19  ;;  %v12450_v49 = vld [vmem:[%s22571_s23] sm:$0xff] }
 0xf06   : > { %v8428_v62 = vadd.f32 %v21544_v7, %v8346_v12  ;;  %16548 = vmatpush3.bf16.msk.msra.mxu1 %vm20794_vm6, %v16546_v50  ;;  %v16564_v7 = vpack.c.bf16 %v13126_v4, %v13125_v63 }
 0xf07   : > { %16556 = vmatprep.subr.bf16.mxu1 %v17877_v19 }
 0xf08   : > { %16555 = vmatpush3.bf16.msk.msra.mxu0 %vm20794_vm6, %v16553_v42  ;;  %v12452_v42 = vld [vmem:[%s22571_s23 + $0x10] sm:$0xff] }
 0xf09   : > { %14520 = vmatmul.mubr.msk.f32.vlgmr.msra.gmra.mrb[112].mxu1 %vm7212_vm5, %v12124_v24  ;;  %16563 = vmatprep.subr.bf16.mxu0 %v17877_v19 }
 0xf0a   : > { %16558 = vmatpush3.bf16.msra.mxu1 %v16557_v61  ;;  %14541 = vmatprep.mubr.msk.f32.mxu1 %vm17878_vm12, %v22515_v57 }
 0xf0b   : > { %v8506_v36 = vpop.f32.mrb[82].mxu0  ;;  %14531 = vmatmul.mubr.msk.f32.vlgmr.msra.gmra.mrb[128].mxu0 %vm7212_vm5, %v12206_v58  ;;  %16559 = vmatprep.subr.bf16.mxu1 %v17877_v19  ;;  %v12454_v58 = vld [vmem:[%s22571_s23 + $0x20] sm:$0xff] }
 0xf0c   : > { %v8510_v37 = vadd.f32 %v8506_v36, %v8428_v62  ;;  %v14026_v9 = vpop.f32.mrb[83].mxu0  ;;  %16565 = vmatpush3.bf16.msra.mxu0 %v16564_v7  ;;  %14552 = vmatprep.mubr.msk.f32.mxu0 %vm17878_vm12, %v22515_v57  ;;  %v12457_v36 = vld [vmem:[%s22571_s23 + $0x38] sm:$0xff] }
 0xf0d   : > { %16566 = vmatprep.subr.bf16.mxu0 %v17877_v19  ;;  %v16580_v9 = vpack.c.bf16 %v12457_v36, %v12456_v27 }
 0xf0e   : > { %v8592_v53 = vadd.f32 %v21865_v28, %v8510_v37  ;;  %16562 = vmatpush3.bf16.msk.msra.mxu1 %vm20794_vm6, %v16560_v31  ;;  %v16577_v31 = vpack.c.bf16 %v12455_v5, %v12454_v58 }
 0xf0f   : > { %16570 = vmatprep.subr.bf16.mxu1 %v17877_v19 }
 0xf10   : > { %16569 = vmatpush3.bf16.msk.msra.mxu0 %vm20794_vm6, %v16567_v17 }
 0xf11   : > { %14542 = vmatmul.mubr.msk.f32.vlgmr.msra.gmra.mrb[114].mxu1 %vm7212_vm5, %v12288_v23 }
 0xf12   : > { %14587 = vmatprep.mubr.msk.f32.mxu1 %vm17878_vm12, %v22515_v57 }
 0xf13   : > { %v8670_v21 = vpop.f32.mrb[84].mxu0  ;;  %14553 = vmatmul.mubr.msk.f32.vlgmr.msra.gmra.mrb[130].mxu0 %vm7212_vm5, %v12370_v13 }
 0xf14   : > { %v8674_v28 = vadd.f32 %v8670_v21, %v8592_v53  ;;  %v14048_v46 = vpop.f32.mrb[85].mxu0 }
 0xf15   : > { %v12459_v46 = vld [vmem:[%s22571_s23 + $0x48] sm:$0xff] }
 0xf16   : > { %v8756_v20 = vadd.f32 %v21873_v56, %v8674_v28  ;;  %v12458_v28 = vld [vmem:[%s22571_s23 + $0x40] sm:$0xff] }
 0xf1b   : > { %v8834_v14 = vpop.f32.mrb[86].mxu0 }
 0xf1c   : > { %v8838_v54 = vadd.f32 %v8834_v14, %v8756_v20  ;;  %v14070_v25 = vpop.f32.mrb[87].mxu0  ;;  %v12460_v20 = vld [vmem:[%s22571_s23 + $0x50] sm:$0xff]  ;;  %v16583_v14 = vpack.c.bf16 %v12459_v46, %v12458_v28 }
 0xf1e   : > { %v8920_v11 = vadd.f32 %v21875_v18, %v8838_v54  ;;  %v12461_v54 = vld [vmem:[%s22571_s23 + $0x58] sm:$0xff] }
 0xf23   : > { %v8998_v32 = vpop.f32.mrb[88].mxu0 }
 0xf24   : > { %v9002_v29 = vadd.f32 %v8998_v32, %v8920_v11  ;;  %v14092_v34 = vpop.f32.mrb[89].mxu0  ;;  %v16586_v11 = vpack.c.bf16 %v12461_v54, %v12460_v20 }
 0xf26   : > { %v9084_v40 = vadd.f32 %v21877_v10, %v9002_v29 }
 0xf2b   : > { %v9162_v1 = vpop.f32.mrb[90].mxu0 }
 0xf2c   : > { %v9166_v55 = vadd.f32 %v9162_v1, %v9084_v40  ;;  %v14114_v57 = vpop.f32.mrb[91].mxu0 }
 0xf2d   : > { %v12463_v57 = vld [vmem:[%s22571_s23 + $0x68] sm:$0xff] }
 0xf2e   : > { %v9248_v15 = vadd.f32 %v21899_v51, %v9166_v55  ;;  %v12462_v55 = vld [vmem:[%s22571_s23 + $0x60] sm:$0xff] }
 0xf32   : > { %v9900_v39 = vpop.f32.mrb[84].mxu1 }
 0xf33   : > { %v9326_v44 = vpop.f32.mrb[92].mxu0  ;;  %v14213_v3 = vpop.f32.mrb[85].mxu1 }
 0xf34   : > { %v9330_v22 = vadd.f32 %v9326_v44, %v9248_v15  ;;  %v14136_v56 = vpop.f32.mrb[93].mxu0  ;;  %v16589_v15 = vpack.c.bf16 %v12463_v57, %v12462_v55 }
 0xf35   : > { %v12465_v56 = vld [vmem:[%s22571_s23 + $0x78] sm:$0xff] }
 0xf36   : > { %v9412_v48 = vadd.f32 %v21943_v6, %v9330_v22  ;;  %v12464_v22 = vld [vmem:[%s22571_s23 + $0x70] sm:$0xff] }
 0xf3a   : > { %v10064_v43 = vpop.f32.mrb[86].mxu1 }
 0xf3b   : > { %v9490_v0 = vpop.f32.mrb[94].mxu0  ;;  %v14235_v18 = vpop.f32.mrb[87].mxu1 }
 0xf3c   : > { %v9494_v26 = vadd.f32 %v9490_v0, %v9412_v48  ;;  %v14158_v33 = vpop.f32.mrb[95].mxu0  ;;  %v16592_v0 = vpack.c.bf16 %v12465_v56, %v12464_v22 }
 0xf3e   : > { %v9576_v41 = vadd.f32 %v21986_v52, %v9494_v26  ;;  %v12451_v52 = vld [vmem:[%s22571_s23 + $0x8] sm:$0xff] }
 0xf3f   : > { %v16571_v63 = vpack.c.bf16 %v12451_v52, %v12450_v49 }
 0xf41   : > { %16572 = vmatpush3.bf16.msra.mxu1 %v16571_v63 }
 0xf42   : > { %v10228_v10 = vpop.f32.mrb[88].mxu1  ;;  %16573 = vmatprep.subr.bf16.mxu1 %v17877_v19 }
 0xf43   : > { %v9654_v60 = vpop.f32.mrb[96].mxu0  ;;  %v14257_v16 = vpop.f32.mrb[89].mxu1 }
 0xf44   : > { %v9658_v59 = vadd.f32 %v9654_v60, %v9576_v41  ;;  %v14180_v30 = vpop.f32.mrb[97].mxu0 }
 0xf46   : > { %v9740_v51 = vadd.f32 %v22029_v47, %v9658_v59  ;;  %v12453_v47 = vld [vmem:[%s22571_s23 + $0x18] sm:$0xff] }
 0xf47   : > { %v16574_v62 = vpack.c.bf16 %v12453_v47, %v12452_v42 }
 0xf49   : > { %16575 = vmatpush3.bf16.msra.mxu1 %v16574_v62 }
 0xf4a   : > { %v10392_v50 = vpop.f32.mrb[90].mxu1  ;;  %16576 = vmatprep.subr.bf16.mxu1 %v17877_v19 }
 0xf4b   : > { %v9818_v2 = vpop.f32.mrb[98].mxu0  ;;  %v14279_v35 = vpop.f32.mrb[91].mxu1 }
 0xf4c   : > { %v9822_v45 = vadd.f32 %v9818_v2, %v9740_v51  ;;  %v14202_v12 = vpop.f32.mrb[99].mxu0 }
 0xf4d   : > { %16578 = vmatpush3.bf16.msra.mxu1 %v16577_v31 }
 0xf4e   : > { %v9904_v6 = vadd.f32 %v9900_v39, %v9822_v45  ;;  %16579 = vmatprep.subr.bf16.mxu1 %v17877_v19 }
 0xf51   : > { %16581 = vmatpush3.bf16.msra.mxu1 %v16580_v9 }
 0xf52   : > { %v10556_v4 = vpop.f32.mrb[92].mxu1  ;;  %16582 = vmatprep.subr.bf16.mxu1 %v17877_v19 }
 0xf53   : > { %v9982_v61 = vpop.f32.mrb[100].mxu0  ;;  %v14301_v24 = vpop.f32.mrb[93].mxu1 }
 0xf54   : > { %v9986_v8 = vadd.f32 %v9982_v61, %v9904_v6  ;;  %v14224_v38 = vpop.f32.mrb[101].mxu0 }
 0xf55   : > { %16584 = vmatpush3.bf16.msra.mxu1 %v16583_v14 }
 0xf56   : > { %v10068_v7 = vadd.f32 %v10064_v43, %v9986_v8  ;;  %16585 = vmatprep.subr.bf16.mxu1 %v17877_v19 }
 0xf59   : > { %16587 = vmatpush3.bf16.msra.mxu1 %v16586_v11 }
 0xf5a   : > { %v10720_v37 = vpop.f32.mrb[94].mxu1  ;;  %16588 = vmatprep.subr.bf16.mxu1 %v17877_v19 }
 0xf5b   : > { %v10146_v17 = vpop.f32.mrb[102].mxu0  ;;  %v14323_v53 = vpop.f32.mrb[95].mxu1 }
 0xf5c   : > { %v10150_v23 = vadd.f32 %v10146_v17, %v10068_v7  ;;  %v14246_v13 = vpop.f32.mrb[103].mxu0 }
 0xf5d   : > { %16590 = vmatpush3.bf16.msra.mxu1 %v16589_v15 }
 0xf5e   : > { %v10232_v21 = vadd.f32 %v10228_v10, %v10150_v23  ;;  %16591 = vmatprep.subr.bf16.mxu1 %v17877_v19 }
 0xf61   : > { %16593 = vmatpush3.bf16.msra.mxu1 %v16592_v0 }
 0xf62   : > { %v10884_v25 = vpop.f32.mrb[96].mxu1 }
 0xf63   : > { %v10310_v32 = vpop.f32.mrb[104].mxu0  ;;  %v14345_v29 = vpop.f32.mrb[97].mxu1 }
 0xf64   : > { %v10314_v34 = vadd.f32 %v10310_v32, %v10232_v21  ;;  %v14268_v40 = vpop.f32.mrb[105].mxu0 }
 0xf66   : > { %v10396_v1 = vadd.f32 %v10392_v50, %v10314_v34 }
 0xf6a   : > { %v11048_v39 = vpop.f32.mrb[98].mxu1 }
 0xf6b   : > { %v10474_v44 = vpop.f32.mrb[106].mxu0  ;;  %v14367_v3 = vpop.f32.mrb[99].mxu1 }
 0xf6c   : > { %v10478_v48 = vadd.f32 %v10474_v44, %v10396_v1  ;;  %v14290_v43 = vpop.f32.mrb[107].mxu0 }
 0xf6d   : > { %v12447_v43 = vld [vmem:[#allocation8] sm:$0x1] }
 0xf6e   : > { %v10560_v18 = vadd.f32 %v10556_v4, %v10478_v48 }
 0xf73   : > { %v10638_v26 = vpop.f32.mrb[108].mxu0 }
 0xf74   : > { %v10642_v33 = vadd.f32 %v10638_v26, %v10560_v18  ;;  %v14312_v41 = vpop.f32.mrb[109].mxu0 }
 0xf75   : > { %v12466_v41 = vld [vmem:[#allocation10] sm:$0x1] }
 0xf76   : > { %v10724_v10 = vadd.f32 %v10720_v37, %v10642_v33 }
 0xf7b   : > { %v10802_v60 = vpop.f32.mrb[110].mxu0 }
 0xf7c   : > { %v10806_v16 = vadd.f32 %v10802_v60, %v10724_v10  ;;  %v14334_v19 = vpop.f32.mrb[111].mxu0 }
 0xf7e   : > { %v10888_v59 = vadd.f32 %v10884_v25, %v10806_v16 }
 0xf83   : > { %v10966_v30 = vpop.f32.mrb[112].mxu0 }
 0xf84   : > { %v10970_v51 = vadd.f32 %v10966_v30, %v10888_v59  ;;  %v14356_v50 = vpop.f32.mrb[113].mxu0 }
 0xf86   : > { %v11052_v2 = vadd.f32 %v11048_v39, %v10970_v51 }
 0xf8b   : > { %v11130_v35 = vpop.f32.mrb[114].mxu0 }
 0xf8c   : > { %v11134_v45 = vadd.f32 %v11130_v35, %v11052_v2  ;;  %v14378_v12 = vpop.f32.mrb[115].mxu0 }
 0xfac   : > { %v11212_v6 = vpop.f32.mrb[100].mxu1 }
 0xfad   : > { %v11216_v49 = vadd.f32 %v11212_v6, %v11134_v45  ;;  %v14389_v52 = vpop.f32.mrb[101].mxu1 }
 0xfae   : > { %v11294_v42 = vpop.f32.mrb[116].mxu0 }
 0xfaf   : > { %v11298_v63 = vadd.f32 %v11294_v42, %v11216_v49  ;;  %v14400_v47 = vpop.f32.mrb[117].mxu0 }
 0xfb4   : > { %v11376_v4 = vpop.f32.mrb[102].mxu1 }
 0xfb5   : > { %v11380_v62 = vadd.f32 %v11376_v4, %v11298_v63  ;;  %v14411_v61 = vpop.f32.mrb[103].mxu1 }
 0xfb6   : > { %v11458_v24 = vpop.f32.mrb[118].mxu0 }
 0xfb7   : > { %v11462_v8 = vadd.f32 %v11458_v24, %v11380_v62  ;;  %v14422_v38 = vpop.f32.mrb[119].mxu0 }
 0xfbc   : > { %v11540_v7 = vpop.f32.mrb[104].mxu1 }
 0xfbd   : > { %v11544_v58 = vadd.f32 %v11540_v7, %v11462_v8  ;;  %v14433_v5 = vpop.f32.mrb[105].mxu1 }
 0xfbe   : > { %v11622_v27 = vpop.f32.mrb[120].mxu0 }
 0xfbf   : > { %v11626_v31 = vadd.f32 %v11622_v27, %v11544_v58  ;;  %v14444_v36 = vpop.f32.mrb[121].mxu0 }
 0xfc4   : > { %v11704_v37 = vpop.f32.mrb[106].mxu1 }
 0xfc5   : > { %v11708_v9 = vadd.f32 %v11704_v37, %v11626_v31  ;;  %v14455_v17 = vpop.f32.mrb[107].mxu1 }
 0xfc6   : > { %v11786_v53 = vpop.f32.mrb[122].mxu0 }
 0xfc7   : > { %v11790_v23 = vadd.f32 %v11786_v53, %v11708_v9  ;;  %v14466_v13 = vpop.f32.mrb[123].mxu0 }
 0xfcc   : > { %v11868_v21 = vpop.f32.mrb[108].mxu1 }
 0xfcd   : > { %v11872_v28 = vadd.f32 %v11868_v21, %v11790_v23  ;;  %v14477_v46 = vpop.f32.mrb[109].mxu1 }
 0xfce   : > { %v11950_v20 = vpop.f32.mrb[124].mxu0 }
 0xfcf   : > { %v11954_v14 = vadd.f32 %v11950_v20, %v11872_v28  ;;  %v14488_v54 = vpop.f32.mrb[125].mxu0 }
 0xfd4   : > { %v12032_v25 = vpop.f32.mrb[110].mxu1 }
 0xfd5   : > { %v12036_v11 = vadd.f32 %v12032_v25, %v11954_v14  ;;  %v14499_v32 = vpop.f32.mrb[111].mxu1 }
 0xfd6   : > { %v12114_v29 = vpop.f32.mrb[126].mxu0 }
 0xfd7   : > { %v12118_v34 = vadd.f32 %v12114_v29, %v12036_v11  ;;  %v14510_v40 = vpop.f32.mrb[127].mxu0 }
 0xfdc   : > { %v12196_v1 = vpop.f32.mrb[112].mxu1 }
 0xfdd   : > { %v12200_v55 = vadd.f32 %v12196_v1, %v12118_v34  ;;  %v14521_v57 = vpop.f32.mrb[113].mxu1 }
 0xfde   : > { %v12278_v15 = vpop.f32.mrb[128].mxu0 }
 0xfdf   : > { %v12282_v39 = vadd.f32 %v12278_v15, %v12200_v55  ;;  %v14532_v44 = vpop.f32.mrb[129].mxu0 }
 0xfe4   : > { %v12360_v3 = vpop.f32.mrb[114].mxu1 }
 0xfe5   : > { %v12364_v22 = vadd.f32 %v12360_v3, %v12282_v39  ;;  %v14543_v56 = vpop.f32.mrb[115].mxu1 }
 0xfe6   : > { %v12442_v48 = vpop.f32.mrb[130].mxu0 }
 0xfe7   : > { %v12446_v0 = vadd.f32 %v12442_v48, %v12364_v22  ;;  %v14554_v18 = vpop.f32.mrb[131].mxu0 }
 0xfe9   : > { %v12448_v26 = vadd.f32 %v12447_v43, %v12446_v0 }
 0xfeb   : > { %v12449_v33 = vmax.f32 %v12448_v26, 0.0 }
 0xfed   : > { %14588 = vmatmul.mubr.f32.vlgmr.msra.gmra.mrb[116].mxu1 %v12449_v33 }
0x10c0   : > { %v12533_v10 = vpop.f32.mrb[116].mxu1 }
0x10c1   : > { %v12534_v60 = vadd.f32 %v12533_v10, %v12466_v41  ;;  %v14589_v16 = vpop.f32.mrb[117].mxu1 }
0x10c3   : > { %v12537_v19 = vsub.f32 0.0, %v12534_v60 }
0x10c5   : > { %v12538_v59 = vmul.f32 1.442695, %v12537_v19 }
0x10c7   : > { %17623 = vpow2.f32 %v12538_v59 }
0x10d1   : > { %v17624_v30 = vpop.eup %17623 }
0x10d2   : > { %v12540_v51 = vadd.f32 1.0, %v17624_v30 }
0x10d4   : > { %17625 = vrcp.f32 %v12540_v51 }
0x10de   : > { %v17626_v50 = vpop.eup %17625 }
0x10df   : > { %12544 = vst.msk [vmem:[%s526_s27] sm:$0x1] %vm12543_vm3, %v17626_v50 }
0x10e0   : > { %17782 = shalt.err (!%p17779_p10)
}
0x10e1   : > { %s17783_s26 = scalar_lea.hbm %s22251_s29, 16  ;;  %s17787_s20 = scalar_lea.hbm %s22575_s25, 32 }
0x10e2   : > { %p17784_p0 = scmp.ne.s32.totalorder %s22251_s29, %s17783_s26  ;;  %p17788_p4 = scmp.lt.u32.totalorder %s22251_s29, %s22575_s25 }
0x10e3   : > { %p17789_p12 = scmp.lt.u32.totalorder %s17787_s20, %s17783_s26  ;;  %p17791_p8 = scmp.lt.u32.totalorder %s17783_s26, %s22251_s29 }
0x10e4   : > { %p17785_p2 = pnand %p17784_p0, %p22576_p11 }
0x10e5   : > { %p17790_p7 = por %p17789_p12, %p17788_p4 }
0x10e6   : > { %p17786_p3 = pneg %p17785_p2 }
0x10e7   : > { %p17792_p13 = por %p17791_p8, %p17790_p7 }
0x10e9   : > { %p17793_p1 = pnand %p17792_p13, %p17786_p3 }
0x10eb   : > { %17796 = shalt.err (!%p17793_p1)
}
0x10ec   : > { %16712 = dma.vmem_to_hbm [thread:$0]  (%p22576_p11), %s22253_s19, 16, %s22251_s29, %s12546_s28  }
0x10ed PF: > { %s22577_s30 = sld [smem:[#allocation19_spill]]  ;;  %s22578_s16 = sld [smem:[#allocation16_spill]] }
0x10ee   : > { %s22579_s21 = sld [smem:[#allocation23_spill]] }
0x10f3   : > { %p16744_p6 = scmp.ge.s32.totalorder %s22577_s30, 2  ;;  %s12570_s17 = sand.u32 1, %s22578_s16  }
0x10f4   : > { %p22580_p9 = scmp.ne.s32.totalorder %s22579_s21, 0  ;;  %s12571_s12 = scalar_lea.sflag [#allocation4], %s12570_s17 }
0x10f6   : > { %p16731_p5 = pnand %p16744_p6, %p22580_p9 }
0x10f8   : > { %17826 = dma.done.wait (!%p16731_p5), %s12571_s12, 16  }
0x10f9   : > { %17828 = vsyncadd (!%p16731_p5), %s12571_s12, 4294967280  ;;  %s22581_s16 = sld [smem:[#allocation20_spill]]  ;;  %s22582_s29 = sld [smem:[#allocation17_spill]] }
0x10fa   : > { %s22583_s30 = sld [smem:[#allocation18_spill]]  ;;  %s22584_s15 = sld [smem:[#allocation21_spill]] }
0x10ff   : > { %p27_p10 = scmp.ge.s32.totalorder %s22581_s16, 4  }
0x1101   :  { %29 = sbr.rel (!%p27_p10) target bundleno = 9 (0x9), region = 195 }
0x1108   :  { %12575 = vsyncpa [#allocation3], 1 }
0x1109   :  { %12577 = vsyncpa [#allocation3 + $0x1], 1 }
0x110a   :  { %12578 = vsyncpa [#allocation6], 1 }
0x110b   :  { %12579 = vsyncpa [#allocation9], 1 }
0x110c   :  { %12580 = vsyncpa [#allocation4], 1 }
0x110d   :  { %12582 = vsyncpa [#allocation4 + $0x1], 1 }

</bundles_post_ra>
